<compile_context>
chip_gen: v7x
topology: tpu7x:2x2x1
jax: 0.10.0
libtpu: 0.0.40
codegen_flags: <defaults>
</compile_context>

<pallas_src>
import jax
import jax.numpy as jnp
from jax.experimental import pallas as pl
from jax.experimental.pallas import tpu as pltpu


def _round_up(x, m):
    return ((x + m - 1) // m) * m


# ---------------------------------------------------------------------------
# Conv-as-matmul kernel: single K step, single N block (Cout padded to 128),
# bias + ReLU fused.  Operands bf16, MXU accumulates in f32.
# ---------------------------------------------------------------------------
def _conv_mm_kernel(x_ref, w_ref, b_ref, o_ref):
    y = jnp.dot(x_ref[...], w_ref[...], preferred_element_type=jnp.float32)
    y = jnp.maximum(y + b_ref[...], 0.0)
    o_ref[...] = y.astype(o_ref.dtype)


def _pick_tm(M):
    # Bigger row tiles -> fewer grid steps (per-step overhead bound), while
    # keeping >=2 programs on the parallel axis when M allows (v7x megacore).
    if M % 512 == 0 and M >= 1024:
        return 512
    if M % 256 == 0 and M >= 512:
        return 256
    return M


def conv_matmul_relu(cols, w, b2d):
    """cols: (M, K) bf16, w: (K, N) bf16 (pre-padded), b2d: (1, N) f32."""
    M, K = cols.shape
    K2, N = w.shape
    assert K == K2 and b2d.shape == (1, N)
    tm = _pick_tm(M)
    return pl.pallas_call(
        _conv_mm_kernel,
        out_shape=jax.ShapeDtypeStruct((M, N), jnp.bfloat16),
        grid_spec=pltpu.PrefetchScalarGridSpec(
            num_scalar_prefetch=0,
            grid=(M // tm,),
            in_specs=[
                pl.BlockSpec((tm, K), lambda i: (i, 0)),
                pl.BlockSpec((K, N), lambda i: (0, 0)),   # weight stays resident
                pl.BlockSpec((1, N), lambda i: (0, 0)),
            ],
            out_specs=pl.BlockSpec((tm, N), lambda i: (i, 0)),
        ),
        compiler_params=pltpu.CompilerParams(dimension_semantics=("parallel",)),
    )(cols, w, b2d)


def conv3x3_relu(x, wm, b2d):
    """x: (N,H,W,Cin) bf16, wm: (9*Cin, Cout) bf16, b2d: (1, Cout) f32."""
    N, H, W, Cin = x.shape
    Cout = wm.shape[1]
    xp = jnp.pad(x, ((0, 0), (1, 1), (1, 1), (0, 0)))
    # TODO(synk): move the 9-tap im2col into the matmul kernel (tap-gridded
    # reduction indexing the padded NHWC input directly) to avoid this HBM
    # concat materialization once batch grows.
    cols = jnp.concatenate(
        [xp[:, kh:kh + H, kw:kw + W, :] for kh in range(3) for kw in range(3)],
        axis=-1).reshape(N * H * W, 9 * Cin)
    y = conv_matmul_relu(cols, wm, b2d)
    return y.reshape(N, H, W, Cout)


# ---------------------------------------------------------------------------
# MaxPool 2x2 (stride 2): elementwise max over the 4 shifted views, presented
# lane-dense as (N*Ho, Wo*C), gridded over capped row tiles.
# ---------------------------------------------------------------------------
def _max4_kernel(a_ref, b_ref, c_ref, d_ref, o_ref):
    o_ref[...] = jnp.maximum(jnp.maximum(a_ref[...], b_ref[...]),
                             jnp.maximum(c_ref[...], d_ref[...]))


def _row_tile(R, cap=512):
    """Largest divisor of R that is <= cap (whole slab only when R <= cap)."""
    if R <= cap:
        return R
    for t in range(cap, 7, -1):
        if R % t == 0:
            return t
    return R


def maxpool2x2(x):
    """x: (N, H, W, C) -> (N, H//2, W//2, C)."""
    N, H, W, C = x.shape
    assert H % 2 == 0 and W % 2 == 0, "maxpool2x2 requires even H and W"
    Ho, Wo = H // 2, W // 2
    # TODO(synk): fuse ReLU + 2x2 pool into the conv matmul epilogue to avoid
    # materializing these four strided views in HBM.
    views = [x[:, 0::2, 0::2, :], x[:, 0::2, 1::2, :],
             x[:, 1::2, 0::2, :], x[:, 1::2, 1::2, :]]
    R, L = N * Ho, Wo * C                       # lane-dense: L = Wo*C >= 1024
    views2d = [v.reshape(R, L) for v in views]
    tr = _row_tile(R)
    out = pl.pallas_call(
        _max4_kernel,
        out_shape=jax.ShapeDtypeStruct((R, L), x.dtype),
        grid_spec=pltpu.PrefetchScalarGridSpec(
            num_scalar_prefetch=0,
            grid=(R // tr,),
            in_specs=[pl.BlockSpec((tr, L), lambda i: (i, 0))] * 4,
            out_specs=pl.BlockSpec((tr, L), lambda i: (i, 0)),
        ),
        compiler_params=pltpu.CompilerParams(dimension_semantics=("parallel",)),
    )(*views2d)
    return out.reshape(N, Ho, Wo, C)


# ---------------------------------------------------------------------------
# Fused classifier: Linear(8192,512p)+ReLU -> Linear(512p,384p)+ReLU ->
# Linear(384p,128p), all in one pallas_call.  fw1 streams over the K grid;
# fw2 / fw3 / biases are VMEM-resident; FC2/FC3 run in the last-k epilogue.
# Dropout(p=0.5) layers are eval-mode identity.
# ---------------------------------------------------------------------------
def _fc_fused_kernel(x_ref, w1_ref, b1_ref, w2_ref, b2_ref, w3_ref, b3_ref,
                     o_ref, acc_ref):
    @pl.when(pl.program_id(0) == 0)
    def _():
        acc_ref[...] = jnp.zeros_like(acc_ref)

    acc_ref[...] += jnp.dot(x_ref[...], w1_ref[...],
                            preferred_element_type=jnp.float32)

    @pl.when(pl.program_id(0) == pl.num_programs(0) - 1)
    def _():
        h1 = jnp.maximum(acc_ref[...] + b1_ref[...], 0.0).astype(jnp.bfloat16)
        h2 = jnp.dot(h1, w2_ref[...], preferred_element_type=jnp.float32)
        h2 = jnp.maximum(h2 + b2_ref[...], 0.0).astype(jnp.bfloat16)
        h3 = jnp.dot(h2, w3_ref[...], preferred_element_type=jnp.float32)
        o_ref[...] = h3 + b3_ref[...]


def fc_fused(x, w1, b1, w2, b2, w3, b3, *, tk=4096):
    """x: (M, 8192) bf16 -> (M, 128) f32 padded logits."""
    M, K1 = x.shape
    N1, N2, N3 = w1.shape[1], w2.shape[1], w3.shape[1]
    tk = min(tk, K1)
    assert K1 % tk == 0
    return pl.pallas_call(
        _fc_fused_kernel,
        out_shape=jax.ShapeDtypeStruct((M, N3), jnp.float32),
        grid_spec=pltpu.PrefetchScalarGridSpec(
            num_scalar_prefetch=0,
            grid=(K1 // tk,),
            in_specs=[
                pl.BlockSpec((M, tk), lambda k: (0, k)),
                pl.BlockSpec((tk, N1), lambda k: (k, 0)),   # streamed weight
                pl.BlockSpec((1, N1), lambda k: (0, 0)),
                pl.BlockSpec((N1, N2), lambda k: (0, 0)),   # resident fw2
                pl.BlockSpec((1, N2), lambda k: (0, 0)),
                pl.BlockSpec((N2, N3), lambda k: (0, 0)),   # resident fw3
                pl.BlockSpec((1, N3), lambda k: (0, 0)),
            ],
            out_specs=pl.BlockSpec((M, N3), lambda k: (0, 0)),
            scratch_shapes=[pltpu.VMEM((M, N1), jnp.float32)],
        ),
        compiler_params=pltpu.CompilerParams(dimension_semantics=("arbitrary",)),
    )(x, w1, b1, w2, b2, w3, b3)


# ---------------------------------------------------------------------------
# Full forward pass (matches PyTorch CNN.forward; dropout in eval mode).
# Takes PREPARED params (see prepare_params).
# ---------------------------------------------------------------------------
def cnn_forward(x_nchw, p):
    x = jnp.transpose(x_nchw, (0, 2, 3, 1)).astype(jnp.bfloat16)  # NCHW->NHWC
    x = conv3x3_relu(x, p["cw1m"], p["cb1p"])     # (N,32,32,128) (ch 64..127 == 0)
    x = maxpool2x2(x)                             # (N,16,16,128)
    x = conv3x3_relu(x, p["cw2m"], p["cb2p"])     # (N,16,16,128)
    x = maxpool2x2(x)                             # (N, 8, 8,128)
    # fw1's rows were pre-permuted to NHWC order, so this plain reshape matches
    # PyTorch's NCHW .view(-1, 8*8*128).
    N = x.shape[0]
    x = x.reshape(N, 8 * 8 * 128)
    Mp = _round_up(max(N, 8), 8)                  # pad rows once, slice once at end
    x = jnp.pad(x, ((0, Mp - N), (0, 0)))
    logits = fc_fused(x, p["fw1p"], p["fb1p"], p["fw2p"], p["fb2p"],
                      p["fw3p"], p["fb3p"])       # (Mp, 128) f32
    return logits[:N, :100]                       # drop row/col zero padding


# ---------------------------------------------------------------------------
# Parameter init (float32) and one-time preparation (reshape / permute /
# zero-pad / bf16-cast) OUTSIDE the jitted forward.
# ---------------------------------------------------------------------------
def init_params(key):
    ks = jax.random.split(key, 5)
    f32 = jnp.float32

    def n(k, shape, scale):
        return (jax.random.normal(k, shape, dtype=f32) * scale).astype(f32)

    return {
        "cw1": n(ks[0], (3, 3, 3, 64), 0.05),   "cb1": jnp.zeros((64,), f32),
        "cw2": n(ks[1], (3, 3, 64, 128), 0.02), "cb2": jnp.zeros((128,), f32),
        "fw1": n(ks[2], (8 * 8 * 128, 500), 0.01), "fb1": jnp.zeros((500,), f32),
        "fw2": n(ks[3], (500, 300), 0.02),         "fb2": jnp.zeros((300,), f32),
        "fw3": n(ks[4], (300, 100), 0.02),         "fb3": jnp.zeros((100,), f32),
    }


def prepare_params(p):
    bf16, f32 = jnp.bfloat16, jnp.float32
    # Conv1 (3,3,3,64) -> (27,64), tap order (kh,kw,cin) matches the im2col
    # concat; Cout pre-padded 64->128 so the activation stays lane-dense and
    # no post-matmul slice is needed (padded channels are exactly zero).
    cw1m = jnp.pad(p["cw1"].reshape(27, 64), ((0, 0), (0, 64))).astype(bf16)
    cb1p = jnp.pad(p["cb1"], ((0, 64),)).astype(f32).reshape(1, 128)
    # Conv2 (3,3,64,128): Cin pre-padded 64->128 with zero rows (they multiply
    # conv1's zero channels), then (9*128, 128).
    cw2m = jnp.pad(p["cw2"], ((0, 0), (0, 0), (0, 64), (0, 0))
                   ).reshape(9 * 128, 128).astype(bf16)
    cb2p = p["cb2"].astype(f32).reshape(1, 128)
    # fw1 rows are indexed in PyTorch NCHW flatten order (c,h,w); permute to
    # NHWC (h,w,c) so the forward needs no transpose before the flatten.
    fw1 = p["fw1"].reshape(128, 8, 8, 500).transpose(1, 2, 0, 3).reshape(8192, 500)
    # Zero-pad FC widths once; zeros propagate exactly through matmul+ReLU,
    # so intermediate activations stay padded and only the final output is
    # sliced back to 100.
    fw1p = jnp.pad(fw1, ((0, 0), (0, 12))).astype(bf16)            # (8192, 512)
    fb1p = jnp.pad(p["fb1"], ((0, 12),)).astype(f32).reshape(1, 512)
    fw2p = jnp.pad(p["fw2"], ((0, 12), (0, 84))).astype(bf16)      # (512, 384)
    fb2p = jnp.pad(p["fb2"], ((0, 84),)).astype(f32).reshape(1, 384)
    fw3p = jnp.pad(p["fw3"], ((0, 84), (0, 28))).astype(bf16)      # (384, 128)
    fb3p = jnp.pad(p["fb3"], ((0, 28),)).astype(f32).reshape(1, 128)
    return {
        "cw1m": cw1m, "cb1p": cb1p,
        "cw2m": cw2m, "cb2p": cb2p,
        "fw1p": fw1p, "fb1p": fb1p,
        "fw2p": fw2p, "fb2p": fb2p,
        "fw3p": fw3p, "fb3p": fb3p,
    }


if __name__ == "__main__":
    key = jax.random.PRNGKey(0)
    pkey, xkey = jax.random.split(key)
    params = prepare_params(init_params(pkey))
    # Input must be 32x32 (two 2x2 maxpools -> 8x8 before the 8*8*128 flatten).
    x = jax.random.normal(xkey, (2, 3, 32, 32), dtype=jnp.float32)

    out = jax.jit(cnn_forward)(x, params)
    out = jax.block_until_ready(out)
    assert out.shape == (2, 100), out.shape
    print("KERNEL_OK")
</pallas_src>

<mosaic_0001>
module attributes {stable_mosaic.version = 11 : i64} {
  func.func @_conv_mm_kernel(%arg0: i32, %arg1: memref<512x27xbf16, #tpu.memory_space<vmem>>, %arg2: memref<27x128xbf16, #tpu.memory_space<vmem>>, %arg3: memref<1x128xf32, #tpu.memory_space<vmem>>, %arg4: memref<512x128xbf16, #tpu.memory_space<vmem>>) attributes {dimension_semantics = [#tpu.dimension_semantics<parallel>], iteration_bounds = array<i64: 4>, scalar_prefetch = 0 : i64, scratch_operands = 0 : i64, tpu.core_type = #tpu.core_type<tc>, window_params = [{transform_indices = @transform_0, window_bounds = array<i64: 512, 27>}, {pipeline_mode = #tpu.pipeline_mode<synchronous>, transform_indices = @transform_1, window_bounds = array<i64: 27, 128>}, {pipeline_mode = #tpu.pipeline_mode<synchronous>, transform_indices = @transform_2, window_bounds = array<i64: 1, 128>}, {transform_indices = @transform_3, window_bounds = array<i64: 512, 128>}]} {
    %c0 = arith.constant 0 : index
    %c0_0 = arith.constant 0 : index
    %0 = vector.load %arg1[%c0, %c0_0] : memref<512x27xbf16, #tpu.memory_space<vmem>>, vector<512x27xbf16>
    %c0_1 = arith.constant 0 : index
    %c0_2 = arith.constant 0 : index
    %1 = vector.load %arg2[%c0_1, %c0_2] : memref<27x128xbf16, #tpu.memory_space<vmem>>, vector<27x128xbf16>
    %cst = arith.constant dense<0.000000e+00> : vector<512x128xf32>
    %2 = tpu.matmul %0, %1, %cst {dimension_numbers = #tpu.dot_dimension_numbers<[1], [0], [0], [1], [0, 0, 1, 1], [], []>} : vector<512x27xbf16>, vector<27x128xbf16>, vector<512x128xf32> -> vector<512x128xf32>
    %c0_3 = arith.constant 0 : index
    %c0_4 = arith.constant 0 : index
    %3 = vector.load %arg3[%c0_3, %c0_4] : memref<1x128xf32, #tpu.memory_space<vmem>>, vector<1x128xf32>
    %4 = vector.broadcast %3 : vector<1x128xf32> to vector<512x128xf32>
    %5 = arith.addf %2, %4 : vector<512x128xf32>
    %cst_5 = arith.constant 0.000000e+00 : f32
    %6 = vector.broadcast %cst_5 : f32 to vector<512x128xf32>
    %7 = arith.maximumf %5, %6 : vector<512x128xf32>
    %8 = arith.truncf %7 : vector<512x128xf32> to vector<512x128xbf16>
    %c0_6 = arith.constant 0 : index
    %c0_7 = arith.constant 0 : index
    %9 = vector.load %arg4[%c0_6, %c0_7] : memref<512x128xbf16, #tpu.memory_space<vmem>>, vector<512x128xbf16>
    tpu.vector_store %arg4[%c0_6, %c0_7], %8 {strides = array<i32>} : memref<512x128xbf16, #tpu.memory_space<vmem>>, vector<512x128xbf16>,
    return
  }
  func.func @transform_0(%arg0: i32) -> (i32, i32) {
    %c0_i32 = arith.constant 0 : i32
    %c0_i32_0 = arith.constant 0 : i32
    return %arg0, %c0_i32 : i32, i32
  }
  func.func @transform_1(%arg0: i32) -> (i32, i32) {
    %c0_i32 = arith.constant 0 : i32
    %c0_i32_0 = arith.constant 0 : i32
    %c0_i32_1 = arith.constant 0 : i32
    return %c0_i32, %c0_i32_0 : i32, i32
  }
  func.func @transform_2(%arg0: i32) -> (i32, i32) {
    %c0_i32 = arith.constant 0 : i32
    %c0_i32_0 = arith.constant 0 : i32
    %c0_i32_1 = arith.constant 0 : i32
    return %c0_i32, %c0_i32_0 : i32, i32
  }
  func.func @transform_3(%arg0: i32) -> (i32, i32) {
    %c0_i32 = arith.constant 0 : i32
    %c0_i32_0 = arith.constant 0 : i32
    return %arg0, %c0_i32 : i32, i32
  }
}

module attributes {stable_mosaic.version = 11 : i64} {
  func.func @_max4_kernel(%arg0: i32, %arg1: memref<32x2048xbf16, #tpu.memory_space<vmem>>, %arg2: memref<32x2048xbf16, #tpu.memory_space<vmem>>, %arg3: memref<32x2048xbf16, #tpu.memory_space<vmem>>, %arg4: memref<32x2048xbf16, #tpu.memory_space<vmem>>, %arg5: memref<32x2048xbf16, #tpu.memory_space<vmem>>) attributes {dimension_semantics = [#tpu.dimension_semantics<parallel>], iteration_bounds = array<i64: 1>, scalar_prefetch = 0 : i64, scratch_operands = 0 : i64, tpu.core_type = #tpu.core_type<tc>, window_params = [{transform_indices = @transform_0, window_bounds = array<i64: 32, 2048>}, {transform_indices = @transform_1, window_bounds = array<i64: 32, 2048>}, {transform_indices = @transform_2, window_bounds = array<i64: 32, 2048>}, {transform_indices = @transform_3, window_bounds = array<i64: 32, 2048>}, {transform_indices = @transform_4, window_bounds = array<i64: 32, 2048>}]} {
    %c0 = arith.constant 0 : index
    %c0_0 = arith.constant 0 : index
    %0 = vector.load %arg1[%c0, %c0_0] : memref<32x2048xbf16, #tpu.memory_space<vmem>>, vector<32x2048xbf16>
    %c0_1 = arith.constant 0 : index
    %c0_2 = arith.constant 0 : index
    %1 = vector.load %arg2[%c0_1, %c0_2] : memref<32x2048xbf16, #tpu.memory_space<vmem>>, vector<32x2048xbf16>
    %2 = arith.maximumf %0, %1 : vector<32x2048xbf16>
    %c0_3 = arith.constant 0 : index
    %c0_4 = arith.constant 0 : index
    %3 = vector.load %arg3[%c0_3, %c0_4] : memref<32x2048xbf16, #tpu.memory_space<vmem>>, vector<32x2048xbf16>
    %c0_5 = arith.constant 0 : index
    %c0_6 = arith.constant 0 : index
    %4 = vector.load %arg4[%c0_5, %c0_6] : memref<32x2048xbf16, #tpu.memory_space<vmem>>, vector<32x2048xbf16>
    %5 = arith.maximumf %3, %4 : vector<32x2048xbf16>
    %6 = arith.maximumf %2, %5 : vector<32x2048xbf16>
    %c0_7 = arith.constant 0 : index
    %c0_8 = arith.constant 0 : index
    %7 = vector.load %arg5[%c0_7, %c0_8] : memref<32x2048xbf16, #tpu.memory_space<vmem>>, vector<32x2048xbf16>
    tpu.vector_store %arg5[%c0_7, %c0_8], %6 {strides = array<i32>} : memref<32x2048xbf16, #tpu.memory_space<vmem>>, vector<32x2048xbf16>,
    return
  }
  func.func @transform_0(%arg0: i32) -> (i32, i32) {
    %c0_i32 = arith.constant 0 : i32
    %c0_i32_0 = arith.constant 0 : i32
    return %arg0, %c0_i32 : i32, i32
  }
  func.func @transform_1(%arg0: i32) -> (i32, i32) {
    %c0_i32 = arith.constant 0 : i32
    %c0_i32_0 = arith.constant 0 : i32
    return %arg0, %c0_i32 : i32, i32
  }
  func.func @transform_2(%arg0: i32) -> (i32, i32) {
    %c0_i32 = arith.constant 0 : i32
    %c0_i32_0 = arith.constant 0 : i32
    return %arg0, %c0_i32 : i32, i32
  }
  func.func @transform_3(%arg0: i32) -> (i32, i32) {
    %c0_i32 = arith.constant 0 : i32
    %c0_i32_0 = arith.constant 0 : i32
    return %arg0, %c0_i32 : i32, i32
  }
  func.func @transform_4(%arg0: i32) -> (i32, i32) {
    %c0_i32 = arith.constant 0 : i32
    %c0_i32_0 = arith.constant 0 : i32
    return %arg0, %c0_i32 : i32, i32
  }
}

module attributes {stable_mosaic.version = 11 : i64} {
  func.func @_conv_mm_kernel(%arg0: i32, %arg1: memref<256x1152xbf16, #tpu.memory_space<vmem>>, %arg2: memref<1152x128xbf16, #tpu.memory_space<vmem>>, %arg3: memref<1x128xf32, #tpu.memory_space<vmem>>, %arg4: memref<256x128xbf16, #tpu.memory_space<vmem>>) attributes {dimension_semantics = [#tpu.dimension_semantics<parallel>], iteration_bounds = array<i64: 2>, scalar_prefetch = 0 : i64, scratch_operands = 0 : i64, tpu.core_type = #tpu.core_type<tc>, window_params = [{transform_indices = @transform_0, window_bounds = array<i64: 256, 1152>}, {pipeline_mode = #tpu.pipeline_mode<synchronous>, transform_indices = @transform_1, window_bounds = array<i64: 1152, 128>}, {pipeline_mode = #tpu.pipeline_mode<synchronous>, transform_indices = @transform_2, window_bounds = array<i64: 1, 128>}, {transform_indices = @transform_3, window_bounds = array<i64: 256, 128>}]} {
    %c0 = arith.constant 0 : index
    %c0_0 = arith.constant 0 : index
    %0 = vector.load %arg1[%c0, %c0_0] : memref<256x1152xbf16, #tpu.memory_space<vmem>>, vector<256x1152xbf16>
    %c0_1 = arith.constant 0 : index
    %c0_2 = arith.constant 0 : index
    %1 = vector.load %arg2[%c0_1, %c0_2] : memref<1152x128xbf16, #tpu.memory_space<vmem>>, vector<1152x128xbf16>
    %cst = arith.constant dense<0.000000e+00> : vector<256x128xf32>
    %2 = tpu.matmul %0, %1, %cst {dimension_numbers = #tpu.dot_dimension_numbers<[1], [0], [0], [1], [0, 0, 1, 1], [], []>} : vector<256x1152xbf16>, vector<1152x128xbf16>, vector<256x128xf32> -> vector<256x128xf32>
    %c0_3 = arith.constant 0 : index
    %c0_4 = arith.constant 0 : index
    %3 = vector.load %arg3[%c0_3, %c0_4] : memref<1x128xf32, #tpu.memory_space<vmem>>, vector<1x128xf32>
    %4 = vector.broadcast %3 : vector<1x128xf32> to vector<256x128xf32>
    %5 = arith.addf %2, %4 : vector<256x128xf32>
    %cst_5 = arith.constant 0.000000e+00 : f32
    %6 = vector.broadcast %cst_5 : f32 to vector<256x128xf32>
    %7 = arith.maximumf %5, %6 : vector<256x128xf32>
    %8 = arith.truncf %7 : vector<256x128xf32> to vector<256x128xbf16>
    %c0_6 = arith.constant 0 : index
    %c0_7 = arith.constant 0 : index
    %9 = vector.load %arg4[%c0_6, %c0_7] : memref<256x128xbf16, #tpu.memory_space<vmem>>, vector<256x128xbf16>
    tpu.vector_store %arg4[%c0_6, %c0_7], %8 {strides = array<i32>} : memref<256x128xbf16, #tpu.memory_space<vmem>>, vector<256x128xbf16>,
    return
  }
  func.func @transform_0(%arg0: i32) -> (i32, i32) {
    %c0_i32 = arith.constant 0 : i32
    %c0_i32_0 = arith.constant 0 : i32
    return %arg0, %c0_i32 : i32, i32
  }
  func.func @transform_1(%arg0: i32) -> (i32, i32) {
    %c0_i32 = arith.constant 0 : i32
    %c0_i32_0 = arith.constant 0 : i32
    %c0_i32_1 = arith.constant 0 : i32
    return %c0_i32, %c0_i32_0 : i32, i32
  }
  func.func @transform_2(%arg0: i32) -> (i32, i32) {
    %c0_i32 = arith.constant 0 : i32
    %c0_i32_0 = arith.constant 0 : i32
    %c0_i32_1 = arith.constant 0 : i32
    return %c0_i32, %c0_i32_0 : i32, i32
  }
  func.func @transform_3(%arg0: i32) -> (i32, i32) {
    %c0_i32 = arith.constant 0 : i32
    %c0_i32_0 = arith.constant 0 : i32
    return %arg0, %c0_i32 : i32, i32
  }
}

module attributes {stable_mosaic.version = 11 : i64} {
  func.func @_max4_kernel(%arg0: i32, %arg1: memref<16x1024xbf16, #tpu.memory_space<vmem>>, %arg2: memref<16x1024xbf16, #tpu.memory_space<vmem>>, %arg3: memref<16x1024xbf16, #tpu.memory_space<vmem>>, %arg4: memref<16x1024xbf16, #tpu.memory_space<vmem>>, %arg5: memref<16x1024xbf16, #tpu.memory_space<vmem>>) attributes {dimension_semantics = [#tpu.dimension_semantics<parallel>], iteration_bounds = array<i64: 1>, scalar_prefetch = 0 : i64, scratch_operands = 0 : i64, tpu.core_type = #tpu.core_type<tc>, window_params = [{transform_indices = @transform_0, window_bounds = array<i64: 16, 1024>}, {transform_indices = @transform_1, window_bounds = array<i64: 16, 1024>}, {transform_indices = @transform_2, window_bounds = array<i64: 16, 1024>}, {transform_indices = @transform_3, window_bounds = array<i64: 16, 1024>}, {transform_indices = @transform_4, window_bounds = array<i64: 16, 1024>}]} {
    %c0 = arith.constant 0 : index
    %c0_0 = arith.constant 0 : index
    %0 = vector.load %arg1[%c0, %c0_0] : memref<16x1024xbf16, #tpu.memory_space<vmem>>, vector<16x1024xbf16>
    %c0_1 = arith.constant 0 : index
    %c0_2 = arith.constant 0 : index
    %1 = vector.load %arg2[%c0_1, %c0_2] : memref<16x1024xbf16, #tpu.memory_space<vmem>>, vector<16x1024xbf16>
    %2 = arith.maximumf %0, %1 : vector<16x1024xbf16>
    %c0_3 = arith.constant 0 : index
    %c0_4 = arith.constant 0 : index
    %3 = vector.load %arg3[%c0_3, %c0_4] : memref<16x1024xbf16, #tpu.memory_space<vmem>>, vector<16x1024xbf16>
    %c0_5 = arith.constant 0 : index
    %c0_6 = arith.constant 0 : index
    %4 = vector.load %arg4[%c0_5, %c0_6] : memref<16x1024xbf16, #tpu.memory_space<vmem>>, vector<16x1024xbf16>
    %5 = arith.maximumf %3, %4 : vector<16x1024xbf16>
    %6 = arith.maximumf %2, %5 : vector<16x1024xbf16>
    %c0_7 = arith.constant 0 : index
    %c0_8 = arith.constant 0 : index
    %7 = vector.load %arg5[%c0_7, %c0_8] : memref<16x1024xbf16, #tpu.memory_space<vmem>>, vector<16x1024xbf16>
    tpu.vector_store %arg5[%c0_7, %c0_8], %6 {strides = array<i32>} : memref<16x1024xbf16, #tpu.memory_space<vmem>>, vector<16x1024xbf16>,
    return
  }
  func.func @transform_0(%arg0: i32) -> (i32, i32) {
    %c0_i32 = arith.constant 0 : i32
    %c0_i32_0 = arith.constant 0 : i32
    return %arg0, %c0_i32 : i32, i32
  }
  func.func @transform_1(%arg0: i32) -> (i32, i32) {
    %c0_i32 = arith.constant 0 : i32
    %c0_i32_0 = arith.constant 0 : i32
    return %arg0, %c0_i32 : i32, i32
  }
  func.func @transform_2(%arg0: i32) -> (i32, i32) {
    %c0_i32 = arith.constant 0 : i32
    %c0_i32_0 = arith.constant 0 : i32
    return %arg0, %c0_i32 : i32, i32
  }
  func.func @transform_3(%arg0: i32) -> (i32, i32) {
    %c0_i32 = arith.constant 0 : i32
    %c0_i32_0 = arith.constant 0 : i32
    return %arg0, %c0_i32 : i32, i32
  }
  func.func @transform_4(%arg0: i32) -> (i32, i32) {
    %c0_i32 = arith.constant 0 : i32
    %c0_i32_0 = arith.constant 0 : i32
    return %arg0, %c0_i32 : i32, i32
  }
}

module attributes {stable_mosaic.version = 11 : i64} {
  func.func @_fc_fused_kernel(%arg0: i32, %arg1: memref<8x4096xbf16, #tpu.memory_space<vmem>>, %arg2: memref<4096x512xbf16, #tpu.memory_space<vmem>>, %arg3: memref<1x512xf32, #tpu.memory_space<vmem>>, %arg4: memref<512x384xbf16, #tpu.memory_space<vmem>>, %arg5: memref<1x384xf32, #tpu.memory_space<vmem>>, %arg6: memref<384x128xbf16, #tpu.memory_space<vmem>>, %arg7: memref<1x128xf32, #tpu.memory_space<vmem>>, %arg8: memref<8x128xf32, #tpu.memory_space<vmem>>, %arg9: memref<8x512xf32, #tpu.memory_space<vmem>>) attributes {dimension_semantics = [#tpu.dimension_semantics<arbitrary>], iteration_bounds = array<i64: 2>, scalar_prefetch = 0 : i64, scratch_operands = 1 : i64, tpu.core_type = #tpu.core_type<tc>, window_params = [{transform_indices = @transform_0, window_bounds = array<i64: 8, 4096>}, {transform_indices = @transform_1, window_bounds = array<i64: 4096, 512>}, {pipeline_mode = #tpu.pipeline_mode<synchronous>, transform_indices = @transform_2, window_bounds = array<i64: 1, 512>}, {pipeline_mode = #tpu.pipeline_mode<synchronous>, transform_indices = @transform_3, window_bounds = array<i64: 512, 384>}, {pipeline_mode = #tpu.pipeline_mode<synchronous>, transform_indices = @transform_4, window_bounds = array<i64: 1, 384>}, {pipeline_mode = #tpu.pipeline_mode<synchronous>, transform_indices = @transform_5, window_bounds = array<i64: 384, 128>}, {pipeline_mode = #tpu.pipeline_mode<synchronous>, transform_indices = @transform_6, window_bounds = array<i64: 1, 128>}, {pipeline_mode = #tpu.pipeline_mode<synchronous>, transform_indices = @transform_7, window_bounds = array<i64: 8, 128>}]} {
    %c0_i32 = arith.constant 0 : i32
    %0 = arith.cmpi eq, %arg0, %c0_i32 : i32
    %1 = arith.extui %0 : i1 to i32
    %c0_i32_0 = arith.constant 0 : i32
    %2 = arith.cmpi ne, %1, %c0_i32_0 : i32
    scf.if %2 {
      %cst_9 = arith.constant 0.000000e+00 : f32
      %12 = vector.broadcast %cst_9 : f32 to vector<8x512xf32>
      %c0_10 = arith.constant 0 : index
      %c0_11 = arith.constant 0 : index
      %13 = vector.load %arg9[%c0_10, %c0_11] : memref<8x512xf32, #tpu.memory_space<vmem>>, vector<8x512xf32>
      tpu.vector_store %arg9[%c0_10, %c0_11], %12 {strides = array<i32>} : memref<8x512xf32, #tpu.memory_space<vmem>>, vector<8x512xf32>,
    } else {
    }
    %c0 = arith.constant 0 : index
    %c0_1 = arith.constant 0 : index
    %3 = vector.load %arg9[%c0, %c0_1] : memref<8x512xf32, #tpu.memory_space<vmem>>, vector<8x512xf32>
    %c0_2 = arith.constant 0 : index
    %c0_3 = arith.constant 0 : index
    %4 = vector.load %arg1[%c0_2, %c0_3] : memref<8x4096xbf16, #tpu.memory_space<vmem>>, vector<8x4096xbf16>
    %c0_4 = arith.constant 0 : index
    %c0_5 = arith.constant 0 : index
    %5 = vector.load %arg2[%c0_4, %c0_5] : memref<4096x512xbf16, #tpu.memory_space<vmem>>, vector<4096x512xbf16>
    %cst = arith.constant dense<0.000000e+00> : vector<8x512xf32>
    %6 = tpu.matmul %4, %5, %cst {dimension_numbers = #tpu.dot_dimension_numbers<[1], [0], [0], [1], [0, 0, 1, 1], [], []>} : vector<8x4096xbf16>, vector<4096x512xbf16>, vector<8x512xf32> -> vector<8x512xf32>
    %7 = arith.addf %3, %6 : vector<8x512xf32>
    %c0_6 = arith.constant 0 : index
    %c0_7 = arith.constant 0 : index
    %8 = vector.load %arg9[%c0_6, %c0_7] : memref<8x512xf32, #tpu.memory_space<vmem>>, vector<8x512xf32>
    tpu.vector_store %arg9[%c0_6, %c0_7], %7 {strides = array<i32>} : memref<8x512xf32, #tpu.memory_space<vmem>>, vector<8x512xf32>,
    %c1_i32 = arith.constant 1 : i32
    %9 = arith.cmpi eq, %arg0, %c1_i32 : i32
    %10 = arith.extui %9 : i1 to i32
    %c0_i32_8 = arith.constant 0 : i32
    %11 = arith.cmpi ne, %10, %c0_i32_8 : i32
    scf.if %11 {
      %c0_9 = arith.constant 0 : index
      %c0_10 = arith.constant 0 : index
      %12 = vector.load %arg9[%c0_9, %c0_10] : memref<8x512xf32, #tpu.memory_space<vmem>>, vector<8x512xf32>
      %c0_11 = arith.constant 0 : index
      %c0_12 = arith.constant 0 : index
      %13 = vector.load %arg3[%c0_11, %c0_12] : memref<1x512xf32, #tpu.memory_space<vmem>>, vector<1x512xf32>
      %14 = vector.broadcast %13 : vector<1x512xf32> to vector<8x512xf32>
      %15 = arith.addf %12, %14 : vector<8x512xf32>
      %cst_13 = arith.constant 0.000000e+00 : f32
      %16 = vector.broadcast %cst_13 : f32 to vector<8x512xf32>
      %17 = arith.maximumf %15, %16 : vector<8x512xf32>
      %18 = arith.truncf %17 : vector<8x512xf32> to vector<8x512xbf16>
      %c0_14 = arith.constant 0 : index
      %c0_15 = arith.constant 0 : index
      %19 = vector.load %arg4[%c0_14, %c0_15] : memref<512x384xbf16, #tpu.memory_space<vmem>>, vector<512x384xbf16>
      %cst_16 = arith.constant dense<0.000000e+00> : vector<8x384xf32>
      %20 = tpu.matmul %18, %19, %cst_16 {dimension_numbers = #tpu.dot_dimension_numbers<[1], [0], [0], [1], [0, 0, 1, 1], [], []>} : vector<8x512xbf16>, vector<512x384xbf16>, vector<8x384xf32> -> vector<8x384xf32>
      %c0_17 = arith.constant 0 : index
      %c0_18 = arith.constant 0 : index
      %21 = vector.load %arg5[%c0_17, %c0_18] : memref<1x384xf32, #tpu.memory_space<vmem>>, vector<1x384xf32>
      %22 = vector.broadcast %21 : vector<1x384xf32> to vector<8x384xf32>
      %23 = arith.addf %20, %22 : vector<8x384xf32>
      %cst_19 = arith.constant 0.000000e+00 : f32
      %24 = vector.broadcast %cst_19 : f32 to vector<8x384xf32>
      %25 = arith.maximumf %23, %24 : vector<8x384xf32>
      %26 = arith.truncf %25 : vector<8x384xf32> to vector<8x384xbf16>
      %c0_20 = arith.constant 0 : index
      %c0_21 = arith.constant 0 : index
      %27 = vector.load %arg6[%c0_20, %c0_21] : memref<384x128xbf16, #tpu.memory_space<vmem>>, vector<384x128xbf16>
      %cst_22 = arith.constant dense<0.000000e+00> : vector<8x128xf32>
      %28 = tpu.matmul %26, %27, %cst_22 {dimension_numbers = #tpu.dot_dimension_numbers<[1], [0], [0], [1], [0, 0, 1, 1], [], []>} : vector<8x384xbf16>, vector<384x128xbf16>, vector<8x128xf32> -> vector<8x128xf32>
      %c0_23 = arith.constant 0 : index
      %c0_24 = arith.constant 0 : index
      %29 = vector.load %arg7[%c0_23, %c0_24] : memref<1x128xf32, #tpu.memory_space<vmem>>, vector<1x128xf32>
      %30 = vector.broadcast %29 : vector<1x128xf32> to vector<8x128xf32>
      %31 = arith.addf %28, %30 : vector<8x128xf32>
      %c0_25 = arith.constant 0 : index
      %c0_26 = arith.constant 0 : index
      %32 = vector.load %arg8[%c0_25, %c0_26] : memref<8x128xf32, #tpu.memory_space<vmem>>, vector<8x128xf32>
      tpu.vector_store %arg8[%c0_25, %c0_26], %31 {strides = array<i32>} : memref<8x128xf32, #tpu.memory_space<vmem>>, vector<8x128xf32>,
    } else {
    }
    return
  }
  func.func @transform_0(%arg0: i32) -> (i32, i32) {
    %c0_i32 = arith.constant 0 : i32
    %c0_i32_0 = arith.constant 0 : i32
    return %c0_i32, %arg0 : i32, i32
  }
  func.func @transform_1(%arg0: i32) -> (i32, i32) {
    %c0_i32 = arith.constant 0 : i32
    %c0_i32_0 = arith.constant 0 : i32
    return %arg0, %c0_i32 : i32, i32
  }
  func.func @transform_2(%arg0: i32) -> (i32, i32) {
    %c0_i32 = arith.constant 0 : i32
    %c0_i32_0 = arith.constant 0 : i32
    %c0_i32_1 = arith.constant 0 : i32
    return %c0_i32, %c0_i32_0 : i32, i32
  }
  func.func @transform_3(%arg0: i32) -> (i32, i32) {
    %c0_i32 = arith.constant 0 : i32
    %c0_i32_0 = arith.constant 0 : i32
    %c0_i32_1 = arith.constant 0 : i32
    return %c0_i32, %c0_i32_0 : i32, i32
  }
  func.func @transform_4(%arg0: i32) -> (i32, i32) {
    %c0_i32 = arith.constant 0 : i32
    %c0_i32_0 = arith.constant 0 : i32
    %c0_i32_1 = arith.constant 0 : i32
    return %c0_i32, %c0_i32_0 : i32, i32
  }
  func.func @transform_5(%arg0: i32) -> (i32, i32) {
    %c0_i32 = arith.constant 0 : i32
    %c0_i32_0 = arith.constant 0 : i32
    %c0_i32_1 = arith.constant 0 : i32
    return %c0_i32, %c0_i32_0 : i32, i32
  }
  func.func @transform_6(%arg0: i32) -> (i32, i32) {
    %c0_i32 = arith.constant 0 : i32
    %c0_i32_0 = arith.constant 0 : i32
    %c0_i32_1 = arith.constant 0 : i32
    return %c0_i32, %c0_i32_0 : i32, i32
  }
  func.func @transform_7(%arg0: i32) -> (i32, i32) {
    %c0_i32 = arith.constant 0 : i32
    %c0_i32_0 = arith.constant 0 : i32
    %c0_i32_1 = arith.constant 0 : i32
    return %c0_i32, %c0_i32_0 : i32, i32
  }
}

</mosaic_0001>

<bundles_post_ra>
// kernel: cnn_forward.5
= control target key start
LH: loop header
LB: loop body
LE: loop exit
PB: predicated region body
PF: predicated region fallthrough
CT: control target
= control target key end

     0   :  { %s1829_s12 = smov 0   ;;  %s2028_s0 = inlined_call_operand.vmem [shape: bf16[2048,27], index: 0, kind: input, shape index: {}]   ;;  %s2029_s1 = inlined_call_operand.vmem [shape: bf16[27,128], index: 1, kind: input, shape index: {}]   ;;  %s2030_s2 = inlined_call_operand.vmem [shape: f32[1,128], index: 2, kind: input, shape index: {}]   ;;  %s2031_s3 = inlined_call_operand.vmem [shape: bf16[2048,128], index: 3, kind: output, shape index: {}]  }
   0x1 LB: > { %s1254_s13 = sadd.s32 4294967295, %s1806_s12   ;;  %p1258_p0 = scmp.ge.s32.totalorder %s1806_s12, 1  ;;  %s1806_s12 = sphi %s1829_s12, %s13_s12  }
   0x2   : > { %p138_p1 = scmp.lt.s32.totalorder %s1806_s12, 5 }
   0x4   : > { %p139_p2 = pnand %p1258_p0, %p138_p1 }
   0x5   : > { %v1766_v0 = vld [vmem:[%s2029_s1] sm:$0xff] (!%p139_p2)   ;;  %vm518_vm0 = vcmask (!%p139_p2), 1044480   ;;  %v1767_v1 = vld [vmem:[%s2029_s1 + $0x8] sm:$0x3f] (!%p139_p2)   ;;  %vm519_vm1 = vcmask (!%p139_p2), 1045504   ;;  %s1259_s18 = sshll.u32 (!%p139_p2), %s1254_s13, 6 }
   0x6   : > { %142 = sbr.rel (%p139_p2) target bundleno = 297 (0x129), region = 32  ;;  %1685 = vmatprep.subr.bf16.mxu0 (!%p139_p2), %v1766_v0  ;;  %1753 = vmatprep.subr.bf16.mxu1 (!%p139_p2), %v1766_v0  ;;  %v1808_v2 = vmov (!%p139_p2), 65535   ;;  %p163_p3 = scmp.lt.s32.totalorder (!%p139_p2), %s1259_s18, 255  ;;  %vm421_vm2 = vcmask (!%p139_p2), 220160   ;;  %v1920_v38 = vld [vmem:[%s2030_s2] ss:$0 sm:$0xff] (!%p139_p2) }
   0x7   : > { %1686 = vmatpush3.bf16.msra.mxu0 (!%p139_p2), %v1766_v0  ;;  %1755 = vmatpush3.bf16.msra.mxu1 (!%p139_p2), %v1766_v0  ;;  %v520_v3 = vsel (!%p139_p2), %vm518_vm0, 4294967295, %v1808_v2 }
   0x8   : > { %v521_v4 = vsel (!%p139_p2), %vm519_vm1, %v520_v3, 0 }
   0x9   : > { %v523_v5 = vand.u32 (!%p139_p2), %v1767_v1, %v521_v4 }
   0xb   : > { %1687 = vmatprep.subr.bf16.mxu0 (!%p139_p2), %v523_v5  ;;  %1754 = vmatprep.subr.bf16.mxu1 (!%p139_p2), %v523_v5 }
   0xc   : > { %1688 = vmatpush3.bf16.msra.mxu0 (!%p139_p2), %v523_v5  ;;  %1756 = vmatpush3.bf16.msra.mxu1 (!%p139_p2), %v523_v5 }
   0xd   : > { %s2033_s18 = smov (!%p163_p3, %s1259_s18), 255 }
   0xe   : > { %s1260_s19 = sshll.u32 %s2033_s18, 2 }
   0xf   : > { %s1851_s22 = scalar_lea.vmem %s2028_s0, %s1260_s19  ;;  %s1935_s27 = scalar_lea.vmem %s2031_s3, %s1260_s19 }
  0x10   : > { %v1768_v6 = vld [vmem:[%s1851_s22] sm:$0xff]   ;;  %v1770_v8 = vld [vmem:[%s1851_s22 + $0x8] sm:$0xff]   ;;  %v1772_v10 = vld [vmem:[%s1851_s22 + $0x10] sm:$0xff]  }
  0x11   : > { %v1769_v7 = vld [vmem:[%s1851_s22 + $0x80] sm:$0xff]   ;;  %1689 = vmatprep.mubr.msk.bf16.mxu0 %vm421_vm2, %v1768_v6  ;;  %v1771_v9 = vld [vmem:[%s1851_s22 + $0x88] sm:$0xff]   ;;  %v1773_v11 = vld [vmem:[%s1851_s22 + $0x90] sm:$0xff]  }
  0x12   : > { %1721 = vmatprep.mubr.msk.bf16.mxu1 %vm421_vm2, %v1769_v7  ;;  %1690 = vmatmul.mubr.msk.bf16.vlgmr.msra.gmra.mrb[0].mxu0 %vm421_vm2, %v1770_v8  ;;  %v1774_v12 = vld [vmem:[%s1851_s22 + $0x18] sm:$0xff]   ;;  %v1776_v14 = vld [vmem:[%s1851_s22 + $0x20] sm:$0xff]   ;;  %v1778_v16 = vld [vmem:[%s1851_s22 + $0x28] sm:$0xff]  }
  0x13   : > { %1722 = vmatmul.mubr.msk.bf16.vlgmr.msra.gmra.mrb[0].mxu1 %vm421_vm2, %v1771_v9  ;;  %1693 = vmatprep.mubr.msk.bf16.mxu0 %vm421_vm2, %v1772_v10  ;;  %v1775_v13 = vld [vmem:[%s1851_s22 + $0x98] sm:$0xff]   ;;  %v1777_v15 = vld [vmem:[%s1851_s22 + $0xa0] sm:$0xff]   ;;  %v1779_v17 = vld [vmem:[%s1851_s22 + $0xa8] sm:$0xff]  }
  0x14   : > { %1725 = vmatprep.mubr.msk.bf16.mxu1 %vm421_vm2, %v1773_v11  ;;  %v1780_v18 = vld [vmem:[%s1851_s22 + $0x30] sm:$0xff]   ;;  %v1782_v20 = vld [vmem:[%s1851_s22 + $0x38] sm:$0xff]   ;;  %v1784_v22 = vld [vmem:[%s1851_s22 + $0x40] sm:$0xff]  }
  0x15   : > { %v1781_v19 = vld [vmem:[%s1851_s22 + $0xb0] sm:$0xff]   ;;  %v1783_v21 = vld [vmem:[%s1851_s22 + $0xb8] sm:$0xff]   ;;  %v1785_v23 = vld [vmem:[%s1851_s22 + $0xc0] sm:$0xff]  }
  0x16   : > { %v1786_v24 = vld [vmem:[%s1851_s22 + $0x48] sm:$0xff]   ;;  %v1788_v26 = vld [vmem:[%s1851_s22 + $0x50] sm:$0xff]   ;;  %v1790_v28 = vld [vmem:[%s1851_s22 + $0x58] sm:$0xff]  }
  0x17   : > { %v1787_v25 = vld [vmem:[%s1851_s22 + $0xc8] sm:$0xff]   ;;  %v1789_v27 = vld [vmem:[%s1851_s22 + $0xd0] sm:$0xff]   ;;  %v1791_v29 = vld [vmem:[%s1851_s22 + $0xd8] sm:$0xff]  }
  0x18   : > { %v1792_v30 = vld [vmem:[%s1851_s22 + $0x60] sm:$0xff]   ;;  %v1794_v32 = vld [vmem:[%s1851_s22 + $0x68] sm:$0xff]   ;;  %v1796_v34 = vld [vmem:[%s1851_s22 + $0x70] sm:$0xff]  }
  0x19   : > { %v1793_v31 = vld [vmem:[%s1851_s22 + $0xe0] sm:$0xff]   ;;  %v1795_v33 = vld [vmem:[%s1851_s22 + $0xe8] sm:$0xff]   ;;  %v1797_v35 = vld [vmem:[%s1851_s22 + $0xf0] sm:$0xff]  }
  0x1a   : > { %1694 = vmatmul.mubr.msk.bf16.gmra.mrb[4].mxu0 %vm421_vm2, %v1774_v12  ;;  %v1798_v36 = vld [vmem:[%s1851_s22 + $0x78] sm:$0xff]  }
  0x1b   : > { %1726 = vmatmul.mubr.msk.bf16.gmra.mrb[4].mxu1 %vm421_vm2, %v1775_v13  ;;  %1697 = vmatprep.mubr.msk.bf16.mxu0 %vm421_vm2, %v1776_v14  ;;  %v1799_v37 = vld [vmem:[%s1851_s22 + $0xf8] sm:$0xff]  }
  0x1c   : > { %1729 = vmatprep.mubr.msk.bf16.mxu1 %vm421_vm2, %v1777_v15 }
  0x22   : > { %1698 = vmatmul.mubr.msk.bf16.gmra.mrb[8].mxu0 %vm421_vm2, %v1778_v16 }
  0x23   : > { %1730 = vmatmul.mubr.msk.bf16.gmra.mrb[8].mxu1 %vm421_vm2, %v1779_v17  ;;  %1701 = vmatprep.mubr.msk.bf16.mxu0 %vm421_vm2, %v1780_v18 }
  0x24   : > { %1733 = vmatprep.mubr.msk.bf16.mxu1 %vm421_vm2, %v1781_v19 }
  0x2a   : > { %1702 = vmatmul.mubr.msk.bf16.gmra.mrb[12].mxu0 %vm421_vm2, %v1782_v20 }
  0x2b   : > { %1734 = vmatmul.mubr.msk.bf16.gmra.mrb[12].mxu1 %vm421_vm2, %v1783_v21  ;;  %1705 = vmatprep.mubr.msk.bf16.mxu0 %vm421_vm2, %v1784_v22 }
  0x2c   : > { %1737 = vmatprep.mubr.msk.bf16.mxu1 %vm421_vm2, %v1785_v23 }
  0x32   : > { %1706 = vmatmul.mubr.msk.bf16.gmra.mrb[16].mxu0 %vm421_vm2, %v1786_v24 }
  0x33   : > { %1738 = vmatmul.mubr.msk.bf16.gmra.mrb[16].mxu1 %vm421_vm2, %v1787_v25  ;;  %1709 = vmatprep.mubr.msk.bf16.mxu0 %vm421_vm2, %v1788_v26 }
  0x34   : > { %1741 = vmatprep.mubr.msk.bf16.mxu1 %vm421_vm2, %v1789_v27 }
  0x3a   : > { %1710 = vmatmul.mubr.msk.bf16.gmra.mrb[20].mxu0 %vm421_vm2, %v1790_v28 }
  0x3b   : > { %1742 = vmatmul.mubr.msk.bf16.gmra.mrb[20].mxu1 %vm421_vm2, %v1791_v29  ;;  %1713 = vmatprep.mubr.msk.bf16.mxu0 %vm421_vm2, %v1792_v30 }
  0x3c   : > { %1745 = vmatprep.mubr.msk.bf16.mxu1 %vm421_vm2, %v1793_v31 }
  0x42   : > { %1714 = vmatmul.mubr.msk.bf16.gmra.mrb[24].mxu0 %vm421_vm2, %v1794_v32 }
  0x43   : > { %1746 = vmatmul.mubr.msk.bf16.gmra.mrb[24].mxu1 %vm421_vm2, %v1795_v33  ;;  %1717 = vmatprep.mubr.msk.bf16.mxu0 %vm421_vm2, %v1796_v34 }
  0x44   : > { %1749 = vmatprep.mubr.msk.bf16.mxu1 %vm421_vm2, %v1797_v35 }
  0x4a   : > { %1718 = vmatmul.mubr.msk.bf16.gmra.mrb[28].mxu0 %vm421_vm2, %v1798_v36 }
  0x4b   : > { %1750 = vmatmul.mubr.msk.bf16.gmra.mrb[28].mxu1 %vm421_vm2, %v1799_v37 }
  0xe5   : > { %v1691_v39 = vpop.f32.mrb[0].mxu0 }
  0xe6   : > { %v568_v40 = vadd.f32 %v1691_v39, %v1920_v38  ;;  %v1723_v41 = vpop.f32.mrb[0].mxu1  ;;  %v559_v42 = vpop.f32.mrb[1].mxu0 }
  0xe7   : > { %v696_v43 = vadd.f32 %v1723_v41, %v1920_v38  ;;  %v560_v44 = vadd.f32 %v1920_v38, %v559_v42  ;;  %v687_v45 = vpop.f32.mrb[1].mxu1  ;;  %v1692_v46 = vpop.f32.mrb[2].mxu0 }
  0xe8   : > { %v688_v47 = vadd.f32 %v1920_v38, %v687_v45  ;;  %v571_v48 = vadd.f32 %v1692_v46, %v1920_v38  ;;  %v1724_v49 = vpop.f32.mrb[2].mxu1  ;;  %v562_v50 = vpop.f32.mrb[3].mxu0  ;;  %v816_v54 = vmax.f32 %v568_v40, 0.0 }
  0xe9   : > { %v699_v51 = vadd.f32 %v1724_v49, %v1920_v38  ;;  %v563_v52 = vadd.f32 %v1920_v38, %v562_v50  ;;  %v690_v53 = vpop.f32.mrb[3].mxu1  ;;  %v848_v57 = vmax.f32 %v696_v43, 0.0  ;;  %v814_v58 = vmax.f32 %v560_v44, 0.0 }
  0xea   : > { %v817_v55 = vmax.f32 %v571_v48, 0.0  ;;  %v691_v56 = vadd.f32 %v1920_v38, %v690_v53  ;;  %v846_v61 = vmax.f32 %v688_v47, 0.0 }
  0xeb   : > { %v849_v59 = vmax.f32 %v699_v51, 0.0  ;;  %v815_v60 = vmax.f32 %v563_v52, 0.0 }
  0xec   : > { %v1468_v62 = vpack.c.bf16 %v817_v55, %v816_v54  ;;  %v847_v63 = vmax.f32 %v691_v56, 0.0 }
  0xed   : > { %v1548_v0 = vpack.c.bf16 %v849_v59, %v848_v57  ;;  %v1463_v1 = vpack.c.bf16 %v815_v60, %v814_v58  ;;  %v1695_v2 = vpop.f32.mrb[4].mxu0 }
  0xee   : > { %1620 = vst [vmem:[%s1935_s27 + $0x8] sm:$0xff] %v1468_v62   ;;  %v1543_v3 = vpack.c.bf16 %v847_v63, %v846_v61  ;;  %v584_v4 = vadd.f32 %v1695_v2, %v1920_v38  ;;  %v1727_v5 = vpop.f32.mrb[4].mxu1  ;;  %v575_v6 = vpop.f32.mrb[5].mxu0 }
  0xef   : > { %1636 = vst [vmem:[%s1935_s27 + $0x88] sm:$0xff] %v1548_v0   ;;  %1464 = vst [vmem:[%s1935_s27] sm:$0xff] %v1463_v1   ;;  %v712_v7 = vadd.f32 %v1727_v5, %v1920_v38  ;;  %v576_v8 = vadd.f32 %v1920_v38, %v575_v6  ;;  %v703_v9 = vpop.f32.mrb[5].mxu1  ;;  %v1696_v10 = vpop.f32.mrb[6].mxu0 }
  0xf0   : > { %1635 = vst [vmem:[%s1935_s27 + $0x80] sm:$0xff] %v1543_v3   ;;  %v704_v11 = vadd.f32 %v1920_v38, %v703_v9  ;;  %v587_v12 = vadd.f32 %v1696_v10, %v1920_v38  ;;  %v1728_v13 = vpop.f32.mrb[6].mxu1  ;;  %v578_v14 = vpop.f32.mrb[7].mxu0  ;;  %v820_v18 = vmax.f32 %v584_v4, 0.0 }
  0xf1   : > { %v715_v15 = vadd.f32 %v1728_v13, %v1920_v38  ;;  %v579_v16 = vadd.f32 %v1920_v38, %v578_v14  ;;  %v706_v17 = vpop.f32.mrb[7].mxu1  ;;  %v852_v21 = vmax.f32 %v712_v7, 0.0  ;;  %v818_v22 = vmax.f32 %v576_v8, 0.0 }
  0xf2   : > { %v821_v19 = vmax.f32 %v587_v12, 0.0  ;;  %v707_v20 = vadd.f32 %v1920_v38, %v706_v17  ;;  %v850_v25 = vmax.f32 %v704_v11, 0.0 }
  0xf3   : > { %v853_v23 = vmax.f32 %v715_v15, 0.0  ;;  %v819_v24 = vmax.f32 %v579_v16, 0.0 }
  0xf4   : > { %v1478_v26 = vpack.c.bf16 %v821_v19, %v820_v18  ;;  %v851_v27 = vmax.f32 %v707_v20, 0.0 }
  0xf5   : > { %v1558_v28 = vpack.c.bf16 %v853_v23, %v852_v21  ;;  %v1473_v29 = vpack.c.bf16 %v819_v24, %v818_v22  ;;  %v1699_v30 = vpop.f32.mrb[8].mxu0 }
  0xf6   : > { %1622 = vst [vmem:[%s1935_s27 + $0x18] sm:$0xff] %v1478_v26   ;;  %v1553_v31 = vpack.c.bf16 %v851_v27, %v850_v25  ;;  %v600_v32 = vadd.f32 %v1699_v30, %v1920_v38  ;;  %v1731_v33 = vpop.f32.mrb[8].mxu1  ;;  %v591_v34 = vpop.f32.mrb[9].mxu0 }
  0xf7   : > { %1638 = vst [vmem:[%s1935_s27 + $0x98] sm:$0xff] %v1558_v28   ;;  %1621 = vst [vmem:[%s1935_s27 + $0x10] sm:$0xff] %v1473_v29   ;;  %v728_v35 = vadd.f32 %v1731_v33, %v1920_v38  ;;  %v592_v36 = vadd.f32 %v1920_v38, %v591_v34  ;;  %v719_v37 = vpop.f32.mrb[9].mxu1  ;;  %v1700_v39 = vpop.f32.mrb[10].mxu0 }
  0xf8   : > { %1637 = vst [vmem:[%s1935_s27 + $0x90] sm:$0xff] %v1553_v31   ;;  %v720_v40 = vadd.f32 %v1920_v38, %v719_v37  ;;  %v603_v41 = vadd.f32 %v1700_v39, %v1920_v38  ;;  %v1732_v42 = vpop.f32.mrb[10].mxu1  ;;  %v594_v43 = vpop.f32.mrb[11].mxu0  ;;  %v824_v47 = vmax.f32 %v600_v32, 0.0 }
  0xf9   : > { %v731_v44 = vadd.f32 %v1732_v42, %v1920_v38  ;;  %v595_v45 = vadd.f32 %v1920_v38, %v594_v43  ;;  %v722_v46 = vpop.f32.mrb[11].mxu1  ;;  %v856_v50 = vmax.f32 %v728_v35, 0.0  ;;  %v822_v51 = vmax.f32 %v592_v36, 0.0 }
  0xfa   : > { %v825_v48 = vmax.f32 %v603_v41, 0.0  ;;  %v723_v49 = vadd.f32 %v1920_v38, %v722_v46  ;;  %v854_v54 = vmax.f32 %v720_v40, 0.0 }
  0xfb   : > { %v857_v52 = vmax.f32 %v731_v44, 0.0  ;;  %v823_v53 = vmax.f32 %v595_v45, 0.0 }
  0xfc   : > { %v1488_v55 = vpack.c.bf16 %v825_v48, %v824_v47  ;;  %v855_v56 = vmax.f32 %v723_v49, 0.0 }
  0xfd   : > { %v1568_v57 = vpack.c.bf16 %v857_v52, %v856_v50  ;;  %v1483_v58 = vpack.c.bf16 %v823_v53, %v822_v51  ;;  %v1703_v59 = vpop.f32.mrb[12].mxu0 }
  0xfe   : > { %1624 = vst [vmem:[%s1935_s27 + $0x28] sm:$0xff] %v1488_v55   ;;  %v1563_v60 = vpack.c.bf16 %v855_v56, %v854_v54  ;;  %v616_v61 = vadd.f32 %v1703_v59, %v1920_v38  ;;  %v1735_v62 = vpop.f32.mrb[12].mxu1  ;;  %v607_v63 = vpop.f32.mrb[13].mxu0 }
  0xff   : > { %1640 = vst [vmem:[%s1935_s27 + $0xa8] sm:$0xff] %v1568_v57   ;;  %1623 = vst [vmem:[%s1935_s27 + $0x20] sm:$0xff] %v1483_v58   ;;  %v744_v0 = vadd.f32 %v1735_v62, %v1920_v38  ;;  %v608_v1 = vadd.f32 %v1920_v38, %v607_v63  ;;  %v735_v2 = vpop.f32.mrb[13].mxu1  ;;  %v1704_v3 = vpop.f32.mrb[14].mxu0 }
 0x100   : > { %1639 = vst [vmem:[%s1935_s27 + $0xa0] sm:$0xff] %v1563_v60   ;;  %v736_v4 = vadd.f32 %v1920_v38, %v735_v2  ;;  %v619_v5 = vadd.f32 %v1704_v3, %v1920_v38  ;;  %v1736_v6 = vpop.f32.mrb[14].mxu1  ;;  %v610_v7 = vpop.f32.mrb[15].mxu0  ;;  %v828_v11 = vmax.f32 %v616_v61, 0.0 }
 0x101   : > { %v747_v8 = vadd.f32 %v1736_v6, %v1920_v38  ;;  %v611_v9 = vadd.f32 %v1920_v38, %v610_v7  ;;  %v738_v10 = vpop.f32.mrb[15].mxu1  ;;  %v860_v14 = vmax.f32 %v744_v0, 0.0  ;;  %v826_v15 = vmax.f32 %v608_v1, 0.0 }
 0x102   : > { %v829_v12 = vmax.f32 %v619_v5, 0.0  ;;  %v739_v13 = vadd.f32 %v1920_v38, %v738_v10  ;;  %v858_v18 = vmax.f32 %v736_v4, 0.0 }
 0x103   : > { %v861_v16 = vmax.f32 %v747_v8, 0.0  ;;  %v827_v17 = vmax.f32 %v611_v9, 0.0 }
 0x104   : > { %v1498_v19 = vpack.c.bf16 %v829_v12, %v828_v11  ;;  %v859_v20 = vmax.f32 %v739_v13, 0.0 }
 0x105   : > { %v1578_v21 = vpack.c.bf16 %v861_v16, %v860_v14  ;;  %v1493_v22 = vpack.c.bf16 %v827_v17, %v826_v15  ;;  %v1707_v23 = vpop.f32.mrb[16].mxu0 }
 0x106   : > { %1626 = vst [vmem:[%s1935_s27 + $0x38] sm:$0xff] %v1498_v19   ;;  %v1573_v24 = vpack.c.bf16 %v859_v20, %v858_v18  ;;  %v632_v25 = vadd.f32 %v1707_v23, %v1920_v38  ;;  %v1739_v26 = vpop.f32.mrb[16].mxu1  ;;  %v623_v27 = vpop.f32.mrb[17].mxu0 }
 0x107   : > { %1642 = vst [vmem:[%s1935_s27 + $0xb8] sm:$0xff] %v1578_v21   ;;  %1625 = vst [vmem:[%s1935_s27 + $0x30] sm:$0xff] %v1493_v22   ;;  %v760_v28 = vadd.f32 %v1739_v26, %v1920_v38  ;;  %v624_v29 = vadd.f32 %v1920_v38, %v623_v27  ;;  %v751_v30 = vpop.f32.mrb[17].mxu1  ;;  %v1708_v31 = vpop.f32.mrb[18].mxu0 }
 0x108   : > { %1641 = vst [vmem:[%s1935_s27 + $0xb0] sm:$0xff] %v1573_v24   ;;  %v752_v32 = vadd.f32 %v1920_v38, %v751_v30  ;;  %v635_v33 = vadd.f32 %v1708_v31, %v1920_v38  ;;  %v1740_v34 = vpop.f32.mrb[18].mxu1  ;;  %v626_v35 = vpop.f32.mrb[19].mxu0  ;;  %v832_v40 = vmax.f32 %v632_v25, 0.0 }
 0x109   : > { %v763_v36 = vadd.f32 %v1740_v34, %v1920_v38  ;;  %v627_v37 = vadd.f32 %v1920_v38, %v626_v35  ;;  %v754_v39 = vpop.f32.mrb[19].mxu1  ;;  %v864_v43 = vmax.f32 %v760_v28, 0.0  ;;  %v830_v44 = vmax.f32 %v624_v29, 0.0 }
 0x10a   : > { %v833_v41 = vmax.f32 %v635_v33, 0.0  ;;  %v755_v42 = vadd.f32 %v1920_v38, %v754_v39  ;;  %v862_v47 = vmax.f32 %v752_v32, 0.0 }
 0x10b   : > { %v865_v45 = vmax.f32 %v763_v36, 0.0  ;;  %v831_v46 = vmax.f32 %v627_v37, 0.0 }
 0x10c   : > { %v1508_v48 = vpack.c.bf16 %v833_v41, %v832_v40  ;;  %v863_v49 = vmax.f32 %v755_v42, 0.0 }
 0x10d   : > { %v1588_v50 = vpack.c.bf16 %v865_v45, %v864_v43  ;;  %v1503_v51 = vpack.c.bf16 %v831_v46, %v830_v44  ;;  %v1711_v52 = vpop.f32.mrb[20].mxu0 }
 0x10e   : > { %1628 = vst [vmem:[%s1935_s27 + $0x48] sm:$0xff] %v1508_v48   ;;  %v1583_v53 = vpack.c.bf16 %v863_v49, %v862_v47  ;;  %v648_v54 = vadd.f32 %v1711_v52, %v1920_v38  ;;  %v1743_v55 = vpop.f32.mrb[20].mxu1  ;;  %v639_v56 = vpop.f32.mrb[21].mxu0 }
 0x10f   : > { %1644 = vst [vmem:[%s1935_s27 + $0xc8] sm:$0xff] %v1588_v50   ;;  %1627 = vst [vmem:[%s1935_s27 + $0x40] sm:$0xff] %v1503_v51   ;;  %v776_v57 = vadd.f32 %v1743_v55, %v1920_v38  ;;  %v640_v58 = vadd.f32 %v1920_v38, %v639_v56  ;;  %v767_v59 = vpop.f32.mrb[21].mxu1  ;;  %v1712_v60 = vpop.f32.mrb[22].mxu0 }
 0x110   : > { %1643 = vst [vmem:[%s1935_s27 + $0xc0] sm:$0xff] %v1583_v53   ;;  %v768_v61 = vadd.f32 %v1920_v38, %v767_v59  ;;  %v651_v62 = vadd.f32 %v1712_v60, %v1920_v38  ;;  %v1744_v63 = vpop.f32.mrb[22].mxu1  ;;  %v642_v0 = vpop.f32.mrb[23].mxu0  ;;  %v836_v4 = vmax.f32 %v648_v54, 0.0 }
 0x111   : > { %v779_v1 = vadd.f32 %v1744_v63, %v1920_v38  ;;  %v643_v2 = vadd.f32 %v1920_v38, %v642_v0  ;;  %v770_v3 = vpop.f32.mrb[23].mxu1  ;;  %v868_v7 = vmax.f32 %v776_v57, 0.0  ;;  %v834_v8 = vmax.f32 %v640_v58, 0.0 }
 0x112   : > { %v837_v5 = vmax.f32 %v651_v62, 0.0  ;;  %v771_v6 = vadd.f32 %v1920_v38, %v770_v3  ;;  %v866_v11 = vmax.f32 %v768_v61, 0.0 }
 0x113   : > { %v869_v9 = vmax.f32 %v779_v1, 0.0  ;;  %v835_v10 = vmax.f32 %v643_v2, 0.0 }
 0x114   : > { %v1518_v12 = vpack.c.bf16 %v837_v5, %v836_v4  ;;  %v867_v13 = vmax.f32 %v771_v6, 0.0 }
 0x115   : > { %v1598_v14 = vpack.c.bf16 %v869_v9, %v868_v7  ;;  %v1513_v15 = vpack.c.bf16 %v835_v10, %v834_v8  ;;  %v1715_v16 = vpop.f32.mrb[24].mxu0 }
 0x116   : > { %1630 = vst [vmem:[%s1935_s27 + $0x58] sm:$0xff] %v1518_v12   ;;  %v1593_v17 = vpack.c.bf16 %v867_v13, %v866_v11  ;;  %v664_v18 = vadd.f32 %v1715_v16, %v1920_v38  ;;  %v1747_v19 = vpop.f32.mrb[24].mxu1  ;;  %v655_v20 = vpop.f32.mrb[25].mxu0 }
 0x117   : > { %1646 = vst [vmem:[%s1935_s27 + $0xd8] sm:$0xff] %v1598_v14   ;;  %1629 = vst [vmem:[%s1935_s27 + $0x50] sm:$0xff] %v1513_v15   ;;  %v792_v21 = vadd.f32 %v1747_v19, %v1920_v38  ;;  %v656_v22 = vadd.f32 %v1920_v38, %v655_v20  ;;  %v783_v23 = vpop.f32.mrb[25].mxu1  ;;  %v1716_v24 = vpop.f32.mrb[26].mxu0 }
 0x118   : > { %1645 = vst [vmem:[%s1935_s27 + $0xd0] sm:$0xff] %v1593_v17   ;;  %v784_v25 = vadd.f32 %v1920_v38, %v783_v23  ;;  %v667_v26 = vadd.f32 %v1716_v24, %v1920_v38  ;;  %v1748_v27 = vpop.f32.mrb[26].mxu1  ;;  %v658_v28 = vpop.f32.mrb[27].mxu0  ;;  %v840_v32 = vmax.f32 %v664_v18, 0.0 }
 0x119   : > { %v795_v29 = vadd.f32 %v1748_v27, %v1920_v38  ;;  %v659_v30 = vadd.f32 %v1920_v38, %v658_v28  ;;  %v786_v31 = vpop.f32.mrb[27].mxu1  ;;  %v872_v35 = vmax.f32 %v792_v21, 0.0  ;;  %v838_v36 = vmax.f32 %v656_v22, 0.0 }
 0x11a   : > { %v841_v33 = vmax.f32 %v667_v26, 0.0  ;;  %v787_v34 = vadd.f32 %v1920_v38, %v786_v31  ;;  %v870_v40 = vmax.f32 %v784_v25, 0.0 }
 0x11b   : > { %v873_v37 = vmax.f32 %v795_v29, 0.0  ;;  %v839_v39 = vmax.f32 %v659_v30, 0.0 }
 0x11c   : > { %v1528_v41 = vpack.c.bf16 %v841_v33, %v840_v32  ;;  %v871_v42 = vmax.f32 %v787_v34, 0.0 }
 0x11d   : > { %v1608_v43 = vpack.c.bf16 %v873_v37, %v872_v35  ;;  %v1523_v44 = vpack.c.bf16 %v839_v39, %v838_v36  ;;  %v1719_v45 = vpop.f32.mrb[28].mxu0 }
 0x11e   : > { %1632 = vst [vmem:[%s1935_s27 + $0x68] sm:$0xff] %v1528_v41   ;;  %v1603_v46 = vpack.c.bf16 %v871_v42, %v870_v40  ;;  %v680_v47 = vadd.f32 %v1719_v45, %v1920_v38  ;;  %v1751_v48 = vpop.f32.mrb[28].mxu1  ;;  %v671_v49 = vpop.f32.mrb[29].mxu0 }
 0x11f   : > { %1648 = vst [vmem:[%s1935_s27 + $0xe8] sm:$0xff] %v1608_v43   ;;  %1631 = vst [vmem:[%s1935_s27 + $0x60] sm:$0xff] %v1523_v44   ;;  %v808_v50 = vadd.f32 %v1751_v48, %v1920_v38  ;;  %v672_v51 = vadd.f32 %v1920_v38, %v671_v49  ;;  %v799_v52 = vpop.f32.mrb[29].mxu1  ;;  %v1720_v53 = vpop.f32.mrb[30].mxu0 }
 0x120   : > { %1647 = vst [vmem:[%s1935_s27 + $0xe0] sm:$0xff] %v1603_v46   ;;  %v800_v54 = vadd.f32 %v1920_v38, %v799_v52  ;;  %v683_v55 = vadd.f32 %v1720_v53, %v1920_v38  ;;  %v1752_v56 = vpop.f32.mrb[30].mxu1  ;;  %v674_v57 = vpop.f32.mrb[31].mxu0  ;;  %v844_v61 = vmax.f32 %v680_v47, 0.0 }
 0x121   : > { %v811_v58 = vadd.f32 %v1752_v56, %v1920_v38  ;;  %v675_v59 = vadd.f32 %v1920_v38, %v674_v57  ;;  %v802_v60 = vpop.f32.mrb[31].mxu1  ;;  %v876_v0 = vmax.f32 %v808_v50, 0.0  ;;  %v842_v1 = vmax.f32 %v672_v51, 0.0 }
 0x122   : > { %v845_v62 = vmax.f32 %v683_v55, 0.0  ;;  %v803_v63 = vadd.f32 %v1920_v38, %v802_v60  ;;  %v874_v4 = vmax.f32 %v800_v54, 0.0 }
 0x123   : > { %v877_v2 = vmax.f32 %v811_v58, 0.0  ;;  %v843_v3 = vmax.f32 %v675_v59, 0.0 }
 0x124   : > { %v1538_v5 = vpack.c.bf16 %v845_v62, %v844_v61  ;;  %v875_v6 = vmax.f32 %v803_v63, 0.0 }
 0x125   : > { %v1618_v7 = vpack.c.bf16 %v877_v2, %v876_v0  ;;  %v1533_v8 = vpack.c.bf16 %v843_v3, %v842_v1 }
 0x126   : > { %1634 = vst [vmem:[%s1935_s27 + $0x78] sm:$0xff] %v1538_v5   ;;  %v1613_v9 = vpack.c.bf16 %v875_v6, %v874_v4 }
 0x127   : > { %1650 = vst [vmem:[%s1935_s27 + $0xf8] sm:$0xff] %v1618_v7   ;;  %1633 = vst [vmem:[%s1935_s27 + $0x70] sm:$0xff] %v1533_v8  }
 0x128   : > { %1649 = vst [vmem:[%s1935_s27 + $0xf0] sm:$0xff] %v1613_v9  }
 0x129 PF: > { %s13_s12 = sadd.s32 1, %s1806_s12  }
 0x12a   : > { %p10_p4 = scmp.ge.s32.totalorder %s13_s12, 6  }
 0x12c   :  { %12 = sbr.rel (!%p10_p4) target bundleno = 1 (0x1), region = 62 }

// kernel: cnn_forward.6
= control target key start
LH: loop header
LB: loop body
LE: loop exit
PB: predicated region body
PF: predicated region fallthrough
CT: control target
= control target key end

     0   :  { %s782_s0 = inlined_call_operand.vmem [shape: bf16[32,2048], index: 0, kind: input, shape index: {}]   ;;  %s783_s1 = inlined_call_operand.vmem [shape: bf16[32,2048], index: 1, kind: input, shape index: {}]   ;;  %s784_s2 = inlined_call_operand.vmem [shape: bf16[32,2048], index: 2, kind: input, shape index: {}]   ;;  %s785_s3 = inlined_call_operand.vmem [shape: bf16[32,2048], index: 3, kind: input, shape index: {}]   ;;  %s786_s4 = inlined_call_operand.vmem [shape: bf16[32,2048], index: 4, kind: output, shape index: {}]  }
   0x1   :  { %v17_v0 = vld [vmem:[%s782_s0] sm:$0xff]  ;;  %v18_v5 = vld [vmem:[%s782_s0 + $0x8] sm:$0xff]  ;;  %v19_v11 = vld [vmem:[%s782_s0 + $0x10] sm:$0xff] }
   0x2   :  { %v49_v1 = vld [vmem:[%s783_s1] sm:$0xff]  ;;  %v50_v6 = vld [vmem:[%s783_s1 + $0x8] sm:$0xff]  ;;  %v51_v13 = vld [vmem:[%s783_s1 + $0x10] sm:$0xff] }
   0x3   :  { %v113_v2 = vld [vmem:[%s784_s2] sm:$0xff]  ;;  %v81_v3 = vmax.bf16 %v49_v1, %v17_v0  ;;  %v82_v8 = vmax.bf16 %v50_v6, %v18_v5  ;;  %v114_v9 = vld [vmem:[%s784_s2 + $0x8] sm:$0xff]  ;;  %v115_v14 = vld [vmem:[%s784_s2 + $0x10] sm:$0xff]  ;;  %v83_v17 = vmax.bf16 %v51_v13, %v19_v11 }
   0x4   :  { %v145_v4 = vld [vmem:[%s785_s3] sm:$0xff]  ;;  %v146_v10 = vld [vmem:[%s785_s3 + $0x8] sm:$0xff]  ;;  %v147_v15 = vld [vmem:[%s785_s3 + $0x10] sm:$0xff] }
   0x5   :  { %v177_v7 = vmax.bf16 %v145_v4, %v113_v2  ;;  %v178_v12 = vmax.bf16 %v146_v10, %v114_v9  ;;  %v179_v18 = vmax.bf16 %v147_v15, %v115_v14  ;;  %v20_v19 = vld [vmem:[%s782_s0 + $0x18] sm:$0xff]  ;;  %v21_v25 = vld [vmem:[%s782_s0 + $0x20] sm:$0xff]  ;;  %v22_v32 = vld [vmem:[%s782_s0 + $0x28] sm:$0xff] }
   0x6   :  { %v52_v20 = vld [vmem:[%s783_s1 + $0x18] sm:$0xff]  ;;  %v53_v26 = vld [vmem:[%s783_s1 + $0x20] sm:$0xff]  ;;  %v54_v34 = vld [vmem:[%s783_s1 + $0x28] sm:$0xff] }
   0x7   :  { %v209_v16 = vmax.bf16 %v177_v7, %v81_v3  ;;  %v116_v21 = vld [vmem:[%s784_s2 + $0x18] sm:$0xff]  ;;  %v210_v22 = vmax.bf16 %v178_v12, %v82_v8  ;;  %v84_v23 = vmax.bf16 %v52_v20, %v20_v19  ;;  %v211_v27 = vmax.bf16 %v179_v18, %v83_v17  ;;  %v117_v30 = vld [vmem:[%s784_s2 + $0x20] sm:$0xff]  ;;  %v118_v35 = vld [vmem:[%s784_s2 + $0x28] sm:$0xff] }
   0x8   :  { %v148_v24 = vld [vmem:[%s785_s3 + $0x18] sm:$0xff]  ;;  %v85_v29 = vmax.bf16 %v53_v26, %v21_v25  ;;  %v149_v31 = vld [vmem:[%s785_s3 + $0x20] sm:$0xff]  ;;  %v150_v36 = vld [vmem:[%s785_s3 + $0x28] sm:$0xff]  ;;  %v86_v38 = vmax.bf16 %v54_v34, %v22_v32 }
   0x9   :  { %241 = vst [vmem:[%s786_s4] sm:$0xff] %v209_v16  ;;  %v180_v28 = vmax.bf16 %v148_v24, %v116_v21  ;;  %242 = vst [vmem:[%s786_s4 + $0x8] sm:$0xff] %v210_v22  ;;  %v181_v33 = vmax.bf16 %v149_v31, %v117_v30  ;;  %v182_v39 = vmax.bf16 %v150_v36, %v118_v35  ;;  %v23_v40 = vld [vmem:[%s782_s0 + $0x30] sm:$0xff]  ;;  %v24_v46 = vld [vmem:[%s782_s0 + $0x38] sm:$0xff] }
   0xa   :  { %243 = vst [vmem:[%s786_s4 + $0x10] sm:$0xff] %v211_v27  ;;  %v55_v41 = vld [vmem:[%s783_s1 + $0x30] sm:$0xff]  ;;  %v56_v47 = vld [vmem:[%s783_s1 + $0x38] sm:$0xff]  ;;  %v25_v53 = vld [vmem:[%s782_s0 + $0x40] sm:$0xff] }
   0xb   :  { %v212_v37 = vmax.bf16 %v180_v28, %v84_v23  ;;  %v119_v42 = vld [vmem:[%s784_s2 + $0x30] sm:$0xff]  ;;  %v213_v43 = vmax.bf16 %v181_v33, %v85_v29  ;;  %v87_v44 = vmax.bf16 %v55_v41, %v23_v40  ;;  %v214_v48 = vmax.bf16 %v182_v39, %v86_v38  ;;  %v120_v51 = vld [vmem:[%s784_s2 + $0x38] sm:$0xff]  ;;  %v57_v55 = vld [vmem:[%s783_s1 + $0x40] sm:$0xff] }
   0xc   :  { %v151_v45 = vld [vmem:[%s785_s3 + $0x30] sm:$0xff]  ;;  %v88_v50 = vmax.bf16 %v56_v47, %v24_v46  ;;  %v152_v52 = vld [vmem:[%s785_s3 + $0x38] sm:$0xff]  ;;  %v121_v56 = vld [vmem:[%s784_s2 + $0x40] sm:$0xff]  ;;  %v89_v59 = vmax.bf16 %v57_v55, %v25_v53 }
   0xd   :  { %244 = vst [vmem:[%s786_s4 + $0x18] sm:$0xff] %v212_v37  ;;  %v183_v49 = vmax.bf16 %v151_v45, %v119_v42  ;;  %245 = vst [vmem:[%s786_s4 + $0x20] sm:$0xff] %v213_v43  ;;  %v184_v54 = vmax.bf16 %v152_v52, %v120_v51  ;;  %v153_v57 = vld [vmem:[%s785_s3 + $0x40] sm:$0xff]  ;;  %v26_v61 = vld [vmem:[%s782_s0 + $0x48] sm:$0xff] }
   0xe   :  { %246 = vst [vmem:[%s786_s4 + $0x28] sm:$0xff] %v214_v48  ;;  %v185_v60 = vmax.bf16 %v153_v57, %v121_v56  ;;  %v58_v62 = vld [vmem:[%s783_s1 + $0x48] sm:$0xff]  ;;  %v27_v3 = vld [vmem:[%s782_s0 + $0x50] sm:$0xff]  ;;  %v28_v10 = vld [vmem:[%s782_s0 + $0x58] sm:$0xff] }
   0xf   :  { %v215_v58 = vmax.bf16 %v183_v49, %v87_v44  ;;  %v122_v63 = vld [vmem:[%s784_s2 + $0x48] sm:$0xff]  ;;  %v216_v0 = vmax.bf16 %v184_v54, %v88_v50  ;;  %v90_v1 = vmax.bf16 %v58_v62, %v26_v61  ;;  %v59_v4 = vld [vmem:[%s783_s1 + $0x50] sm:$0xff]  ;;  %v60_v12 = vld [vmem:[%s783_s1 + $0x58] sm:$0xff] }
  0x10   :  { %v154_v2 = vld [vmem:[%s785_s3 + $0x48] sm:$0xff]  ;;  %v217_v5 = vmax.bf16 %v185_v60, %v89_v59  ;;  %v91_v7 = vmax.bf16 %v59_v4, %v27_v3  ;;  %v123_v8 = vld [vmem:[%s784_s2 + $0x50] sm:$0xff]  ;;  %v124_v13 = vld [vmem:[%s784_s2 + $0x58] sm:$0xff]  ;;  %v92_v16 = vmax.bf16 %v60_v12, %v28_v10 }
  0x11   :  { %247 = vst [vmem:[%s786_s4 + $0x30] sm:$0xff] %v215_v58  ;;  %v186_v6 = vmax.bf16 %v154_v2, %v122_v63  ;;  %v155_v9 = vld [vmem:[%s785_s3 + $0x50] sm:$0xff]  ;;  %248 = vst [vmem:[%s786_s4 + $0x38] sm:$0xff] %v216_v0  ;;  %v156_v14 = vld [vmem:[%s785_s3 + $0x58] sm:$0xff] }
  0x12   :  { %v187_v11 = vmax.bf16 %v155_v9, %v123_v8  ;;  %249 = vst [vmem:[%s786_s4 + $0x40] sm:$0xff] %v217_v5  ;;  %v188_v17 = vmax.bf16 %v156_v14, %v124_v13  ;;  %v29_v18 = vld [vmem:[%s782_s0 + $0x60] sm:$0xff]  ;;  %v30_v24 = vld [vmem:[%s782_s0 + $0x68] sm:$0xff]  ;;  %v31_v31 = vld [vmem:[%s782_s0 + $0x70] sm:$0xff] }
  0x13   :  { %v218_v15 = vmax.bf16 %v186_v6, %v90_v1  ;;  %v61_v19 = vld [vmem:[%s783_s1 + $0x60] sm:$0xff]  ;;  %v62_v25 = vld [vmem:[%s783_s1 + $0x68] sm:$0xff]  ;;  %v63_v33 = vld [vmem:[%s783_s1 + $0x70] sm:$0xff] }
  0x14   :  { %v125_v20 = vld [vmem:[%s784_s2 + $0x60] sm:$0xff]  ;;  %v219_v21 = vmax.bf16 %v187_v11, %v91_v7  ;;  %v93_v22 = vmax.bf16 %v61_v19, %v29_v18  ;;  %v220_v26 = vmax.bf16 %v188_v17, %v92_v16  ;;  %v94_v28 = vmax.bf16 %v62_v25, %v30_v24  ;;  %v126_v29 = vld [vmem:[%s784_s2 + $0x68] sm:$0xff]  ;;  %v127_v34 = vld [vmem:[%s784_s2 + $0x70] sm:$0xff] }
  0x15   :  { %v157_v23 = vld [vmem:[%s785_s3 + $0x60] sm:$0xff]  ;;  %250 = vst [vmem:[%s786_s4 + $0x48] sm:$0xff] %v218_v15  ;;  %v158_v30 = vld [vmem:[%s785_s3 + $0x68] sm:$0xff]  ;;  %v159_v35 = vld [vmem:[%s785_s3 + $0x70] sm:$0xff]  ;;  %v95_v37 = vmax.bf16 %v63_v33, %v31_v31 }
  0x16   :  { %v189_v27 = vmax.bf16 %v157_v23, %v125_v20  ;;  %251 = vst [vmem:[%s786_s4 + $0x50] sm:$0xff] %v219_v21  ;;  %v190_v32 = vmax.bf16 %v158_v30, %v126_v29  ;;  %252 = vst [vmem:[%s786_s4 + $0x58] sm:$0xff] %v220_v26  ;;  %v191_v38 = vmax.bf16 %v159_v35, %v127_v34  ;;  %v32_v39 = vld [vmem:[%s782_s0 + $0x78] sm:$0xff]  ;;  %v33_v45 = vld [vmem:[%s782_s0 + $0x80] sm:$0xff] }
  0x17   :  { %v64_v40 = vld [vmem:[%s783_s1 + $0x78] sm:$0xff]  ;;  %v65_v46 = vld [vmem:[%s783_s1 + $0x80] sm:$0xff]  ;;  %v34_v52 = vld [vmem:[%s782_s0 + $0x88] sm:$0xff] }
  0x18   :  { %v221_v36 = vmax.bf16 %v189_v27, %v93_v22  ;;  %v128_v41 = vld [vmem:[%s784_s2 + $0x78] sm:$0xff]  ;;  %v222_v42 = vmax.bf16 %v190_v32, %v94_v28  ;;  %v96_v43 = vmax.bf16 %v64_v40, %v32_v39  ;;  %v223_v47 = vmax.bf16 %v191_v38, %v95_v37  ;;  %v129_v50 = vld [vmem:[%s784_s2 + $0x80] sm:$0xff]  ;;  %v66_v54 = vld [vmem:[%s783_s1 + $0x88] sm:$0xff] }
  0x19   :  { %v160_v44 = vld [vmem:[%s785_s3 + $0x78] sm:$0xff]  ;;  %v97_v49 = vmax.bf16 %v65_v46, %v33_v45  ;;  %v161_v51 = vld [vmem:[%s785_s3 + $0x80] sm:$0xff]  ;;  %v130_v55 = vld [vmem:[%s784_s2 + $0x88] sm:$0xff]  ;;  %v98_v58 = vmax.bf16 %v66_v54, %v34_v52 }
  0x1a   :  { %253 = vst [vmem:[%s786_s4 + $0x60] sm:$0xff] %v221_v36  ;;  %v192_v48 = vmax.bf16 %v160_v44, %v128_v41  ;;  %254 = vst [vmem:[%s786_s4 + $0x68] sm:$0xff] %v222_v42  ;;  %v193_v53 = vmax.bf16 %v161_v51, %v129_v50  ;;  %v162_v56 = vld [vmem:[%s785_s3 + $0x88] sm:$0xff]  ;;  %v35_v60 = vld [vmem:[%s782_s0 + $0x90] sm:$0xff] }
  0x1b   :  { %255 = vst [vmem:[%s786_s4 + $0x70] sm:$0xff] %v223_v47  ;;  %v194_v59 = vmax.bf16 %v162_v56, %v130_v55  ;;  %v67_v61 = vld [vmem:[%s783_s1 + $0x90] sm:$0xff]  ;;  %v36_v2 = vld [vmem:[%s782_s0 + $0x98] sm:$0xff]  ;;  %v37_v9 = vld [vmem:[%s782_s0 + $0xa0] sm:$0xff] }
  0x1c   :  { %v224_v57 = vmax.bf16 %v192_v48, %v96_v43  ;;  %v131_v62 = vld [vmem:[%s784_s2 + $0x90] sm:$0xff]  ;;  %v225_v63 = vmax.bf16 %v193_v53, %v97_v49  ;;  %v99_v0 = vmax.bf16 %v67_v61, %v35_v60  ;;  %v68_v3 = vld [vmem:[%s783_s1 + $0x98] sm:$0xff]  ;;  %v69_v11 = vld [vmem:[%s783_s1 + $0xa0] sm:$0xff] }
  0x1d   :  { %v163_v1 = vld [vmem:[%s785_s3 + $0x90] sm:$0xff]  ;;  %v226_v4 = vmax.bf16 %v194_v59, %v98_v58  ;;  %v100_v6 = vmax.bf16 %v68_v3, %v36_v2  ;;  %v132_v7 = vld [vmem:[%s784_s2 + $0x98] sm:$0xff]  ;;  %v133_v12 = vld [vmem:[%s784_s2 + $0xa0] sm:$0xff]  ;;  %v101_v15 = vmax.bf16 %v69_v11, %v37_v9 }
  0x1e   :  { %256 = vst [vmem:[%s786_s4 + $0x78] sm:$0xff] %v224_v57  ;;  %v195_v5 = vmax.bf16 %v163_v1, %v131_v62  ;;  %v164_v8 = vld [vmem:[%s785_s3 + $0x98] sm:$0xff]  ;;  %257 = vst [vmem:[%s786_s4 + $0x80] sm:$0xff] %v225_v63  ;;  %v165_v13 = vld [vmem:[%s785_s3 + $0xa0] sm:$0xff] }
  0x1f   :  { %v196_v10 = vmax.bf16 %v164_v8, %v132_v7  ;;  %258 = vst [vmem:[%s786_s4 + $0x88] sm:$0xff] %v226_v4  ;;  %v197_v16 = vmax.bf16 %v165_v13, %v133_v12  ;;  %v38_v17 = vld [vmem:[%s782_s0 + $0xa8] sm:$0xff]  ;;  %v39_v23 = vld [vmem:[%s782_s0 + $0xb0] sm:$0xff]  ;;  %v40_v30 = vld [vmem:[%s782_s0 + $0xb8] sm:$0xff] }
  0x20   :  { %v227_v14 = vmax.bf16 %v195_v5, %v99_v0  ;;  %v70_v18 = vld [vmem:[%s783_s1 + $0xa8] sm:$0xff]  ;;  %v71_v24 = vld [vmem:[%s783_s1 + $0xb0] sm:$0xff]  ;;  %v72_v32 = vld [vmem:[%s783_s1 + $0xb8] sm:$0xff] }
  0x21   :  { %v134_v19 = vld [vmem:[%s784_s2 + $0xa8] sm:$0xff]  ;;  %v228_v20 = vmax.bf16 %v196_v10, %v100_v6  ;;  %v102_v21 = vmax.bf16 %v70_v18, %v38_v17  ;;  %v229_v25 = vmax.bf16 %v197_v16, %v101_v15  ;;  %v103_v27 = vmax.bf16 %v71_v24, %v39_v23  ;;  %v135_v28 = vld [vmem:[%s784_s2 + $0xb0] sm:$0xff]  ;;  %v136_v33 = vld [vmem:[%s784_s2 + $0xb8] sm:$0xff] }
  0x22   :  { %v166_v22 = vld [vmem:[%s785_s3 + $0xa8] sm:$0xff]  ;;  %259 = vst [vmem:[%s786_s4 + $0x90] sm:$0xff] %v227_v14  ;;  %v167_v29 = vld [vmem:[%s785_s3 + $0xb0] sm:$0xff]  ;;  %v168_v34 = vld [vmem:[%s785_s3 + $0xb8] sm:$0xff]  ;;  %v104_v36 = vmax.bf16 %v72_v32, %v40_v30 }
  0x23   :  { %v198_v26 = vmax.bf16 %v166_v22, %v134_v19  ;;  %260 = vst [vmem:[%s786_s4 + $0x98] sm:$0xff] %v228_v20  ;;  %v199_v31 = vmax.bf16 %v167_v29, %v135_v28  ;;  %261 = vst [vmem:[%s786_s4 + $0xa0] sm:$0xff] %v229_v25  ;;  %v200_v37 = vmax.bf16 %v168_v34, %v136_v33  ;;  %v41_v38 = vld [vmem:[%s782_s0 + $0xc0] sm:$0xff]  ;;  %v42_v44 = vld [vmem:[%s782_s0 + $0xc8] sm:$0xff] }
  0x24   :  { %v73_v39 = vld [vmem:[%s783_s1 + $0xc0] sm:$0xff]  ;;  %v74_v45 = vld [vmem:[%s783_s1 + $0xc8] sm:$0xff]  ;;  %v43_v51 = vld [vmem:[%s782_s0 + $0xd0] sm:$0xff] }
  0x25   :  { %v230_v35 = vmax.bf16 %v198_v26, %v102_v21  ;;  %v137_v40 = vld [vmem:[%s784_s2 + $0xc0] sm:$0xff]  ;;  %v231_v41 = vmax.bf16 %v199_v31, %v103_v27  ;;  %v105_v42 = vmax.bf16 %v73_v39, %v41_v38  ;;  %v232_v46 = vmax.bf16 %v200_v37, %v104_v36  ;;  %v138_v49 = vld [vmem:[%s784_s2 + $0xc8] sm:$0xff]  ;;  %v75_v53 = vld [vmem:[%s783_s1 + $0xd0] sm:$0xff] }
  0x26   :  { %v169_v43 = vld [vmem:[%s785_s3 + $0xc0] sm:$0xff]  ;;  %v106_v48 = vmax.bf16 %v74_v45, %v42_v44  ;;  %v170_v50 = vld [vmem:[%s785_s3 + $0xc8] sm:$0xff]  ;;  %v139_v54 = vld [vmem:[%s784_s2 + $0xd0] sm:$0xff]  ;;  %v107_v57 = vmax.bf16 %v75_v53, %v43_v51 }
  0x27   :  { %262 = vst [vmem:[%s786_s4 + $0xa8] sm:$0xff] %v230_v35  ;;  %v201_v47 = vmax.bf16 %v169_v43, %v137_v40  ;;  %263 = vst [vmem:[%s786_s4 + $0xb0] sm:$0xff] %v231_v41  ;;  %v202_v52 = vmax.bf16 %v170_v50, %v138_v49  ;;  %v171_v55 = vld [vmem:[%s785_s3 + $0xd0] sm:$0xff]  ;;  %v44_v59 = vld [vmem:[%s782_s0 + $0xd8] sm:$0xff] }
  0x28   :  { %264 = vst [vmem:[%s786_s4 + $0xb8] sm:$0xff] %v232_v46  ;;  %v203_v58 = vmax.bf16 %v171_v55, %v139_v54  ;;  %v76_v60 = vld [vmem:[%s783_s1 + $0xd8] sm:$0xff]  ;;  %v45_v1 = vld [vmem:[%s782_s0 + $0xe0] sm:$0xff]  ;;  %v46_v8 = vld [vmem:[%s782_s0 + $0xe8] sm:$0xff] }
  0x29   :  { %v233_v56 = vmax.bf16 %v201_v47, %v105_v42  ;;  %v140_v61 = vld [vmem:[%s784_s2 + $0xd8] sm:$0xff]  ;;  %v234_v62 = vmax.bf16 %v202_v52, %v106_v48  ;;  %v108_v63 = vmax.bf16 %v76_v60, %v44_v59  ;;  %v77_v2 = vld [vmem:[%s783_s1 + $0xe0] sm:$0xff]  ;;  %v78_v10 = vld [vmem:[%s783_s1 + $0xe8] sm:$0xff] }
  0x2a   :  { %v172_v0 = vld [vmem:[%s785_s3 + $0xd8] sm:$0xff]  ;;  %v235_v3 = vmax.bf16 %v203_v58, %v107_v57  ;;  %v109_v5 = vmax.bf16 %v77_v2, %v45_v1  ;;  %v141_v6 = vld [vmem:[%s784_s2 + $0xe0] sm:$0xff]  ;;  %v142_v11 = vld [vmem:[%s784_s2 + $0xe8] sm:$0xff]  ;;  %v110_v14 = vmax.bf16 %v78_v10, %v46_v8 }
  0x2b   :  { %265 = vst [vmem:[%s786_s4 + $0xc0] sm:$0xff] %v233_v56  ;;  %v204_v4 = vmax.bf16 %v172_v0, %v140_v61  ;;  %v173_v7 = vld [vmem:[%s785_s3 + $0xe0] sm:$0xff]  ;;  %266 = vst [vmem:[%s786_s4 + $0xc8] sm:$0xff] %v234_v62  ;;  %v174_v12 = vld [vmem:[%s785_s3 + $0xe8] sm:$0xff] }
  0x2c   :  { %v205_v9 = vmax.bf16 %v173_v7, %v141_v6  ;;  %267 = vst [vmem:[%s786_s4 + $0xd0] sm:$0xff] %v235_v3  ;;  %v206_v15 = vmax.bf16 %v174_v12, %v142_v11  ;;  %v47_v16 = vld [vmem:[%s782_s0 + $0xf0] sm:$0xff]  ;;  %v48_v22 = vld [vmem:[%s782_s0 + $0xf8] sm:$0xff] }
  0x2d   :  { %v236_v13 = vmax.bf16 %v204_v4, %v108_v63  ;;  %v79_v17 = vld [vmem:[%s783_s1 + $0xf0] sm:$0xff]  ;;  %v80_v23 = vld [vmem:[%s783_s1 + $0xf8] sm:$0xff] }
  0x2e   :  { %v143_v18 = vld [vmem:[%s784_s2 + $0xf0] sm:$0xff]  ;;  %v237_v19 = vmax.bf16 %v205_v9, %v109_v5  ;;  %v111_v20 = vmax.bf16 %v79_v17, %v47_v16  ;;  %v238_v24 = vmax.bf16 %v206_v15, %v110_v14  ;;  %v112_v26 = vmax.bf16 %v80_v23, %v48_v22  ;;  %v144_v27 = vld [vmem:[%s784_s2 + $0xf8] sm:$0xff] }
  0x2f   :  { %v175_v21 = vld [vmem:[%s785_s3 + $0xf0] sm:$0xff]  ;;  %268 = vst [vmem:[%s786_s4 + $0xd8] sm:$0xff] %v236_v13  ;;  %v176_v28 = vld [vmem:[%s785_s3 + $0xf8] sm:$0xff] }
  0x30   :  { %v207_v25 = vmax.bf16 %v175_v21, %v143_v18  ;;  %269 = vst [vmem:[%s786_s4 + $0xe0] sm:$0xff] %v237_v19  ;;  %v208_v29 = vmax.bf16 %v176_v28, %v144_v27  ;;  %270 = vst [vmem:[%s786_s4 + $0xe8] sm:$0xff] %v238_v24 }
  0x32   :  { %v239_v30 = vmax.bf16 %v207_v25, %v111_v20  ;;  %v240_v31 = vmax.bf16 %v208_v29, %v112_v26 }
  0x34   :  { %271 = vst [vmem:[%s786_s4 + $0xf0] sm:$0xff] %v239_v30  ;;  %272 = vst [vmem:[%s786_s4 + $0xf8] sm:$0xff] %v240_v31 }

// kernel: cnn_forward.8
= control target key start
LH: loop header
LB: loop body
LE: loop exit
PB: predicated region body
PF: predicated region fallthrough
CT: control target
= control target key end

     0   :  { %s230_s0 = inlined_call_operand.vmem [shape: bf16[16,1024], index: 0, kind: input, shape index: {}]   ;;  %s231_s1 = inlined_call_operand.vmem [shape: bf16[16,1024], index: 1, kind: input, shape index: {}]   ;;  %s232_s2 = inlined_call_operand.vmem [shape: bf16[16,1024], index: 2, kind: input, shape index: {}]   ;;  %s233_s3 = inlined_call_operand.vmem [shape: bf16[16,1024], index: 3, kind: input, shape index: {}]   ;;  %s234_s4 = inlined_call_operand.vmem [shape: bf16[16,1024], index: 4, kind: output, shape index: {}]  }
   0x1   :  { %v17_v0 = vld [vmem:[%s230_s0] sm:$0xff]  ;;  %v18_v5 = vld [vmem:[%s230_s0 + $0x8] sm:$0xff]  ;;  %v19_v11 = vld [vmem:[%s230_s0 + $0x10] sm:$0xff] }
   0x2   :  { %v25_v1 = vld [vmem:[%s231_s1] sm:$0xff]  ;;  %v26_v6 = vld [vmem:[%s231_s1 + $0x8] sm:$0xff]  ;;  %v27_v13 = vld [vmem:[%s231_s1 + $0x10] sm:$0xff] }
   0x3   :  { %v41_v2 = vld [vmem:[%s232_s2] sm:$0xff]  ;;  %v33_v3 = vmax.bf16 %v25_v1, %v17_v0  ;;  %v34_v8 = vmax.bf16 %v26_v6, %v18_v5  ;;  %v42_v9 = vld [vmem:[%s232_s2 + $0x8] sm:$0xff]  ;;  %v43_v14 = vld [vmem:[%s232_s2 + $0x10] sm:$0xff]  ;;  %v35_v17 = vmax.bf16 %v27_v13, %v19_v11 }
   0x4   :  { %v49_v4 = vld [vmem:[%s233_s3] sm:$0xff]  ;;  %v50_v10 = vld [vmem:[%s233_s3 + $0x8] sm:$0xff]  ;;  %v51_v15 = vld [vmem:[%s233_s3 + $0x10] sm:$0xff] }
   0x5   :  { %v57_v7 = vmax.bf16 %v49_v4, %v41_v2  ;;  %v58_v12 = vmax.bf16 %v50_v10, %v42_v9  ;;  %v59_v18 = vmax.bf16 %v51_v15, %v43_v14  ;;  %v20_v19 = vld [vmem:[%s230_s0 + $0x18] sm:$0xff]  ;;  %v21_v25 = vld [vmem:[%s230_s0 + $0x20] sm:$0xff]  ;;  %v22_v32 = vld [vmem:[%s230_s0 + $0x28] sm:$0xff] }
   0x6   :  { %v28_v20 = vld [vmem:[%s231_s1 + $0x18] sm:$0xff]  ;;  %v29_v26 = vld [vmem:[%s231_s1 + $0x20] sm:$0xff]  ;;  %v30_v34 = vld [vmem:[%s231_s1 + $0x28] sm:$0xff] }
   0x7   :  { %v65_v16 = vmax.bf16 %v57_v7, %v33_v3  ;;  %v44_v21 = vld [vmem:[%s232_s2 + $0x18] sm:$0xff]  ;;  %v66_v22 = vmax.bf16 %v58_v12, %v34_v8  ;;  %v36_v23 = vmax.bf16 %v28_v20, %v20_v19  ;;  %v67_v27 = vmax.bf16 %v59_v18, %v35_v17  ;;  %v45_v30 = vld [vmem:[%s232_s2 + $0x20] sm:$0xff]  ;;  %v46_v35 = vld [vmem:[%s232_s2 + $0x28] sm:$0xff] }
   0x8   :  { %v52_v24 = vld [vmem:[%s233_s3 + $0x18] sm:$0xff]  ;;  %v37_v29 = vmax.bf16 %v29_v26, %v21_v25  ;;  %v53_v31 = vld [vmem:[%s233_s3 + $0x20] sm:$0xff]  ;;  %v54_v36 = vld [vmem:[%s233_s3 + $0x28] sm:$0xff]  ;;  %v38_v38 = vmax.bf16 %v30_v34, %v22_v32 }
   0x9   :  { %73 = vst [vmem:[%s234_s4] sm:$0xff] %v65_v16  ;;  %v60_v28 = vmax.bf16 %v52_v24, %v44_v21  ;;  %74 = vst [vmem:[%s234_s4 + $0x8] sm:$0xff] %v66_v22  ;;  %v61_v33 = vmax.bf16 %v53_v31, %v45_v30  ;;  %v62_v39 = vmax.bf16 %v54_v36, %v46_v35  ;;  %v23_v40 = vld [vmem:[%s230_s0 + $0x30] sm:$0xff]  ;;  %v24_v46 = vld [vmem:[%s230_s0 + $0x38] sm:$0xff] }
   0xa   :  { %75 = vst [vmem:[%s234_s4 + $0x10] sm:$0xff] %v67_v27  ;;  %v31_v41 = vld [vmem:[%s231_s1 + $0x30] sm:$0xff]  ;;  %v32_v47 = vld [vmem:[%s231_s1 + $0x38] sm:$0xff] }
   0xb   :  { %v68_v37 = vmax.bf16 %v60_v28, %v36_v23  ;;  %v47_v42 = vld [vmem:[%s232_s2 + $0x30] sm:$0xff]  ;;  %v69_v43 = vmax.bf16 %v61_v33, %v37_v29  ;;  %v39_v44 = vmax.bf16 %v31_v41, %v23_v40  ;;  %v70_v48 = vmax.bf16 %v62_v39, %v38_v38  ;;  %v48_v51 = vld [vmem:[%s232_s2 + $0x38] sm:$0xff] }
   0xc   :  { %v55_v45 = vld [vmem:[%s233_s3 + $0x30] sm:$0xff]  ;;  %v40_v50 = vmax.bf16 %v32_v47, %v24_v46  ;;  %v56_v52 = vld [vmem:[%s233_s3 + $0x38] sm:$0xff] }
   0xd   :  { %76 = vst [vmem:[%s234_s4 + $0x18] sm:$0xff] %v68_v37  ;;  %v63_v49 = vmax.bf16 %v55_v45, %v47_v42  ;;  %77 = vst [vmem:[%s234_s4 + $0x20] sm:$0xff] %v69_v43  ;;  %v64_v53 = vmax.bf16 %v56_v52, %v48_v51 }
   0xe   :  { %78 = vst [vmem:[%s234_s4 + $0x28] sm:$0xff] %v70_v48 }
   0xf   :  { %v71_v54 = vmax.bf16 %v63_v49, %v39_v44  ;;  %v72_v55 = vmax.bf16 %v64_v53, %v40_v50 }
  0x11   :  { %79 = vst [vmem:[%s234_s4 + $0x30] sm:$0xff] %v71_v54  ;;  %80 = vst [vmem:[%s234_s4 + $0x38] sm:$0xff] %v72_v55 }

// kernel: cnn_forward.7
= control target key start
LH: loop header
LB: loop body
LE: loop exit
PB: predicated region body
PF: predicated region fallthrough
CT: control target
= control target key end

     0   :  { %s3950_s12 = smov 0   ;;  %s4730_s0 = inlined_call_operand.vmem [shape: bf16[512,1152], index: 0, kind: input, shape index: {}]   ;;  %s4731_s1 = inlined_call_operand.vmem [shape: bf16[1152,128], index: 1, kind: input, shape index: {}]   ;;  %s4732_s2 = inlined_call_operand.vmem [shape: f32[1,128], index: 2, kind: input, shape index: {}]   ;;  %s4733_s3 = inlined_call_operand.vmem [shape: bf16[512,128], index: 3, kind: output, shape index: {}]  }
   0x1 LB: > { %s2710_s13 = sadd.s32 4294967295, %s3928_s12   ;;  %p2714_p0 = scmp.ge.s32.totalorder %s3928_s12, 1  ;;  %s3928_s12 = sphi %s3950_s12, %s13_s12  }
   0x2   : > { %p139_p1 = scmp.lt.s32.totalorder %s3928_s12, 3 }
   0x4   : > { %p140_p2 = pnand %p2714_p0, %p139_p1 }
   0x5   : > { %v3642_v0 = vld [vmem:[%s4731_s1 + $0x40] sm:$0xff] (!%p140_p2)   ;;  %s2715_s16 = sshll.u32 (!%p140_p2), %s2710_s13, 5  ;;  %v3644_v2 = vld [vmem:[%s4731_s1 + $0x48] sm:$0xff] (!%p140_p2)   ;;  %v3646_v4 = vld [vmem:[%s4731_s1 + $0x50] sm:$0xff] (!%p140_p2)  }
   0x6   : > { %143 = sbr.rel (%p140_p2) target bundleno = 544 (0x220), region = 32  ;;  %v3643_v1 = vld [vmem:[%s4731_s1] sm:$0xff] (!%p140_p2)   ;;  %3097 = vmatprep.subr.bf16.mxu0 (!%p140_p2), %v3642_v0  ;;  %3617 = vmatprep.subr.bf16.mxu1 (!%p140_p2), %v3642_v0  ;;  %p165_p3 = scmp.lt.s32.totalorder (!%p140_p2), %s2715_s16, 63  ;;  %v3645_v3 = vld [vmem:[%s4731_s1 + $0x8] sm:$0xff] (!%p140_p2)   ;;  %v3647_v5 = vld [vmem:[%s4731_s1 + $0x10] sm:$0xff] (!%p140_p2)  }
   0x7   : > { %3098 = vmatpush3.bf16.msra.mxu0 (!%p140_p2), %v3643_v1  ;;  %3625 = vmatpush3.bf16.msra.mxu1 (!%p140_p2), %v3643_v1  ;;  %v3648_v6 = vld [vmem:[%s4731_s1 + $0x58] sm:$0xff] (!%p140_p2)   ;;  %v3650_v8 = vld [vmem:[%s4731_s1 + $0x60] sm:$0xff] (!%p140_p2)   ;;  %v3652_v10 = vld [vmem:[%s4731_s1 + $0x68] sm:$0xff] (!%p140_p2)  }
   0x8   : > { %3099 = vmatprep.subr.bf16.mxu0 (!%p140_p2), %v3644_v2  ;;  %3618 = vmatprep.subr.bf16.mxu1 (!%p140_p2), %v3644_v2  ;;  %v3649_v7 = vld [vmem:[%s4731_s1 + $0x18] sm:$0xff] (!%p140_p2)   ;;  %v3651_v9 = vld [vmem:[%s4731_s1 + $0x20] sm:$0xff] (!%p140_p2)   ;;  %v3653_v13 = vld [vmem:[%s4731_s1 + $0x28] sm:$0xff] (!%p140_p2)  }
   0x9   : > { %v3654_v14 = vld [vmem:[%s4731_s1 + $0x70] sm:$0xff] (!%p140_p2)   ;;  %v3656_v16 = vld [vmem:[%s4731_s1 + $0x78] sm:$0xff] (!%p140_p2)   ;;  %v3664_v18 = vld [vmem:[%s4731_s1 + $0xc0] sm:$0xff] (!%p140_p2)  }
   0xa   : > { %v3655_v15 = vld [vmem:[%s4731_s1 + $0x30] sm:$0xff] (!%p140_p2)   ;;  %v3657_v17 = vld [vmem:[%s4731_s1 + $0x38] sm:$0xff] (!%p140_p2)   ;;  %v3667_v21 = vld [vmem:[%s4731_s1 + $0x140] sm:$0xff] (!%p140_p2)  }
   0xb   : > { %3100 = vmatpush3.bf16.msra.mxu0 (!%p140_p2), %v3645_v3  ;;  %3626 = vmatpush3.bf16.msra.mxu1 (!%p140_p2), %v3645_v3  ;;  %v3665_v22 = vld [vmem:[%s4731_s1 + $0x80] sm:$0xff] (!%p140_p2)   ;;  %v3666_v23 = vld [vmem:[%s4731_s1 + $0xc8] sm:$0xff] (!%p140_p2)   ;;  %v3676_v31 = vld [vmem:[%s4731_s1 + $0xd0] sm:$0xff] (!%p140_p2)  }
   0xc   : > { %3101 = vmatprep.subr.bf16.mxu0 (!%p140_p2), %v3646_v4  ;;  %3619 = vmatprep.subr.bf16.mxu1 (!%p140_p2), %v3646_v4  ;;  %v3669_v24 = vld [vmem:[%s4731_s1 + $0x100] sm:$0xff] (!%p140_p2)   ;;  %v3668_v27 = vld [vmem:[%s4731_s1 + $0x88] sm:$0xff] (!%p140_p2)   ;;  %v3677_v32 = vld [vmem:[%s4731_s1 + $0x90] sm:$0xff] (!%p140_p2)  }
   0xd   : > { %s4735_s16 = smov (!%p165_p3, %s2715_s16), 63  ;;  %v3687_v28 = vld [vmem:[%s4731_s1 + $0x148] sm:$0xff]   ;;  %v3678_v34 = vld [vmem:[%s4731_s1 + $0xd8] sm:$0xff]   ;;  %v3686_v40 = vld [vmem:[%s4731_s1 + $0xe0] sm:$0xff]  }
   0xe   : > { %s3633_s29 = smul.u32 36, %s4735_s16  ;;  %v3689_v33 = vld [vmem:[%s4731_s1 + $0x108] sm:$0xff]   ;;  %v3679_v37 = vld [vmem:[%s4731_s1 + $0x98] sm:$0xff]   ;;  %v3688_v41 = vld [vmem:[%s4731_s1 + $0xa0] sm:$0xff]  }
   0xf   : > { %3102 = vmatpush3.bf16.msra.mxu0 %v3647_v5  ;;  %3627 = vmatpush3.bf16.msra.mxu1 %v3647_v5  ;;  %v3690_v42 = vld [vmem:[%s4731_s1 + $0xe8] sm:$0xff]   ;;  %v3701_v43 = vld [vmem:[%s4731_s1 + $0x150] sm:$0xff]   ;;  %v3700_v52 = vld [vmem:[%s4731_s1 + $0xf8] sm:$0xff]  }
  0x10   : > { %3103 = vmatprep.subr.bf16.mxu0 %v3648_v6  ;;  %3620 = vmatprep.subr.bf16.mxu1 %v3648_v6  ;;  %s3991_s9 = scalar_lea.vmem %s4730_s0, %s3633_s29  ;;  %v3703_v46 = vld [vmem:[%s4731_s1 + $0x110] sm:$0xff]   ;;  %v3691_v47 = vld [vmem:[%s4731_s1 + $0xa8] sm:$0xff]   ;;  %v3718_v55 = vld [vmem:[%s4731_s1 + $0x158] sm:$0xff]  }
  0x11   : > { %v3660_v11 = vld [vmem:[%s3991_s9 + $0x4] ss:$36 sps:$4 sm:$0xff]   ;;  %v3670_v25 = vld [vmem:[%s3991_s9 + $0x4c] ss:$36 sps:$4 sm:$0xff]   ;;  %v3680_v35 = vld [vmem:[%s3991_s9 + $0x94] ss:$36 sps:$4 sm:$0xff]  }
  0x12   : > { %v3663_v12 = vld [vmem:[%s3991_s9 + $0x364] ss:$36 sps:$4 sm:$0xff]   ;;  %1689 = vmatprep.mubr.bf16.mxu0 %v3660_v11  ;;  %v3672_v26 = vld [vmem:[%s3991_s9 + $0x3ac] ss:$36 sps:$4 sm:$0xff]   ;;  %v3682_v36 = vld [vmem:[%s3991_s9 + $0x3f4] ss:$36 sps:$4 sm:$0xff]  }
  0x13   : > { %3104 = vmatpush3.bf16.msra.mxu0 %v3649_v7  ;;  %3628 = vmatpush3.bf16.msra.mxu1 %v3649_v7  ;;  %v3658_v19 = vld [vmem:[%s3991_s9] ss:$36 sps:$4 sm:$0xff]   ;;  %v3674_v29 = vld [vmem:[%s3991_s9 + $0x48] ss:$36 sps:$4 sm:$0xff]   ;;  %v3684_v38 = vld [vmem:[%s3991_s9 + $0x90] ss:$36 sps:$4 sm:$0xff]  }
  0x14   : > { %3105 = vmatprep.subr.bf16.mxu0 %v3650_v8  ;;  %3621 = vmatprep.subr.bf16.mxu1 %v3650_v8  ;;  %v3661_v20 = vld [vmem:[%s3991_s9 + $0x360] ss:$36 sps:$4 sm:$0xff]   ;;  %v3675_v30 = vld [vmem:[%s3991_s9 + $0x3a8] ss:$36 sps:$4 sm:$0xff]   ;;  %v3685_v39 = vld [vmem:[%s3991_s9 + $0x3f0] ss:$36 sps:$4 sm:$0xff]  }
  0x15   : > { %1785 = vmatprep.mubr.bf16.mxu1 %v3663_v12  ;;  %v3692_v44 = vld [vmem:[%s3991_s9 + $0xdc] ss:$36 sps:$4 sm:$0xff]   ;;  %v3698_v48 = vld [vmem:[%s4731_s1 + $0xf0] sm:$0xff]   ;;  %v3704_v53 = vld [vmem:[%s3991_s9 + $0x124] ss:$36 sps:$4 sm:$0xff]  }
  0x16   : > { %v3694_v45 = vld [vmem:[%s3991_s9 + $0x43c] ss:$36 sps:$4 sm:$0xff]   ;;  %v3699_v51 = vld [vmem:[%s4731_s1 + $0xb0] sm:$0xff]   ;;  %v3706_v58 = vld [vmem:[%s3991_s9 + $0x8] ss:$36 sps:$4 sm:$0xff]  }
  0x17   : > { %3106 = vmatpush3.bf16.msra.mxu0 %v3651_v9  ;;  %3629 = vmatpush3.bf16.msra.mxu1 %v3651_v9  ;;  %v3696_v49 = vld [vmem:[%s3991_s9 + $0xd8] ss:$36 sps:$4 sm:$0xff]   ;;  %v3708_v54 = vld [vmem:[%s3991_s9 + $0xc] ss:$36 sps:$4 sm:$0xff]   ;;  %v3709_v59 = vld [vmem:[%s3991_s9 + $0x120] ss:$36 sps:$4 sm:$0xff]  }
  0x18   : > { %3107 = vmatprep.subr.bf16.mxu0 %v3652_v10  ;;  %3622 = vmatprep.subr.bf16.mxu1 %v3652_v10  ;;  %v3697_v50 = vld [vmem:[%s3991_s9 + $0x438] ss:$36 sps:$4 sm:$0xff]   ;;  %v3710_v60 = vld [vmem:[%s4731_s1 + $0x1c0] sm:$0xff]   ;;  %v3712_v62 = vld [vmem:[%s3991_s9 + $0x16c] ss:$36 sps:$4 sm:$0xff]  }
  0x19   : > { %v3719_v56 = vld [vmem:[%s4731_s1 + $0x118] sm:$0xff]   ;;  %v3711_v61 = vld [vmem:[%s4731_s1 + $0x180] sm:$0xff]   ;;  %v3726_v1 = vld [vmem:[%s4731_s1 + $0x1c8] sm:$0xff]  }
  0x1a   : > { %v3702_v57 = vld [vmem:[%s4731_s1 + $0xb8] sm:$0xff]   ;;  %v3728_v0 = vld [vmem:[%s4731_s1 + $0x160] sm:$0xff]   ;;  %v3727_v3 = vld [vmem:[%s4731_s1 + $0x188] sm:$0xff]  }
  0x1b   : > { %3108 = vmatpush3.bf16.msra.mxu0 %v3653_v13  ;;  %3630 = vmatpush3.bf16.msra.mxu1 %v3653_v13  ;;  %v3714_v63 = vld [vmem:[%s3991_s9 + $0x54] ss:$36 sps:$4 sm:$0xff]   ;;  %v3729_v2 = vld [vmem:[%s4731_s1 + $0x120] sm:$0xff]   ;;  %v3716_v4 = vld [vmem:[%s3991_s9 + $0x168] ss:$36 sps:$4 sm:$0xff]  }
  0x1c   : > { %3109 = vmatprep.subr.bf16.mxu0 %v3654_v14  ;;  %3623 = vmatprep.subr.bf16.mxu1 %v3654_v14  ;;  %v3717_v5 = vld [vmem:[%s3991_s9 + $0x50] ss:$36 sps:$4 sm:$0xff]   ;;  %v3722_v7 = vld [vmem:[%s3991_s9 + $0x9c] ss:$36 sps:$4 sm:$0xff]   ;;  %v3742_v8 = vld [vmem:[%s4731_s1 + $0x168] sm:$0xff]  }
  0x1d   : > { %v3720_v6 = vld [vmem:[%s3991_s9 + $0x1b4] ss:$36 sps:$4 sm:$0xff]   ;;  %v3744_v10 = vld [vmem:[%s4731_s1 + $0x128] sm:$0xff]   ;;  %v3730_v14 = vld [vmem:[%s3991_s9 + $0x1fc] ss:$36 sps:$4 sm:$0xff]  }
  0x1e   : > { %v3743_v9 = vld [vmem:[%s4731_s1 + $0x1d0] sm:$0xff]   ;;  %v3725_v13 = vld [vmem:[%s3991_s9 + $0x98] ss:$36 sps:$4 sm:$0xff]  }
  0x1f   : > { %3110 = vmatpush3.bf16.msra.mxu0 %v3655_v15  ;;  %3631 = vmatpush3.bf16.msra.mxu1 %v3655_v15  ;;  %v3745_v11 = vld [vmem:[%s4731_s1 + $0x190] sm:$0xff]  }
  0x20   : > { %3111 = vmatprep.subr.bf16.mxu0 %v3656_v16  ;;  %3624 = vmatprep.subr.bf16.mxu1 %v3656_v16  ;;  %v3724_v12 = vld [vmem:[%s3991_s9 + $0x1b0] ss:$36 sps:$4 sm:$0xff]  }
  0x21   : > { %v3752_v15 = vld [vmem:[%s4731_s1 + $0x170] sm:$0xff]  }
  0x22   : > { %v3753_v16 = vld [vmem:[%s4731_s1 + $0x130] sm:$0xff]  }
  0x23   : > { %3112 = vmatpush3.bf16.msra.mxu0 %v3657_v17  ;;  %3632 = vmatpush3.bf16.msra.mxu1 %v3657_v17  ;;  %v3732_v17 = vld [vmem:[%s3991_s9 + $0xe4] ss:$36 sps:$4 sm:$0xff]  }
  0x24   : > { %3209 = vmatprep.subr.bf16.mxu1 %v3664_v18  ;;  %3321 = vmatprep.subr.bf16.mxu0 %v3667_v21  ;;  %v3760_v18 = vld [vmem:[%s4731_s1 + $0x1d8] sm:$0xff]   ;;  %v3735_v21 = vld [vmem:[%s3991_s9 + $0xe0] ss:$36 sps:$4 sm:$0xff]  }
  0x26   : > { %1690 = vmatmul.mubr.bf16.vlgmr.msra.gmra.mrb[0].mxu0 %v3658_v19  ;;  %1786 = vmatmul.mubr.bf16.vlgmr.msra.gmra.mrb[0].mxu1 %v3661_v20  ;;  %v3761_v19 = vld [vmem:[%s4731_s1 + $0x198] sm:$0xff]  }
  0x27   : > { %3210 = vmatpush3.bf16.msra.mxu1 %v3665_v22  ;;  %3322 = vmatpush3.bf16.msra.mxu0 %v3669_v24  ;;  %v3734_v20 = vld [vmem:[%s3991_s9 + $0x1f8] ss:$36 sps:$4 sm:$0xff]   ;;  %v3736_v22 = vld [vmem:[%s3991_s9 + $0x244] ss:$36 sps:$4 sm:$0xff]  }
  0x28   : > { %3211 = vmatprep.subr.bf16.mxu1 %v3666_v23  ;;  %1697 = vmatprep.mubr.bf16.mxu0 %v3670_v25  ;;  %v3738_v23 = vld [vmem:[%s3991_s9 + $0x12c] ss:$36 sps:$4 sm:$0xff]   ;;  %v3768_v24 = vld [vmem:[%s4731_s1 + $0x178] sm:$0xff]  }
  0x29   : > { %1793 = vmatprep.mubr.bf16.mxu1 %v3672_v26  ;;  %3323 = vmatprep.subr.bf16.mxu0 %v3687_v28  ;;  %v3769_v25 = vld [vmem:[%s4731_s1 + $0x138] sm:$0xff]   ;;  %v3776_v26 = vld [vmem:[%s4731_s1 + $0x1e0] sm:$0xff]  }
  0x2a   : > { %v3777_v28 = vld [vmem:[%s4731_s1 + $0x1a0] sm:$0xff]  }
  0x2b   : > { %3212 = vmatpush3.bf16.msra.mxu1 %v3668_v27  ;;  %3324 = vmatpush3.bf16.msra.mxu0 %v3689_v33  ;;  %v3740_v27 = vld [vmem:[%s3991_s9 + $0x240] ss:$36 sps:$4 sm:$0xff]   ;;  %v3791_v33 = vld [vmem:[%s4731_s1 + $0x1e8] sm:$0xff]  }
  0x2c   : > { %3213 = vmatprep.subr.bf16.mxu1 %v3676_v31  ;;  %3325 = vmatprep.subr.bf16.mxu0 %v3701_v43  ;;  %v3746_v31 = vld [vmem:[%s3991_s9 + $0x28c] ss:$36 sps:$4 sm:$0xff]   ;;  %v3762_v43 = vld [vmem:[%s3991_s9 + $0x31c] ss:$36 sps:$4 sm:$0xff]  }
  0x2e   : > { %1698 = vmatmul.mubr.bf16.gmra.mrb[4].mxu0 %v3674_v29  ;;  %1794 = vmatmul.mubr.bf16.gmra.mrb[4].mxu1 %v3675_v30  ;;  %v3778_v29 = vld [vmem:[%s4731_s1 + $0x200] sm:$0xff]   ;;  %v3741_v30 = vld [vmem:[%s3991_s9 + $0x128] ss:$36 sps:$4 sm:$0xff]  }
  0x2f   : > { %3214 = vmatpush3.bf16.msra.mxu1 %v3677_v32  ;;  %1705 = vmatprep.mubr.bf16.mxu0 %v3680_v35  ;;  %v3748_v32 = vld [vmem:[%s3991_s9 + $0x174] ss:$36 sps:$4 sm:$0xff]   ;;  %v3792_v35 = vld [vmem:[%s4731_s1 + $0x1a8] sm:$0xff]  }
  0x30   : > { %3215 = vmatprep.subr.bf16.mxu1 %v3678_v34  ;;  %1801 = vmatprep.mubr.bf16.mxu1 %v3682_v36  ;;  %v3750_v34 = vld [vmem:[%s3991_s9 + $0x288] ss:$36 sps:$4 sm:$0xff]   ;;  %v3751_v36 = vld [vmem:[%s3991_s9 + $0x170] ss:$36 sps:$4 sm:$0xff]  }
  0x31   : > { %3326 = vmatpush3.bf16.msra.mxu0 %v3703_v46  ;;  %v3767_v46 = vld [vmem:[%s3991_s9 + $0x200] ss:$36 sps:$4 sm:$0xff]  }
  0x32   : > { %3327 = vmatprep.subr.bf16.mxu0 %v3718_v55  ;;  %v3793_v55 = vld [vmem:[%s4731_s1 + $0x208] sm:$0xff]  }
  0x33   : > { %3216 = vmatpush3.bf16.msra.mxu1 %v3679_v37  ;;  %v3754_v37 = vld [vmem:[%s3991_s9 + $0x2d4] ss:$36 sps:$4 sm:$0xff]  }
  0x34   : > { %3217 = vmatprep.subr.bf16.mxu1 %v3686_v40  ;;  %v3759_v40 = vld [vmem:[%s3991_s9 + $0x1b8] ss:$36 sps:$4 sm:$0xff]  }
  0x35   : > { %3328 = vmatpush3.bf16.msra.mxu0 %v3719_v56  ;;  %v3808_v56 = vld [vmem:[%s4731_s1 + $0x210] sm:$0xff]  }
  0x36   : > { %1706 = vmatmul.mubr.bf16.gmra.mrb[8].mxu0 %v3684_v38  ;;  %1802 = vmatmul.mubr.bf16.gmra.mrb[8].mxu1 %v3685_v39  ;;  %v3756_v38 = vld [vmem:[%s3991_s9 + $0x1bc] ss:$36 sps:$4 sm:$0xff]   ;;  %v3758_v39 = vld [vmem:[%s3991_s9 + $0x2d0] ss:$36 sps:$4 sm:$0xff]  }
  0x37   : > { %3218 = vmatpush3.bf16.msra.mxu1 %v3688_v41  ;;  %1713 = vmatprep.mubr.bf16.mxu0 %v3692_v44  ;;  %v3806_v41 = vld [vmem:[%s4731_s1 + $0x1f0] sm:$0xff]   ;;  %v3764_v44 = vld [vmem:[%s3991_s9 + $0x204] ss:$36 sps:$4 sm:$0xff]  }
  0x38   : > { %3219 = vmatprep.subr.bf16.mxu1 %v3690_v42  ;;  %1809 = vmatprep.mubr.bf16.mxu1 %v3694_v45  ;;  %v3807_v42 = vld [vmem:[%s4731_s1 + $0x1b0] sm:$0xff]   ;;  %v3766_v45 = vld [vmem:[%s3991_s9 + $0x318] ss:$36 sps:$4 sm:$0xff]  }
  0x39   : > { %3329 = vmatprep.subr.bf16.mxu0 %v3728_v0  ;;  %v3790_v0 = vld [vmem:[%s3991_s9 + $0xa0] ss:$36 sps:$4 sm:$0xff]  }
  0x3a   : > { %3330 = vmatpush3.bf16.msra.mxu0 %v3729_v2  ;;  %v3796_v2 = vld [vmem:[%s3991_s9 + $0xec] ss:$36 sps:$4 sm:$0xff]  }
  0x3b   : > { %3220 = vmatpush3.bf16.msra.mxu1 %v3691_v47  ;;  %3331 = vmatprep.subr.bf16.mxu0 %v3742_v8  ;;  %v3821_v47 = vld [vmem:[%s4731_s1 + $0x1f8] sm:$0xff]  }
  0x3c   : > { %3221 = vmatprep.subr.bf16.mxu1 %v3698_v48  ;;  %v3822_v48 = vld [vmem:[%s4731_s1 + $0x1b8] sm:$0xff]  }
  0x3d   : > { %v3802_v8 = vld [vmem:[%s3991_s9 + $0x134] ss:$36 sps:$4 sm:$0xff]  }
  0x3e   : > { %1714 = vmatmul.mubr.bf16.gmra.mrb[12].mxu0 %v3696_v49  ;;  %1810 = vmatmul.mubr.bf16.gmra.mrb[12].mxu1 %v3697_v50  ;;  %v3770_v49 = vld [vmem:[%s3991_s9 + $0x24c] ss:$36 sps:$4 sm:$0xff]   ;;  %v3774_v50 = vld [vmem:[%s3991_s9 + $0x14] ss:$36 sps:$4 sm:$0xff]  }
  0x3f   : > { %3222 = vmatpush3.bf16.msra.mxu1 %v3699_v51  ;;  %1721 = vmatprep.mubr.bf16.mxu0 %v3704_v53  ;;  %v3772_v51 = vld [vmem:[%s3991_s9 + $0x10] ss:$36 sps:$4 sm:$0xff]  }
  0x40   : > { %3223 = vmatprep.subr.bf16.mxu1 %v3700_v52  ;;  %1850 = vmatprep.mubr.bf16.mxu1 %v3708_v54  ;;  %v3775_v52 = vld [vmem:[%s3991_s9 + $0x248] ss:$36 sps:$4 sm:$0xff]   ;;  %v3779_v53 = vld [vmem:[%s3991_s9 + $0x294] ss:$36 sps:$4 sm:$0xff]   ;;  %v3781_v54 = vld [vmem:[%s3991_s9 + $0x5c] ss:$36 sps:$4 sm:$0xff]  }
  0x41   : > { %3332 = vmatpush3.bf16.msra.mxu0 %v3744_v10  ;;  %v3804_v10 = vld [vmem:[%s3991_s9 + $0x368] ss:$36 sps:$4 sm:$0xff]  }
  0x42   : > { %3333 = vmatprep.subr.bf16.mxu0 %v3752_v15  ;;  %v3814_v15 = vld [vmem:[%s3991_s9 + $0x178] ss:$36 sps:$4 sm:$0xff]  }
  0x43   : > { %3224 = vmatpush3.bf16.msra.mxu1 %v3702_v57  ;;  %v3783_v57 = vld [vmem:[%s3991_s9 + $0x290] ss:$36 sps:$4 sm:$0xff]  }
  0x44   : > { %3433 = vmatprep.subr.bf16.mxu1 %v3710_v60  ;;  %v3787_v60 = vld [vmem:[%s3991_s9 + $0xa4] ss:$36 sps:$4 sm:$0xff]  }
  0x45   : > { %3334 = vmatpush3.bf16.msra.mxu0 %v3753_v16  ;;  %v3815_v16 = vld [vmem:[%s3991_s9 + $0x3fc] ss:$36 sps:$4 sm:$0xff]  }
  0x46   : > { %1722 = vmatmul.mubr.bf16.gmra.mrb[16].mxu0 %v3709_v59  ;;  %1851 = vmatmul.mubr.bf16.vlgmr.msra.gmra.mrb[16].mxu1 %v3706_v58  ;;  %v3784_v58 = vld [vmem:[%s3991_s9 + $0x58] ss:$36 sps:$4 sm:$0xff]  }
  0x47   : > { %3434 = vmatpush3.bf16.msra.mxu1 %v3711_v61  ;;  %1729 = vmatprep.mubr.bf16.mxu0 %v3712_v62  ;;  %v3785_v59 = vld [vmem:[%s3991_s9 + $0x2dc] ss:$36 sps:$4 sm:$0xff]  }
  0x48   : > { %1858 = vmatprep.mubr.bf16.mxu1 %v3714_v63  ;;  %3435 = vmatprep.subr.bf16.mxu1 %v3726_v1  ;;  %v3823_v61 = vld [vmem:[%s4731_s1 + $0x218] sm:$0xff]   ;;  %v3836_v62 = vld [vmem:[%s4731_s1 + $0x220] sm:$0xff]  }
  0x49   : > { %3335 = vmatprep.subr.bf16.mxu0 %v3768_v24  ;;  %v3789_v63 = vld [vmem:[%s3991_s9 + $0x2d8] ss:$36 sps:$4 sm:$0xff]   ;;  %v3794_v1 = vld [vmem:[%s3991_s9 + $0x324] ss:$36 sps:$4 sm:$0xff]  }
  0x4a   : > { %3336 = vmatpush3.bf16.msra.mxu0 %v3769_v25  ;;  %v3830_v24 = vld [vmem:[%s3991_s9 + $0x254] ss:$36 sps:$4 sm:$0xff]   ;;  %v3834_v25 = vld [vmem:[%s3991_s9 + $0x1c] ss:$36 sps:$4 sm:$0xff]  }
  0x4b   : > { %3436 = vmatpush3.bf16.msra.mxu1 %v3727_v3  ;;  %3569 = vmatprep.subr.bf16.mxu0 %v3778_v29  ;;  %v3849_v3 = vld [vmem:[%s4731_s1 + $0x228] sm:$0xff]  }
  0x4c   : > { %3437 = vmatprep.subr.bf16.mxu1 %v3743_v9  ;;  %v3875_v9 = vld [vmem:[%s4731_s1 + $0x238] sm:$0xff]  }
  0x4e   : > { %1730 = vmatmul.mubr.bf16.gmra.mrb[20].mxu0 %v3716_v4  ;;  %1859 = vmatmul.mubr.bf16.gmra.mrb[20].mxu1 %v3717_v5  ;;  %v3798_v4 = vld [vmem:[%s3991_s9 + $0x320] ss:$36 sps:$4 sm:$0xff]   ;;  %v3799_v5 = vld [vmem:[%s3991_s9 + $0xe8] ss:$36 sps:$4 sm:$0xff]  }
  0x4f   : > { %1737 = vmatprep.mubr.bf16.mxu0 %v3720_v6  ;;  %1866 = vmatprep.mubr.bf16.mxu1 %v3722_v7  ;;  %v3862_v6 = vld [vmem:[%s4731_s1 + $0x230] sm:$0xff]  }
  0x50   : > { %3438 = vmatpush3.bf16.msra.mxu1 %v3745_v11  ;;  %v3800_v7 = vld [vmem:[%s3991_s9 + $0x36c] ss:$36 sps:$4 sm:$0xff]  }
  0x51   : > { %3439 = vmatprep.subr.bf16.mxu1 %v3760_v18  ;;  %v3805_v11 = vld [vmem:[%s3991_s9 + $0x130] ss:$36 sps:$4 sm:$0xff]   ;;  %v3819_v18 = vld [vmem:[%s3991_s9 + $0x3f8] ss:$36 sps:$4 sm:$0xff]  }
  0x54   : > { %3440 = vmatpush3.bf16.msra.mxu1 %v3761_v19  ;;  %v3820_v19 = vld [vmem:[%s3991_s9 + $0x1c0] ss:$36 sps:$4 sm:$0xff]  }
  0x55   : > { %3441 = vmatprep.subr.bf16.mxu1 %v3776_v26  ;;  %v3832_v26 = vld [vmem:[%s3991_s9 + $0x18] ss:$36 sps:$4 sm:$0xff]  }
  0x56   : > { %1738 = vmatmul.mubr.bf16.gmra.mrb[24].mxu0 %v3724_v12  ;;  %1867 = vmatmul.mubr.bf16.gmra.mrb[24].mxu1 %v3725_v13  ;;  %v3809_v12 = vld [vmem:[%s3991_s9 + $0x3b4] ss:$36 sps:$4 sm:$0xff]   ;;  %v3811_v13 = vld [vmem:[%s3991_s9 + $0x17c] ss:$36 sps:$4 sm:$0xff]  }
  0x57   : > { %1745 = vmatprep.mubr.bf16.mxu0 %v3730_v14  ;;  %1874 = vmatprep.mubr.bf16.mxu1 %v3732_v17  ;;  %v3813_v14 = vld [vmem:[%s3991_s9 + $0x3b0] ss:$36 sps:$4 sm:$0xff]   ;;  %v3817_v17 = vld [vmem:[%s3991_s9 + $0x1c4] ss:$36 sps:$4 sm:$0xff]  }
  0x58   : > { %3442 = vmatpush3.bf16.msra.mxu1 %v3777_v28  ;;  %v3837_v28 = vld [vmem:[%s3991_s9 + $0x29c] ss:$36 sps:$4 sm:$0xff]  }
  0x59   : > { %3443 = vmatprep.subr.bf16.mxu1 %v3791_v33  ;;  %v3845_v33 = vld [vmem:[%s3991_s9 + $0xac] ss:$36 sps:$4 sm:$0xff]  }
  0x5c   : > { %3444 = vmatpush3.bf16.msra.mxu1 %v3792_v35  ;;  %v3848_v35 = vld [vmem:[%s3991_s9 + $0xa8] ss:$36 sps:$4 sm:$0xff]  }
  0x5d   : > { %3445 = vmatprep.subr.bf16.mxu1 %v3806_v41  ;;  %v3858_v41 = vld [vmem:[%s3991_s9 + $0x13c] ss:$36 sps:$4 sm:$0xff]  }
  0x5e   : > { %1746 = vmatmul.mubr.bf16.gmra.mrb[28].mxu0 %v3734_v20  ;;  %1875 = vmatmul.mubr.bf16.gmra.mrb[28].mxu1 %v3735_v21  ;;  %v3824_v20 = vld [vmem:[%s3991_s9 + $0x444] ss:$36 sps:$4 sm:$0xff]   ;;  %v3826_v21 = vld [vmem:[%s3991_s9 + $0x20c] ss:$36 sps:$4 sm:$0xff]  }
  0x5f   : > { %1753 = vmatprep.mubr.bf16.mxu0 %v3736_v22  ;;  %1882 = vmatprep.mubr.bf16.mxu1 %v3738_v23  ;;  %v3828_v22 = vld [vmem:[%s3991_s9 + $0x440] ss:$36 sps:$4 sm:$0xff]   ;;  %v3829_v23 = vld [vmem:[%s3991_s9 + $0x208] ss:$36 sps:$4 sm:$0xff]  }
  0x60   : > { %3446 = vmatpush3.bf16.msra.mxu1 %v3807_v42  ;;  %v3860_v42 = vld [vmem:[%s3991_s9 + $0x370] ss:$36 sps:$4 sm:$0xff]  }
  0x61   : > { %3447 = vmatprep.subr.bf16.mxu1 %v3821_v47  ;;  %v3868_v47 = vld [vmem:[%s3991_s9 + $0x180] ss:$36 sps:$4 sm:$0xff]  }
  0x64   : > { %3448 = vmatpush3.bf16.msra.mxu1 %v3822_v48  ;;  %v3869_v48 = vld [vmem:[%s3991_s9 + $0x404] ss:$36 sps:$4 sm:$0xff]  }
  0x66   : > { %1754 = vmatmul.mubr.bf16.gmra.mrb[32].mxu0 %v3740_v27  ;;  %1883 = vmatmul.mubr.bf16.gmra.mrb[32].mxu1 %v3741_v30  ;;  %v3835_v27 = vld [vmem:[%s3991_s9 + $0x250] ss:$36 sps:$4 sm:$0xff]   ;;  %v3841_v30 = vld [vmem:[%s3991_s9 + $0x298] ss:$36 sps:$4 sm:$0xff]  }
  0x67   : > { %1761 = vmatprep.mubr.bf16.mxu0 %v3746_v31  ;;  %1890 = vmatprep.mubr.bf16.mxu1 %v3748_v32  ;;  %v3842_v31 = vld [vmem:[%s3991_s9 + $0x60] ss:$36 sps:$4 sm:$0xff]  }
  0x68   : > { %v3843_v32 = vld [vmem:[%s3991_s9 + $0x2e4] ss:$36 sps:$4 sm:$0xff]  }
  0x6e   : > { %1762 = vmatmul.mubr.bf16.gmra.mrb[36].mxu0 %v3750_v34  ;;  %1891 = vmatmul.mubr.bf16.gmra.mrb[36].mxu1 %v3751_v36  ;;  %v3847_v34 = vld [vmem:[%s3991_s9 + $0x2e0] ss:$36 sps:$4 sm:$0xff]   ;;  %v3850_v36 = vld [vmem:[%s3991_s9 + $0x32c] ss:$36 sps:$4 sm:$0xff]  }
  0x6f   : > { %1769 = vmatprep.mubr.bf16.mxu0 %v3754_v37  ;;  %1898 = vmatprep.mubr.bf16.mxu1 %v3756_v38  ;;  %v3852_v37 = vld [vmem:[%s3991_s9 + $0xf4] ss:$36 sps:$4 sm:$0xff]   ;;  %v3854_v38 = vld [vmem:[%s3991_s9 + $0x328] ss:$36 sps:$4 sm:$0xff]  }
  0x76   : > { %1770 = vmatmul.mubr.bf16.gmra.mrb[40].mxu0 %v3758_v39  ;;  %1899 = vmatmul.mubr.bf16.gmra.mrb[40].mxu1 %v3759_v40  ;;  %v3855_v39 = vld [vmem:[%s3991_s9 + $0xf0] ss:$36 sps:$4 sm:$0xff]  }
  0x77   : > { %1777 = vmatprep.mubr.bf16.mxu0 %v3762_v43  ;;  %1906 = vmatprep.mubr.bf16.mxu1 %v3764_v44  ;;  %v3856_v40 = vld [vmem:[%s3991_s9 + $0x374] ss:$36 sps:$4 sm:$0xff]   ;;  %v3863_v44 = vld [vmem:[%s3991_s9 + $0x3bc] ss:$36 sps:$4 sm:$0xff]  }
  0x78   : > { %v3861_v43 = vld [vmem:[%s3991_s9 + $0x138] ss:$36 sps:$4 sm:$0xff]  }
  0x7e   : > { %1778 = vmatmul.mubr.bf16.gmra.mrb[44].mxu0 %v3766_v45  ;;  %1907 = vmatmul.mubr.bf16.gmra.mrb[44].mxu1 %v3767_v46  ;;  %v3865_v45 = vld [vmem:[%s3991_s9 + $0x184] ss:$36 sps:$4 sm:$0xff]   ;;  %v3867_v46 = vld [vmem:[%s3991_s9 + $0x3b8] ss:$36 sps:$4 sm:$0xff]  }
  0x7f   : > { %1914 = vmatprep.mubr.bf16.mxu1 %v3770_v49  ;;  %2011 = vmatprep.mubr.bf16.mxu0 %v3774_v50  ;;  %v3871_v49 = vld [vmem:[%s3991_s9 + $0x1cc] ss:$36 sps:$4 sm:$0xff]   ;;  %v3873_v50 = vld [vmem:[%s3991_s9 + $0x400] ss:$36 sps:$4 sm:$0xff]  }
  0x86   : > { %1915 = vmatmul.mubr.bf16.gmra.mrb[48].mxu1 %v3775_v52  ;;  %2012 = vmatmul.mubr.bf16.vlgmr.msra.gmra.mrb[48].mxu0 %v3772_v51  ;;  %v3874_v51 = vld [vmem:[%s3991_s9 + $0x1c8] ss:$36 sps:$4 sm:$0xff]  }
  0x87   : > { %3570 = vmatpush3.bf16.msra.mxu0 %v3778_v29  ;;  %1922 = vmatprep.mubr.bf16.mxu1 %v3779_v53  ;;  %v3839_v29 = vld [vmem:[%s3991_s9 + $0x64] ss:$36 sps:$4 sm:$0xff]   ;;  %v3876_v52 = vld [vmem:[%s3991_s9 + $0x44c] ss:$36 sps:$4 sm:$0xff]   ;;  %v3878_v53 = vld [vmem:[%s3991_s9 + $0x214] ss:$36 sps:$4 sm:$0xff]  }
  0x88   : > { %2019 = vmatprep.mubr.bf16.mxu0 %v3781_v54  ;;  %3571 = vmatprep.subr.bf16.mxu0 %v3793_v55 }
  0x8b   : > { %3572 = vmatpush3.bf16.msra.mxu0 %v3793_v55 }
  0x8c   : > { %3573 = vmatprep.subr.bf16.mxu0 %v3808_v56 }
  0x8e   : > { %1923 = vmatmul.mubr.bf16.gmra.mrb[52].mxu1 %v3783_v57  ;;  %2020 = vmatmul.mubr.bf16.gmra.mrb[52].mxu0 %v3784_v58  ;;  %v3880_v58 = vld [vmem:[%s3991_s9 + $0x448] ss:$36 sps:$4 sm:$0xff]  }
  0x8f   : > { %1930 = vmatprep.mubr.bf16.mxu1 %v3785_v59  ;;  %2027 = vmatprep.mubr.bf16.mxu0 %v3787_v60  ;;  %v3881_v59 = vld [vmem:[%s3991_s9 + $0x210] ss:$36 sps:$4 sm:$0xff]  }
  0x90   : > { %3574 = vmatpush3.bf16.msra.mxu0 %v3808_v56 }
  0x91   : > { %3575 = vmatprep.subr.bf16.mxu0 %v3823_v61 }
  0x94   : > { %3576 = vmatpush3.bf16.msra.mxu0 %v3823_v61 }
  0x95   : > { %3577 = vmatprep.subr.bf16.mxu0 %v3836_v62 }
  0x96   : > { %1931 = vmatmul.mubr.bf16.gmra.mrb[56].mxu1 %v3789_v63  ;;  %2028 = vmatmul.mubr.bf16.gmra.mrb[56].mxu0 %v3790_v0  ;;  %v3882_v0 = vld [vmem:[%s3991_s9 + $0x25c] ss:$36 sps:$4 sm:$0xff]  }
  0x97   : > { %1938 = vmatprep.mubr.bf16.mxu1 %v3794_v1  ;;  %2035 = vmatprep.mubr.bf16.mxu0 %v3796_v2  ;;  %v3884_v1 = vld [vmem:[%s3991_s9 + $0x20] ss:$36 sps:$4 sm:$0xff]  }
  0x98   : > { %3578 = vmatpush3.bf16.msra.mxu0 %v3836_v62 }
  0x99   : > { %3579 = vmatprep.subr.bf16.mxu0 %v3849_v3 }
  0x9c   : > { %3580 = vmatpush3.bf16.msra.mxu0 %v3849_v3 }
  0x9d   : > { %3581 = vmatprep.subr.bf16.mxu0 %v3862_v6 }
  0x9e   : > { %1939 = vmatmul.mubr.bf16.gmra.mrb[60].mxu1 %v3798_v4  ;;  %2036 = vmatmul.mubr.bf16.gmra.mrb[60].mxu0 %v3799_v5 }
  0x9f   : > { %1946 = vmatprep.mubr.bf16.mxu1 %v3800_v7  ;;  %2043 = vmatprep.mubr.bf16.mxu0 %v3802_v8 }
  0xa0   : > { %3582 = vmatpush3.bf16.msra.mxu0 %v3862_v6 }
  0xa1   : > { %3583 = vmatprep.subr.bf16.mxu0 %v3875_v9 }
  0xa4   : > { %3584 = vmatpush3.bf16.msra.mxu0 %v3875_v9 }
  0xa6   : > { %1947 = vmatmul.mubr.bf16.gmra.mrb[64].mxu1 %v3804_v10  ;;  %2044 = vmatmul.mubr.bf16.gmra.mrb[64].mxu0 %v3805_v11  ;;  %v3885_v10 = vld [vmem:[%s3991_s9 + $0x258] ss:$36 sps:$4 sm:$0xff]   ;;  %v3886_v11 = vld [vmem:[%s3991_s9 + $0x68] ss:$36 sps:$4 sm:$0xff]  }
  0xa7   : > { %1954 = vmatprep.mubr.bf16.mxu1 %v3809_v12  ;;  %2051 = vmatprep.mubr.bf16.mxu0 %v3811_v13 }
  0xae   : > { %1955 = vmatmul.mubr.bf16.gmra.mrb[68].mxu1 %v3813_v14  ;;  %2052 = vmatmul.mubr.bf16.gmra.mrb[68].mxu0 %v3814_v15 }
  0xaf   : > { %1962 = vmatprep.mubr.bf16.mxu1 %v3815_v16  ;;  %2059 = vmatprep.mubr.bf16.mxu0 %v3817_v17  ;;  %v3887_v16 = vld [vmem:[%s3991_s9 + $0x2a4] ss:$36 sps:$4 sm:$0xff]   ;;  %v3889_v17 = vld [vmem:[%s3991_s9 + $0xb0] ss:$36 sps:$4 sm:$0xff]  }
  0xb6   : > { %1963 = vmatmul.mubr.bf16.gmra.mrb[72].mxu1 %v3819_v18  ;;  %2060 = vmatmul.mubr.bf16.gmra.mrb[72].mxu0 %v3820_v19 }
  0xb7   : > { %1970 = vmatprep.mubr.bf16.mxu1 %v3824_v20  ;;  %2067 = vmatprep.mubr.bf16.mxu0 %v3826_v21 }
  0xbe   : > { %1971 = vmatmul.mubr.bf16.gmra.mrb[76].mxu1 %v3828_v22  ;;  %2068 = vmatmul.mubr.bf16.gmra.mrb[76].mxu0 %v3829_v23 }
  0xbf   : > { %2075 = vmatprep.mubr.bf16.mxu0 %v3830_v24  ;;  %2172 = vmatprep.mubr.bf16.mxu1 %v3834_v25 }
  0xc6   : > { %2076 = vmatmul.mubr.bf16.gmra.mrb[80].mxu0 %v3835_v27  ;;  %2173 = vmatmul.mubr.bf16.vlgmr.msra.gmra.mrb[80].mxu1 %v3832_v26  ;;  %v3890_v26 = vld [vmem:[%s3991_s9 + $0x2a0] ss:$36 sps:$4 sm:$0xff]   ;;  %v3891_v27 = vld [vmem:[%s3991_s9 + $0xf8] ss:$36 sps:$4 sm:$0xff]  }
  0xc7   : > { %2083 = vmatprep.mubr.bf16.mxu0 %v3837_v28  ;;  %2180 = vmatprep.mubr.bf16.mxu1 %v3839_v29 }
  0xce   : > { %2084 = vmatmul.mubr.bf16.gmra.mrb[84].mxu0 %v3841_v30  ;;  %2181 = vmatmul.mubr.bf16.gmra.mrb[84].mxu1 %v3842_v31 }
  0xcf   : > { %2091 = vmatprep.mubr.bf16.mxu0 %v3843_v32  ;;  %2188 = vmatprep.mubr.bf16.mxu1 %v3845_v33  ;;  %v3892_v32 = vld [vmem:[%s3991_s9 + $0x2ec] ss:$36 sps:$4 sm:$0xff]   ;;  %v3894_v33 = vld [vmem:[%s3991_s9 + $0x140] ss:$36 sps:$4 sm:$0xff]  }
  0xd6   : > { %2092 = vmatmul.mubr.bf16.gmra.mrb[88].mxu0 %v3847_v34  ;;  %2189 = vmatmul.mubr.bf16.gmra.mrb[88].mxu1 %v3848_v35 }
  0xd7   : > { %2099 = vmatprep.mubr.bf16.mxu0 %v3850_v36  ;;  %2196 = vmatprep.mubr.bf16.mxu1 %v3852_v37 }
  0xde   : > { %2100 = vmatmul.mubr.bf16.gmra.mrb[92].mxu0 %v3854_v38  ;;  %2197 = vmatmul.mubr.bf16.gmra.mrb[92].mxu1 %v3855_v39 }
  0xdf   : > { %2107 = vmatprep.mubr.bf16.mxu0 %v3856_v40  ;;  %2204 = vmatprep.mubr.bf16.mxu1 %v3858_v41 }
  0xe6   : > { %2108 = vmatmul.mubr.bf16.gmra.mrb[96].mxu0 %v3860_v42  ;;  %2205 = vmatmul.mubr.bf16.gmra.mrb[96].mxu1 %v3861_v43  ;;  %v3895_v42 = vld [vmem:[%s3991_s9 + $0x2e8] ss:$36 sps:$4 sm:$0xff]  }
  0xe7   : > { %2115 = vmatprep.mubr.bf16.mxu0 %v3863_v44  ;;  %2212 = vmatprep.mubr.bf16.mxu1 %v3865_v45  ;;  %v3896_v43 = vld [vmem:[%s3991_s9 + $0x188] ss:$36 sps:$4 sm:$0xff]  }
  0xee   : > { %2116 = vmatmul.mubr.bf16.gmra.mrb[100].mxu0 %v3867_v46  ;;  %2213 = vmatmul.mubr.bf16.gmra.mrb[100].mxu1 %v3868_v47 }
  0xef   : > { %2123 = vmatprep.mubr.bf16.mxu0 %v3869_v48  ;;  %2220 = vmatprep.mubr.bf16.mxu1 %v3871_v49  ;;  %v3897_v48 = vld [vmem:[%s3991_s9 + $0x334] ss:$36 sps:$4 sm:$0xff]  }
  0xf0   : > { %v3899_v49 = vld [vmem:[%s3991_s9 + $0x1d0] ss:$36 sps:$4 sm:$0xff]  }
  0xf6   : > { %2124 = vmatmul.mubr.bf16.gmra.mrb[104].mxu0 %v3873_v50  ;;  %2221 = vmatmul.mubr.bf16.gmra.mrb[104].mxu1 %v3874_v51 }
  0xf7   : > { %2131 = vmatprep.mubr.bf16.mxu0 %v3876_v52  ;;  %2228 = vmatprep.mubr.bf16.mxu1 %v3878_v53 }
  0xf9   : > { %v3185_v54 = vpop.f32.mrb[0].mxu1  ;;  %v3113_v55 = vpop.f32.mrb[0].mxu0 }
  0xfa   : > { %v3186_v56 = vpop.f32.mrb[1].mxu1  ;;  %v3114_v57 = vpop.f32.mrb[1].mxu0 }
  0xfb   : > { %v4294_v60 = vadd.f32 %v3186_v56, %v3185_v54  ;;  %v3188_v61 = vpop.f32.mrb[2].mxu1  ;;  %v4296_v62 = vadd.f32 %v3114_v57, %v3113_v55  ;;  %v3116_v63 = vpop.f32.mrb[2].mxu0  ;;  %v4343_v54 = vld [vmem:[%s4732_s2] ss:$0 sm:$0xff] }
  0xfc   : > { %v3189_v2 = vpop.f32.mrb[3].mxu1  ;;  %v3117_v3 = vpop.f32.mrb[3].mxu0 }
  0xfd   : > { %v4300_v4 = vadd.f32 %v3189_v2, %v3188_v61  ;;  %v4302_v5 = vadd.f32 %v3117_v3, %v3116_v63  ;;  %v3901_v61 = vld [vmem:[%s3991_s9 + $0x218] ss:$36 sps:$4 sm:$0xff]   ;;  %v1692_v63 = vadd.f32 %v4296_v62, %v4343_v54 }
  0xfe   : > { %2132 = vmatmul.mubr.bf16.gmra.mrb[108].mxu0 %v3880_v58  ;;  %2229 = vmatmul.mubr.bf16.gmra.mrb[108].mxu1 %v3881_v59  ;;  %v3900_v59 = vld [vmem:[%s3991_s9 + $0x330] ss:$36 sps:$4 sm:$0xff]  }
  0xff   : > { %2236 = vmatprep.mubr.bf16.mxu1 %v3882_v0  ;;  %3585 = vmatprep.mubr.bf16.mxu0 %v3884_v1 }
 0x101   : > { %v3191_v6 = vpop.f32.mrb[4].mxu1  ;;  %v3119_v7 = vpop.f32.mrb[4].mxu0 }
 0x102   : > { %v3192_v8 = vpop.f32.mrb[5].mxu1  ;;  %v3120_v9 = vpop.f32.mrb[5].mxu0 }
 0x103   : > { %v4306_v12 = vadd.f32 %v3192_v8, %v3191_v6  ;;  %v3194_v13 = vpop.f32.mrb[6].mxu1  ;;  %v4308_v14 = vadd.f32 %v3120_v9, %v3119_v7  ;;  %v3122_v15 = vpop.f32.mrb[6].mxu0  ;;  %v3902_v6 = vld [vmem:[%s3991_s9 + $0x37c] ss:$36 sps:$4 sm:$0xff]  }
 0x104   : > { %v3195_v18 = vpop.f32.mrb[7].mxu1  ;;  %v3123_v19 = vpop.f32.mrb[7].mxu0  ;;  %v3904_v7 = vld [vmem:[%s3991_s9 + $0x260] ss:$36 sps:$4 sm:$0xff]  }
 0x105   : > { %v4312_v20 = vadd.f32 %v3195_v18, %v3194_v13  ;;  %v4314_v21 = vadd.f32 %v3123_v19, %v3122_v15 }
 0x106   : > { %2237 = vmatmul.mubr.bf16.gmra.mrb[112].mxu1 %v3885_v10  ;;  %3586 = vmatmul.mubr.bf16.vlgmr.msra.gmra.mrb[112].mxu0 %v3886_v11  ;;  %v1695_v10 = vadd.f32 %v4302_v5, %v4343_v54  ;;  %v1700_v5 = vadd.f32 %v4308_v14, %v4343_v54 }
 0x107   : > { %2244 = vmatprep.mubr.bf16.mxu1 %v3887_v16  ;;  %3589 = vmatprep.mubr.bf16.mxu0 %v3889_v17 }
 0x109   : > { %v3197_v22 = vpop.f32.mrb[8].mxu1  ;;  %v3125_v23 = vpop.f32.mrb[8].mxu0 }
 0x10a   : > { %v3198_v24 = vpop.f32.mrb[9].mxu1  ;;  %v3126_v25 = vpop.f32.mrb[9].mxu0 }
 0x10b   : > { %v4318_v28 = vadd.f32 %v3198_v24, %v3197_v22  ;;  %v3200_v29 = vpop.f32.mrb[10].mxu1  ;;  %v4320_v30 = vadd.f32 %v3126_v25, %v3125_v23  ;;  %v3128_v31 = vpop.f32.mrb[10].mxu0  ;;  %v3905_v22 = vld [vmem:[%s3991_s9 + $0x378] ss:$36 sps:$4 sm:$0xff]   ;;  %v3906_v23 = vld [vmem:[%s3991_s9 + $0x2a8] ss:$36 sps:$4 sm:$0xff]  }
 0x10c   : > { %v3201_v34 = vpop.f32.mrb[11].mxu1  ;;  %v3129_v35 = vpop.f32.mrb[11].mxu0 }
 0x10d   : > { %v4324_v36 = vadd.f32 %v3201_v34, %v3200_v29  ;;  %v4326_v37 = vadd.f32 %v3129_v35, %v3128_v31  ;;  %v3907_v29 = vld [vmem:[%s3991_s9 + $0x3c4] ss:$36 sps:$4 sm:$0xff]   ;;  %v3909_v31 = vld [vmem:[%s3991_s9 + $0x2f0] ss:$36 sps:$4 sm:$0xff]   ;;  %v1703_v34 = vadd.f32 %v4314_v21, %v4343_v54  ;;  %v1708_v21 = vadd.f32 %v4320_v30, %v4343_v54 }
 0x10e   : > { %2245 = vmatmul.mubr.bf16.gmra.mrb[116].mxu1 %v3890_v26  ;;  %3590 = vmatmul.mubr.bf16.gmra.mrb[116].mxu0 %v3891_v27 }
 0x10f   : > { %2252 = vmatprep.mubr.bf16.mxu1 %v3892_v32  ;;  %3593 = vmatprep.mubr.bf16.mxu0 %v3894_v33 }
 0x111   : > { %v3203_v38 = vpop.f32.mrb[12].mxu1  ;;  %v3131_v39 = vpop.f32.mrb[12].mxu0 }
 0x112   : > { %v3204_v40 = vpop.f32.mrb[13].mxu1  ;;  %v3132_v41 = vpop.f32.mrb[13].mxu0 }
 0x113   : > { %v4330_v44 = vadd.f32 %v3204_v40, %v3203_v38  ;;  %v3206_v45 = vpop.f32.mrb[14].mxu1  ;;  %v4332_v46 = vadd.f32 %v3132_v41, %v3131_v39  ;;  %v3134_v47 = vpop.f32.mrb[14].mxu0 }
 0x114   : > { %v3207_v50 = vpop.f32.mrb[15].mxu1  ;;  %v3135_v51 = vpop.f32.mrb[15].mxu0 }
 0x115   : > { %v4336_v52 = vadd.f32 %v3207_v50, %v3206_v45  ;;  %v4338_v53 = vadd.f32 %v3135_v51, %v3134_v47  ;;  %v3910_v45 = vld [vmem:[%s3991_s9 + $0x3c0] ss:$36 sps:$4 sm:$0xff]   ;;  %v3911_v47 = vld [vmem:[%s3991_s9 + $0x338] ss:$36 sps:$4 sm:$0xff]  }
 0x116   : > { %2253 = vmatmul.mubr.bf16.gmra.mrb[120].mxu1 %v3895_v42  ;;  %3594 = vmatmul.mubr.bf16.gmra.mrb[120].mxu0 %v3896_v43 }
 0x117   : > { %2260 = vmatprep.mubr.bf16.mxu1 %v3897_v48  ;;  %3597 = vmatprep.mubr.bf16.mxu0 %v3899_v49 }
 0x119   : > { %v3225_v55 = vpop.f32.mrb[16].mxu1  ;;  %v3137_v56 = vpop.f32.mrb[16].mxu0 }
 0x11a   : > { %v3226_v57 = vpop.f32.mrb[17].mxu1  ;;  %v3138_v58 = vpop.f32.mrb[17].mxu0 }
 0x11b   : > { %v3227_v0 = vadd.f32 %v3226_v57, %v3225_v55  ;;  %v3228_v1 = vpop.f32.mrb[18].mxu1  ;;  %v4349_v2 = vadd.f32 %v3138_v58, %v3137_v56  ;;  %v3140_v3 = vpop.f32.mrb[18].mxu0  ;;  %v3912_v55 = vld [vmem:[%s3991_s9 + $0x40c] ss:$36 sps:$4 sm:$0xff]   ;;  %v3914_v56 = vld [vmem:[%s3991_s9 + $0x380] ss:$36 sps:$4 sm:$0xff]  }
 0x11c   : > { %v3229_v8 = vpop.f32.mrb[19].mxu1  ;;  %v3141_v9 = vpop.f32.mrb[19].mxu0 }
 0x11d   : > { %v4355_v11 = vadd.f32 %v3227_v0, %v1692_v63  ;;  %v3230_v13 = vadd.f32 %v3229_v8, %v3228_v1  ;;  %v4357_v15 = vadd.f32 %v3141_v9, %v3140_v3  ;;  %v3915_v8 = vld [vmem:[%s3991_s9 + $0x408] ss:$36 sps:$4 sm:$0xff]  }
 0x11e   : > { %2261 = vmatmul.mubr.bf16.gmra.mrb[124].mxu1 %v3900_v59  ;;  %3598 = vmatmul.mubr.bf16.gmra.mrb[124].mxu0 %v3901_v61  ;;  %v1711_v59 = vadd.f32 %v4326_v37, %v4343_v54  ;;  %v3916_v9 = vld [vmem:[%s3991_s9 + $0x3c8] ss:$36 sps:$4 sm:$0xff]   ;;  %v1716_v37 = vadd.f32 %v4332_v46, %v4343_v54 }
 0x11f   : > { %v4359_v62 = vadd.f32 %v3230_v13, %v1695_v10  ;;  %2268 = vmatprep.mubr.bf16.mxu1 %v3902_v6  ;;  %3601 = vmatprep.mubr.bf16.mxu0 %v3904_v7 }
 0x121   : > { %v3231_v16 = vpop.f32.mrb[20].mxu1  ;;  %v3143_v17 = vpop.f32.mrb[20].mxu0 }
 0x122   : > { %v3232_v18 = vpop.f32.mrb[21].mxu1  ;;  %v3144_v19 = vpop.f32.mrb[21].mxu0 }
 0x123   : > { %v3233_v24 = vadd.f32 %v3232_v18, %v3231_v16  ;;  %v3234_v25 = vpop.f32.mrb[22].mxu1  ;;  %v4365_v26 = vadd.f32 %v3144_v19, %v3143_v17  ;;  %v3146_v27 = vpop.f32.mrb[22].mxu0  ;;  %v3917_v18 = vld [vmem:[%s3991_s9 + $0x454] ss:$36 sps:$4 sm:$0xff]  }
 0x124   : > { %v3235_v32 = vpop.f32.mrb[23].mxu1  ;;  %v3147_v33 = vpop.f32.mrb[23].mxu0  ;;  %v3919_v19 = vld [vmem:[%s3991_s9 + $0x410] ss:$36 sps:$4 sm:$0xff]  }
 0x125   : > { %v4371_v35 = vadd.f32 %v3233_v24, %v1700_v5  ;;  %v3236_v38 = vadd.f32 %v3235_v32, %v3234_v25  ;;  %v4373_v39 = vadd.f32 %v3147_v33, %v3146_v27  ;;  %v1719_v5 = vadd.f32 %v4338_v53, %v4343_v54 }
 0x126   : > { %2269 = vmatmul.mubr.bf16.gmra.mrb[128].mxu1 %v3905_v22  ;;  %3602 = vmatmul.mubr.bf16.gmra.mrb[128].mxu0 %v3906_v23  ;;  %v1724_v53 = vadd.f32 %v4349_v2, %v4343_v54 }
 0x127   : > { %v4375_v14 = vadd.f32 %v3236_v38, %v1703_v34  ;;  %2276 = vmatprep.mubr.bf16.mxu1 %v3907_v29  ;;  %3605 = vmatprep.mubr.bf16.mxu0 %v3909_v31  ;;  %v3920_v34 = vld [vmem:[%s3991_s9 + $0x450] ss:$36 sps:$4 sm:$0xff]   ;;  %v3921_v38 = vld [vmem:[%s3991_s9 + $0x458] ss:$36 sps:$4 sm:$0xff]   ;;  %s2718_s9 = sshll.u32 %s4735_s16, 2 }
 0x128   : > { %s4672_s22 = scalar_lea.vmem %s4733_s3, %s2718_s9 }
 0x129   : > { %v3237_v40 = vpop.f32.mrb[24].mxu1  ;;  %v3149_v41 = vpop.f32.mrb[24].mxu0 }
 0x12a   : > { %v3238_v42 = vpop.f32.mrb[25].mxu1  ;;  %v3150_v43 = vpop.f32.mrb[25].mxu0 }
 0x12b   : > { %v3239_v48 = vadd.f32 %v3238_v42, %v3237_v40  ;;  %v3240_v49 = vpop.f32.mrb[26].mxu1  ;;  %v4381_v50 = vadd.f32 %v3150_v43, %v3149_v41  ;;  %v3152_v51 = vpop.f32.mrb[26].mxu0 }
 0x12c   : > { %v3241_v57 = vpop.f32.mrb[27].mxu1  ;;  %v3153_v58 = vpop.f32.mrb[27].mxu0 }
 0x12d   : > { %v4387_v61 = vadd.f32 %v3239_v48, %v1708_v21  ;;  %v3242_v63 = vadd.f32 %v3241_v57, %v3240_v49  ;;  %v4389_v0 = vadd.f32 %v3153_v58, %v3152_v51  ;;  %v1727_v21 = vadd.f32 %v4357_v15, %v4343_v54 }
 0x12e   : > { %2277 = vmatmul.mubr.bf16.gmra.mrb[132].mxu1 %v3910_v45  ;;  %3606 = vmatmul.mubr.bf16.gmra.mrb[132].mxu0 %v3911_v47 }
 0x12f   : > { %v4391_v30 = vadd.f32 %v3242_v63, %v1711_v59  ;;  %2284 = vmatprep.mubr.bf16.mxu1 %v3912_v55  ;;  %3609 = vmatprep.mubr.bf16.mxu0 %v3914_v56  ;;  %v1732_v59 = vadd.f32 %v4365_v26, %v4343_v54 }
 0x131   : > { %v3243_v1 = vpop.f32.mrb[28].mxu1  ;;  %v3155_v3 = vpop.f32.mrb[28].mxu0 }
 0x132   : > { %v3244_v6 = vpop.f32.mrb[29].mxu1  ;;  %v3156_v7 = vpop.f32.mrb[29].mxu0 }
 0x133   : > { %v3245_v10 = vadd.f32 %v3244_v6, %v3243_v1  ;;  %v3246_v13 = vpop.f32.mrb[30].mxu1  ;;  %v4397_v16 = vadd.f32 %v3156_v7, %v3155_v3  ;;  %v3158_v17 = vpop.f32.mrb[30].mxu0 }
 0x134   : > { %v3247_v22 = vpop.f32.mrb[31].mxu1  ;;  %v3159_v23 = vpop.f32.mrb[31].mxu0 }
 0x135   : > { %v4403_v24 = vadd.f32 %v3245_v10, %v1716_v37  ;;  %v3248_v25 = vadd.f32 %v3247_v22, %v3246_v13  ;;  %v4405_v27 = vadd.f32 %v3159_v23, %v3158_v17  ;;  %v1740_v22 = vadd.f32 %v4381_v50, %v4343_v54 }
 0x136   : > { %2285 = vmatmul.mubr.bf16.gmra.mrb[136].mxu1 %v3915_v8  ;;  %3610 = vmatmul.mubr.bf16.gmra.mrb[136].mxu0 %v3916_v9  ;;  %v1735_v8 = vadd.f32 %v4373_v39, %v4343_v54 }
 0x137   : > { %v4407_v46 = vadd.f32 %v3248_v25, %v1719_v5  ;;  %2292 = vmatprep.mubr.bf16.mxu1 %v3917_v18  ;;  %3613 = vmatprep.mubr.bf16.mxu0 %v3919_v19 }
 0x139   : > { %v3249_v29 = vpop.f32.mrb[32].mxu1  ;;  %v3161_v31 = vpop.f32.mrb[32].mxu0 }
 0x13a   : > { %v3250_v32 = vpop.f32.mrb[33].mxu1  ;;  %v3162_v33 = vpop.f32.mrb[33].mxu0 }
 0x13b   : > { %v3251_v40 = vadd.f32 %v3250_v32, %v3249_v29  ;;  %v3252_v41 = vpop.f32.mrb[34].mxu1  ;;  %v4413_v42 = vadd.f32 %v3162_v33, %v3161_v31  ;;  %v3164_v43 = vpop.f32.mrb[34].mxu0  ;;  %v1743_v32 = vadd.f32 %v4389_v0, %v4343_v54 }
 0x13c   : > { %v3253_v45 = vpop.f32.mrb[35].mxu1  ;;  %v3165_v47 = vpop.f32.mrb[35].mxu0 }
 0x13d   : > { %v4417_v48 = vadd.f32 %v3251_v40, %v1724_v53  ;;  %v3254_v49 = vadd.f32 %v3253_v45, %v3252_v41  ;;  %v3166_v51 = vadd.f32 %v3165_v47, %v3164_v43  ;;  %v1748_v45 = vadd.f32 %v4397_v16, %v4343_v54 }
 0x13e   : > { %2293 = vmatmul.mubr.bf16.gmra.mrb[140].mxu1 %v3920_v34  ;;  %3614 = vmatmul.mubr.bf16.gmra.mrb[140].mxu0 %v3921_v38 }
 0x13f   : > { %v4419_v55 = vadd.f32 %v3254_v49, %v1727_v21 }
 0x141   : > { %v3255_v56 = vpop.f32.mrb[36].mxu1  ;;  %v3167_v2 = vpop.f32.mrb[36].mxu0 }
 0x142   : > { %v3256_v57 = vpop.f32.mrb[37].mxu1  ;;  %v3168_v58 = vpop.f32.mrb[37].mxu0 }
 0x143   : > { %v3257_v63 = vadd.f32 %v3256_v57, %v3255_v56  ;;  %v3258_v1 = vpop.f32.mrb[38].mxu1  ;;  %v4423_v3 = vadd.f32 %v3168_v58, %v3167_v2  ;;  %v3170_v15 = vpop.f32.mrb[38].mxu0  ;;  %v1751_v57 = vadd.f32 %v4405_v27, %v4343_v54  ;;  %v1759_v27 = vadd.f32 %v3166_v51, %v4343_v54 }
 0x144   : > { %v3259_v6 = vpop.f32.mrb[39].mxu1  ;;  %v3171_v7 = vpop.f32.mrb[39].mxu0 }
 0x145   : > { %v4427_v9 = vadd.f32 %v3257_v63, %v1732_v59  ;;  %v3260_v37 = vadd.f32 %v3259_v6, %v3258_v1  ;;  %v3172_v10 = vadd.f32 %v3171_v7, %v3170_v15  ;;  %v1764_v51 = vadd.f32 %v4423_v3, %v4343_v54 }
 0x147   : > { %v4429_v13 = vadd.f32 %v3260_v37, %v1735_v8  ;;  %v1756_v8 = vadd.f32 %v4413_v42, %v4343_v54 }
 0x149   : > { %v3261_v17 = vpop.f32.mrb[40].mxu1  ;;  %v3173_v18 = vpop.f32.mrb[40].mxu0 }
 0x14a   : > { %v3262_v19 = vpop.f32.mrb[41].mxu1  ;;  %v3174_v26 = vpop.f32.mrb[41].mxu0 }
 0x14b   : > { %v3263_v23 = vadd.f32 %v3262_v19, %v3261_v17  ;;  %v3264_v5 = vpop.f32.mrb[42].mxu1  ;;  %v4433_v25 = vadd.f32 %v3174_v26, %v3173_v18  ;;  %v3176_v29 = vpop.f32.mrb[42].mxu0 }
 0x14c   : > { %v3265_v31 = vpop.f32.mrb[43].mxu1  ;;  %v3177_v39 = vpop.f32.mrb[43].mxu0 }
 0x14d   : > { %v4437_v33 = vadd.f32 %v3263_v23, %v1740_v22  ;;  %v3266_v34 = vadd.f32 %v3265_v31, %v3264_v5  ;;  %v4439_v38 = vadd.f32 %v3177_v39, %v3176_v29 }
 0x14f   : > { %v4441_v53 = vadd.f32 %v3266_v34, %v1743_v32 }
 0x151   : > { %v3267_v40 = vpop.f32.mrb[44].mxu1  ;;  %v3179_v41 = vpop.f32.mrb[44].mxu0 }
 0x152   : > { %v3268_v50 = vpop.f32.mrb[45].mxu1  ;;  %v3180_v43 = vpop.f32.mrb[45].mxu0 }
 0x153   : > { %v3269_v47 = vadd.f32 %v3268_v50, %v3267_v40  ;;  %v3270_v21 = vpop.f32.mrb[46].mxu1  ;;  %v4445_v49 = vadd.f32 %v3180_v43, %v3179_v41  ;;  %v3182_v56 = vpop.f32.mrb[46].mxu0 }
 0x154   : > { %v3271_v0 = vpop.f32.mrb[47].mxu1  ;;  %v3183_v2 = vpop.f32.mrb[47].mxu0 }
 0x155   : > { %v4449_v58 = vadd.f32 %v3269_v47, %v1748_v45  ;;  %v3272_v59 = vadd.f32 %v3271_v0, %v3270_v21  ;;  %v4451_v63 = vadd.f32 %v3183_v2, %v3182_v56 }
 0x157   : > { %v4453_v1 = vadd.f32 %v3272_v59, %v1751_v57 }
 0x159   : > { %v3273_v15 = vpop.f32.mrb[48].mxu1  ;;  %v3337_v6 = vpop.f32.mrb[48].mxu0 }
 0x15a   : > { %v3274_v16 = vpop.f32.mrb[49].mxu1  ;;  %v3338_v7 = vpop.f32.mrb[49].mxu0 }
 0x15b   : > { %v3275_v37 = vadd.f32 %v3274_v16, %v3273_v15  ;;  %v3339_v17 = vadd.f32 %v3338_v7, %v3337_v6  ;;  %v3276_v18 = vpop.f32.mrb[50].mxu1  ;;  %v3340_v19 = vpop.f32.mrb[50].mxu0 }
 0x15c   : > { %v3277_v26 = vpop.f32.mrb[51].mxu1  ;;  %v3341_v22 = vpop.f32.mrb[51].mxu0 }
 0x15d   : > { %v4458_v23 = vadd.f32 %v3275_v37, %v1756_v8  ;;  %v4461_v5 = vadd.f32 %v3339_v17, %v4355_v11  ;;  %v3278_v29 = vadd.f32 %v3277_v26, %v3276_v18  ;;  %v3342_v31 = vadd.f32 %v3341_v22, %v3340_v19 }
 0x15e   : > { %v1767_v11 = vadd.f32 %v3172_v10, %v4343_v54  ;;  %v1772_v10 = vadd.f32 %v4433_v25, %v4343_v54 }
 0x15f   : > { %v4463_v39 = vadd.f32 %v3278_v29, %v1759_v27  ;;  %v4466_v32 = vadd.f32 %v3342_v31, %v4359_v62 }
 0x161   : > { %v3279_v42 = vpop.f32.mrb[52].mxu1  ;;  %v3343_v34 = vpop.f32.mrb[52].mxu0 }
 0x162   : > { %v3280_v40 = vpop.f32.mrb[53].mxu1  ;;  %v3344_v41 = vpop.f32.mrb[53].mxu0 }
 0x163   : > { %v3281_v50 = vadd.f32 %v3280_v40, %v3279_v42  ;;  %v3345_v43 = vadd.f32 %v3344_v41, %v3343_v34  ;;  %v3282_v45 = vpop.f32.mrb[54].mxu1  ;;  %v3346_v47 = vpop.f32.mrb[54].mxu0 }
 0x164   : > { %v3283_v21 = vpop.f32.mrb[55].mxu1  ;;  %v3347_v56 = vpop.f32.mrb[55].mxu0 }
 0x165   : > { %v4471_v0 = vadd.f32 %v3281_v50, %v1764_v51  ;;  %v4474_v62 = vadd.f32 %v3345_v43, %v4371_v35  ;;  %v3284_v2 = vadd.f32 %v3283_v21, %v3282_v45  ;;  %v3348_v57 = vadd.f32 %v3347_v56, %v3346_v47 }
 0x166   : > { %v1775_v35 = vadd.f32 %v4439_v38, %v4343_v54  ;;  %v1780_v38 = vadd.f32 %v4445_v49, %v4343_v54 }
 0x167   : > { %v4476_v59 = vadd.f32 %v3284_v2, %v1767_v11  ;;  %v4479_v15 = vadd.f32 %v3348_v57, %v4375_v14 }
 0x169   : > { %v3285_v3 = vpop.f32.mrb[56].mxu1  ;;  %v3349_v6 = vpop.f32.mrb[56].mxu0 }
 0x16a   : > { %v3286_v16 = vpop.f32.mrb[57].mxu1  ;;  %v3350_v7 = vpop.f32.mrb[57].mxu0 }
 0x16b   : > { %v3287_v8 = vadd.f32 %v3286_v16, %v3285_v3  ;;  %v3351_v37 = vadd.f32 %v3350_v7, %v3349_v6  ;;  %v3288_v17 = vpop.f32.mrb[58].mxu1  ;;  %v3352_v18 = vpop.f32.mrb[58].mxu0 }
 0x16c   : > { %v3289_v19 = vpop.f32.mrb[59].mxu1  ;;  %v3353_v27 = vpop.f32.mrb[59].mxu0 }
 0x16d   : > { %v4485_v26 = vadd.f32 %v3287_v8, %v1772_v10  ;;  %v4488_v14 = vadd.f32 %v3351_v37, %v4387_v61  ;;  %v3290_v22 = vadd.f32 %v3289_v19, %v3288_v17  ;;  %v3354_v29 = vadd.f32 %v3353_v27, %v3352_v18 }
 0x16e   : > { %v1783_v61 = vadd.f32 %v4451_v63, %v4343_v54  ;;  %v1788_v63 = vadd.f32 %v4294_v60, %v4343_v54 }
 0x16f   : > { %v4490_v31 = vadd.f32 %v3290_v22, %v1775_v35  ;;  %v4493_v25 = vadd.f32 %v3354_v29, %v4391_v30 }
 0x171   : > { %v3291_v42 = vpop.f32.mrb[60].mxu1  ;;  %v3355_v34 = vpop.f32.mrb[60].mxu0 }
 0x172   : > { %v3292_v40 = vpop.f32.mrb[61].mxu1  ;;  %v3356_v41 = vpop.f32.mrb[61].mxu0 }
 0x173   : > { %v3293_v51 = vadd.f32 %v3292_v40, %v3291_v42  ;;  %v3357_v50 = vadd.f32 %v3356_v41, %v3355_v34  ;;  %v3294_v43 = vpop.f32.mrb[62].mxu1  ;;  %v3358_v45 = vpop.f32.mrb[62].mxu0 }
 0x174   : > { %v3295_v47 = vpop.f32.mrb[63].mxu1  ;;  %v3359_v11 = vpop.f32.mrb[63].mxu0 }
 0x175   : > { %v4499_v21 = vadd.f32 %v3293_v51, %v1780_v38  ;;  %v4502_v30 = vadd.f32 %v3357_v50, %v4403_v24  ;;  %v3296_v56 = vadd.f32 %v3295_v47, %v3294_v43  ;;  %v3360_v2 = vadd.f32 %v3359_v11, %v3358_v45 }
 0x176   : > { %v1791_v24 = vadd.f32 %v4300_v4, %v4343_v54  ;;  %v1796_v4 = vadd.f32 %v4306_v12, %v4343_v54 }
 0x177   : > { %v4504_v57 = vadd.f32 %v3296_v56, %v1783_v61  ;;  %v4507_v49 = vadd.f32 %v3360_v2, %v4407_v46 }
 0x179   : > { %v3297_v3 = vpop.f32.mrb[64].mxu1  ;;  %v3361_v6 = vpop.f32.mrb[64].mxu0 }
 0x17a   : > { %v3298_v16 = vpop.f32.mrb[65].mxu1  ;;  %v3362_v7 = vpop.f32.mrb[65].mxu0 }
 0x17b   : > { %v3299_v10 = vadd.f32 %v3298_v16, %v3297_v3  ;;  %v3363_v8 = vadd.f32 %v3362_v7, %v3361_v6  ;;  %v3300_v37 = vpop.f32.mrb[66].mxu1  ;;  %v3364_v17 = vpop.f32.mrb[66].mxu0 }
 0x17c   : > { %v3301_v18 = vpop.f32.mrb[67].mxu1  ;;  %v3365_v35 = vpop.f32.mrb[67].mxu0 }
 0x17d   : > { %v4513_v19 = vadd.f32 %v3299_v10, %v1788_v63  ;;  %v4516_v46 = vadd.f32 %v3363_v8, %v4417_v48  ;;  %v3302_v27 = vadd.f32 %v3301_v18, %v3300_v37  ;;  %v3366_v22 = vadd.f32 %v3365_v35, %v3364_v17 }
 0x17e   : > { %v1799_v48 = vadd.f32 %v4312_v20, %v4343_v54  ;;  %v1804_v20 = vadd.f32 %v4318_v28, %v4343_v54 }
 0x17f   : > { %v4518_v29 = vadd.f32 %v3302_v27, %v1791_v24  ;;  %v4521_v60 = vadd.f32 %v3366_v22, %v4419_v55 }
 0x181   : > { %v3303_v42 = vpop.f32.mrb[68].mxu1  ;;  %v3367_v34 = vpop.f32.mrb[68].mxu0 }
 0x182   : > { %v3304_v40 = vpop.f32.mrb[69].mxu1  ;;  %v3368_v41 = vpop.f32.mrb[69].mxu0 }
 0x183   : > { %v3305_v38 = vadd.f32 %v3304_v40, %v3303_v42  ;;  %v3369_v51 = vadd.f32 %v3368_v41, %v3367_v34  ;;  %v3306_v50 = vpop.f32.mrb[70].mxu1  ;;  %v3370_v43 = vpop.f32.mrb[70].mxu0 }
 0x184   : > { %v3307_v45 = vpop.f32.mrb[71].mxu1  ;;  %v3371_v61 = vpop.f32.mrb[71].mxu0 }
 0x185   : > { %v4527_v47 = vadd.f32 %v3305_v38, %v1796_v4  ;;  %v4530_v55 = vadd.f32 %v3369_v51, %v4427_v9  ;;  %v3308_v11 = vadd.f32 %v3307_v45, %v3306_v50  ;;  %v3372_v56 = vadd.f32 %v3371_v61, %v3370_v43 }
 0x186   : > { %v1807_v9 = vadd.f32 %v4324_v36, %v4343_v54  ;;  %v1812_v36 = vadd.f32 %v4330_v44, %v4343_v54 }
 0x187   : > { %v4532_v2 = vadd.f32 %v3308_v11, %v1799_v48  ;;  %v4535_v12 = vadd.f32 %v3372_v56, %v4429_v13 }
 0x189   : > { %v3309_v3 = vpop.f32.mrb[72].mxu1  ;;  %v3373_v6 = vpop.f32.mrb[72].mxu0 }
 0x18a   : > { %v3310_v16 = vpop.f32.mrb[73].mxu1  ;;  %v3374_v7 = vpop.f32.mrb[73].mxu0 }
 0x18b   : > { %v3311_v63 = vadd.f32 %v3310_v16, %v3309_v3  ;;  %v3375_v10 = vadd.f32 %v3374_v7, %v3373_v6  ;;  %v3312_v8 = vpop.f32.mrb[74].mxu1  ;;  %v3376_v37 = vpop.f32.mrb[74].mxu0 }
 0x18c   : > { %v3313_v17 = vpop.f32.mrb[75].mxu1  ;;  %v3377_v24 = vpop.f32.mrb[75].mxu0 }
 0x18d   : > { %v4541_v18 = vadd.f32 %v3311_v63, %v1804_v20  ;;  %v4544_v13 = vadd.f32 %v3375_v10, %v4437_v33  ;;  %v3314_v35 = vadd.f32 %v3313_v17, %v3312_v8  ;;  %v3378_v27 = vadd.f32 %v3377_v24, %v3376_v37 }
 0x18e   : > { %v1815_v33 = vadd.f32 %v4336_v52, %v4343_v54 }
 0x18f   : > { %v4546_v22 = vadd.f32 %v3314_v35, %v1807_v9  ;;  %v4549_v28 = vadd.f32 %v3378_v27, %v4441_v53 }
 0x191   : > { %v3315_v42 = vpop.f32.mrb[76].mxu1  ;;  %v3379_v34 = vpop.f32.mrb[76].mxu0 }
 0x192   : > { %v3316_v40 = vpop.f32.mrb[77].mxu1  ;;  %v3380_v41 = vpop.f32.mrb[77].mxu0 }
 0x193   : > { %v3317_v4 = vadd.f32 %v3316_v40, %v3315_v42  ;;  %v3381_v38 = vadd.f32 %v3380_v41, %v3379_v34  ;;  %v3318_v51 = vpop.f32.mrb[78].mxu1  ;;  %v3382_v50 = vpop.f32.mrb[78].mxu0 }
 0x194   : > { %v3319_v43 = vpop.f32.mrb[79].mxu1  ;;  %v3383_v48 = vpop.f32.mrb[79].mxu0 }
 0x195   : > { %v4555_v45 = vadd.f32 %v3317_v4, %v1812_v36  ;;  %v4558_v53 = vadd.f32 %v3381_v38, %v4449_v58  ;;  %v3320_v61 = vadd.f32 %v3319_v43, %v3318_v51  ;;  %v3384_v11 = vadd.f32 %v3383_v48, %v3382_v50 }
 0x197   : > { %v4560_v56 = vadd.f32 %v3320_v61, %v1815_v33  ;;  %v4563_v44 = vadd.f32 %v3384_v11, %v4453_v1 }
 0x199   : > { %v3385_v3 = vpop.f32.mrb[80].mxu0  ;;  %v3449_v6 = vpop.f32.mrb[80].mxu1 }
 0x19a   : > { %v3386_v16 = vpop.f32.mrb[81].mxu0  ;;  %v3450_v7 = vpop.f32.mrb[81].mxu1 }
 0x19b   : > { %v3387_v20 = vadd.f32 %v3386_v16, %v3385_v3  ;;  %v3451_v52 = vadd.f32 %v3450_v7, %v3449_v6  ;;  %v3388_v54 = vpop.f32.mrb[82].mxu0  ;;  %v3452_v63 = vpop.f32.mrb[82].mxu1 }
 0x19c   : > { %v3389_v10 = vpop.f32.mrb[83].mxu0  ;;  %v3453_v8 = vpop.f32.mrb[83].mxu1 }
 0x19d   : > { %v4566_v58 = vadd.f32 %v3387_v20, %v4458_v23  ;;  %v3390_v37 = vadd.f32 %v3389_v10, %v3388_v54  ;;  %v3454_v9 = vadd.f32 %v3453_v8, %v3452_v63  ;;  %v4569_v17 = vadd.f32 %v3451_v52, %v4461_v5 }
 0x19f   : > { %v4572_v1 = vadd.f32 %v3390_v37, %v4463_v39  ;;  %v4575_v24 = vadd.f32 %v3454_v9, %v4466_v32 }
 0x1a1   : > { %v3391_v35 = vpop.f32.mrb[84].mxu0  ;;  %v3455_v27 = vpop.f32.mrb[84].mxu1 }
 0x1a2   : > { %v3392_v42 = vpop.f32.mrb[85].mxu0  ;;  %v3456_v34 = vpop.f32.mrb[85].mxu1 }
 0x1a3   : > { %v3393_v40 = vadd.f32 %v3392_v42, %v3391_v35  ;;  %v3457_v41 = vadd.f32 %v3456_v34, %v3455_v27  ;;  %v3394_v36 = vpop.f32.mrb[86].mxu0  ;;  %v3458_v23 = vpop.f32.mrb[86].mxu1 }
 0x1a4   : > { %v3395_v4 = vpop.f32.mrb[87].mxu0  ;;  %v3459_v38 = vpop.f32.mrb[87].mxu1 }
 0x1a5   : > { %v4578_v51 = vadd.f32 %v3393_v40, %v4471_v0  ;;  %v3396_v5 = vadd.f32 %v3395_v4, %v3394_v36  ;;  %v3460_v50 = vadd.f32 %v3459_v38, %v3458_v23  ;;  %v4581_v39 = vadd.f32 %v3457_v41, %v4474_v62 }
 0x1a7   : > { %v4584_v32 = vadd.f32 %v3396_v5, %v4476_v59  ;;  %v4587_v33 = vadd.f32 %v3460_v50, %v4479_v15 }
 0x1a9   : > { %v3397_v43 = vpop.f32.mrb[88].mxu0  ;;  %v3461_v48 = vpop.f32.mrb[88].mxu1 }
 0x1aa   : > { %v3398_v61 = vpop.f32.mrb[89].mxu0  ;;  %v3462_v11 = vpop.f32.mrb[89].mxu1 }
 0x1ab   : > { %v3399_v3 = vadd.f32 %v3398_v61, %v3397_v43  ;;  %v3463_v6 = vadd.f32 %v3462_v11, %v3461_v48  ;;  %v3400_v16 = vpop.f32.mrb[90].mxu0  ;;  %v3464_v0 = vpop.f32.mrb[90].mxu1 }
 0x1ac   : > { %v3401_v7 = vpop.f32.mrb[91].mxu0  ;;  %v3465_v20 = vpop.f32.mrb[91].mxu1 }
 0x1ad   : > { %v4590_v52 = vadd.f32 %v3399_v3, %v4485_v26  ;;  %v3402_v62 = vadd.f32 %v3401_v7, %v3400_v16  ;;  %v3466_v54 = vadd.f32 %v3465_v20, %v3464_v0  ;;  %v4593_v59 = vadd.f32 %v3463_v6, %v4488_v14 }
 0x1af   : > { %v4596_v15 = vadd.f32 %v3402_v62, %v4490_v31  ;;  %v4599_v63 = vadd.f32 %v3466_v54, %v4493_v25 }
 0x1b1   : > { %v3403_v10 = vpop.f32.mrb[92].mxu0  ;;  %v3467_v8 = vpop.f32.mrb[92].mxu1 }
 0x1b2   : > { %v3404_v37 = vpop.f32.mrb[93].mxu0  ;;  %v3468_v9 = vpop.f32.mrb[93].mxu1 }
 0x1b3   : > { %v3405_v35 = vadd.f32 %v3404_v37, %v3403_v10  ;;  %v3469_v27 = vadd.f32 %v3468_v9, %v3467_v8  ;;  %v3406_v42 = vpop.f32.mrb[94].mxu0  ;;  %v3470_v26 = vpop.f32.mrb[94].mxu1 }
 0x1b4   : > { %v3407_v34 = vpop.f32.mrb[95].mxu0  ;;  %v3471_v40 = vpop.f32.mrb[95].mxu1 }
 0x1b5   : > { %v4602_v41 = vadd.f32 %v3405_v35, %v4499_v21  ;;  %v3408_v14 = vadd.f32 %v3407_v34, %v3406_v42  ;;  %v3472_v36 = vadd.f32 %v3471_v40, %v3470_v26  ;;  %v4605_v31 = vadd.f32 %v3469_v27, %v4502_v30 }
 0x1b7   : > { %v4608_v25 = vadd.f32 %v3408_v14, %v4504_v57  ;;  %v4611_v23 = vadd.f32 %v3472_v36, %v4507_v49 }
 0x1b9   : > { %v3409_v4 = vpop.f32.mrb[96].mxu0  ;;  %v3473_v38 = vpop.f32.mrb[96].mxu1 }
 0x1ba   : > { %v3410_v5 = vpop.f32.mrb[97].mxu0  ;;  %v3474_v50 = vpop.f32.mrb[97].mxu1 }
 0x1bb   : > { %v3411_v43 = vadd.f32 %v3410_v5, %v3409_v4  ;;  %v3475_v48 = vadd.f32 %v3474_v50, %v3473_v38  ;;  %v3412_v61 = vpop.f32.mrb[98].mxu0  ;;  %v3476_v21 = vpop.f32.mrb[98].mxu1 }
 0x1bc   : > { %v3413_v11 = vpop.f32.mrb[99].mxu0  ;;  %v3477_v3 = vpop.f32.mrb[99].mxu1 }
 0x1bd   : > { %v4614_v6 = vadd.f32 %v3411_v43, %v4513_v19  ;;  %v3414_v30 = vadd.f32 %v3413_v11, %v3412_v61  ;;  %v3478_v16 = vadd.f32 %v3477_v3, %v3476_v21  ;;  %v4617_v57 = vadd.f32 %v3475_v48, %v4516_v46 }
 0x1bf   : > { %v4620_v49 = vadd.f32 %v3414_v30, %v4518_v29  ;;  %v4623_v0 = vadd.f32 %v3478_v16, %v4521_v60 }
 0x1c1   : > { %v3415_v7 = vpop.f32.mrb[100].mxu0  ;;  %v3479_v20 = vpop.f32.mrb[100].mxu1 }
 0x1c2   : > { %v3416_v62 = vpop.f32.mrb[101].mxu0  ;;  %v3480_v54 = vpop.f32.mrb[101].mxu1 }
 0x1c3   : > { %v3417_v10 = vadd.f32 %v3416_v62, %v3415_v7  ;;  %v3481_v8 = vadd.f32 %v3480_v54, %v3479_v20  ;;  %v3418_v37 = vpop.f32.mrb[102].mxu0  ;;  %v3482_v19 = vpop.f32.mrb[102].mxu1 }
 0x1c4   : > { %v3419_v9 = vpop.f32.mrb[103].mxu0  ;;  %v3483_v35 = vpop.f32.mrb[103].mxu1 }
 0x1c5   : > { %v4626_v27 = vadd.f32 %v3417_v10, %v4527_v47  ;;  %v3420_v46 = vadd.f32 %v3419_v9, %v3418_v37  ;;  %v3484_v42 = vadd.f32 %v3483_v35, %v3482_v19  ;;  %v4629_v29 = vadd.f32 %v3481_v8, %v4530_v55 }
 0x1c7   : > { %v4632_v60 = vadd.f32 %v3420_v46, %v4532_v2  ;;  %v4635_v26 = vadd.f32 %v3484_v42, %v4535_v12 }
 0x1c9   : > { %v3421_v34 = vpop.f32.mrb[104].mxu0  ;;  %v3485_v40 = vpop.f32.mrb[104].mxu1 }
 0x1ca   : > { %v3422_v14 = vpop.f32.mrb[105].mxu0  ;;  %v3486_v36 = vpop.f32.mrb[105].mxu1 }
 0x1cb   : > { %v3423_v4 = vadd.f32 %v3422_v14, %v3421_v34  ;;  %v3487_v38 = vadd.f32 %v3486_v36, %v3485_v40  ;;  %v3424_v5 = vpop.f32.mrb[106].mxu0  ;;  %v3488_v47 = vpop.f32.mrb[106].mxu1 }
 0x1cc   : > { %v3425_v50 = vpop.f32.mrb[107].mxu0  ;;  %v3489_v43 = vpop.f32.mrb[107].mxu1 }
 0x1cd   : > { %v4638_v48 = vadd.f32 %v3423_v4, %v4541_v18  ;;  %v3426_v55 = vadd.f32 %v3425_v50, %v3424_v5  ;;  %v3490_v61 = vadd.f32 %v3489_v43, %v3488_v47  ;;  %v4641_v2 = vadd.f32 %v3487_v38, %v4544_v13 }
 0x1cf   : > { %v4644_v12 = vadd.f32 %v3426_v55, %v4546_v22  ;;  %v4647_v21 = vadd.f32 %v3490_v61, %v4549_v28 }
 0x1d1   : > { %v3427_v11 = vpop.f32.mrb[108].mxu0  ;;  %v3491_v3 = vpop.f32.mrb[108].mxu1 }
 0x1d2   : > { %v3428_v30 = vpop.f32.mrb[109].mxu0  ;;  %v3492_v16 = vpop.f32.mrb[109].mxu1 }
 0x1d3   : > { %v3429_v7 = vadd.f32 %v3428_v30, %v3427_v11  ;;  %v3493_v20 = vadd.f32 %v3492_v16, %v3491_v3  ;;  %v3430_v62 = vpop.f32.mrb[110].mxu0  ;;  %v3494_v18 = vpop.f32.mrb[110].mxu1 }
 0x1d4   : > { %v3431_v54 = vpop.f32.mrb[111].mxu0  ;;  %v3495_v10 = vpop.f32.mrb[111].mxu1 }
 0x1d5   : > { %v4650_v13 = vadd.f32 %v3429_v7, %v4555_v45  ;;  %v3432_v8 = vadd.f32 %v3431_v54, %v3430_v62  ;;  %v3496_v22 = vadd.f32 %v3495_v10, %v3494_v18  ;;  %v4653_v37 = vadd.f32 %v3493_v20, %v4558_v53 }
 0x1d7   : > { %v4656_v28 = vadd.f32 %v3432_v8, %v4560_v56  ;;  %v4659_v19 = vadd.f32 %v3496_v22, %v4563_v44 }
 0x1d9   : > { %v3497_v9 = vpop.f32.mrb[112].mxu1  ;;  %v3587_v35 = vpop.f32.mrb[112].mxu0 }
 0x1da   : > { %v2344_v46 = vadd.f32 %v3587_v35, %v4581_v39  ;;  %v3498_v42 = vpop.f32.mrb[113].mxu1  ;;  %v2335_v34 = vpop.f32.mrb[113].mxu0 }
 0x1db   : > { %v3499_v40 = vadd.f32 %v3498_v42, %v3497_v9  ;;  %v2336_v45 = vadd.f32 %v2335_v34, %v4569_v17  ;;  %v3500_v14 = vpop.f32.mrb[114].mxu1  ;;  %v3588_v36 = vpop.f32.mrb[114].mxu0 }
 0x1dc   : > { %v2347_v53 = vadd.f32 %v3588_v36, %v4587_v33  ;;  %v3501_v4 = vpop.f32.mrb[115].mxu1  ;;  %v2338_v56 = vpop.f32.mrb[115].mxu0  ;;  %v2464_v47 = vmax.f32 %v2344_v46, 0.0 }
 0x1dd   : > { %v3502_v38 = vadd.f32 %v3501_v4, %v3500_v14  ;;  %v2339_v44 = vadd.f32 %v2338_v56, %v4575_v24  ;;  %v4667_v5 = vadd.f32 %v3499_v40, %v4566_v58  ;;  %v2462_v50 = vmax.f32 %v2336_v45, 0.0 }
 0x1de   : > { %v2465_v39 = vmax.f32 %v2347_v53, 0.0 }
 0x1df   : > { %v2463_v17 = vmax.f32 %v2339_v44, 0.0  ;;  %v4675_v33 = vadd.f32 %v3502_v38, %v4572_v1 }
 0x1e0   : > { %v3010_v43 = vpack.c.bf16 %v2465_v39, %v2464_v47 }
 0x1e1   : > { %v3005_v55 = vpack.c.bf16 %v2463_v17, %v2462_v50  ;;  %v3503_v24 = vpop.f32.mrb[116].mxu1  ;;  %v3591_v61 = vpop.f32.mrb[116].mxu0 }
 0x1e2   : > { %3082 = vst [vmem:[%s4672_s22 + $0x8] sm:$0xff] %v3010_v43   ;;  %v2360_v58 = vadd.f32 %v3591_v61, %v4605_v31  ;;  %v3504_v11 = vpop.f32.mrb[117].mxu1  ;;  %v2351_v3 = vpop.f32.mrb[117].mxu0 }
 0x1e3   : > { %3006 = vst [vmem:[%s4672_s22] sm:$0xff] %v3005_v55   ;;  %v3505_v30 = vadd.f32 %v3504_v11, %v3503_v24  ;;  %v2352_v16 = vadd.f32 %v2351_v3, %v4593_v59  ;;  %v3506_v7 = vpop.f32.mrb[118].mxu1  ;;  %v3592_v20 = vpop.f32.mrb[118].mxu0 }
 0x1e4   : > { %v2363_v62 = vadd.f32 %v3592_v20, %v4611_v23  ;;  %v3507_v1 = vpop.f32.mrb[119].mxu1  ;;  %v2354_v18 = vpop.f32.mrb[119].mxu0  ;;  %v2468_v31 = vmax.f32 %v2360_v58, 0.0 }
 0x1e5   : > { %v3508_v54 = vadd.f32 %v3507_v1, %v3506_v7  ;;  %v2355_v10 = vadd.f32 %v2354_v18, %v4599_v63  ;;  %v2247_v8 = vadd.f32 %v3505_v30, %v4578_v51  ;;  %v2466_v9 = vmax.f32 %v2352_v16, 0.0 }
 0x1e6   : > { %v2469_v22 = vmax.f32 %v2363_v62, 0.0 }
 0x1e7   : > { %v2467_v35 = vmax.f32 %v2355_v10, 0.0  ;;  %v2250_v46 = vadd.f32 %v3508_v54, %v4584_v32 }
 0x1e8   : > { %v3020_v59 = vpack.c.bf16 %v2469_v22, %v2468_v31 }
 0x1e9   : > { %v3015_v42 = vpack.c.bf16 %v2467_v35, %v2466_v9  ;;  %v3509_v34 = vpop.f32.mrb[120].mxu1  ;;  %v3595_v40 = vpop.f32.mrb[120].mxu0 }
 0x1ea   : > { %3084 = vst [vmem:[%s4672_s22 + $0x18] sm:$0xff] %v3020_v59   ;;  %v2376_v23 = vadd.f32 %v3595_v40, %v4629_v29  ;;  %v3510_v45 = vpop.f32.mrb[121].mxu1  ;;  %v2367_v14 = vpop.f32.mrb[121].mxu0 }
 0x1eb   : > { %3083 = vst [vmem:[%s4672_s22 + $0x10] sm:$0xff] %v3015_v42   ;;  %v3511_v36 = vadd.f32 %v3510_v45, %v3509_v34  ;;  %v2368_v63 = vadd.f32 %v2367_v14, %v4617_v57  ;;  %v3512_v51 = vpop.f32.mrb[122].mxu1  ;;  %v3596_v53 = vpop.f32.mrb[122].mxu0 }
 0x1ec   : > { %v2379_v4 = vadd.f32 %v3596_v53, %v4635_v26  ;;  %v3513_v56 = vpop.f32.mrb[123].mxu1  ;;  %v2370_v32 = vpop.f32.mrb[123].mxu0  ;;  %v2472_v29 = vmax.f32 %v2376_v23, 0.0 }
 0x1ed   : > { %v3514_v38 = vadd.f32 %v3513_v56, %v3512_v51  ;;  %v2371_v44 = vadd.f32 %v2370_v32, %v4623_v0  ;;  %v4692_v47 = vadd.f32 %v3511_v36, %v4590_v52  ;;  %v2470_v50 = vmax.f32 %v2368_v63, 0.0 }
 0x1ee   : > { %v2473_v39 = vmax.f32 %v2379_v4, 0.0 }
 0x1ef   : > { %v2471_v17 = vmax.f32 %v2371_v44, 0.0  ;;  %v4695_v57 = vadd.f32 %v3514_v38, %v4596_v15 }
 0x1f0   : > { %v3030_v43 = vpack.c.bf16 %v2473_v39, %v2472_v29 }
 0x1f1   : > { %v3025_v55 = vpack.c.bf16 %v2471_v17, %v2470_v50  ;;  %v3515_v24 = vpop.f32.mrb[124].mxu1  ;;  %v3599_v26 = vpop.f32.mrb[124].mxu0 }
 0x1f2   : > { %3086 = vst [vmem:[%s4672_s22 + $0x28] sm:$0xff] %v3030_v43   ;;  %v2392_v61 = vadd.f32 %v3599_v26, %v4653_v37  ;;  %v3516_v58 = vpop.f32.mrb[125].mxu1  ;;  %v2383_v11 = vpop.f32.mrb[125].mxu0 }
 0x1f3   : > { %3085 = vst [vmem:[%s4672_s22 + $0x20] sm:$0xff] %v3025_v55   ;;  %v3517_v0 = vadd.f32 %v3516_v58, %v3515_v24  ;;  %v2384_v52 = vadd.f32 %v2383_v11, %v4641_v2  ;;  %v3518_v3 = vpop.f32.mrb[126].mxu1  ;;  %v3600_v30 = vpop.f32.mrb[126].mxu0 }
 0x1f4   : > { %v2395_v16 = vadd.f32 %v3600_v30, %v4659_v19  ;;  %v3519_v15 = vpop.f32.mrb[127].mxu1  ;;  %v2386_v7 = vpop.f32.mrb[127].mxu0  ;;  %v2476_v37 = vmax.f32 %v2392_v61, 0.0 }
 0x1f5   : > { %v3520_v20 = vadd.f32 %v3519_v15, %v3518_v3  ;;  %v2387_v62 = vadd.f32 %v2386_v7, %v4647_v21  ;;  %v2263_v1 = vadd.f32 %v3517_v0, %v4602_v41  ;;  %v2474_v54 = vmax.f32 %v2384_v52, 0.0 }
 0x1f6   : > { %v2477_v18 = vmax.f32 %v2395_v16, 0.0 }
 0x1f7   : > { %v2475_v10 = vmax.f32 %v2387_v62, 0.0  ;;  %v2266_v31 = vadd.f32 %v3520_v20, %v4608_v25 }
 0x1f8   : > { %v3040_v2 = vpack.c.bf16 %v2477_v18, %v2476_v37 }
 0x1f9   : > { %v3035_v22 = vpack.c.bf16 %v2475_v10, %v2474_v54  ;;  %v3521_v9 = vpop.f32.mrb[128].mxu1  ;;  %v3603_v35 = vpop.f32.mrb[128].mxu0 }
 0x1fa   : > { %3088 = vst [vmem:[%s4672_s22 + $0x38] sm:$0xff] %v3040_v2   ;;  %v2408_v19 = vadd.f32 %v3603_v35, %v2247_v8  ;;  %v3522_v59 = vpop.f32.mrb[129].mxu1  ;;  %v2399_v42 = vpop.f32.mrb[129].mxu0 }
 0x1fb   : > { %3087 = vst [vmem:[%s4672_s22 + $0x30] sm:$0xff] %v3035_v22   ;;  %v3523_v34 = vadd.f32 %v3522_v59, %v3521_v9  ;;  %v2400_v21 = vadd.f32 %v2399_v42, %v4667_v5  ;;  %v3524_v40 = vpop.f32.mrb[130].mxu1  ;;  %v3604_v41 = vpop.f32.mrb[130].mxu0 }
 0x1fc   : > { %v2411_v23 = vadd.f32 %v3604_v41, %v2250_v46  ;;  %v3525_v45 = vpop.f32.mrb[131].mxu1  ;;  %v2402_v14 = vpop.f32.mrb[131].mxu0  ;;  %v2480_v51 = vmax.f32 %v2408_v19, 0.0 }
 0x1fd   : > { %v3526_v36 = vadd.f32 %v3525_v45, %v3524_v40  ;;  %v2403_v25 = vadd.f32 %v2402_v14, %v4675_v33  ;;  %v2271_v63 = vadd.f32 %v3523_v34, %v4614_v6  ;;  %v2478_v53 = vmax.f32 %v2400_v21, 0.0 }
 0x1fe   : > { %v2481_v8 = vmax.f32 %v2411_v23, 0.0 }
 0x1ff   : > { %v2479_v4 = vmax.f32 %v2403_v25, 0.0  ;;  %v2274_v56 = vadd.f32 %v3526_v36, %v4620_v49 }
 0x200   : > { %v3050_v32 = vpack.c.bf16 %v2481_v8, %v2480_v51 }
 0x201   : > { %v3045_v5 = vpack.c.bf16 %v2479_v4, %v2478_v53  ;;  %v3527_v38 = vpop.f32.mrb[132].mxu1  ;;  %v3607_v44 = vpop.f32.mrb[132].mxu0 }
 0x202   : > { %3090 = vst [vmem:[%s4672_s22 + $0x48] sm:$0xff] %v3050_v32   ;;  %v2424_v46 = vadd.f32 %v3607_v44, %v2263_v1  ;;  %v3528_v29 = vpop.f32.mrb[133].mxu1  ;;  %v2415_v39 = vpop.f32.mrb[133].mxu0 }
 0x203   : > { %3089 = vst [vmem:[%s4672_s22 + $0x40] sm:$0xff] %v3045_v5   ;;  %v3529_v50 = vadd.f32 %v3528_v29, %v3527_v38  ;;  %v2416_v33 = vadd.f32 %v2415_v39, %v4692_v47  ;;  %v3530_v17 = vpop.f32.mrb[134].mxu1  ;;  %v3608_v6 = vpop.f32.mrb[134].mxu0 }
 0x204   : > { %v2427_v43 = vadd.f32 %v3608_v6, %v2266_v31  ;;  %v3531_v55 = vpop.f32.mrb[135].mxu1  ;;  %v2418_v24 = vpop.f32.mrb[135].mxu0  ;;  %v2484_v58 = vmax.f32 %v2424_v46, 0.0 }
 0x205   : > { %v3532_v26 = vadd.f32 %v3531_v55, %v3530_v17  ;;  %v2419_v49 = vadd.f32 %v2418_v24, %v4695_v57  ;;  %v2279_v61 = vadd.f32 %v3529_v50, %v4626_v27  ;;  %v2482_v0 = vmax.f32 %v2416_v33, 0.0 }
 0x206   : > { %v2485_v11 = vmax.f32 %v2427_v43, 0.0 }
 0x207   : > { %v2483_v52 = vmax.f32 %v2419_v49, 0.0  ;;  %v2282_v3 = vadd.f32 %v3532_v26, %v4632_v60 }
 0x208   : > { %v3060_v30 = vpack.c.bf16 %v2485_v11, %v2484_v58 }
 0x209   : > { %v3055_v47 = vpack.c.bf16 %v2483_v52, %v2482_v0  ;;  %v3533_v16 = vpop.f32.mrb[136].mxu1  ;;  %v3611_v15 = vpop.f32.mrb[136].mxu0 }
 0x20a   : > { %3092 = vst [vmem:[%s4672_s22 + $0x58] sm:$0xff] %v3060_v30   ;;  %v2440_v7 = vadd.f32 %v3611_v15, %v2279_v61  ;;  %v3534_v20 = vpop.f32.mrb[137].mxu1  ;;  %v2431_v62 = vpop.f32.mrb[137].mxu0 }
 0x20b   : > { %3091 = vst [vmem:[%s4672_s22 + $0x50] sm:$0xff] %v3055_v47   ;;  %v3535_v1 = vadd.f32 %v3534_v20, %v3533_v16  ;;  %v2432_v37 = vadd.f32 %v2431_v62, %v2271_v63  ;;  %v3536_v57 = vpop.f32.mrb[138].mxu1  ;;  %v3612_v18 = vpop.f32.mrb[138].mxu0 }
 0x20c   : > { %v2443_v27 = vadd.f32 %v3612_v18, %v2282_v3  ;;  %v3537_v54 = vpop.f32.mrb[139].mxu1  ;;  %v2434_v10 = vpop.f32.mrb[139].mxu0  ;;  %v2488_v22 = vmax.f32 %v2440_v7, 0.0 }
 0x20d   : > { %v3538_v31 = vadd.f32 %v3537_v54, %v3536_v57  ;;  %v2435_v60 = vadd.f32 %v2434_v10, %v2274_v56  ;;  %v2287_v2 = vadd.f32 %v3535_v1, %v4638_v48  ;;  %v2486_v35 = vmax.f32 %v2432_v37, 0.0 }
 0x20e   : > { %v2489_v9 = vmax.f32 %v2443_v27, 0.0 }
 0x20f   : > { %v2487_v19 = vmax.f32 %v2435_v60, 0.0  ;;  %v2290_v59 = vadd.f32 %v3538_v31, %v4644_v12 }
 0x210   : > { %v3070_v42 = vpack.c.bf16 %v2489_v9, %v2488_v22 }
 0x211   : > { %v3065_v34 = vpack.c.bf16 %v2487_v19, %v2486_v35  ;;  %v3539_v21 = vpop.f32.mrb[140].mxu1  ;;  %v3615_v40 = vpop.f32.mrb[140].mxu0 }
 0x212   : > { %3094 = vst [vmem:[%s4672_s22 + $0x68] sm:$0xff] %v3070_v42   ;;  %v3540_v41 = vpop.f32.mrb[141].mxu1  ;;  %v2447_v23 = vpop.f32.mrb[141].mxu0 }
 0x213   : > { %3093 = vst [vmem:[%s4672_s22 + $0x60] sm:$0xff] %v3065_v34   ;;  %v3541_v45 = vadd.f32 %v3540_v41, %v3539_v21  ;;  %v2448_v14 = vadd.f32 %v2447_v23, %v2287_v2  ;;  %v3542_v36 = vpop.f32.mrb[142].mxu1  ;;  %v3616_v25 = vpop.f32.mrb[142].mxu0 }
 0x214   : > { %v3543_v48 = vpop.f32.mrb[143].mxu1  ;;  %v2450_v63 = vpop.f32.mrb[143].mxu0 }
 0x215   : > { %v2295_v51 = vadd.f32 %v3541_v45, %v4650_v13  ;;  %v3544_v8 = vadd.f32 %v3543_v48, %v3542_v36  ;;  %v2451_v12 = vadd.f32 %v2450_v63, %v2290_v59  ;;  %v2490_v4 = vmax.f32 %v2448_v14, 0.0 }
 0x217   : > { %v2456_v53 = vadd.f32 %v3615_v40, %v2295_v51  ;;  %v2298_v56 = vadd.f32 %v3544_v8, %v4656_v28  ;;  %v2491_v32 = vmax.f32 %v2451_v12, 0.0 }
 0x219   : > { %v2459_v5 = vadd.f32 %v3616_v25, %v2298_v56  ;;  %v3075_v38 = vpack.c.bf16 %v2491_v32, %v2490_v4  ;;  %v2492_v44 = vmax.f32 %v2456_v53, 0.0 }
 0x21b   : > { %v2493_v46 = vmax.f32 %v2459_v5, 0.0  ;;  %3095 = vst [vmem:[%s4672_s22 + $0x70] sm:$0xff] %v3075_v38  }
 0x21d   : > { %v3080_v29 = vpack.c.bf16 %v2493_v46, %v2492_v44 }
 0x21f   : > { %3096 = vst [vmem:[%s4672_s22 + $0x78] sm:$0xff] %v3080_v29  }
 0x220 PF: > { %s13_s12 = sadd.s32 1, %s3928_s12  }
 0x221   : > { %p10_p4 = scmp.ge.s32.totalorder %s13_s12, 4  }
 0x223   :  { %12 = sbr.rel (!%p10_p4) target bundleno = 1 (0x1), region = 62 }

// kernel: cnn_forward.9
= control target key start
LH: loop header
LB: loop body
LE: loop exit
PB: predicated region body
PF: predicated region fallthrough
CT: control target
= control target key end

     0   :  { %s12157_s24 = smov 0   ;;  %s13898_s0 = inlined_call_operand.vmem [shape: bf16[8,8192], index: 0, kind: input, shape index: {}]   ;;  %s13899_s1 = inlined_call_operand.vmem [shape: bf16[8192,512], index: 1, kind: input, shape index: {}]   ;;  %s13900_s2 = inlined_call_operand.vmem [shape: f32[1,512], index: 2, kind: input, shape index: {}]   ;;  %s13901_s3 = inlined_call_operand.vmem [shape: bf16[512,384], index: 3, kind: input, shape index: {}]   ;;  %s13902_s4 = inlined_call_operand.vmem [shape: f32[1,384], index: 4, kind: input, shape index: {}]   ;;  %s13903_s5 = inlined_call_operand.vmem [shape: bf16[384,128], index: 5, kind: input, shape index: {}]   ;;  %s13904_s6 = inlined_call_operand.vmem [shape: f32[1,128], index: 6, kind: input, shape index: {}]   ;;  %s13905_s7 = inlined_call_operand.vmem [shape: f32[8,128], index: 7, kind: output, shape index: {}]  }
   0x1 LB: > { %s12163_s25 = sadd.s32 4294967295, %s12112_s24   ;;  %p9086_p0 = scmp.ge.s32.totalorder %s12112_s24, 1  ;;  %s12112_s24 = sphi %s12157_s24, %s17_s24  }
   0x2   : > { %p245_p1 = scmp.lt.s32.totalorder %s12112_s24, 3 }
   0x4   : > { %p246_p2 = pnand %p9086_p0, %p245_p1 }
   0x5   : > { %s9087_s26 = sshll.u32 (!%p246_p2), %s12163_s25, 5  ;;  %s9089_s27 = sshll.u32 (!%p246_p2), %s12163_s25, 9 }
   0x6   : > { %249 = sbr.rel (%p246_p2) target bundleno = 1811 (0x713), region = 48  ;;  %p279_p3 = scmp.lt.s32.totalorder (!%p246_p2), %s9087_s26, 63 }
   0x7   : > { %p285_p4 = scmp.lt.s32.totalorder (!%p246_p2), %s9089_s27, 1023  ;;  %p9092_p5 = scmp.ne.s32.totalorder (!%p246_p2), %s12163_s25, 0 }
   0xd   : > { %s13907_s26 = smov (!%p279_p3, %s9087_s26), 63  ;;  %s13909_s27 = smov (!%p285_p4, %s9089_s27), 1023 }
   0xe   : > { %s9088_s28 = sshll.u32 %s13907_s26, 2  ;;  %s10273_s9 = sshll.u32 %s13909_s27, 4  ;;  %v12114_v0 = vmov (!%p9092_p5), 0.0  }
   0xf   : > { %s12172_s8 = scalar_lea.vmem %s13898_s0, %s9088_s28  ;;  %s12177_s12 = scalar_lea.vmem %s13899_s1, %s10273_s9  ;;  %296 = vst [vmem:[#allocation2] sm:$0xff] (!%p9092_p5), %v12114_v0  ;;  %297 = vst [vmem:[#allocation2 + $0x8] sm:$0xff] (!%p9092_p5), %v12114_v0 }
  0x10   : > { %295 = sbr.rel (%p9092_p5) target bundleno = 23 (0x17), region = 52  ;;  %298 = vst [vmem:[#allocation2 + $0x10] sm:$0xff] (!%p9092_p5), %v12114_v0  ;;  %299 = vst [vmem:[#allocation2 + $0x18] sm:$0xff] (!%p9092_p5), %v12114_v0 }
  0x17 PF: > { %v10386_v1 = vld [vmem:[%s12177_s12 + $0x4] ss:$16 sps:$4 sm:$0xff]   ;;  %v10390_v3 = vld [vmem:[%s12177_s12] ss:$16 sps:$4 sm:$0xff]   ;;  %v305_v49 = vld [vmem:[%s12172_s8 + $0x8] sm:$0xff]  ;;  %p10149_p6 = scmp.ne.s32.totalorder %s12163_s25, 1 }
  0x18   : > { %v10388_v2 = vld [vmem:[%s12177_s12 + $0x204] ss:$16 sps:$4 sm:$0xff]   ;;  %6576 = vmatprep.subr.bf16.mxu0 %v10386_v1  ;;  %v10391_v4 = vld [vmem:[%s12177_s12 + $0x200] ss:$16 sps:$4 sm:$0xff]   ;;  %v12232_v52 = vcombine.high %v305_v49, %v305_v49  ;;  %vm12116_vm0 = vmmov (!%p10149_p6), 0  }
  0x19   : > { %6617 = vmatprep.subr.bf16.mxu1 %v10388_v2  ;;  %v10392_v5 = vld [vmem:[%s12177_s12 + $0x24] ss:$16 sps:$4 sm:$0xff]   ;;  %6577 = vmatpush1.bf16.msra.mxu0 %v10390_v3  ;;  %v10396_v7 = vld [vmem:[%s12177_s12 + $0x20] ss:$16 sps:$4 sm:$0xff]  }
  0x1a   : > { %6618 = vmatpush1.bf16.msra.mxu1 %v10391_v4  ;;  %v10394_v6 = vld [vmem:[%s12177_s12 + $0x224] ss:$16 sps:$4 sm:$0xff]   ;;  %6578 = vmatprep.subr.bf16.mxu0 %v10392_v5  ;;  %v10397_v8 = vld [vmem:[%s12177_s12 + $0x220] ss:$16 sps:$4 sm:$0xff]  }
  0x1b   : > { %6619 = vmatprep.subr.bf16.mxu1 %v10394_v6  ;;  %v10398_v9 = vld [vmem:[%s12177_s12 + $0x44] ss:$16 sps:$4 sm:$0xff]   ;;  %v10402_v11 = vld [vmem:[%s12177_s12 + $0x40] ss:$16 sps:$4 sm:$0xff]   ;;  %6649 = vmatprep.mubr.bf16.mxu1 %v12232_v52 }
  0x1c   : > { %v10400_v10 = vld [vmem:[%s12177_s12 + $0x244] ss:$16 sps:$4 sm:$0xff]   ;;  %v10403_v12 = vld [vmem:[%s12177_s12 + $0x240] ss:$16 sps:$4 sm:$0xff]  }
  0x1d   : > { %6579 = vmatpush1.bf16.msra.mxu0 %v10396_v7  ;;  %v10404_v13 = vld [vmem:[%s12177_s12 + $0x64] ss:$16 sps:$4 sm:$0xff]   ;;  %v10408_v15 = vld [vmem:[%s12177_s12 + $0x60] ss:$16 sps:$4 sm:$0xff]  }
  0x1e   : > { %6620 = vmatpush1.bf16.msra.mxu1 %v10397_v8  ;;  %6580 = vmatprep.subr.bf16.mxu0 %v10398_v9  ;;  %v10406_v14 = vld [vmem:[%s12177_s12 + $0x264] ss:$16 sps:$4 sm:$0xff]   ;;  %v10409_v16 = vld [vmem:[%s12177_s12 + $0x260] ss:$16 sps:$4 sm:$0xff]   ;;  %v12256_v8 = vcombine.low %v305_v49, %v305_v49 }
  0x1f   : > { %6621 = vmatprep.subr.bf16.mxu1 %v10400_v10  ;;  %v10410_v17 = vld [vmem:[%s12177_s12 + $0x84] ss:$16 sps:$4 sm:$0xff]   ;;  %v10414_v19 = vld [vmem:[%s12177_s12 + $0x80] ss:$16 sps:$4 sm:$0xff]  }
  0x20   : > { %v10412_v18 = vld [vmem:[%s12177_s12 + $0x284] ss:$16 sps:$4 sm:$0xff]   ;;  %v10415_v20 = vld [vmem:[%s12177_s12 + $0x280] ss:$16 sps:$4 sm:$0xff]  }
  0x21   : > { %6581 = vmatpush1.bf16.msra.mxu0 %v10402_v11  ;;  %v10416_v21 = vld [vmem:[%s12177_s12 + $0xa4] ss:$16 sps:$4 sm:$0xff]   ;;  %v10420_v23 = vld [vmem:[%s12177_s12 + $0xa0] ss:$16 sps:$4 sm:$0xff]  }
  0x22   : > { %6622 = vmatpush1.bf16.msra.mxu1 %v10403_v12  ;;  %6582 = vmatprep.subr.bf16.mxu0 %v10404_v13  ;;  %v10418_v22 = vld [vmem:[%s12177_s12 + $0x2a4] ss:$16 sps:$4 sm:$0xff]   ;;  %v10421_v24 = vld [vmem:[%s12177_s12 + $0x2a0] ss:$16 sps:$4 sm:$0xff]  }
  0x23   : > { %6623 = vmatprep.subr.bf16.mxu1 %v10406_v14  ;;  %v10422_v25 = vld [vmem:[%s12177_s12 + $0xc4] ss:$16 sps:$4 sm:$0xff]   ;;  %v10426_v27 = vld [vmem:[%s12177_s12 + $0xc0] ss:$16 sps:$4 sm:$0xff]  }
  0x24   : > { %v10424_v26 = vld [vmem:[%s12177_s12 + $0x2c4] ss:$16 sps:$4 sm:$0xff]   ;;  %v10427_v28 = vld [vmem:[%s12177_s12 + $0x2c0] ss:$16 sps:$4 sm:$0xff]  }
  0x25   : > { %6583 = vmatpush1.bf16.msra.mxu0 %v10408_v15  ;;  %v10428_v29 = vld [vmem:[%s12177_s12 + $0xe4] ss:$16 sps:$4 sm:$0xff]   ;;  %v10432_v31 = vld [vmem:[%s12177_s12 + $0xe0] ss:$16 sps:$4 sm:$0xff]  }
  0x26   : > { %6624 = vmatpush1.bf16.msra.mxu1 %v10409_v16  ;;  %6584 = vmatprep.subr.bf16.mxu0 %v10410_v17  ;;  %v10430_v30 = vld [vmem:[%s12177_s12 + $0x2e4] ss:$16 sps:$4 sm:$0xff]   ;;  %v10433_v32 = vld [vmem:[%s12177_s12 + $0x2e0] ss:$16 sps:$4 sm:$0xff]  }
  0x27   : > { %6625 = vmatprep.subr.bf16.mxu1 %v10412_v18  ;;  %v10434_v33 = vld [vmem:[%s12177_s12 + $0x104] ss:$16 sps:$4 sm:$0xff]   ;;  %v10438_v35 = vld [vmem:[%s12177_s12 + $0x100] ss:$16 sps:$4 sm:$0xff]  }
  0x28   : > { %v10436_v34 = vld [vmem:[%s12177_s12 + $0x304] ss:$16 sps:$4 sm:$0xff]   ;;  %v10439_v36 = vld [vmem:[%s12177_s12 + $0x300] ss:$16 sps:$4 sm:$0xff]  }
  0x29   : > { %6585 = vmatpush1.bf16.msra.mxu0 %v10414_v19  ;;  %v10440_v37 = vld [vmem:[%s12177_s12 + $0x124] ss:$16 sps:$4 sm:$0xff]   ;;  %v10444_v39 = vld [vmem:[%s12177_s12 + $0x120] ss:$16 sps:$4 sm:$0xff]  }
  0x2a   : > { %6626 = vmatpush1.bf16.msra.mxu1 %v10415_v20  ;;  %6586 = vmatprep.subr.bf16.mxu0 %v10416_v21  ;;  %v10442_v38 = vld [vmem:[%s12177_s12 + $0x324] ss:$16 sps:$4 sm:$0xff]   ;;  %v10445_v40 = vld [vmem:[%s12177_s12 + $0x320] ss:$16 sps:$4 sm:$0xff]  }
  0x2b   : > { %6627 = vmatprep.subr.bf16.mxu1 %v10418_v22  ;;  %v10446_v41 = vld [vmem:[%s12177_s12 + $0x144] ss:$16 sps:$4 sm:$0xff]   ;;  %v10450_v43 = vld [vmem:[%s12177_s12 + $0x140] ss:$16 sps:$4 sm:$0xff]  }
  0x2c   : > { %v10448_v42 = vld [vmem:[%s12177_s12 + $0x344] ss:$16 sps:$4 sm:$0xff]   ;;  %v10451_v44 = vld [vmem:[%s12177_s12 + $0x340] ss:$16 sps:$4 sm:$0xff]  }
  0x2d   : > { %6587 = vmatpush1.bf16.msra.mxu0 %v10420_v23  ;;  %v10452_v45 = vld [vmem:[%s12177_s12 + $0x164] ss:$16 sps:$4 sm:$0xff]   ;;  %v10456_v50 = vld [vmem:[%s12177_s12 + $0x160] ss:$16 sps:$4 sm:$0xff]  }
  0x2e   : > { %6628 = vmatpush1.bf16.msra.mxu1 %v10421_v24  ;;  %6588 = vmatprep.subr.bf16.mxu0 %v10422_v25  ;;  %v10454_v46 = vld [vmem:[%s12177_s12 + $0x364] ss:$16 sps:$4 sm:$0xff]   ;;  %v10457_v51 = vld [vmem:[%s12177_s12 + $0x360] ss:$16 sps:$4 sm:$0xff]  }
  0x2f   : > { %6629 = vmatprep.subr.bf16.mxu1 %v10424_v26  ;;  %v304_v47 = vld [vmem:[%s12172_s8] sm:$0xff] }
  0x30   : > { %v12227_v48 = vcombine.high %v304_v47, %v304_v47  ;;  %v10458_v53 = vld [vmem:[%s12177_s12 + $0x184] ss:$16 sps:$4 sm:$0xff]   ;;  %v10462_v55 = vld [vmem:[%s12177_s12 + $0x180] ss:$16 sps:$4 sm:$0xff]   ;;  %v12254_v7 = vcombine.low %v304_v47, %v304_v47 }
  0x31   : > { %6589 = vmatpush1.bf16.msra.mxu0 %v10426_v27  ;;  %v10460_v54 = vld [vmem:[%s12177_s12 + $0x384] ss:$16 sps:$4 sm:$0xff]   ;;  %v10463_v56 = vld [vmem:[%s12177_s12 + $0x380] ss:$16 sps:$4 sm:$0xff]  }
  0x32   : > { %6630 = vmatpush1.bf16.msra.mxu1 %v10427_v28  ;;  %6590 = vmatprep.subr.bf16.mxu0 %v10428_v29  ;;  %v10464_v57 = vld [vmem:[%s12177_s12 + $0x1a4] ss:$16 sps:$4 sm:$0xff]   ;;  %v10468_v59 = vld [vmem:[%s12177_s12 + $0x1a0] ss:$16 sps:$4 sm:$0xff]  }
  0x33   : > { %6631 = vmatprep.subr.bf16.mxu1 %v10430_v30  ;;  %6608 = vmatprep.mubr.bf16.mxu0 %v12227_v48  ;;  %v10466_v58 = vld [vmem:[%s12177_s12 + $0x3a4] ss:$16 sps:$4 sm:$0xff]   ;;  %v10469_v60 = vld [vmem:[%s12177_s12 + $0x3a0] ss:$16 sps:$4 sm:$0xff]  }
  0x34   : > { %v10470_v61 = vld [vmem:[%s12177_s12 + $0x1c4] ss:$16 sps:$4 sm:$0xff]   ;;  %v10474_v63 = vld [vmem:[%s12177_s12 + $0x1c0] ss:$16 sps:$4 sm:$0xff]  }
  0x35   : > { %6591 = vmatpush1.bf16.msra.mxu0 %v10432_v31  ;;  %v10472_v62 = vld [vmem:[%s12177_s12 + $0x3c4] ss:$16 sps:$4 sm:$0xff]   ;;  %v10475_v0 = vld [vmem:[%s12177_s12 + $0x3c0] ss:$16 sps:$4 sm:$0xff]  }
  0x36   : > { %6632 = vmatpush1.bf16.msra.mxu1 %v10433_v32  ;;  %6592 = vmatprep.subr.bf16.mxu0 %v10434_v33  ;;  %v10476_v1 = vld [vmem:[%s12177_s12 + $0x1e4] ss:$16 sps:$4 sm:$0xff]   ;;  %v10480_v3 = vld [vmem:[%s12177_s12 + $0x1e0] ss:$16 sps:$4 sm:$0xff]  }
  0x37   : > { %6633 = vmatprep.subr.bf16.mxu1 %v10436_v34  ;;  %v10478_v2 = vld [vmem:[%s12177_s12 + $0x3e4] ss:$16 sps:$4 sm:$0xff]   ;;  %v10481_v4 = vld [vmem:[%s12177_s12 + $0x3e0] ss:$16 sps:$4 sm:$0xff]   ;;  %v12288_v34 = vld [vmem:[%s12172_s8 + $0x18] sm:$0xff] }
  0x38   : > { %v10488_v5 = vld [vmem:[%s12177_s12 + $0x404] ss:$16 sps:$4 sm:$0xff]   ;;  %v10486_v9 = vld [vmem:[%s12177_s12 + $0x400] ss:$16 sps:$4 sm:$0xff]  }
  0x39   : > { %6593 = vmatpush1.bf16.msra.mxu0 %v10438_v35  ;;  %v10491_v6 = vld [vmem:[%s12177_s12 + $0x604] ss:$16 sps:$4 sm:$0xff]   ;;  %v10489_v10 = vld [vmem:[%s12177_s12 + $0x600] ss:$16 sps:$4 sm:$0xff]  }
  0x3a   : > { %6634 = vmatpush1.bf16.msra.mxu1 %v10439_v36  ;;  %6594 = vmatprep.subr.bf16.mxu0 %v10440_v37  ;;  %v10494_v11 = vld [vmem:[%s12177_s12 + $0x424] ss:$16 sps:$4 sm:$0xff]   ;;  %v10492_v13 = vld [vmem:[%s12177_s12 + $0x420] ss:$16 sps:$4 sm:$0xff]  }
  0x3b   : > { %6635 = vmatprep.subr.bf16.mxu1 %v10442_v38  ;;  %v10497_v12 = vld [vmem:[%s12177_s12 + $0x624] ss:$16 sps:$4 sm:$0xff]   ;;  %v10495_v14 = vld [vmem:[%s12177_s12 + $0x620] ss:$16 sps:$4 sm:$0xff]   ;;  %v12298_v38 = vcombine.high %v12288_v34, %v12288_v34 }
  0x3c   : > { %v10500_v15 = vld [vmem:[%s12177_s12 + $0x444] ss:$16 sps:$4 sm:$0xff]   ;;  %v10498_v17 = vld [vmem:[%s12177_s12 + $0x440] ss:$16 sps:$4 sm:$0xff]  }
  0x3d   : > { %6595 = vmatpush1.bf16.msra.mxu0 %v10444_v39  ;;  %v10503_v16 = vld [vmem:[%s12177_s12 + $0x644] ss:$16 sps:$4 sm:$0xff]   ;;  %v10501_v18 = vld [vmem:[%s12177_s12 + $0x640] ss:$16 sps:$4 sm:$0xff]  }
  0x3e   : > { %6636 = vmatpush1.bf16.msra.mxu1 %v10445_v40  ;;  %6596 = vmatprep.subr.bf16.mxu0 %v10446_v41  ;;  %v10506_v19 = vld [vmem:[%s12177_s12 + $0x464] ss:$16 sps:$4 sm:$0xff]   ;;  %v10504_v21 = vld [vmem:[%s12177_s12 + $0x460] ss:$16 sps:$4 sm:$0xff]  }
  0x3f   : > { %6637 = vmatprep.subr.bf16.mxu1 %v10448_v42  ;;  %v10509_v20 = vld [vmem:[%s12177_s12 + $0x664] ss:$16 sps:$4 sm:$0xff]   ;;  %v10507_v22 = vld [vmem:[%s12177_s12 + $0x660] ss:$16 sps:$4 sm:$0xff]  }
  0x40   : > { %v10512_v23 = vld [vmem:[%s12177_s12 + $0x484] ss:$16 sps:$4 sm:$0xff]   ;;  %v10510_v25 = vld [vmem:[%s12177_s12 + $0x480] ss:$16 sps:$4 sm:$0xff]  }
  0x41   : > { %6597 = vmatpush1.bf16.msra.mxu0 %v10450_v43  ;;  %v10515_v24 = vld [vmem:[%s12177_s12 + $0x684] ss:$16 sps:$4 sm:$0xff]   ;;  %v10513_v26 = vld [vmem:[%s12177_s12 + $0x680] ss:$16 sps:$4 sm:$0xff]  }
  0x42   : > { %6638 = vmatpush1.bf16.msra.mxu1 %v10451_v44  ;;  %6598 = vmatprep.subr.bf16.mxu0 %v10452_v45  ;;  %v10518_v27 = vld [vmem:[%s12177_s12 + $0x4a4] ss:$16 sps:$4 sm:$0xff]   ;;  %v10516_v29 = vld [vmem:[%s12177_s12 + $0x4a0] ss:$16 sps:$4 sm:$0xff]  }
  0x43   : > { %6639 = vmatprep.subr.bf16.mxu1 %v10454_v46  ;;  %v10521_v28 = vld [vmem:[%s12177_s12 + $0x6a4] ss:$16 sps:$4 sm:$0xff]   ;;  %v10519_v30 = vld [vmem:[%s12177_s12 + $0x6a0] ss:$16 sps:$4 sm:$0xff]  }
  0x44   : > { %v10524_v31 = vld [vmem:[%s12177_s12 + $0x4c4] ss:$16 sps:$4 sm:$0xff]   ;;  %v10522_v35 = vld [vmem:[%s12177_s12 + $0x4c0] ss:$16 sps:$4 sm:$0xff]  }
  0x45   : > { %6599 = vmatpush1.bf16.msra.mxu0 %v10456_v50  ;;  %v10527_v32 = vld [vmem:[%s12177_s12 + $0x6c4] ss:$16 sps:$4 sm:$0xff]   ;;  %v10525_v36 = vld [vmem:[%s12177_s12 + $0x6c0] ss:$16 sps:$4 sm:$0xff]  }
  0x46   : > { %6640 = vmatpush1.bf16.msra.mxu1 %v10457_v51  ;;  %6600 = vmatprep.subr.bf16.mxu0 %v10458_v53  ;;  %v12285_v33 = vld [vmem:[%s12172_s8 + $0x10] sm:$0xff] }
  0x47   : > { %6641 = vmatprep.subr.bf16.mxu1 %v10460_v54  ;;  %v12294_v37 = vcombine.high %v12285_v33, %v12285_v33  ;;  %v10530_v39 = vld [vmem:[%s12177_s12 + $0x4e4] ss:$16 sps:$4 sm:$0xff]   ;;  %v10528_v41 = vld [vmem:[%s12177_s12 + $0x4e0] ss:$16 sps:$4 sm:$0xff]  }
  0x48   : > { %v10533_v40 = vld [vmem:[%s12177_s12 + $0x6e4] ss:$16 sps:$4 sm:$0xff]   ;;  %v10531_v42 = vld [vmem:[%s12177_s12 + $0x6e0] ss:$16 sps:$4 sm:$0xff]  }
  0x49   : > { %6601 = vmatpush1.bf16.msra.mxu0 %v10462_v55  ;;  %v10536_v43 = vld [vmem:[%s12177_s12 + $0x504] ss:$16 sps:$4 sm:$0xff]   ;;  %v10534_v45 = vld [vmem:[%s12177_s12 + $0x500] ss:$16 sps:$4 sm:$0xff]  }
  0x4a   : > { %6642 = vmatpush1.bf16.msra.mxu1 %v10463_v56  ;;  %6602 = vmatprep.subr.bf16.mxu0 %v10464_v57  ;;  %v10539_v44 = vld [vmem:[%s12177_s12 + $0x704] ss:$16 sps:$4 sm:$0xff]   ;;  %v10537_v46 = vld [vmem:[%s12177_s12 + $0x700] ss:$16 sps:$4 sm:$0xff]  }
  0x4b   : > { %6643 = vmatprep.subr.bf16.mxu1 %v10466_v58  ;;  %v10542_v47 = vld [vmem:[%s12177_s12 + $0x524] ss:$16 sps:$4 sm:$0xff]   ;;  %v10540_v50 = vld [vmem:[%s12177_s12 + $0x520] ss:$16 sps:$4 sm:$0xff]  }
  0x4c   : > { %v10545_v49 = vld [vmem:[%s12177_s12 + $0x724] ss:$16 sps:$4 sm:$0xff]   ;;  %v10543_v51 = vld [vmem:[%s12177_s12 + $0x720] ss:$16 sps:$4 sm:$0xff]  }
  0x4d   : > { %6603 = vmatpush1.bf16.msra.mxu0 %v10468_v59  ;;  %v10548_v53 = vld [vmem:[%s12177_s12 + $0x544] ss:$16 sps:$4 sm:$0xff]   ;;  %v10546_v55 = vld [vmem:[%s12177_s12 + $0x540] ss:$16 sps:$4 sm:$0xff]  }
  0x4e   : > { %6644 = vmatpush1.bf16.msra.mxu1 %v10469_v60  ;;  %6604 = vmatprep.subr.bf16.mxu0 %v10470_v61  ;;  %v10551_v54 = vld [vmem:[%s12177_s12 + $0x744] ss:$16 sps:$4 sm:$0xff]   ;;  %v10549_v56 = vld [vmem:[%s12177_s12 + $0x740] ss:$16 sps:$4 sm:$0xff]  }
  0x4f   : > { %6645 = vmatprep.subr.bf16.mxu1 %v10472_v62  ;;  %v10554_v57 = vld [vmem:[%s12177_s12 + $0x564] ss:$16 sps:$4 sm:$0xff]   ;;  %v10552_v59 = vld [vmem:[%s12177_s12 + $0x560] ss:$16 sps:$4 sm:$0xff]  }
  0x50   : > { %v10557_v58 = vld [vmem:[%s12177_s12 + $0x764] ss:$16 sps:$4 sm:$0xff]   ;;  %v10555_v60 = vld [vmem:[%s12177_s12 + $0x760] ss:$16 sps:$4 sm:$0xff]  }
  0x51   : > { %6605 = vmatpush1.bf16.msra.mxu0 %v10474_v63  ;;  %v10560_v61 = vld [vmem:[%s12177_s12 + $0x584] ss:$16 sps:$4 sm:$0xff]   ;;  %v10558_v63 = vld [vmem:[%s12177_s12 + $0x580] ss:$16 sps:$4 sm:$0xff]  }
  0x52   : > { %6646 = vmatpush1.bf16.msra.mxu1 %v10475_v0  ;;  %6606 = vmatprep.subr.bf16.mxu0 %v10476_v1  ;;  %v10563_v62 = vld [vmem:[%s12177_s12 + $0x784] ss:$16 sps:$4 sm:$0xff]   ;;  %v10561_v0 = vld [vmem:[%s12177_s12 + $0x780] ss:$16 sps:$4 sm:$0xff]  }
  0x53   : > { %6647 = vmatprep.subr.bf16.mxu1 %v10478_v2  ;;  %v10566_v1 = vld [vmem:[%s12177_s12 + $0x5a4] ss:$16 sps:$4 sm:$0xff]  }
  0x54   : > { %v10569_v2 = vld [vmem:[%s12177_s12 + $0x7a4] ss:$16 sps:$4 sm:$0xff]  }
  0x55   : > { %6607 = vmatpush1.bf16.msra.mxu0 %v10480_v3  ;;  %v10564_v3 = vld [vmem:[%s12177_s12 + $0x5a0] ss:$16 sps:$4 sm:$0xff]  }
  0x56   : > { %6648 = vmatpush1.bf16.msra.mxu1 %v10481_v4  ;;  %6658 = vmatprep.subr.bf16.mxu0 %v10488_v5  ;;  %v10567_v4 = vld [vmem:[%s12177_s12 + $0x7a0] ss:$16 sps:$4 sm:$0xff]   ;;  %v10572_v5 = vld [vmem:[%s12177_s12 + $0x5c4] ss:$16 sps:$4 sm:$0xff]  }
  0x57   : > { %6699 = vmatprep.subr.bf16.mxu1 %v10491_v6  ;;  %v10575_v6 = vld [vmem:[%s12177_s12 + $0x7c4] ss:$16 sps:$4 sm:$0xff]  }
  0x58   : > { %6609 = vmatmul.mubr.bf16.vlgmr.msra.gmra.mrb[0].mxu0 %v12254_v7 }
  0x59   : > { %6650 = vmatmul.mubr.bf16.vlgmr.msra.gmra.mrb[0].mxu1 %v12256_v8  ;;  %6659 = vmatpush1.bf16.msra.mxu0 %v10486_v9  ;;  %v10570_v9 = vld [vmem:[%s12177_s12 + $0x5c0] ss:$16 sps:$4 sm:$0xff]  }
  0x5a   : > { %6700 = vmatpush1.bf16.msra.mxu1 %v10489_v10  ;;  %6660 = vmatprep.subr.bf16.mxu0 %v10494_v11  ;;  %v10573_v10 = vld [vmem:[%s12177_s12 + $0x7c0] ss:$16 sps:$4 sm:$0xff]   ;;  %v10578_v11 = vld [vmem:[%s12177_s12 + $0x5e4] ss:$16 sps:$4 sm:$0xff]  }
  0x5b   : > { %6701 = vmatprep.subr.bf16.mxu1 %v10497_v12  ;;  %6690 = vmatprep.mubr.bf16.mxu0 %v12294_v37  ;;  %v10581_v12 = vld [vmem:[%s12177_s12 + $0x7e4] ss:$16 sps:$4 sm:$0xff]  }
  0x5c   : > { %6731 = vmatprep.mubr.bf16.mxu1 %v12298_v38 }
  0x5d   : > { %6661 = vmatpush1.bf16.msra.mxu0 %v10492_v13  ;;  %v10576_v13 = vld [vmem:[%s12177_s12 + $0x5e0] ss:$16 sps:$4 sm:$0xff]  }
  0x5e   : > { %6702 = vmatpush1.bf16.msra.mxu1 %v10495_v14  ;;  %6662 = vmatprep.subr.bf16.mxu0 %v10500_v15  ;;  %v10579_v14 = vld [vmem:[%s12177_s12 + $0x7e0] ss:$16 sps:$4 sm:$0xff]   ;;  %v10588_v15 = vld [vmem:[%s12177_s12 + $0x804] ss:$16 sps:$4 sm:$0xff]  }
  0x5f   : > { %6703 = vmatprep.subr.bf16.mxu1 %v10503_v16  ;;  %v10591_v16 = vld [vmem:[%s12177_s12 + $0xa04] ss:$16 sps:$4 sm:$0xff]  }
  0x61   : > { %6663 = vmatpush1.bf16.msra.mxu0 %v10498_v17  ;;  %v12342_v17 = vcombine.low %v12285_v33, %v12285_v33  ;;  %v10606_v33 = vld [vmem:[%s12177_s12 + $0x864] ss:$16 sps:$4 sm:$0xff]  }
  0x62   : > { %6704 = vmatpush1.bf16.msra.mxu1 %v10501_v18  ;;  %6664 = vmatprep.subr.bf16.mxu0 %v10506_v19  ;;  %v12346_v18 = vcombine.low %v12288_v34, %v12288_v34  ;;  %v10586_v19 = vld [vmem:[%s12177_s12 + $0x800] ss:$16 sps:$4 sm:$0xff]   ;;  %v10609_v34 = vld [vmem:[%s12177_s12 + $0xa64] ss:$16 sps:$4 sm:$0xff]  }
  0x63   : > { %6705 = vmatprep.subr.bf16.mxu1 %v10509_v20  ;;  %v10589_v20 = vld [vmem:[%s12177_s12 + $0xa00] ss:$16 sps:$4 sm:$0xff]  }
  0x65   : > { %6665 = vmatpush1.bf16.msra.mxu0 %v10504_v21  ;;  %v10594_v21 = vld [vmem:[%s12177_s12 + $0x824] ss:$16 sps:$4 sm:$0xff]  }
  0x66   : > { %6706 = vmatpush1.bf16.msra.mxu1 %v10507_v22  ;;  %6666 = vmatprep.subr.bf16.mxu0 %v10512_v23  ;;  %v10597_v22 = vld [vmem:[%s12177_s12 + $0xa24] ss:$16 sps:$4 sm:$0xff]  }
  0x67   : > { %6707 = vmatprep.subr.bf16.mxu1 %v10515_v24  ;;  %v12353_v23 = vld [vmem:[%s12172_s8 + $0x20] sm:$0xff]  ;;  %v12356_v24 = vld [vmem:[%s12172_s8 + $0x28] sm:$0xff] }
  0x69   : > { %6667 = vmatpush1.bf16.msra.mxu0 %v10510_v25  ;;  %v12360_v25 = vcombine.high %v12353_v23, %v12353_v23 }
  0x6a   : > { %6708 = vmatpush1.bf16.msra.mxu1 %v10513_v26  ;;  %6668 = vmatprep.subr.bf16.mxu0 %v10518_v27  ;;  %v12364_v26 = vcombine.high %v12356_v24, %v12356_v24  ;;  %v10592_v27 = vld [vmem:[%s12177_s12 + $0x820] ss:$16 sps:$4 sm:$0xff]  }
  0x6b   : > { %6709 = vmatprep.subr.bf16.mxu1 %v10521_v28  ;;  %v10595_v28 = vld [vmem:[%s12177_s12 + $0xa20] ss:$16 sps:$4 sm:$0xff]  }
  0x6d   : > { %6669 = vmatpush1.bf16.msra.mxu0 %v10516_v29  ;;  %v10600_v29 = vld [vmem:[%s12177_s12 + $0x844] ss:$16 sps:$4 sm:$0xff]  }
  0x6e   : > { %6710 = vmatpush1.bf16.msra.mxu1 %v10519_v30  ;;  %6670 = vmatprep.subr.bf16.mxu0 %v10524_v31  ;;  %v10603_v30 = vld [vmem:[%s12177_s12 + $0xa44] ss:$16 sps:$4 sm:$0xff]   ;;  %v10598_v31 = vld [vmem:[%s12177_s12 + $0x840] ss:$16 sps:$4 sm:$0xff]  }
  0x6f   : > { %6711 = vmatprep.subr.bf16.mxu1 %v10527_v32  ;;  %v10601_v32 = vld [vmem:[%s12177_s12 + $0xa40] ss:$16 sps:$4 sm:$0xff]  }
  0x71   : > { %6671 = vmatpush1.bf16.msra.mxu0 %v10522_v35  ;;  %v10604_v35 = vld [vmem:[%s12177_s12 + $0x860] ss:$16 sps:$4 sm:$0xff]  }
  0x72   : > { %6712 = vmatpush1.bf16.msra.mxu1 %v10525_v36  ;;  %6672 = vmatprep.subr.bf16.mxu0 %v10530_v39  ;;  %v10607_v36 = vld [vmem:[%s12177_s12 + $0xa60] ss:$16 sps:$4 sm:$0xff]   ;;  %v10612_v39 = vld [vmem:[%s12177_s12 + $0x884] ss:$16 sps:$4 sm:$0xff]  }
  0x73   : > { %6713 = vmatprep.subr.bf16.mxu1 %v10533_v40  ;;  %v10615_v40 = vld [vmem:[%s12177_s12 + $0xa84] ss:$16 sps:$4 sm:$0xff]  }
  0x75   : > { %6673 = vmatpush1.bf16.msra.mxu0 %v10528_v41  ;;  %v10610_v41 = vld [vmem:[%s12177_s12 + $0x880] ss:$16 sps:$4 sm:$0xff]  }
  0x76   : > { %6714 = vmatpush1.bf16.msra.mxu1 %v10531_v42  ;;  %6674 = vmatprep.subr.bf16.mxu0 %v10536_v43  ;;  %v10613_v42 = vld [vmem:[%s12177_s12 + $0xa80] ss:$16 sps:$4 sm:$0xff]   ;;  %v10618_v43 = vld [vmem:[%s12177_s12 + $0x8a4] ss:$16 sps:$4 sm:$0xff]  }
  0x77   : > { %6715 = vmatprep.subr.bf16.mxu1 %v10539_v44  ;;  %v10621_v44 = vld [vmem:[%s12177_s12 + $0xaa4] ss:$16 sps:$4 sm:$0xff]  }
  0x79   : > { %6675 = vmatpush1.bf16.msra.mxu0 %v10534_v45  ;;  %v10616_v45 = vld [vmem:[%s12177_s12 + $0x8a0] ss:$16 sps:$4 sm:$0xff]  }
  0x7a   : > { %6716 = vmatpush1.bf16.msra.mxu1 %v10537_v46  ;;  %6676 = vmatprep.subr.bf16.mxu0 %v10542_v47  ;;  %v10619_v46 = vld [vmem:[%s12177_s12 + $0xaa0] ss:$16 sps:$4 sm:$0xff]   ;;  %v10624_v47 = vld [vmem:[%s12177_s12 + $0x8c4] ss:$16 sps:$4 sm:$0xff]  }
  0x7b   : > { %6717 = vmatprep.subr.bf16.mxu1 %v10545_v49  ;;  %v10627_v49 = vld [vmem:[%s12177_s12 + $0xac4] ss:$16 sps:$4 sm:$0xff]  }
  0x7d   : > { %6677 = vmatpush1.bf16.msra.mxu0 %v10540_v50  ;;  %v10622_v50 = vld [vmem:[%s12177_s12 + $0x8c0] ss:$16 sps:$4 sm:$0xff]  }
  0x7e   : > { %6718 = vmatpush1.bf16.msra.mxu1 %v10543_v51  ;;  %6678 = vmatprep.subr.bf16.mxu0 %v10548_v53  ;;  %v10625_v51 = vld [vmem:[%s12177_s12 + $0xac0] ss:$16 sps:$4 sm:$0xff]   ;;  %v10630_v53 = vld [vmem:[%s12177_s12 + $0x8e4] ss:$16 sps:$4 sm:$0xff]  }
  0x7f   : > { %6719 = vmatprep.subr.bf16.mxu1 %v10551_v54  ;;  %v10633_v54 = vld [vmem:[%s12177_s12 + $0xae4] ss:$16 sps:$4 sm:$0xff]  }
  0x81   : > { %6679 = vmatpush1.bf16.msra.mxu0 %v10546_v55  ;;  %v10628_v55 = vld [vmem:[%s12177_s12 + $0x8e0] ss:$16 sps:$4 sm:$0xff]  }
  0x82   : > { %6720 = vmatpush1.bf16.msra.mxu1 %v10549_v56  ;;  %6680 = vmatprep.subr.bf16.mxu0 %v10554_v57  ;;  %v10631_v56 = vld [vmem:[%s12177_s12 + $0xae0] ss:$16 sps:$4 sm:$0xff]   ;;  %v10636_v57 = vld [vmem:[%s12177_s12 + $0x904] ss:$16 sps:$4 sm:$0xff]  }
  0x83   : > { %6721 = vmatprep.subr.bf16.mxu1 %v10557_v58  ;;  %v10639_v58 = vld [vmem:[%s12177_s12 + $0xb04] ss:$16 sps:$4 sm:$0xff]  }
  0x85   : > { %6681 = vmatpush1.bf16.msra.mxu0 %v10552_v59  ;;  %v10634_v59 = vld [vmem:[%s12177_s12 + $0x900] ss:$16 sps:$4 sm:$0xff]  }
  0x86   : > { %6722 = vmatpush1.bf16.msra.mxu1 %v10555_v60  ;;  %6682 = vmatprep.subr.bf16.mxu0 %v10560_v61  ;;  %v10637_v60 = vld [vmem:[%s12177_s12 + $0xb00] ss:$16 sps:$4 sm:$0xff]   ;;  %v10642_v61 = vld [vmem:[%s12177_s12 + $0x924] ss:$16 sps:$4 sm:$0xff]  }
  0x87   : > { %6723 = vmatprep.subr.bf16.mxu1 %v10563_v62  ;;  %v10645_v62 = vld [vmem:[%s12177_s12 + $0xb24] ss:$16 sps:$4 sm:$0xff]  }
  0x89   : > { %6683 = vmatpush1.bf16.msra.mxu0 %v10558_v63  ;;  %v10640_v63 = vld [vmem:[%s12177_s12 + $0x920] ss:$16 sps:$4 sm:$0xff]  }
  0x8a   : > { %6724 = vmatpush1.bf16.msra.mxu1 %v10561_v0  ;;  %6684 = vmatprep.subr.bf16.mxu0 %v10566_v1  ;;  %v10643_v0 = vld [vmem:[%s12177_s12 + $0xb20] ss:$16 sps:$4 sm:$0xff]   ;;  %v10648_v1 = vld [vmem:[%s12177_s12 + $0x944] ss:$16 sps:$4 sm:$0xff]  }
  0x8b   : > { %6725 = vmatprep.subr.bf16.mxu1 %v10569_v2  ;;  %v10651_v2 = vld [vmem:[%s12177_s12 + $0xb44] ss:$16 sps:$4 sm:$0xff]  }
  0x8d   : > { %6685 = vmatpush1.bf16.msra.mxu0 %v10564_v3  ;;  %v10646_v3 = vld [vmem:[%s12177_s12 + $0x940] ss:$16 sps:$4 sm:$0xff]  }
  0x8e   : > { %6726 = vmatpush1.bf16.msra.mxu1 %v10567_v4  ;;  %6686 = vmatprep.subr.bf16.mxu0 %v10572_v5  ;;  %v10649_v4 = vld [vmem:[%s12177_s12 + $0xb40] ss:$16 sps:$4 sm:$0xff]   ;;  %v10654_v5 = vld [vmem:[%s12177_s12 + $0x964] ss:$16 sps:$4 sm:$0xff]  }
  0x8f   : > { %6727 = vmatprep.subr.bf16.mxu1 %v10575_v6  ;;  %v10657_v6 = vld [vmem:[%s12177_s12 + $0xb64] ss:$16 sps:$4 sm:$0xff]  }
  0x91   : > { %6687 = vmatpush1.bf16.msra.mxu0 %v10570_v9  ;;  %v10652_v9 = vld [vmem:[%s12177_s12 + $0x960] ss:$16 sps:$4 sm:$0xff]  }
  0x92   : > { %6728 = vmatpush1.bf16.msra.mxu1 %v10573_v10  ;;  %6688 = vmatprep.subr.bf16.mxu0 %v10578_v11  ;;  %v10655_v10 = vld [vmem:[%s12177_s12 + $0xb60] ss:$16 sps:$4 sm:$0xff]   ;;  %v10660_v11 = vld [vmem:[%s12177_s12 + $0x984] ss:$16 sps:$4 sm:$0xff]  }
  0x93   : > { %6729 = vmatprep.subr.bf16.mxu1 %v10581_v12  ;;  %v10663_v12 = vld [vmem:[%s12177_s12 + $0xb84] ss:$16 sps:$4 sm:$0xff]  }
  0x95   : > { %6689 = vmatpush1.bf16.msra.mxu0 %v10576_v13  ;;  %v10658_v13 = vld [vmem:[%s12177_s12 + $0x980] ss:$16 sps:$4 sm:$0xff]  }
  0x96   : > { %6730 = vmatpush1.bf16.msra.mxu1 %v10579_v14  ;;  %6740 = vmatprep.subr.bf16.mxu0 %v10588_v15  ;;  %v10661_v14 = vld [vmem:[%s12177_s12 + $0xb80] ss:$16 sps:$4 sm:$0xff]   ;;  %v10666_v15 = vld [vmem:[%s12177_s12 + $0x9a4] ss:$16 sps:$4 sm:$0xff]  }
  0x97   : > { %6781 = vmatprep.subr.bf16.mxu1 %v10591_v16  ;;  %v10669_v16 = vld [vmem:[%s12177_s12 + $0xba4] ss:$16 sps:$4 sm:$0xff]  }
  0x98   : > { %6691 = vmatmul.mubr.bf16.vlgmr.msra.gmra.mrb[4].mxu0 %v12342_v17 }
  0x99   : > { %6732 = vmatmul.mubr.bf16.vlgmr.msra.gmra.mrb[4].mxu1 %v12346_v18  ;;  %6741 = vmatpush1.bf16.msra.mxu0 %v10586_v19  ;;  %v10664_v19 = vld [vmem:[%s12177_s12 + $0x9a0] ss:$16 sps:$4 sm:$0xff]  }
  0x9a   : > { %6782 = vmatpush1.bf16.msra.mxu1 %v10589_v20  ;;  %6742 = vmatprep.subr.bf16.mxu0 %v10594_v21  ;;  %v10667_v20 = vld [vmem:[%s12177_s12 + $0xba0] ss:$16 sps:$4 sm:$0xff]   ;;  %v10672_v21 = vld [vmem:[%s12177_s12 + $0x9c4] ss:$16 sps:$4 sm:$0xff]  }
  0x9b   : > { %6783 = vmatprep.subr.bf16.mxu1 %v10597_v22  ;;  %6772 = vmatprep.mubr.bf16.mxu0 %v12360_v25  ;;  %v10675_v22 = vld [vmem:[%s12177_s12 + $0xbc4] ss:$16 sps:$4 sm:$0xff]  }
  0x9c   : > { %6813 = vmatprep.mubr.bf16.mxu1 %v12364_v26 }
  0x9d   : > { %6743 = vmatpush1.bf16.msra.mxu0 %v10592_v27  ;;  %v10670_v27 = vld [vmem:[%s12177_s12 + $0x9c0] ss:$16 sps:$4 sm:$0xff]  }
  0x9e   : > { %6784 = vmatpush1.bf16.msra.mxu1 %v10595_v28  ;;  %6744 = vmatprep.subr.bf16.mxu0 %v10600_v29  ;;  %v10673_v28 = vld [vmem:[%s12177_s12 + $0xbc0] ss:$16 sps:$4 sm:$0xff]   ;;  %v10678_v29 = vld [vmem:[%s12177_s12 + $0x9e4] ss:$16 sps:$4 sm:$0xff]  }
  0x9f   : > { %6785 = vmatprep.subr.bf16.mxu1 %v10603_v30  ;;  %v10681_v30 = vld [vmem:[%s12177_s12 + $0xbe4] ss:$16 sps:$4 sm:$0xff]  }
  0xa1   : > { %6745 = vmatpush1.bf16.msra.mxu0 %v10598_v31  ;;  %v10676_v31 = vld [vmem:[%s12177_s12 + $0x9e0] ss:$16 sps:$4 sm:$0xff]  }
  0xa2   : > { %6786 = vmatpush1.bf16.msra.mxu1 %v10601_v32  ;;  %6746 = vmatprep.subr.bf16.mxu0 %v10606_v33  ;;  %v10679_v32 = vld [vmem:[%s12177_s12 + $0xbe0] ss:$16 sps:$4 sm:$0xff]   ;;  %v10688_v33 = vld [vmem:[%s12177_s12 + $0xc04] ss:$16 sps:$4 sm:$0xff]  }
  0xa3   : > { %6787 = vmatprep.subr.bf16.mxu1 %v10609_v34  ;;  %v10691_v34 = vld [vmem:[%s12177_s12 + $0xe04] ss:$16 sps:$4 sm:$0xff]  }
  0xa5   : > { %6747 = vmatpush1.bf16.msra.mxu0 %v10604_v35  ;;  %v10686_v35 = vld [vmem:[%s12177_s12 + $0xc00] ss:$16 sps:$4 sm:$0xff]  }
  0xa6   : > { %6788 = vmatpush1.bf16.msra.mxu1 %v10607_v36  ;;  %6748 = vmatprep.subr.bf16.mxu0 %v10612_v39  ;;  %v10689_v36 = vld [vmem:[%s12177_s12 + $0xe00] ss:$16 sps:$4 sm:$0xff]   ;;  %v12434_v39 = vcombine.low %v12353_v23, %v12353_v23 }
  0xa7   : > { %6789 = vmatprep.subr.bf16.mxu1 %v10615_v40  ;;  %v12438_v40 = vcombine.low %v12356_v24, %v12356_v24 }
  0xa9   : > { %6749 = vmatpush1.bf16.msra.mxu0 %v10610_v41  ;;  %v12441_v41 = vld [vmem:[%s12172_s8 + $0x30] sm:$0xff] }
  0xaa   : > { %6790 = vmatpush1.bf16.msra.mxu1 %v10613_v42  ;;  %6750 = vmatprep.subr.bf16.mxu0 %v10618_v43  ;;  %v12444_v42 = vld [vmem:[%s12172_s8 + $0x38] sm:$0xff]  ;;  %v10694_v43 = vld [vmem:[%s12177_s12 + $0xc24] ss:$16 sps:$4 sm:$0xff]   ;;  %v12450_v23 = vcombine.high %v12441_v41, %v12441_v41 }
  0xab   : > { %6791 = vmatprep.subr.bf16.mxu1 %v10621_v44  ;;  %v10697_v44 = vld [vmem:[%s12177_s12 + $0xe24] ss:$16 sps:$4 sm:$0xff]   ;;  %v12454_v24 = vcombine.high %v12444_v42, %v12444_v42 }
  0xad   : > { %6751 = vmatpush1.bf16.msra.mxu0 %v10616_v45  ;;  %v10692_v45 = vld [vmem:[%s12177_s12 + $0xc20] ss:$16 sps:$4 sm:$0xff]  }
  0xae   : > { %6792 = vmatpush1.bf16.msra.mxu1 %v10619_v46  ;;  %6752 = vmatprep.subr.bf16.mxu0 %v10624_v47  ;;  %v10695_v46 = vld [vmem:[%s12177_s12 + $0xe20] ss:$16 sps:$4 sm:$0xff]   ;;  %v10700_v47 = vld [vmem:[%s12177_s12 + $0xc44] ss:$16 sps:$4 sm:$0xff]  }
  0xaf   : > { %6793 = vmatprep.subr.bf16.mxu1 %v10627_v49  ;;  %v10703_v49 = vld [vmem:[%s12177_s12 + $0xe44] ss:$16 sps:$4 sm:$0xff]  }
  0xb1   : > { %6753 = vmatpush1.bf16.msra.mxu0 %v10622_v50  ;;  %v10698_v50 = vld [vmem:[%s12177_s12 + $0xc40] ss:$16 sps:$4 sm:$0xff]  }
  0xb2   : > { %6794 = vmatpush1.bf16.msra.mxu1 %v10625_v51  ;;  %6754 = vmatprep.subr.bf16.mxu0 %v10630_v53  ;;  %v10701_v51 = vld [vmem:[%s12177_s12 + $0xe40] ss:$16 sps:$4 sm:$0xff]   ;;  %v10706_v53 = vld [vmem:[%s12177_s12 + $0xc64] ss:$16 sps:$4 sm:$0xff]  }
  0xb3   : > { %6795 = vmatprep.subr.bf16.mxu1 %v10633_v54  ;;  %v10709_v54 = vld [vmem:[%s12177_s12 + $0xe64] ss:$16 sps:$4 sm:$0xff]  }
  0xb5   : > { %6755 = vmatpush1.bf16.msra.mxu0 %v10628_v55  ;;  %v10704_v55 = vld [vmem:[%s12177_s12 + $0xc60] ss:$16 sps:$4 sm:$0xff]  }
  0xb6   : > { %6796 = vmatpush1.bf16.msra.mxu1 %v10631_v56  ;;  %6756 = vmatprep.subr.bf16.mxu0 %v10636_v57  ;;  %v10707_v56 = vld [vmem:[%s12177_s12 + $0xe60] ss:$16 sps:$4 sm:$0xff]   ;;  %v10712_v57 = vld [vmem:[%s12177_s12 + $0xc84] ss:$16 sps:$4 sm:$0xff]  }
  0xb7   : > { %6797 = vmatprep.subr.bf16.mxu1 %v10639_v58  ;;  %v10715_v58 = vld [vmem:[%s12177_s12 + $0xe84] ss:$16 sps:$4 sm:$0xff]  }
  0xb9   : > { %6757 = vmatpush1.bf16.msra.mxu0 %v10634_v59  ;;  %v10710_v59 = vld [vmem:[%s12177_s12 + $0xc80] ss:$16 sps:$4 sm:$0xff]  }
  0xba   : > { %6798 = vmatpush1.bf16.msra.mxu1 %v10637_v60  ;;  %6758 = vmatprep.subr.bf16.mxu0 %v10642_v61  ;;  %v10713_v60 = vld [vmem:[%s12177_s12 + $0xe80] ss:$16 sps:$4 sm:$0xff]   ;;  %v10718_v61 = vld [vmem:[%s12177_s12 + $0xca4] ss:$16 sps:$4 sm:$0xff]  }
  0xbb   : > { %6799 = vmatprep.subr.bf16.mxu1 %v10645_v62  ;;  %v10721_v62 = vld [vmem:[%s12177_s12 + $0xea4] ss:$16 sps:$4 sm:$0xff]  }
  0xbd   : > { %6759 = vmatpush1.bf16.msra.mxu0 %v10640_v63  ;;  %v10716_v63 = vld [vmem:[%s12177_s12 + $0xca0] ss:$16 sps:$4 sm:$0xff]  }
  0xbe   : > { %6800 = vmatpush1.bf16.msra.mxu1 %v10643_v0  ;;  %6760 = vmatprep.subr.bf16.mxu0 %v10648_v1  ;;  %v10719_v0 = vld [vmem:[%s12177_s12 + $0xea0] ss:$16 sps:$4 sm:$0xff]   ;;  %v10724_v1 = vld [vmem:[%s12177_s12 + $0xcc4] ss:$16 sps:$4 sm:$0xff]  }
  0xbf   : > { %6801 = vmatprep.subr.bf16.mxu1 %v10651_v2  ;;  %v10727_v2 = vld [vmem:[%s12177_s12 + $0xec4] ss:$16 sps:$4 sm:$0xff]  }
  0xc1   : > { %6761 = vmatpush1.bf16.msra.mxu0 %v10646_v3  ;;  %v10722_v3 = vld [vmem:[%s12177_s12 + $0xcc0] ss:$16 sps:$4 sm:$0xff]  }
  0xc2   : > { %6802 = vmatpush1.bf16.msra.mxu1 %v10649_v4  ;;  %6762 = vmatprep.subr.bf16.mxu0 %v10654_v5  ;;  %v10725_v4 = vld [vmem:[%s12177_s12 + $0xec0] ss:$16 sps:$4 sm:$0xff]   ;;  %v10730_v5 = vld [vmem:[%s12177_s12 + $0xce4] ss:$16 sps:$4 sm:$0xff]  }
  0xc3   : > { %6803 = vmatprep.subr.bf16.mxu1 %v10657_v6  ;;  %v10733_v6 = vld [vmem:[%s12177_s12 + $0xee4] ss:$16 sps:$4 sm:$0xff]  }
  0xc5   : > { %6763 = vmatpush1.bf16.msra.mxu0 %v10652_v9  ;;  %v10728_v9 = vld [vmem:[%s12177_s12 + $0xce0] ss:$16 sps:$4 sm:$0xff]  }
  0xc6   : > { %6804 = vmatpush1.bf16.msra.mxu1 %v10655_v10  ;;  %6764 = vmatprep.subr.bf16.mxu0 %v10660_v11  ;;  %v10731_v10 = vld [vmem:[%s12177_s12 + $0xee0] ss:$16 sps:$4 sm:$0xff]   ;;  %v10736_v11 = vld [vmem:[%s12177_s12 + $0xd04] ss:$16 sps:$4 sm:$0xff]  }
  0xc7   : > { %6805 = vmatprep.subr.bf16.mxu1 %v10663_v12  ;;  %v10739_v12 = vld [vmem:[%s12177_s12 + $0xf04] ss:$16 sps:$4 sm:$0xff]  }
  0xc9   : > { %6765 = vmatpush1.bf16.msra.mxu0 %v10658_v13  ;;  %v10734_v13 = vld [vmem:[%s12177_s12 + $0xd00] ss:$16 sps:$4 sm:$0xff]  }
  0xca   : > { %6806 = vmatpush1.bf16.msra.mxu1 %v10661_v14  ;;  %6766 = vmatprep.subr.bf16.mxu0 %v10666_v15  ;;  %v10737_v14 = vld [vmem:[%s12177_s12 + $0xf00] ss:$16 sps:$4 sm:$0xff]   ;;  %v10742_v15 = vld [vmem:[%s12177_s12 + $0xd24] ss:$16 sps:$4 sm:$0xff]  }
  0xcb   : > { %6807 = vmatprep.subr.bf16.mxu1 %v10669_v16  ;;  %v10745_v16 = vld [vmem:[%s12177_s12 + $0xf24] ss:$16 sps:$4 sm:$0xff]  }
  0xcd   : > { %6767 = vmatpush1.bf16.msra.mxu0 %v10664_v19  ;;  %v10740_v19 = vld [vmem:[%s12177_s12 + $0xd20] ss:$16 sps:$4 sm:$0xff]  }
  0xce   : > { %6808 = vmatpush1.bf16.msra.mxu1 %v10667_v20  ;;  %6768 = vmatprep.subr.bf16.mxu0 %v10672_v21  ;;  %v10743_v20 = vld [vmem:[%s12177_s12 + $0xf20] ss:$16 sps:$4 sm:$0xff]   ;;  %v10748_v21 = vld [vmem:[%s12177_s12 + $0xd44] ss:$16 sps:$4 sm:$0xff]  }
  0xcf   : > { %6809 = vmatprep.subr.bf16.mxu1 %v10675_v22  ;;  %v10751_v22 = vld [vmem:[%s12177_s12 + $0xf44] ss:$16 sps:$4 sm:$0xff]  }
  0xd1   : > { %6769 = vmatpush1.bf16.msra.mxu0 %v10670_v27  ;;  %v10746_v27 = vld [vmem:[%s12177_s12 + $0xd40] ss:$16 sps:$4 sm:$0xff]  }
  0xd2   : > { %6810 = vmatpush1.bf16.msra.mxu1 %v10673_v28  ;;  %6770 = vmatprep.subr.bf16.mxu0 %v10678_v29  ;;  %v10749_v28 = vld [vmem:[%s12177_s12 + $0xf40] ss:$16 sps:$4 sm:$0xff]   ;;  %v10754_v29 = vld [vmem:[%s12177_s12 + $0xd64] ss:$16 sps:$4 sm:$0xff]  }
  0xd3   : > { %6811 = vmatprep.subr.bf16.mxu1 %v10681_v30  ;;  %v10757_v30 = vld [vmem:[%s12177_s12 + $0xf64] ss:$16 sps:$4 sm:$0xff]  }
  0xd5   : > { %6771 = vmatpush1.bf16.msra.mxu0 %v10676_v31  ;;  %v10752_v31 = vld [vmem:[%s12177_s12 + $0xd60] ss:$16 sps:$4 sm:$0xff]  }
  0xd6   : > { %6812 = vmatpush1.bf16.msra.mxu1 %v10679_v32  ;;  %6822 = vmatprep.subr.bf16.mxu0 %v10688_v33  ;;  %v10755_v32 = vld [vmem:[%s12177_s12 + $0xf60] ss:$16 sps:$4 sm:$0xff]   ;;  %v10760_v33 = vld [vmem:[%s12177_s12 + $0xd84] ss:$16 sps:$4 sm:$0xff]  }
  0xd7   : > { %6863 = vmatprep.subr.bf16.mxu1 %v10691_v34  ;;  %v10763_v34 = vld [vmem:[%s12177_s12 + $0xf84] ss:$16 sps:$4 sm:$0xff]  }
  0xd8   : > { %6773 = vmatmul.mubr.bf16.vlgmr.msra.gmra.mrb[8].mxu0 %v12434_v39 }
  0xd9   : > { %6814 = vmatmul.mubr.bf16.vlgmr.msra.gmra.mrb[8].mxu1 %v12438_v40  ;;  %6823 = vmatpush1.bf16.msra.mxu0 %v10686_v35  ;;  %v10758_v35 = vld [vmem:[%s12177_s12 + $0xd80] ss:$16 sps:$4 sm:$0xff]  }
  0xda   : > { %6864 = vmatpush1.bf16.msra.mxu1 %v10689_v36  ;;  %6824 = vmatprep.subr.bf16.mxu0 %v10694_v43  ;;  %v10761_v36 = vld [vmem:[%s12177_s12 + $0xf80] ss:$16 sps:$4 sm:$0xff]   ;;  %v10766_v43 = vld [vmem:[%s12177_s12 + $0xda4] ss:$16 sps:$4 sm:$0xff]  }
  0xdb   : > { %6865 = vmatprep.subr.bf16.mxu1 %v10697_v44  ;;  %6854 = vmatprep.mubr.bf16.mxu0 %v12450_v23  ;;  %v10769_v44 = vld [vmem:[%s12177_s12 + $0xfa4] ss:$16 sps:$4 sm:$0xff]  }
  0xdc   : > { %6895 = vmatprep.mubr.bf16.mxu1 %v12454_v24 }
  0xdd   : > { %6825 = vmatpush1.bf16.msra.mxu0 %v10692_v45  ;;  %v10764_v45 = vld [vmem:[%s12177_s12 + $0xda0] ss:$16 sps:$4 sm:$0xff]  }
  0xde   : > { %6866 = vmatpush1.bf16.msra.mxu1 %v10695_v46  ;;  %6826 = vmatprep.subr.bf16.mxu0 %v10700_v47  ;;  %v10767_v46 = vld [vmem:[%s12177_s12 + $0xfa0] ss:$16 sps:$4 sm:$0xff]   ;;  %v10772_v47 = vld [vmem:[%s12177_s12 + $0xdc4] ss:$16 sps:$4 sm:$0xff]  }
  0xdf   : > { %6867 = vmatprep.subr.bf16.mxu1 %v10703_v49  ;;  %v10775_v49 = vld [vmem:[%s12177_s12 + $0xfc4] ss:$16 sps:$4 sm:$0xff]  }
  0xe1   : > { %6827 = vmatpush1.bf16.msra.mxu0 %v10698_v50  ;;  %v10770_v50 = vld [vmem:[%s12177_s12 + $0xdc0] ss:$16 sps:$4 sm:$0xff]  }
  0xe2   : > { %6868 = vmatpush1.bf16.msra.mxu1 %v10701_v51  ;;  %6828 = vmatprep.subr.bf16.mxu0 %v10706_v53  ;;  %v10773_v51 = vld [vmem:[%s12177_s12 + $0xfc0] ss:$16 sps:$4 sm:$0xff]   ;;  %v10778_v53 = vld [vmem:[%s12177_s12 + $0xde4] ss:$16 sps:$4 sm:$0xff]  }
  0xe3   : > { %6869 = vmatprep.subr.bf16.mxu1 %v10709_v54  ;;  %v10781_v54 = vld [vmem:[%s12177_s12 + $0xfe4] ss:$16 sps:$4 sm:$0xff]  }
  0xe5   : > { %6829 = vmatpush1.bf16.msra.mxu0 %v10704_v55  ;;  %v10776_v55 = vld [vmem:[%s12177_s12 + $0xde0] ss:$16 sps:$4 sm:$0xff]  }
  0xe6   : > { %6870 = vmatpush1.bf16.msra.mxu1 %v10707_v56  ;;  %6830 = vmatprep.subr.bf16.mxu0 %v10712_v57  ;;  %v10779_v56 = vld [vmem:[%s12177_s12 + $0xfe0] ss:$16 sps:$4 sm:$0xff]   ;;  %v10788_v57 = vld [vmem:[%s12177_s12 + $0x1004] ss:$16 sps:$4 sm:$0xff]  }
  0xe7   : > { %6871 = vmatprep.subr.bf16.mxu1 %v10715_v58  ;;  %v10791_v58 = vld [vmem:[%s12177_s12 + $0x1204] ss:$16 sps:$4 sm:$0xff]  }
  0xe9   : > { %6831 = vmatpush1.bf16.msra.mxu0 %v10710_v59  ;;  %v12521_v59 = vld [vmem:[%s12172_s8 + $0x40] sm:$0xff] }
  0xea   : > { %6872 = vmatpush1.bf16.msra.mxu1 %v10713_v60  ;;  %6832 = vmatprep.subr.bf16.mxu0 %v10718_v61  ;;  %v12525_v60 = vcombine.low %v12441_v41, %v12441_v41  ;;  %v12529_v61 = vcombine.low %v12444_v42, %v12444_v42  ;;  %v12540_v41 = vcombine.high %v12521_v59, %v12521_v59 }
  0xeb   : > { %6873 = vmatprep.subr.bf16.mxu1 %v10721_v62  ;;  %v12532_v62 = vld [vmem:[%s12172_s8 + $0x48] sm:$0xff] }
  0xec   : > { %v12544_v42 = vcombine.high %v12532_v62, %v12532_v62 }
  0xed   : > { %6833 = vmatpush1.bf16.msra.mxu0 %v10716_v63  ;;  %v10786_v63 = vld [vmem:[%s12177_s12 + $0x1000] ss:$16 sps:$4 sm:$0xff]  }
  0xee   : > { %6874 = vmatpush1.bf16.msra.mxu1 %v10719_v0  ;;  %6834 = vmatprep.subr.bf16.mxu0 %v10724_v1  ;;  %v10789_v0 = vld [vmem:[%s12177_s12 + $0x1200] ss:$16 sps:$4 sm:$0xff]   ;;  %v10794_v1 = vld [vmem:[%s12177_s12 + $0x1024] ss:$16 sps:$4 sm:$0xff]  }
  0xef   : > { %6875 = vmatprep.subr.bf16.mxu1 %v10727_v2  ;;  %v10797_v2 = vld [vmem:[%s12177_s12 + $0x1224] ss:$16 sps:$4 sm:$0xff]  }
  0xf1   : > { %6835 = vmatpush1.bf16.msra.mxu0 %v10722_v3  ;;  %v10792_v3 = vld [vmem:[%s12177_s12 + $0x1020] ss:$16 sps:$4 sm:$0xff]  }
  0xf2   : > { %6876 = vmatpush1.bf16.msra.mxu1 %v10725_v4  ;;  %6836 = vmatprep.subr.bf16.mxu0 %v10730_v5  ;;  %v10795_v4 = vld [vmem:[%s12177_s12 + $0x1220] ss:$16 sps:$4 sm:$0xff]   ;;  %v10800_v5 = vld [vmem:[%s12177_s12 + $0x1044] ss:$16 sps:$4 sm:$0xff]  }
  0xf3   : > { %6877 = vmatprep.subr.bf16.mxu1 %v10733_v6  ;;  %v10803_v6 = vld [vmem:[%s12177_s12 + $0x1244] ss:$16 sps:$4 sm:$0xff]  }
  0xf5   : > { %6837 = vmatpush1.bf16.msra.mxu0 %v10728_v9  ;;  %v10798_v9 = vld [vmem:[%s12177_s12 + $0x1040] ss:$16 sps:$4 sm:$0xff]  }
  0xf6   : > { %6878 = vmatpush1.bf16.msra.mxu1 %v10731_v10  ;;  %6838 = vmatprep.subr.bf16.mxu0 %v10736_v11  ;;  %v10801_v10 = vld [vmem:[%s12177_s12 + $0x1240] ss:$16 sps:$4 sm:$0xff]   ;;  %v10806_v11 = vld [vmem:[%s12177_s12 + $0x1064] ss:$16 sps:$4 sm:$0xff]  }
  0xf7   : > { %6879 = vmatprep.subr.bf16.mxu1 %v10739_v12  ;;  %v10809_v12 = vld [vmem:[%s12177_s12 + $0x1264] ss:$16 sps:$4 sm:$0xff]  }
  0xf9   : > { %6839 = vmatpush1.bf16.msra.mxu0 %v10734_v13  ;;  %v10804_v13 = vld [vmem:[%s12177_s12 + $0x1060] ss:$16 sps:$4 sm:$0xff]  }
  0xfa   : > { %6880 = vmatpush1.bf16.msra.mxu1 %v10737_v14  ;;  %6840 = vmatprep.subr.bf16.mxu0 %v10742_v15  ;;  %v10807_v14 = vld [vmem:[%s12177_s12 + $0x1260] ss:$16 sps:$4 sm:$0xff]   ;;  %v10812_v15 = vld [vmem:[%s12177_s12 + $0x1084] ss:$16 sps:$4 sm:$0xff]  }
  0xfb   : > { %6881 = vmatprep.subr.bf16.mxu1 %v10745_v16  ;;  %v10815_v16 = vld [vmem:[%s12177_s12 + $0x1284] ss:$16 sps:$4 sm:$0xff]  }
  0xfd   : > { %6841 = vmatpush1.bf16.msra.mxu0 %v10740_v19  ;;  %v10810_v19 = vld [vmem:[%s12177_s12 + $0x1080] ss:$16 sps:$4 sm:$0xff]  }
  0xfe   : > { %6882 = vmatpush1.bf16.msra.mxu1 %v10743_v20  ;;  %6842 = vmatprep.subr.bf16.mxu0 %v10748_v21  ;;  %v10813_v20 = vld [vmem:[%s12177_s12 + $0x1280] ss:$16 sps:$4 sm:$0xff]   ;;  %v10818_v21 = vld [vmem:[%s12177_s12 + $0x10a4] ss:$16 sps:$4 sm:$0xff]  }
  0xff   : > { %6883 = vmatprep.subr.bf16.mxu1 %v10751_v22  ;;  %v10821_v22 = vld [vmem:[%s12177_s12 + $0x12a4] ss:$16 sps:$4 sm:$0xff]  }
 0x101   : > { %6843 = vmatpush1.bf16.msra.mxu0 %v10746_v27  ;;  %v10816_v27 = vld [vmem:[%s12177_s12 + $0x10a0] ss:$16 sps:$4 sm:$0xff]  }
 0x102   : > { %6884 = vmatpush1.bf16.msra.mxu1 %v10749_v28  ;;  %6844 = vmatprep.subr.bf16.mxu0 %v10754_v29  ;;  %v10819_v28 = vld [vmem:[%s12177_s12 + $0x12a0] ss:$16 sps:$4 sm:$0xff]   ;;  %v10824_v29 = vld [vmem:[%s12177_s12 + $0x10c4] ss:$16 sps:$4 sm:$0xff]  }
 0x103   : > { %6885 = vmatprep.subr.bf16.mxu1 %v10757_v30  ;;  %v10827_v30 = vld [vmem:[%s12177_s12 + $0x12c4] ss:$16 sps:$4 sm:$0xff]  }
 0x105   : > { %6845 = vmatpush1.bf16.msra.mxu0 %v10752_v31 }
 0x106   : > { %6886 = vmatpush1.bf16.msra.mxu1 %v10755_v32  ;;  %6846 = vmatprep.subr.bf16.mxu0 %v10760_v33  ;;  %v10822_v33 = vld [vmem:[%s12177_s12 + $0x10c0] ss:$16 sps:$4 sm:$0xff]  }
 0x107   : > { %6887 = vmatprep.subr.bf16.mxu1 %v10763_v34  ;;  %v10825_v34 = vld [vmem:[%s12177_s12 + $0x12c0] ss:$16 sps:$4 sm:$0xff]  }
 0x109   : > { %6847 = vmatpush1.bf16.msra.mxu0 %v10758_v35 }
 0x10a   : > { %6888 = vmatpush1.bf16.msra.mxu1 %v10761_v36  ;;  %6848 = vmatprep.subr.bf16.mxu0 %v10766_v43 }
 0x10b   : > { %6889 = vmatprep.subr.bf16.mxu1 %v10769_v44 }
 0x10d   : > { %6849 = vmatpush1.bf16.msra.mxu0 %v10764_v45 }
 0x10e   : > { %6890 = vmatpush1.bf16.msra.mxu1 %v10767_v46  ;;  %6850 = vmatprep.subr.bf16.mxu0 %v10772_v47 }
 0x10f   : > { %6891 = vmatprep.subr.bf16.mxu1 %v10775_v49 }
 0x111   : > { %6851 = vmatpush1.bf16.msra.mxu0 %v10770_v50  ;;  %v10830_v50 = vld [vmem:[%s12177_s12 + $0x10e4] ss:$16 sps:$4 sm:$0xff]  }
 0x112   : > { %6892 = vmatpush1.bf16.msra.mxu1 %v10773_v51  ;;  %6852 = vmatprep.subr.bf16.mxu0 %v10778_v53  ;;  %v10833_v51 = vld [vmem:[%s12177_s12 + $0x12e4] ss:$16 sps:$4 sm:$0xff]   ;;  %v10828_v53 = vld [vmem:[%s12177_s12 + $0x10e0] ss:$16 sps:$4 sm:$0xff]  }
 0x113   : > { %6893 = vmatprep.subr.bf16.mxu1 %v10781_v54  ;;  %v10831_v54 = vld [vmem:[%s12177_s12 + $0x12e0] ss:$16 sps:$4 sm:$0xff]  }
 0x115   : > { %6853 = vmatpush1.bf16.msra.mxu0 %v10776_v55  ;;  %v10836_v55 = vld [vmem:[%s12177_s12 + $0x1104] ss:$16 sps:$4 sm:$0xff]  }
 0x116   : > { %6894 = vmatpush1.bf16.msra.mxu1 %v10779_v56  ;;  %6904 = vmatprep.subr.bf16.mxu0 %v10788_v57  ;;  %v10839_v56 = vld [vmem:[%s12177_s12 + $0x1304] ss:$16 sps:$4 sm:$0xff]   ;;  %v10834_v57 = vld [vmem:[%s12177_s12 + $0x1100] ss:$16 sps:$4 sm:$0xff]  }
 0x117   : > { %6945 = vmatprep.subr.bf16.mxu1 %v10791_v58  ;;  %v10837_v58 = vld [vmem:[%s12177_s12 + $0x1300] ss:$16 sps:$4 sm:$0xff]  }
 0x118   : > { %6855 = vmatmul.mubr.bf16.vlgmr.msra.gmra.mrb[12].mxu0 %v12525_v60 }
 0x119   : > { %6896 = vmatmul.mubr.bf16.vlgmr.msra.gmra.mrb[12].mxu1 %v12529_v61  ;;  %6905 = vmatpush1.bf16.msra.mxu0 %v10786_v63  ;;  %v10842_v63 = vld [vmem:[%s12177_s12 + $0x1124] ss:$16 sps:$4 sm:$0xff]  }
 0x11a   : > { %6946 = vmatpush1.bf16.msra.mxu1 %v10789_v0  ;;  %6906 = vmatprep.subr.bf16.mxu0 %v10794_v1  ;;  %v10845_v0 = vld [vmem:[%s12177_s12 + $0x1324] ss:$16 sps:$4 sm:$0xff]   ;;  %v10840_v1 = vld [vmem:[%s12177_s12 + $0x1120] ss:$16 sps:$4 sm:$0xff]  }
 0x11b   : > { %6947 = vmatprep.subr.bf16.mxu1 %v10797_v2  ;;  %6936 = vmatprep.mubr.bf16.mxu0 %v12540_v41  ;;  %v10843_v2 = vld [vmem:[%s12177_s12 + $0x1320] ss:$16 sps:$4 sm:$0xff]  }
 0x11c   : > { %6977 = vmatprep.mubr.bf16.mxu1 %v12544_v42 }
 0x11d   : > { %6907 = vmatpush1.bf16.msra.mxu0 %v10792_v3  ;;  %v10848_v3 = vld [vmem:[%s12177_s12 + $0x1144] ss:$16 sps:$4 sm:$0xff]  }
 0x11e   : > { %6948 = vmatpush1.bf16.msra.mxu1 %v10795_v4  ;;  %6908 = vmatprep.subr.bf16.mxu0 %v10800_v5  ;;  %v10851_v4 = vld [vmem:[%s12177_s12 + $0x1344] ss:$16 sps:$4 sm:$0xff]   ;;  %v10846_v5 = vld [vmem:[%s12177_s12 + $0x1140] ss:$16 sps:$4 sm:$0xff]  }
 0x11f   : > { %6949 = vmatprep.subr.bf16.mxu1 %v10803_v6  ;;  %v10849_v6 = vld [vmem:[%s12177_s12 + $0x1340] ss:$16 sps:$4 sm:$0xff]  }
 0x121   : > { %6909 = vmatpush1.bf16.msra.mxu0 %v10798_v9  ;;  %v10854_v9 = vld [vmem:[%s12177_s12 + $0x1164] ss:$16 sps:$4 sm:$0xff]  }
 0x122   : > { %6950 = vmatpush1.bf16.msra.mxu1 %v10801_v10  ;;  %6910 = vmatprep.subr.bf16.mxu0 %v10806_v11  ;;  %v10857_v10 = vld [vmem:[%s12177_s12 + $0x1364] ss:$16 sps:$4 sm:$0xff]   ;;  %v10852_v11 = vld [vmem:[%s12177_s12 + $0x1160] ss:$16 sps:$4 sm:$0xff]  }
 0x123   : > { %6951 = vmatprep.subr.bf16.mxu1 %v10809_v12  ;;  %v10855_v12 = vld [vmem:[%s12177_s12 + $0x1360] ss:$16 sps:$4 sm:$0xff]  }
 0x125   : > { %6911 = vmatpush1.bf16.msra.mxu0 %v10804_v13  ;;  %v10860_v13 = vld [vmem:[%s12177_s12 + $0x1184] ss:$16 sps:$4 sm:$0xff]  }
 0x126   : > { %6952 = vmatpush1.bf16.msra.mxu1 %v10807_v14  ;;  %6912 = vmatprep.subr.bf16.mxu0 %v10812_v15  ;;  %v10863_v14 = vld [vmem:[%s12177_s12 + $0x1384] ss:$16 sps:$4 sm:$0xff]   ;;  %v10858_v15 = vld [vmem:[%s12177_s12 + $0x1180] ss:$16 sps:$4 sm:$0xff]  }
 0x127   : > { %6953 = vmatprep.subr.bf16.mxu1 %v10815_v16  ;;  %v10861_v16 = vld [vmem:[%s12177_s12 + $0x1380] ss:$16 sps:$4 sm:$0xff]  }
 0x129   : > { %6913 = vmatpush1.bf16.msra.mxu0 %v10810_v19  ;;  %v10866_v19 = vld [vmem:[%s12177_s12 + $0x11a4] ss:$16 sps:$4 sm:$0xff]  }
 0x12a   : > { %6954 = vmatpush1.bf16.msra.mxu1 %v10813_v20  ;;  %6914 = vmatprep.subr.bf16.mxu0 %v10818_v21  ;;  %v10869_v20 = vld [vmem:[%s12177_s12 + $0x13a4] ss:$16 sps:$4 sm:$0xff]   ;;  %v10864_v21 = vld [vmem:[%s12177_s12 + $0x11a0] ss:$16 sps:$4 sm:$0xff]  }
 0x12b   : > { %6955 = vmatprep.subr.bf16.mxu1 %v10821_v22  ;;  %v6610_v31 = vpop.f32.mrb[0].mxu0  ;;  %v10867_v22 = vld [vmem:[%s12177_s12 + $0x13a0] ss:$16 sps:$4 sm:$0xff]  }
 0x12c   : > { %v6651_v32 = vpop.f32.mrb[0].mxu1  ;;  %v6612_v36 = vpop.f32.mrb[1].mxu0 }
 0x12d   : > { %v12572_v35 = vadd.f32 %v6651_v32, %v6610_v31  ;;  %v6653_v43 = vpop.f32.mrb[1].mxu1  ;;  %v6614_v45 = vpop.f32.mrb[2].mxu0  ;;  %6915 = vmatpush1.bf16.msra.mxu0 %v10816_v27  ;;  %v10872_v27 = vld [vmem:[%s12177_s12 + $0x11c4] ss:$16 sps:$4 sm:$0xff]  }
 0x12e   : > { %v12574_v44 = vadd.f32 %v6653_v43, %v6612_v36  ;;  %v6655_v46 = vpop.f32.mrb[2].mxu1  ;;  %6956 = vmatpush1.bf16.msra.mxu1 %v10819_v28  ;;  %v6615_v47 = vpop.f32.mrb[3].mxu0  ;;  %6916 = vmatprep.subr.bf16.mxu0 %v10824_v29  ;;  %v10875_v28 = vld [vmem:[%s12177_s12 + $0x13c4] ss:$16 sps:$4 sm:$0xff]   ;;  %v10870_v29 = vld [vmem:[%s12177_s12 + $0x11c0] ss:$16 sps:$4 sm:$0xff]  }
 0x12f   : > { %v6656_v49 = vpop.f32.mrb[3].mxu1  ;;  %6957 = vmatprep.subr.bf16.mxu1 %v10827_v30  ;;  %v10873_v30 = vld [vmem:[%s12177_s12 + $0x13c0] ss:$16 sps:$4 sm:$0xff]   ;;  %v10878_v31 = vld [vmem:[%s12177_s12 + $0x11e4] ss:$16 sps:$4 sm:$0xff]   ;;  %v12618_v47 = vcombine.low %v12521_v59, %v12521_v59 }
 0x130   : > { %v10881_v32 = vld [vmem:[%s12177_s12 + $0x13e4] ss:$16 sps:$4 sm:$0xff]   ;;  %v10886_v45 = vld [vmem:[%s12177_s12 + $0x1400] ss:$16 sps:$4 sm:$0xff]   ;;  %v12622_v49 = vcombine.low %v12532_v62, %v12532_v62 }
 0x131   : > { %6917 = vmatpush1.bf16.msra.mxu0 %v10822_v33  ;;  %v10876_v33 = vld [vmem:[%s12177_s12 + $0x11e0] ss:$16 sps:$4 sm:$0xff]   ;;  %v10888_v36 = vld [vmem:[%s12177_s12 + $0x1404] ss:$16 sps:$4 sm:$0xff]  }
 0x132   : > { %6958 = vmatpush1.bf16.msra.mxu1 %v10825_v34  ;;  %6918 = vmatprep.subr.bf16.mxu0 %v10830_v50  ;;  %v10879_v34 = vld [vmem:[%s12177_s12 + $0x13e0] ss:$16 sps:$4 sm:$0xff]   ;;  %v10891_v43 = vld [vmem:[%s12177_s12 + $0x1604] ss:$16 sps:$4 sm:$0xff]  }
 0x133   : > { %6959 = vmatprep.subr.bf16.mxu1 %v10833_v51  ;;  %v10889_v46 = vld [vmem:[%s12177_s12 + $0x1600] ss:$16 sps:$4 sm:$0xff]   ;;  %v12628_v51 = vld [vmem:[%s12172_s8 + $0x58] sm:$0xff] }
 0x134   : > { %v12625_v50 = vld [vmem:[%s12172_s8 + $0x50] sm:$0xff]  ;;  %v12638_v62 = vcombine.high %v12628_v51, %v12628_v51 }
 0x135   : > { %6919 = vmatpush1.bf16.msra.mxu0 %v10828_v53  ;;  %v10894_v53 = vld [vmem:[%s12177_s12 + $0x1424] ss:$16 sps:$4 sm:$0xff]   ;;  %v12634_v59 = vcombine.high %v12625_v50, %v12625_v50 }
 0x136   : > { %6960 = vmatpush1.bf16.msra.mxu1 %v10831_v54  ;;  %6920 = vmatprep.subr.bf16.mxu0 %v10836_v55  ;;  %v10897_v54 = vld [vmem:[%s12177_s12 + $0x1624] ss:$16 sps:$4 sm:$0xff]   ;;  %v10892_v55 = vld [vmem:[%s12177_s12 + $0x1420] ss:$16 sps:$4 sm:$0xff]  }
 0x137   : > { %6961 = vmatprep.subr.bf16.mxu1 %v10839_v56  ;;  %v10895_v56 = vld [vmem:[%s12177_s12 + $0x1620] ss:$16 sps:$4 sm:$0xff]  }
 0x139   : > { %6921 = vmatpush1.bf16.msra.mxu0 %v10834_v57  ;;  %v10900_v57 = vld [vmem:[%s12177_s12 + $0x1444] ss:$16 sps:$4 sm:$0xff]  }
 0x13a   : > { %6962 = vmatpush1.bf16.msra.mxu1 %v10837_v58  ;;  %6922 = vmatprep.subr.bf16.mxu0 %v10842_v63  ;;  %v10903_v58 = vld [vmem:[%s12177_s12 + $0x1644] ss:$16 sps:$4 sm:$0xff]   ;;  %v10898_v63 = vld [vmem:[%s12177_s12 + $0x1440] ss:$16 sps:$4 sm:$0xff]  }
 0x13b   : > { %6963 = vmatprep.subr.bf16.mxu1 %v10845_v0  ;;  %v10901_v0 = vld [vmem:[%s12177_s12 + $0x1640] ss:$16 sps:$4 sm:$0xff]  }
 0x13d   : > { %6923 = vmatpush1.bf16.msra.mxu0 %v10840_v1  ;;  %v10906_v1 = vld [vmem:[%s12177_s12 + $0x1464] ss:$16 sps:$4 sm:$0xff]  }
 0x13e   : > { %6964 = vmatpush1.bf16.msra.mxu1 %v10843_v2  ;;  %6924 = vmatprep.subr.bf16.mxu0 %v10848_v3  ;;  %v10909_v2 = vld [vmem:[%s12177_s12 + $0x1664] ss:$16 sps:$4 sm:$0xff]   ;;  %v10904_v3 = vld [vmem:[%s12177_s12 + $0x1460] ss:$16 sps:$4 sm:$0xff]  }
 0x13f   : > { %6965 = vmatprep.subr.bf16.mxu1 %v10851_v4  ;;  %v10907_v4 = vld [vmem:[%s12177_s12 + $0x1660] ss:$16 sps:$4 sm:$0xff]  }
 0x141   : > { %6925 = vmatpush1.bf16.msra.mxu0 %v10846_v5  ;;  %v10912_v5 = vld [vmem:[%s12177_s12 + $0x1484] ss:$16 sps:$4 sm:$0xff]  }
 0x142   : > { %6966 = vmatpush1.bf16.msra.mxu1 %v10849_v6  ;;  %6926 = vmatprep.subr.bf16.mxu0 %v10854_v9  ;;  %v10915_v6 = vld [vmem:[%s12177_s12 + $0x1684] ss:$16 sps:$4 sm:$0xff]   ;;  %v10910_v9 = vld [vmem:[%s12177_s12 + $0x1480] ss:$16 sps:$4 sm:$0xff]  }
 0x143   : > { %6967 = vmatprep.subr.bf16.mxu1 %v10857_v10  ;;  %v10913_v10 = vld [vmem:[%s12177_s12 + $0x1680] ss:$16 sps:$4 sm:$0xff]  }
 0x145   : > { %6927 = vmatpush1.bf16.msra.mxu0 %v10852_v11  ;;  %v10918_v11 = vld [vmem:[%s12177_s12 + $0x14a4] ss:$16 sps:$4 sm:$0xff]  }
 0x146   : > { %6968 = vmatpush1.bf16.msra.mxu1 %v10855_v12  ;;  %6928 = vmatprep.subr.bf16.mxu0 %v10860_v13  ;;  %v10921_v12 = vld [vmem:[%s12177_s12 + $0x16a4] ss:$16 sps:$4 sm:$0xff]   ;;  %v10916_v13 = vld [vmem:[%s12177_s12 + $0x14a0] ss:$16 sps:$4 sm:$0xff]  }
 0x147   : > { %6969 = vmatprep.subr.bf16.mxu1 %v10863_v14  ;;  %v10919_v14 = vld [vmem:[%s12177_s12 + $0x16a0] ss:$16 sps:$4 sm:$0xff]  }
 0x149   : > { %6929 = vmatpush1.bf16.msra.mxu0 %v10858_v15  ;;  %v10924_v15 = vld [vmem:[%s12177_s12 + $0x14c4] ss:$16 sps:$4 sm:$0xff]  }
 0x14a   : > { %6970 = vmatpush1.bf16.msra.mxu1 %v10861_v16  ;;  %6930 = vmatprep.subr.bf16.mxu0 %v10866_v19  ;;  %v10927_v16 = vld [vmem:[%s12177_s12 + $0x16c4] ss:$16 sps:$4 sm:$0xff]  }
 0x14b   : > { %6971 = vmatprep.subr.bf16.mxu1 %v10869_v20 }
 0x14d   : > { %6931 = vmatpush1.bf16.msra.mxu0 %v10864_v21  ;;  %v10922_v21 = vld [vmem:[%s12177_s12 + $0x14c0] ss:$16 sps:$4 sm:$0xff]  }
 0x14e   : > { %6972 = vmatpush1.bf16.msra.mxu1 %v10867_v22  ;;  %6932 = vmatprep.subr.bf16.mxu0 %v10872_v27  ;;  %v10925_v22 = vld [vmem:[%s12177_s12 + $0x16c0] ss:$16 sps:$4 sm:$0xff]  }
 0x14f   : > { %6973 = vmatprep.subr.bf16.mxu1 %v10875_v28 }
 0x151   : > { %6933 = vmatpush1.bf16.msra.mxu0 %v10870_v29 }
 0x152   : > { %6974 = vmatpush1.bf16.msra.mxu1 %v10873_v30  ;;  %6934 = vmatprep.subr.bf16.mxu0 %v10878_v31 }
 0x153   : > { %6975 = vmatprep.subr.bf16.mxu1 %v10881_v32 }
 0x155   : > { %6935 = vmatpush1.bf16.msra.mxu0 %v10876_v33 }
 0x156   : > { %6976 = vmatpush1.bf16.msra.mxu1 %v10879_v34  ;;  %6986 = vmatprep.subr.bf16.mxu0 %v10888_v36 }
 0x157   : > { %7027 = vmatprep.subr.bf16.mxu1 %v10891_v43  ;;  %v10933_v43 = vld [vmem:[%s12177_s12 + $0x16e4] ss:$16 sps:$4 sm:$0xff]  }
 0x158   : > { %6937 = vmatmul.mubr.bf16.vlgmr.msra.gmra.mrb[16].mxu0 %v12618_v47 }
 0x159   : > { %6978 = vmatmul.mubr.bf16.vlgmr.msra.gmra.mrb[16].mxu1 %v12622_v49  ;;  %6987 = vmatpush1.bf16.msra.mxu0 %v10886_v45 }
 0x15a   : > { %7028 = vmatpush1.bf16.msra.mxu1 %v10889_v46  ;;  %6988 = vmatprep.subr.bf16.mxu0 %v10894_v53  ;;  %v10931_v46 = vld [vmem:[%s12177_s12 + $0x16e0] ss:$16 sps:$4 sm:$0xff]   ;;  %v10936_v53 = vld [vmem:[%s12177_s12 + $0x1504] ss:$16 sps:$4 sm:$0xff]  }
 0x15b   : > { %7029 = vmatprep.subr.bf16.mxu1 %v10897_v54  ;;  %7018 = vmatprep.mubr.bf16.mxu0 %v12634_v59  ;;  %v10939_v54 = vld [vmem:[%s12177_s12 + $0x1704] ss:$16 sps:$4 sm:$0xff]  }
 0x15c   : > { %7059 = vmatprep.mubr.bf16.mxu1 %v12638_v62 }
 0x15d   : > { %6989 = vmatpush1.bf16.msra.mxu0 %v10892_v55  ;;  %v10934_v55 = vld [vmem:[%s12177_s12 + $0x1500] ss:$16 sps:$4 sm:$0xff]  }
 0x15e   : > { %7030 = vmatpush1.bf16.msra.mxu1 %v10895_v56  ;;  %6990 = vmatprep.subr.bf16.mxu0 %v10900_v57  ;;  %v10937_v56 = vld [vmem:[%s12177_s12 + $0x1700] ss:$16 sps:$4 sm:$0xff]   ;;  %v10942_v57 = vld [vmem:[%s12177_s12 + $0x1524] ss:$16 sps:$4 sm:$0xff]  }
 0x15f   : > { %7031 = vmatprep.subr.bf16.mxu1 %v10903_v58  ;;  %v10945_v58 = vld [vmem:[%s12177_s12 + $0x1724] ss:$16 sps:$4 sm:$0xff]  }
 0x161   : > { %6991 = vmatpush1.bf16.msra.mxu0 %v10898_v63  ;;  %v10940_v63 = vld [vmem:[%s12177_s12 + $0x1520] ss:$16 sps:$4 sm:$0xff]  }
 0x162   : > { %7032 = vmatpush1.bf16.msra.mxu1 %v10901_v0  ;;  %6992 = vmatprep.subr.bf16.mxu0 %v10906_v1  ;;  %v10943_v0 = vld [vmem:[%s12177_s12 + $0x1720] ss:$16 sps:$4 sm:$0xff]   ;;  %v10948_v1 = vld [vmem:[%s12177_s12 + $0x1544] ss:$16 sps:$4 sm:$0xff]  }
 0x163   : > { %7033 = vmatprep.subr.bf16.mxu1 %v10909_v2  ;;  %v10951_v2 = vld [vmem:[%s12177_s12 + $0x1744] ss:$16 sps:$4 sm:$0xff]  }
 0x165   : > { %6993 = vmatpush1.bf16.msra.mxu0 %v10904_v3  ;;  %v10946_v3 = vld [vmem:[%s12177_s12 + $0x1540] ss:$16 sps:$4 sm:$0xff]  }
 0x166   : > { %7034 = vmatpush1.bf16.msra.mxu1 %v10907_v4  ;;  %6994 = vmatprep.subr.bf16.mxu0 %v10912_v5  ;;  %v10949_v4 = vld [vmem:[%s12177_s12 + $0x1740] ss:$16 sps:$4 sm:$0xff]   ;;  %v10954_v5 = vld [vmem:[%s12177_s12 + $0x1564] ss:$16 sps:$4 sm:$0xff]  }
 0x167   : > { %7035 = vmatprep.subr.bf16.mxu1 %v10915_v6  ;;  %v10957_v6 = vld [vmem:[%s12177_s12 + $0x1764] ss:$16 sps:$4 sm:$0xff]  }
 0x169   : > { %6995 = vmatpush1.bf16.msra.mxu0 %v10910_v9  ;;  %v10952_v9 = vld [vmem:[%s12177_s12 + $0x1560] ss:$16 sps:$4 sm:$0xff]  }
 0x16a   : > { %7036 = vmatpush1.bf16.msra.mxu1 %v10913_v10  ;;  %6996 = vmatprep.subr.bf16.mxu0 %v10918_v11  ;;  %v10955_v10 = vld [vmem:[%s12177_s12 + $0x1760] ss:$16 sps:$4 sm:$0xff]   ;;  %v10960_v11 = vld [vmem:[%s12177_s12 + $0x1584] ss:$16 sps:$4 sm:$0xff]  }
 0x16b   : > { %7037 = vmatprep.subr.bf16.mxu1 %v10921_v12  ;;  %v6692_v19 = vpop.f32.mrb[4].mxu0  ;;  %v10963_v12 = vld [vmem:[%s12177_s12 + $0x1784] ss:$16 sps:$4 sm:$0xff]  }
 0x16c   : > { %v6733_v20 = vpop.f32.mrb[4].mxu1  ;;  %v6693_v27 = vadd.f32 %v6692_v19, %v12572_v35  ;;  %v6694_v28 = vpop.f32.mrb[5].mxu0  ;;  %v10930_v35 = vld [vmem:[%s12177_s12 + $0x14e4] ss:$16 sps:$4 sm:$0xff]   ;;  %v10964_v19 = vld [vmem:[%s12177_s12 + $0x15a0] ss:$16 sps:$4 sm:$0xff]  }
 0x16d   : > { %v6735_v29 = vpop.f32.mrb[5].mxu1  ;;  %v6695_v30 = vadd.f32 %v6694_v28, %v12574_v44  ;;  %v6696_v31 = vpop.f32.mrb[6].mxu0  ;;  %6997 = vmatpush1.bf16.msra.mxu0 %v10916_v13  ;;  %v10928_v44 = vld [vmem:[%s12177_s12 + $0x14e0] ss:$16 sps:$4 sm:$0xff]  }
 0x16e   : > { %v6737_v32 = vpop.f32.mrb[6].mxu1  ;;  %7038 = vmatpush1.bf16.msra.mxu1 %v10919_v14  ;;  %v12668_v33 = vadd.f32 %v6733_v20, %v6693_v27  ;;  %v6697_v34 = vpop.f32.mrb[7].mxu0  ;;  %6998 = vmatprep.subr.bf16.mxu0 %v10924_v15  ;;  %v10958_v13 = vld [vmem:[%s12177_s12 + $0x1580] ss:$16 sps:$4 sm:$0xff]   ;;  %v10966_v15 = vld [vmem:[%s12177_s12 + $0x15a4] ss:$16 sps:$4 sm:$0xff]  }
 0x16f   : > { %v6738_v36 = vpop.f32.mrb[7].mxu1  ;;  %7039 = vmatprep.subr.bf16.mxu1 %v10927_v16  ;;  %v12672_v45 = vadd.f32 %v6735_v29, %v6695_v30  ;;  %v10961_v14 = vld [vmem:[%s12177_s12 + $0x1780] ss:$16 sps:$4 sm:$0xff]   ;;  %v10969_v16 = vld [vmem:[%s12177_s12 + $0x17a4] ss:$16 sps:$4 sm:$0xff]  }
 0x170   : > { %v10967_v20 = vld [vmem:[%s12177_s12 + $0x17a0] ss:$16 sps:$4 sm:$0xff]   ;;  %v10978_v29 = vld [vmem:[%s12177_s12 + $0x15e4] ss:$16 sps:$4 sm:$0xff]  }
 0x171   : > { %6999 = vmatpush1.bf16.msra.mxu0 %v10922_v21  ;;  %v10972_v21 = vld [vmem:[%s12177_s12 + $0x15c4] ss:$16 sps:$4 sm:$0xff]   ;;  %v10970_v27 = vld [vmem:[%s12177_s12 + $0x15c0] ss:$16 sps:$4 sm:$0xff]  }
 0x172   : > { %7040 = vmatpush1.bf16.msra.mxu1 %v10925_v22  ;;  %7000 = vmatprep.subr.bf16.mxu0 %v10930_v35  ;;  %v10975_v22 = vld [vmem:[%s12177_s12 + $0x17c4] ss:$16 sps:$4 sm:$0xff]   ;;  %v10973_v28 = vld [vmem:[%s12177_s12 + $0x17c0] ss:$16 sps:$4 sm:$0xff]  }
 0x173   : > { %7041 = vmatprep.subr.bf16.mxu1 %v10933_v43  ;;  %v10981_v30 = vld [vmem:[%s12177_s12 + $0x17e4] ss:$16 sps:$4 sm:$0xff]   ;;  %v10976_v31 = vld [vmem:[%s12177_s12 + $0x15e0] ss:$16 sps:$4 sm:$0xff]  }
 0x174   : > { %v10979_v32 = vld [vmem:[%s12177_s12 + $0x17e0] ss:$16 sps:$4 sm:$0xff]   ;;  %v10988_v34 = vld [vmem:[%s12177_s12 + $0x1804] ss:$16 sps:$4 sm:$0xff]  }
 0x175   : > { %7001 = vmatpush1.bf16.msra.mxu0 %v10928_v44  ;;  %v10991_v36 = vld [vmem:[%s12177_s12 + $0x1a04] ss:$16 sps:$4 sm:$0xff]   ;;  %v10986_v35 = vld [vmem:[%s12177_s12 + $0x1800] ss:$16 sps:$4 sm:$0xff]   ;;  %v12714_v44 = vcombine.low %v12625_v50, %v12625_v50 }
 0x176   : > { %7042 = vmatpush1.bf16.msra.mxu1 %v10931_v46  ;;  %7002 = vmatprep.subr.bf16.mxu0 %v10936_v53  ;;  %v10989_v43 = vld [vmem:[%s12177_s12 + $0x1a00] ss:$16 sps:$4 sm:$0xff]   ;;  %v12718_v46 = vcombine.low %v12628_v51, %v12628_v51 }
 0x177   : > { %7043 = vmatprep.subr.bf16.mxu1 %v10939_v54  ;;  %v12721_v53 = vld [vmem:[%s12172_s8 + $0x60] sm:$0xff]  ;;  %v12724_v54 = vld [vmem:[%s12172_s8 + $0x68] sm:$0xff] }
 0x178   : > { %v12730_v50 = vcombine.high %v12721_v53, %v12721_v53  ;;  %v12734_v51 = vcombine.high %v12724_v54, %v12724_v54 }
 0x179   : > { %7003 = vmatpush1.bf16.msra.mxu0 %v10934_v55  ;;  %v10994_v55 = vld [vmem:[%s12177_s12 + $0x1824] ss:$16 sps:$4 sm:$0xff]  }
 0x17a   : > { %7044 = vmatpush1.bf16.msra.mxu1 %v10937_v56  ;;  %7004 = vmatprep.subr.bf16.mxu0 %v10942_v57  ;;  %v10997_v56 = vld [vmem:[%s12177_s12 + $0x1a24] ss:$16 sps:$4 sm:$0xff]   ;;  %v10992_v57 = vld [vmem:[%s12177_s12 + $0x1820] ss:$16 sps:$4 sm:$0xff]  }
 0x17b   : > { %7045 = vmatprep.subr.bf16.mxu1 %v10945_v58  ;;  %v10995_v58 = vld [vmem:[%s12177_s12 + $0x1a20] ss:$16 sps:$4 sm:$0xff]  }
 0x17d   : > { %7005 = vmatpush1.bf16.msra.mxu0 %v10940_v63  ;;  %v11000_v63 = vld [vmem:[%s12177_s12 + $0x1844] ss:$16 sps:$4 sm:$0xff]  }
 0x17e   : > { %7046 = vmatpush1.bf16.msra.mxu1 %v10943_v0  ;;  %7006 = vmatprep.subr.bf16.mxu0 %v10948_v1  ;;  %v11003_v0 = vld [vmem:[%s12177_s12 + $0x1a44] ss:$16 sps:$4 sm:$0xff]   ;;  %v10998_v1 = vld [vmem:[%s12177_s12 + $0x1840] ss:$16 sps:$4 sm:$0xff]  }
 0x17f   : > { %7047 = vmatprep.subr.bf16.mxu1 %v10951_v2  ;;  %v11001_v2 = vld [vmem:[%s12177_s12 + $0x1a40] ss:$16 sps:$4 sm:$0xff]  }
 0x181   : > { %7007 = vmatpush1.bf16.msra.mxu0 %v10946_v3  ;;  %v11006_v3 = vld [vmem:[%s12177_s12 + $0x1864] ss:$16 sps:$4 sm:$0xff]  }
 0x182   : > { %7048 = vmatpush1.bf16.msra.mxu1 %v10949_v4  ;;  %7008 = vmatprep.subr.bf16.mxu0 %v10954_v5  ;;  %v11009_v4 = vld [vmem:[%s12177_s12 + $0x1a64] ss:$16 sps:$4 sm:$0xff]   ;;  %v11004_v5 = vld [vmem:[%s12177_s12 + $0x1860] ss:$16 sps:$4 sm:$0xff]  }
 0x183   : > { %7049 = vmatprep.subr.bf16.mxu1 %v10957_v6  ;;  %v11007_v6 = vld [vmem:[%s12177_s12 + $0x1a60] ss:$16 sps:$4 sm:$0xff]  }
 0x185   : > { %7009 = vmatpush1.bf16.msra.mxu0 %v10952_v9  ;;  %v11012_v9 = vld [vmem:[%s12177_s12 + $0x1884] ss:$16 sps:$4 sm:$0xff]  }
 0x186   : > { %7050 = vmatpush1.bf16.msra.mxu1 %v10955_v10  ;;  %7010 = vmatprep.subr.bf16.mxu0 %v10960_v11  ;;  %v11015_v10 = vld [vmem:[%s12177_s12 + $0x1a84] ss:$16 sps:$4 sm:$0xff]   ;;  %v11010_v11 = vld [vmem:[%s12177_s12 + $0x1880] ss:$16 sps:$4 sm:$0xff]  }
 0x187   : > { %7051 = vmatprep.subr.bf16.mxu1 %v10963_v12  ;;  %v11013_v12 = vld [vmem:[%s12177_s12 + $0x1a80] ss:$16 sps:$4 sm:$0xff]  }
 0x189   : > { %7011 = vmatpush1.bf16.msra.mxu0 %v10958_v13  ;;  %v11018_v13 = vld [vmem:[%s12177_s12 + $0x18a4] ss:$16 sps:$4 sm:$0xff]  }
 0x18a   : > { %7052 = vmatpush1.bf16.msra.mxu1 %v10961_v14  ;;  %7012 = vmatprep.subr.bf16.mxu0 %v10966_v15  ;;  %v11021_v14 = vld [vmem:[%s12177_s12 + $0x1aa4] ss:$16 sps:$4 sm:$0xff]   ;;  %v11016_v15 = vld [vmem:[%s12177_s12 + $0x18a0] ss:$16 sps:$4 sm:$0xff]  }
 0x18b   : > { %7053 = vmatprep.subr.bf16.mxu1 %v10969_v16  ;;  %v11019_v16 = vld [vmem:[%s12177_s12 + $0x1aa0] ss:$16 sps:$4 sm:$0xff]  }
 0x18d   : > { %7013 = vmatpush1.bf16.msra.mxu0 %v10964_v19  ;;  %v11024_v19 = vld [vmem:[%s12177_s12 + $0x18c4] ss:$16 sps:$4 sm:$0xff]  }
 0x18e   : > { %7054 = vmatpush1.bf16.msra.mxu1 %v10967_v20  ;;  %7014 = vmatprep.subr.bf16.mxu0 %v10972_v21  ;;  %v11027_v20 = vld [vmem:[%s12177_s12 + $0x1ac4] ss:$16 sps:$4 sm:$0xff]  }
 0x18f   : > { %7055 = vmatprep.subr.bf16.mxu1 %v10975_v22 }
 0x191   : > { %7015 = vmatpush1.bf16.msra.mxu0 %v10970_v27  ;;  %v11022_v27 = vld [vmem:[%s12177_s12 + $0x18c0] ss:$16 sps:$4 sm:$0xff]  }
 0x192   : > { %7056 = vmatpush1.bf16.msra.mxu1 %v10973_v28  ;;  %7016 = vmatprep.subr.bf16.mxu0 %v10978_v29  ;;  %v11025_v28 = vld [vmem:[%s12177_s12 + $0x1ac0] ss:$16 sps:$4 sm:$0xff]  }
 0x193   : > { %7057 = vmatprep.subr.bf16.mxu1 %v10981_v30 }
 0x195   : > { %7017 = vmatpush1.bf16.msra.mxu0 %v10976_v31 }
 0x196   : > { %7058 = vmatpush1.bf16.msra.mxu1 %v10979_v32  ;;  %7068 = vmatprep.subr.bf16.mxu0 %v10988_v34 }
 0x197   : > { %7109 = vmatprep.subr.bf16.mxu1 %v10991_v36 }
 0x198   : > { %7019 = vmatmul.mubr.bf16.vlgmr.msra.gmra.mrb[20].mxu0 %v12714_v44 }
 0x199   : > { %7060 = vmatmul.mubr.bf16.vlgmr.msra.gmra.mrb[20].mxu1 %v12718_v46  ;;  %7069 = vmatpush1.bf16.msra.mxu0 %v10986_v35 }
 0x19a   : > { %7110 = vmatpush1.bf16.msra.mxu1 %v10989_v43  ;;  %7070 = vmatprep.subr.bf16.mxu0 %v10994_v55 }
 0x19b   : > { %7111 = vmatprep.subr.bf16.mxu1 %v10997_v56  ;;  %7100 = vmatprep.mubr.bf16.mxu0 %v12730_v50  ;;  %v11033_v56 = vld [vmem:[%s12177_s12 + $0x1ae4] ss:$16 sps:$4 sm:$0xff]  }
 0x19c   : > { %7141 = vmatprep.mubr.bf16.mxu1 %v12734_v51 }
 0x19d   : > { %7071 = vmatpush1.bf16.msra.mxu0 %v10992_v57 }
 0x19e   : > { %7112 = vmatpush1.bf16.msra.mxu1 %v10995_v58  ;;  %7072 = vmatprep.subr.bf16.mxu0 %v11000_v63  ;;  %v11031_v58 = vld [vmem:[%s12177_s12 + $0x1ae0] ss:$16 sps:$4 sm:$0xff]   ;;  %v11036_v63 = vld [vmem:[%s12177_s12 + $0x1904] ss:$16 sps:$4 sm:$0xff]  }
 0x19f   : > { %7113 = vmatprep.subr.bf16.mxu1 %v11003_v0  ;;  %v11039_v0 = vld [vmem:[%s12177_s12 + $0x1b04] ss:$16 sps:$4 sm:$0xff]  }
 0x1a1   : > { %7073 = vmatpush1.bf16.msra.mxu0 %v10998_v1  ;;  %v11034_v1 = vld [vmem:[%s12177_s12 + $0x1900] ss:$16 sps:$4 sm:$0xff]  }
 0x1a2   : > { %7114 = vmatpush1.bf16.msra.mxu1 %v11001_v2  ;;  %7074 = vmatprep.subr.bf16.mxu0 %v11006_v3  ;;  %v11037_v2 = vld [vmem:[%s12177_s12 + $0x1b00] ss:$16 sps:$4 sm:$0xff]   ;;  %v11042_v3 = vld [vmem:[%s12177_s12 + $0x1924] ss:$16 sps:$4 sm:$0xff]  }
 0x1a3   : > { %7115 = vmatprep.subr.bf16.mxu1 %v11009_v4  ;;  %v11045_v4 = vld [vmem:[%s12177_s12 + $0x1b24] ss:$16 sps:$4 sm:$0xff]  }
 0x1a5   : > { %7075 = vmatpush1.bf16.msra.mxu0 %v11004_v5  ;;  %v11040_v5 = vld [vmem:[%s12177_s12 + $0x1920] ss:$16 sps:$4 sm:$0xff]  }
 0x1a6   : > { %7116 = vmatpush1.bf16.msra.mxu1 %v11007_v6  ;;  %7076 = vmatprep.subr.bf16.mxu0 %v11012_v9  ;;  %v11043_v6 = vld [vmem:[%s12177_s12 + $0x1b20] ss:$16 sps:$4 sm:$0xff]   ;;  %v11048_v9 = vld [vmem:[%s12177_s12 + $0x1944] ss:$16 sps:$4 sm:$0xff]  }
 0x1a7   : > { %7117 = vmatprep.subr.bf16.mxu1 %v11015_v10  ;;  %v11051_v10 = vld [vmem:[%s12177_s12 + $0x1b44] ss:$16 sps:$4 sm:$0xff]  }
 0x1a9   : > { %7077 = vmatpush1.bf16.msra.mxu0 %v11010_v11  ;;  %v11046_v11 = vld [vmem:[%s12177_s12 + $0x1940] ss:$16 sps:$4 sm:$0xff]  }
 0x1aa   : > { %7118 = vmatpush1.bf16.msra.mxu1 %v11013_v12  ;;  %7078 = vmatprep.subr.bf16.mxu0 %v11018_v13  ;;  %v11049_v12 = vld [vmem:[%s12177_s12 + $0x1b40] ss:$16 sps:$4 sm:$0xff]   ;;  %v11054_v13 = vld [vmem:[%s12177_s12 + $0x1964] ss:$16 sps:$4 sm:$0xff]  }
 0x1ab   : > { %7119 = vmatprep.subr.bf16.mxu1 %v11021_v14  ;;  %v6774_v21 = vpop.f32.mrb[8].mxu0  ;;  %v11057_v14 = vld [vmem:[%s12177_s12 + $0x1b64] ss:$16 sps:$4 sm:$0xff]  }
 0x1ac   : > { %v6815_v22 = vpop.f32.mrb[8].mxu1  ;;  %v6775_v29 = vadd.f32 %v6774_v21, %v12668_v33  ;;  %v6776_v30 = vpop.f32.mrb[9].mxu0  ;;  %v11030_v33 = vld [vmem:[%s12177_s12 + $0x18e4] ss:$16 sps:$4 sm:$0xff]   ;;  %v11058_v21 = vld [vmem:[%s12177_s12 + $0x1980] ss:$16 sps:$4 sm:$0xff]  }
 0x1ad   : > { %v6817_v31 = vpop.f32.mrb[9].mxu1  ;;  %v6777_v32 = vadd.f32 %v6776_v30, %v12672_v45  ;;  %v6778_v34 = vpop.f32.mrb[10].mxu0  ;;  %7079 = vmatpush1.bf16.msra.mxu0 %v11016_v15  ;;  %v11028_v45 = vld [vmem:[%s12177_s12 + $0x18e0] ss:$16 sps:$4 sm:$0xff]  }
 0x1ae   : > { %v6819_v36 = vpop.f32.mrb[10].mxu1  ;;  %7120 = vmatpush1.bf16.msra.mxu1 %v11019_v16  ;;  %v12764_v35 = vadd.f32 %v6815_v22, %v6775_v29  ;;  %v6779_v43 = vpop.f32.mrb[11].mxu0  ;;  %7080 = vmatprep.subr.bf16.mxu0 %v11024_v19  ;;  %v11052_v15 = vld [vmem:[%s12177_s12 + $0x1960] ss:$16 sps:$4 sm:$0xff]   ;;  %v11060_v19 = vld [vmem:[%s12177_s12 + $0x1984] ss:$16 sps:$4 sm:$0xff]  }
 0x1af   : > { %v6820_v55 = vpop.f32.mrb[11].mxu1  ;;  %7121 = vmatprep.subr.bf16.mxu1 %v11027_v20  ;;  %v12768_v57 = vadd.f32 %v6817_v31, %v6777_v32  ;;  %v11055_v16 = vld [vmem:[%s12177_s12 + $0x1b60] ss:$16 sps:$4 sm:$0xff]   ;;  %v11063_v20 = vld [vmem:[%s12177_s12 + $0x1b84] ss:$16 sps:$4 sm:$0xff]  }
 0x1b0   : > { %v11061_v22 = vld [vmem:[%s12177_s12 + $0x1b80] ss:$16 sps:$4 sm:$0xff]   ;;  %v11072_v31 = vld [vmem:[%s12177_s12 + $0x19c4] ss:$16 sps:$4 sm:$0xff]  }
 0x1b1   : > { %7081 = vmatpush1.bf16.msra.mxu0 %v11022_v27  ;;  %v11066_v27 = vld [vmem:[%s12177_s12 + $0x19a4] ss:$16 sps:$4 sm:$0xff]   ;;  %v11064_v29 = vld [vmem:[%s12177_s12 + $0x19a0] ss:$16 sps:$4 sm:$0xff]  }
 0x1b2   : > { %7122 = vmatpush1.bf16.msra.mxu1 %v11025_v28  ;;  %7082 = vmatprep.subr.bf16.mxu0 %v11030_v33  ;;  %v11069_v28 = vld [vmem:[%s12177_s12 + $0x1ba4] ss:$16 sps:$4 sm:$0xff]   ;;  %v11067_v30 = vld [vmem:[%s12177_s12 + $0x1ba0] ss:$16 sps:$4 sm:$0xff]  }
 0x1b3   : > { %7123 = vmatprep.subr.bf16.mxu1 %v11033_v56  ;;  %v11075_v32 = vld [vmem:[%s12177_s12 + $0x1bc4] ss:$16 sps:$4 sm:$0xff]   ;;  %v11070_v34 = vld [vmem:[%s12177_s12 + $0x19c0] ss:$16 sps:$4 sm:$0xff]  }
 0x1b4   : > { %v11073_v36 = vld [vmem:[%s12177_s12 + $0x1bc0] ss:$16 sps:$4 sm:$0xff]   ;;  %v11078_v43 = vld [vmem:[%s12177_s12 + $0x19e4] ss:$16 sps:$4 sm:$0xff]  }
 0x1b5   : > { %7083 = vmatpush1.bf16.msra.mxu0 %v11028_v45  ;;  %v11081_v55 = vld [vmem:[%s12177_s12 + $0x1be4] ss:$16 sps:$4 sm:$0xff]   ;;  %v11076_v33 = vld [vmem:[%s12177_s12 + $0x19e0] ss:$16 sps:$4 sm:$0xff]  }
 0x1b6   : > { %7124 = vmatpush1.bf16.msra.mxu1 %v11031_v58  ;;  %7084 = vmatprep.subr.bf16.mxu0 %v11036_v63  ;;  %v11079_v56 = vld [vmem:[%s12177_s12 + $0x1be0] ss:$16 sps:$4 sm:$0xff]   ;;  %v11088_v45 = vld [vmem:[%s12177_s12 + $0x1c04] ss:$16 sps:$4 sm:$0xff]  }
 0x1b7   : > { %7125 = vmatprep.subr.bf16.mxu1 %v11039_v0  ;;  %v11091_v58 = vld [vmem:[%s12177_s12 + $0x1e04] ss:$16 sps:$4 sm:$0xff]   ;;  %v12810_v0 = vld [vmem:[%s12172_s8 + $0x78] sm:$0xff] }
 0x1b8   : > { %v12807_v63 = vld [vmem:[%s12172_s8 + $0x70] sm:$0xff] }
 0x1b9   : > { %7085 = vmatpush1.bf16.msra.mxu0 %v11034_v1  ;;  %v11086_v1 = vld [vmem:[%s12177_s12 + $0x1c00] ss:$16 sps:$4 sm:$0xff]  }
 0x1ba   : > { %7126 = vmatpush1.bf16.msra.mxu1 %v11037_v2  ;;  %7086 = vmatprep.subr.bf16.mxu0 %v11042_v3  ;;  %v11089_v2 = vld [vmem:[%s12177_s12 + $0x1e00] ss:$16 sps:$4 sm:$0xff]   ;;  %v12816_v3 = vcombine.low %v12721_v53, %v12721_v53  ;;  %v12830_v53 = vcombine.high %v12810_v0, %v12810_v0 }
 0x1bb   : > { %7127 = vmatprep.subr.bf16.mxu1 %v11045_v4  ;;  %v12820_v4 = vcombine.low %v12724_v54, %v12724_v54  ;;  %v11092_v54 = vld [vmem:[%s12177_s12 + $0x1c20] ss:$16 sps:$4 sm:$0xff]  }
 0x1bd   : > { %7087 = vmatpush1.bf16.msra.mxu0 %v11040_v5  ;;  %v11094_v5 = vld [vmem:[%s12177_s12 + $0x1c24] ss:$16 sps:$4 sm:$0xff]  }
 0x1be   : > { %7128 = vmatpush1.bf16.msra.mxu1 %v11043_v6  ;;  %7088 = vmatprep.subr.bf16.mxu0 %v11048_v9  ;;  %v11097_v6 = vld [vmem:[%s12177_s12 + $0x1e24] ss:$16 sps:$4 sm:$0xff]   ;;  %v12826_v9 = vcombine.high %v12807_v63, %v12807_v63 }
 0x1bf   : > { %7129 = vmatprep.subr.bf16.mxu1 %v11051_v10  ;;  %v11095_v10 = vld [vmem:[%s12177_s12 + $0x1e20] ss:$16 sps:$4 sm:$0xff]  }
 0x1c1   : > { %7089 = vmatpush1.bf16.msra.mxu0 %v11046_v11  ;;  %v11100_v11 = vld [vmem:[%s12177_s12 + $0x1c44] ss:$16 sps:$4 sm:$0xff]  }
 0x1c2   : > { %7130 = vmatpush1.bf16.msra.mxu1 %v11049_v12  ;;  %7090 = vmatprep.subr.bf16.mxu0 %v11054_v13  ;;  %v11103_v12 = vld [vmem:[%s12177_s12 + $0x1e44] ss:$16 sps:$4 sm:$0xff]   ;;  %v11098_v13 = vld [vmem:[%s12177_s12 + $0x1c40] ss:$16 sps:$4 sm:$0xff]  }
 0x1c3   : > { %7131 = vmatprep.subr.bf16.mxu1 %v11057_v14  ;;  %v11101_v14 = vld [vmem:[%s12177_s12 + $0x1e40] ss:$16 sps:$4 sm:$0xff]  }
 0x1c5   : > { %7091 = vmatpush1.bf16.msra.mxu0 %v11052_v15  ;;  %v11106_v15 = vld [vmem:[%s12177_s12 + $0x1c64] ss:$16 sps:$4 sm:$0xff]  }
 0x1c6   : > { %7132 = vmatpush1.bf16.msra.mxu1 %v11055_v16  ;;  %7092 = vmatprep.subr.bf16.mxu0 %v11060_v19  ;;  %v11109_v16 = vld [vmem:[%s12177_s12 + $0x1e64] ss:$16 sps:$4 sm:$0xff]   ;;  %v11104_v19 = vld [vmem:[%s12177_s12 + $0x1c60] ss:$16 sps:$4 sm:$0xff]  }
 0x1c7   : > { %7133 = vmatprep.subr.bf16.mxu1 %v11063_v20  ;;  %v11107_v20 = vld [vmem:[%s12177_s12 + $0x1e60] ss:$16 sps:$4 sm:$0xff]  }
 0x1c9   : > { %7093 = vmatpush1.bf16.msra.mxu0 %v11058_v21  ;;  %v11112_v21 = vld [vmem:[%s12177_s12 + $0x1c84] ss:$16 sps:$4 sm:$0xff]  }
 0x1ca   : > { %7134 = vmatpush1.bf16.msra.mxu1 %v11061_v22  ;;  %7094 = vmatprep.subr.bf16.mxu0 %v11066_v27  ;;  %v11115_v22 = vld [vmem:[%s12177_s12 + $0x1e84] ss:$16 sps:$4 sm:$0xff]   ;;  %v11110_v27 = vld [vmem:[%s12177_s12 + $0x1c80] ss:$16 sps:$4 sm:$0xff]  }
 0x1cb   : > { %7135 = vmatprep.subr.bf16.mxu1 %v11069_v28  ;;  %v11113_v28 = vld [vmem:[%s12177_s12 + $0x1e80] ss:$16 sps:$4 sm:$0xff]  }
 0x1cd   : > { %7095 = vmatpush1.bf16.msra.mxu0 %v11064_v29  ;;  %v11118_v29 = vld [vmem:[%s12177_s12 + $0x1ca4] ss:$16 sps:$4 sm:$0xff]  }
 0x1ce   : > { %7136 = vmatpush1.bf16.msra.mxu1 %v11067_v30  ;;  %7096 = vmatprep.subr.bf16.mxu0 %v11072_v31  ;;  %v11121_v30 = vld [vmem:[%s12177_s12 + $0x1ea4] ss:$16 sps:$4 sm:$0xff]   ;;  %v11116_v31 = vld [vmem:[%s12177_s12 + $0x1ca0] ss:$16 sps:$4 sm:$0xff]  }
 0x1cf   : > { %7137 = vmatprep.subr.bf16.mxu1 %v11075_v32  ;;  %v11119_v32 = vld [vmem:[%s12177_s12 + $0x1ea0] ss:$16 sps:$4 sm:$0xff]  }
 0x1d1   : > { %7097 = vmatpush1.bf16.msra.mxu0 %v11070_v34  ;;  %v11124_v34 = vld [vmem:[%s12177_s12 + $0x1cc4] ss:$16 sps:$4 sm:$0xff]  }
 0x1d2   : > { %7138 = vmatpush1.bf16.msra.mxu1 %v11073_v36  ;;  %7098 = vmatprep.subr.bf16.mxu0 %v11078_v43  ;;  %v11127_v36 = vld [vmem:[%s12177_s12 + $0x1ec4] ss:$16 sps:$4 sm:$0xff]  }
 0x1d3   : > { %7139 = vmatprep.subr.bf16.mxu1 %v11081_v55 }
 0x1d5   : > { %7099 = vmatpush1.bf16.msra.mxu0 %v11076_v33  ;;  %v11122_v33 = vld [vmem:[%s12177_s12 + $0x1cc0] ss:$16 sps:$4 sm:$0xff]  }
 0x1d6   : > { %7140 = vmatpush1.bf16.msra.mxu1 %v11079_v56  ;;  %7150 = vmatprep.subr.bf16.mxu0 %v11088_v45  ;;  %v11125_v56 = vld [vmem:[%s12177_s12 + $0x1ec0] ss:$16 sps:$4 sm:$0xff]  }
 0x1d7   : > { %7191 = vmatprep.subr.bf16.mxu1 %v11091_v58 }
 0x1d8   : > { %7101 = vmatmul.mubr.bf16.vlgmr.msra.gmra.mrb[24].mxu0 %v12816_v3 }
 0x1d9   : > { %7142 = vmatmul.mubr.bf16.vlgmr.msra.gmra.mrb[24].mxu1 %v12820_v4  ;;  %7151 = vmatpush1.bf16.msra.mxu0 %v11086_v1 }
 0x1da   : > { %7192 = vmatpush1.bf16.msra.mxu1 %v11089_v2  ;;  %7152 = vmatprep.subr.bf16.mxu0 %v11094_v5 }
 0x1db   : > { %7193 = vmatprep.subr.bf16.mxu1 %v11097_v6  ;;  %7182 = vmatprep.mubr.bf16.mxu0 %v12826_v9 }
 0x1dc   : > { %7223 = vmatprep.mubr.bf16.mxu1 %v12830_v53 }
 0x1dd   : > { %7153 = vmatpush1.bf16.msra.mxu0 %v11092_v54 }
 0x1de   : > { %7194 = vmatpush1.bf16.msra.mxu1 %v11095_v10  ;;  %7154 = vmatprep.subr.bf16.mxu0 %v11100_v11 }
 0x1df   : > { %7195 = vmatprep.subr.bf16.mxu1 %v11103_v12  ;;  %v11133_v12 = vld [vmem:[%s12177_s12 + $0x1ee4] ss:$16 sps:$4 sm:$0xff]  }
 0x1e1   : > { %7155 = vmatpush1.bf16.msra.mxu0 %v11098_v13 }
 0x1e2   : > { %7196 = vmatpush1.bf16.msra.mxu1 %v11101_v14  ;;  %7156 = vmatprep.subr.bf16.mxu0 %v11106_v15  ;;  %v11131_v14 = vld [vmem:[%s12177_s12 + $0x1ee0] ss:$16 sps:$4 sm:$0xff]   ;;  %v11136_v15 = vld [vmem:[%s12177_s12 + $0x1d04] ss:$16 sps:$4 sm:$0xff]  }
 0x1e3   : > { %7197 = vmatprep.subr.bf16.mxu1 %v11109_v16  ;;  %v11139_v16 = vld [vmem:[%s12177_s12 + $0x1f04] ss:$16 sps:$4 sm:$0xff]  }
 0x1e5   : > { %7157 = vmatpush1.bf16.msra.mxu0 %v11104_v19  ;;  %v11134_v19 = vld [vmem:[%s12177_s12 + $0x1d00] ss:$16 sps:$4 sm:$0xff]  }
 0x1e6   : > { %7198 = vmatpush1.bf16.msra.mxu1 %v11107_v20  ;;  %7158 = vmatprep.subr.bf16.mxu0 %v11112_v21  ;;  %v11137_v20 = vld [vmem:[%s12177_s12 + $0x1f00] ss:$16 sps:$4 sm:$0xff]   ;;  %v11142_v21 = vld [vmem:[%s12177_s12 + $0x1d24] ss:$16 sps:$4 sm:$0xff]  }
 0x1e7   : > { %7199 = vmatprep.subr.bf16.mxu1 %v11115_v22  ;;  %v11145_v22 = vld [vmem:[%s12177_s12 + $0x1f24] ss:$16 sps:$4 sm:$0xff]  }
 0x1e9   : > { %7159 = vmatpush1.bf16.msra.mxu0 %v11110_v27  ;;  %v11140_v27 = vld [vmem:[%s12177_s12 + $0x1d20] ss:$16 sps:$4 sm:$0xff]  }
 0x1ea   : > { %7200 = vmatpush1.bf16.msra.mxu1 %v11113_v28  ;;  %7160 = vmatprep.subr.bf16.mxu0 %v11118_v29  ;;  %v11143_v28 = vld [vmem:[%s12177_s12 + $0x1f20] ss:$16 sps:$4 sm:$0xff]   ;;  %v11148_v29 = vld [vmem:[%s12177_s12 + $0x1d44] ss:$16 sps:$4 sm:$0xff]  }
 0x1eb   : > { %7201 = vmatprep.subr.bf16.mxu1 %v11121_v30  ;;  %v6856_v43 = vpop.f32.mrb[12].mxu0  ;;  %v11151_v30 = vld [vmem:[%s12177_s12 + $0x1f44] ss:$16 sps:$4 sm:$0xff]  }
 0x1ec   : > { %v6897_v55 = vpop.f32.mrb[12].mxu1  ;;  %v6857_v45 = vadd.f32 %v6856_v43, %v12764_v35  ;;  %v6858_v58 = vpop.f32.mrb[13].mxu0  ;;  %v11130_v35 = vld [vmem:[%s12177_s12 + $0x1ce4] ss:$16 sps:$4 sm:$0xff]   ;;  %v11152_v43 = vld [vmem:[%s12177_s12 + $0x1d60] ss:$16 sps:$4 sm:$0xff]  }
 0x1ed   : > { %v6899_v1 = vpop.f32.mrb[13].mxu1  ;;  %v6859_v2 = vadd.f32 %v6858_v58, %v12768_v57  ;;  %v6860_v5 = vpop.f32.mrb[14].mxu0  ;;  %7161 = vmatpush1.bf16.msra.mxu0 %v11116_v31  ;;  %v11128_v57 = vld [vmem:[%s12177_s12 + $0x1ce0] ss:$16 sps:$4 sm:$0xff]  }
 0x1ee   : > { %v6901_v6 = vpop.f32.mrb[14].mxu1  ;;  %7202 = vmatpush1.bf16.msra.mxu1 %v11119_v32  ;;  %v12860_v54 = vadd.f32 %v6897_v55, %v6857_v45  ;;  %v6861_v10 = vpop.f32.mrb[15].mxu0  ;;  %7162 = vmatprep.subr.bf16.mxu0 %v11124_v34  ;;  %v11146_v31 = vld [vmem:[%s12177_s12 + $0x1d40] ss:$16 sps:$4 sm:$0xff]   ;;  %v11154_v34 = vld [vmem:[%s12177_s12 + $0x1d64] ss:$16 sps:$4 sm:$0xff]  }
 0x1ef   : > { %v6902_v11 = vpop.f32.mrb[15].mxu1  ;;  %7203 = vmatprep.subr.bf16.mxu1 %v11127_v36  ;;  %v12864_v13 = vadd.f32 %v6899_v1, %v6859_v2  ;;  %v11149_v32 = vld [vmem:[%s12177_s12 + $0x1f40] ss:$16 sps:$4 sm:$0xff]   ;;  %v11157_v36 = vld [vmem:[%s12177_s12 + $0x1f64] ss:$16 sps:$4 sm:$0xff]  }
 0x1f0   : > { %v11155_v55 = vld [vmem:[%s12177_s12 + $0x1f60] ss:$16 sps:$4 sm:$0xff]   ;;  %v11166_v1 = vld [vmem:[%s12177_s12 + $0x1da4] ss:$16 sps:$4 sm:$0xff]  }
 0x1f1   : > { %7163 = vmatpush1.bf16.msra.mxu0 %v11122_v33  ;;  %v11160_v33 = vld [vmem:[%s12177_s12 + $0x1d84] ss:$16 sps:$4 sm:$0xff]   ;;  %v11158_v45 = vld [vmem:[%s12177_s12 + $0x1d80] ss:$16 sps:$4 sm:$0xff]  }
 0x1f2   : > { %7204 = vmatpush1.bf16.msra.mxu1 %v11125_v56  ;;  %7164 = vmatprep.subr.bf16.mxu0 %v11130_v35  ;;  %v11163_v56 = vld [vmem:[%s12177_s12 + $0x1f84] ss:$16 sps:$4 sm:$0xff]   ;;  %v11161_v58 = vld [vmem:[%s12177_s12 + $0x1f80] ss:$16 sps:$4 sm:$0xff]  }
 0x1f3   : > { %7205 = vmatprep.subr.bf16.mxu1 %v11133_v12  ;;  %v11169_v2 = vld [vmem:[%s12177_s12 + $0x1fa4] ss:$16 sps:$4 sm:$0xff]   ;;  %v11164_v5 = vld [vmem:[%s12177_s12 + $0x1da0] ss:$16 sps:$4 sm:$0xff]  }
 0x1f4   : > { %v11167_v6 = vld [vmem:[%s12177_s12 + $0x1fa0] ss:$16 sps:$4 sm:$0xff]   ;;  %v11172_v10 = vld [vmem:[%s12177_s12 + $0x1dc4] ss:$16 sps:$4 sm:$0xff]  }
 0x1f5   : > { %7165 = vmatpush1.bf16.msra.mxu0 %v11128_v57  ;;  %v11175_v11 = vld [vmem:[%s12177_s12 + $0x1fc4] ss:$16 sps:$4 sm:$0xff]   ;;  %v11170_v35 = vld [vmem:[%s12177_s12 + $0x1dc0] ss:$16 sps:$4 sm:$0xff]  }
 0x1f6   : > { %7206 = vmatpush1.bf16.msra.mxu1 %v11131_v14  ;;  %7166 = vmatprep.subr.bf16.mxu0 %v11136_v15  ;;  %v11173_v12 = vld [vmem:[%s12177_s12 + $0x1fc0] ss:$16 sps:$4 sm:$0xff]   ;;  %v11178_v57 = vld [vmem:[%s12177_s12 + $0x1de4] ss:$16 sps:$4 sm:$0xff]  }
 0x1f7   : > { %7207 = vmatprep.subr.bf16.mxu1 %v11139_v16  ;;  %v11181_v14 = vld [vmem:[%s12177_s12 + $0x1fe4] ss:$16 sps:$4 sm:$0xff]   ;;  %v11176_v15 = vld [vmem:[%s12177_s12 + $0x1de0] ss:$16 sps:$4 sm:$0xff]  }
 0x1f8   : > { %v11179_v16 = vld [vmem:[%s12177_s12 + $0x1fe0] ss:$16 sps:$4 sm:$0xff]  }
 0x1f9   : > { %7167 = vmatpush1.bf16.msra.mxu0 %v11134_v19  ;;  %v11188_v19 = vld [vmem:[%s12177_s12 + $0xc] ss:$16 sps:$4 sm:$0xff]  }
 0x1fa   : > { %7208 = vmatpush1.bf16.msra.mxu1 %v11137_v20  ;;  %7168 = vmatprep.subr.bf16.mxu0 %v11142_v21  ;;  %v11191_v20 = vld [vmem:[%s12177_s12 + $0x20c] ss:$16 sps:$4 sm:$0xff]   ;;  %v11186_v21 = vld [vmem:[%s12177_s12 + $0x8] ss:$16 sps:$4 sm:$0xff]  }
 0x1fb   : > { %7209 = vmatprep.subr.bf16.mxu1 %v11145_v22  ;;  %v11189_v22 = vld [vmem:[%s12177_s12 + $0x208] ss:$16 sps:$4 sm:$0xff]  }
 0x1fd   : > { %7169 = vmatpush1.bf16.msra.mxu0 %v11140_v27  ;;  %v12906_v27 = vcombine.low %v12807_v63, %v12807_v63  ;;  %v11192_v63 = vld [vmem:[%s12177_s12 + $0x28] ss:$16 sps:$4 sm:$0xff]  }
 0x1fe   : > { %7210 = vmatpush1.bf16.msra.mxu1 %v11143_v28  ;;  %7170 = vmatprep.subr.bf16.mxu0 %v11148_v29  ;;  %v12910_v28 = vcombine.low %v12810_v0, %v12810_v0  ;;  %v11194_v29 = vld [vmem:[%s12177_s12 + $0x2c] ss:$16 sps:$4 sm:$0xff]   ;;  %v11195_v0 = vld [vmem:[%s12177_s12 + $0x228] ss:$16 sps:$4 sm:$0xff]  }
 0x1ff   : > { %7211 = vmatprep.subr.bf16.mxu1 %v11151_v30  ;;  %v11197_v30 = vld [vmem:[%s12177_s12 + $0x22c] ss:$16 sps:$4 sm:$0xff]  }
 0x201   : > { %7171 = vmatpush1.bf16.msra.mxu0 %v11146_v31  ;;  %v11200_v31 = vld [vmem:[%s12177_s12 + $0x4c] ss:$16 sps:$4 sm:$0xff]  }
 0x202   : > { %7212 = vmatpush1.bf16.msra.mxu1 %v11149_v32  ;;  %7172 = vmatprep.subr.bf16.mxu0 %v11154_v34  ;;  %v11203_v32 = vld [vmem:[%s12177_s12 + $0x24c] ss:$16 sps:$4 sm:$0xff]   ;;  %v11198_v34 = vld [vmem:[%s12177_s12 + $0x48] ss:$16 sps:$4 sm:$0xff]  }
 0x203   : > { %7213 = vmatprep.subr.bf16.mxu1 %v11157_v36  ;;  %v11201_v36 = vld [vmem:[%s12177_s12 + $0x248] ss:$16 sps:$4 sm:$0xff]  }
 0x205   : > { %7173 = vmatpush1.bf16.msra.mxu0 %v11152_v43  ;;  %v11206_v43 = vld [vmem:[%s12177_s12 + $0x6c] ss:$16 sps:$4 sm:$0xff]  }
 0x206   : > { %7214 = vmatpush1.bf16.msra.mxu1 %v11155_v55  ;;  %7174 = vmatprep.subr.bf16.mxu0 %v11160_v33  ;;  %v11209_v55 = vld [vmem:[%s12177_s12 + $0x26c] ss:$16 sps:$4 sm:$0xff]   ;;  %v11207_v33 = vld [vmem:[%s12177_s12 + $0x268] ss:$16 sps:$4 sm:$0xff]  }
 0x207   : > { %7215 = vmatprep.subr.bf16.mxu1 %v11163_v56  ;;  %v11215_v56 = vld [vmem:[%s12177_s12 + $0x28c] ss:$16 sps:$4 sm:$0xff]  }
 0x209   : > { %7175 = vmatpush1.bf16.msra.mxu0 %v11158_v45  ;;  %v11210_v45 = vld [vmem:[%s12177_s12 + $0x88] ss:$16 sps:$4 sm:$0xff]  }
 0x20a   : > { %7216 = vmatpush1.bf16.msra.mxu1 %v11161_v58  ;;  %7176 = vmatprep.subr.bf16.mxu0 %v11166_v1  ;;  %v11213_v58 = vld [vmem:[%s12177_s12 + $0x288] ss:$16 sps:$4 sm:$0xff]   ;;  %v11218_v1 = vld [vmem:[%s12177_s12 + $0xac] ss:$16 sps:$4 sm:$0xff]  }
 0x20b   : > { %7217 = vmatprep.subr.bf16.mxu1 %v11169_v2  ;;  %v11221_v2 = vld [vmem:[%s12177_s12 + $0x2ac] ss:$16 sps:$4 sm:$0xff]  }
 0x20d   : > { %7177 = vmatpush1.bf16.msra.mxu0 %v11164_v5  ;;  %v11216_v5 = vld [vmem:[%s12177_s12 + $0xa8] ss:$16 sps:$4 sm:$0xff]  }
 0x20e   : > { %7218 = vmatpush1.bf16.msra.mxu1 %v11167_v6  ;;  %7178 = vmatprep.subr.bf16.mxu0 %v11172_v10  ;;  %v11219_v6 = vld [vmem:[%s12177_s12 + $0x2a8] ss:$16 sps:$4 sm:$0xff]   ;;  %v11224_v10 = vld [vmem:[%s12177_s12 + $0xcc] ss:$16 sps:$4 sm:$0xff]  }
 0x20f   : > { %7219 = vmatprep.subr.bf16.mxu1 %v11175_v11  ;;  %v11227_v11 = vld [vmem:[%s12177_s12 + $0x2cc] ss:$16 sps:$4 sm:$0xff]  }
 0x211   : > { %7179 = vmatpush1.bf16.msra.mxu0 %v11170_v35 }
 0x212   : > { %7220 = vmatpush1.bf16.msra.mxu1 %v11173_v12  ;;  %7180 = vmatprep.subr.bf16.mxu0 %v11178_v57  ;;  %v11222_v57 = vld [vmem:[%s12177_s12 + $0xc8] ss:$16 sps:$4 sm:$0xff]  }
 0x213   : > { %7221 = vmatprep.subr.bf16.mxu1 %v11181_v14  ;;  %v11225_v14 = vld [vmem:[%s12177_s12 + $0x2c8] ss:$16 sps:$4 sm:$0xff]  }
 0x215   : > { %7181 = vmatpush1.bf16.msra.mxu0 %v11176_v15 }
 0x216   : > { %7222 = vmatpush1.bf16.msra.mxu1 %v11179_v16  ;;  %7232 = vmatprep.subr.bf16.mxu0 %v11188_v19 }
 0x217   : > { %7273 = vmatprep.subr.bf16.mxu1 %v11191_v20 }
 0x218   : > { %7183 = vmatmul.mubr.bf16.vlgmr.msra.gmra.mrb[28].mxu0 %v12906_v27 }
 0x219   : > { %7224 = vmatmul.mubr.bf16.vlgmr.msra.gmra.mrb[28].mxu1 %v12910_v28  ;;  %7233 = vmatpush1.bf16.msra.mxu0 %v11186_v21 }
 0x21a   : > { %7274 = vmatpush1.bf16.msra.mxu1 %v11189_v22  ;;  %7234 = vmatprep.subr.bf16.mxu0 %v11194_v29 }
 0x21b   : > { %7275 = vmatprep.subr.bf16.mxu1 %v11197_v30  ;;  %7264 = vmatprep.mubr.bf16.mxu0 %v12227_v48  ;;  %v11204_v48 = vld [vmem:[%s12177_s12 + $0x68] ss:$16 sps:$4 sm:$0xff]  }
 0x21c   : > { %7305 = vmatprep.mubr.bf16.mxu1 %v12232_v52  ;;  %v11212_v52 = vld [vmem:[%s12177_s12 + $0x8c] ss:$16 sps:$4 sm:$0xff]  }
 0x21d   : > { %7235 = vmatpush1.bf16.msra.mxu0 %v11192_v63 }
 0x21e   : > { %7276 = vmatpush1.bf16.msra.mxu1 %v11195_v0  ;;  %7236 = vmatprep.subr.bf16.mxu0 %v11200_v31  ;;  %v11233_v0 = vld [vmem:[%s12177_s12 + $0x2ec] ss:$16 sps:$4 sm:$0xff]  }
 0x21f   : > { %7277 = vmatprep.subr.bf16.mxu1 %v11203_v32  ;;  %v11231_v32 = vld [vmem:[%s12177_s12 + $0x2e8] ss:$16 sps:$4 sm:$0xff]  }
 0x221   : > { %7237 = vmatpush1.bf16.msra.mxu0 %v11198_v34  ;;  %v11236_v34 = vld [vmem:[%s12177_s12 + $0x10c] ss:$16 sps:$4 sm:$0xff]  }
 0x222   : > { %7278 = vmatpush1.bf16.msra.mxu1 %v11201_v36  ;;  %7238 = vmatprep.subr.bf16.mxu0 %v11206_v43  ;;  %v11239_v36 = vld [vmem:[%s12177_s12 + $0x30c] ss:$16 sps:$4 sm:$0xff]   ;;  %v11234_v43 = vld [vmem:[%s12177_s12 + $0x108] ss:$16 sps:$4 sm:$0xff]  }
 0x223   : > { %7279 = vmatprep.subr.bf16.mxu1 %v11209_v55  ;;  %v11237_v55 = vld [vmem:[%s12177_s12 + $0x308] ss:$16 sps:$4 sm:$0xff]  }
 0x225   : > { %7239 = vmatpush1.bf16.msra.mxu0 %v11204_v48  ;;  %v11242_v48 = vld [vmem:[%s12177_s12 + $0x12c] ss:$16 sps:$4 sm:$0xff]  }
 0x226   : > { %7280 = vmatpush1.bf16.msra.mxu1 %v11207_v33  ;;  %7240 = vmatprep.subr.bf16.mxu0 %v11212_v52  ;;  %v11245_v33 = vld [vmem:[%s12177_s12 + $0x32c] ss:$16 sps:$4 sm:$0xff]   ;;  %v11240_v52 = vld [vmem:[%s12177_s12 + $0x128] ss:$16 sps:$4 sm:$0xff]  }
 0x227   : > { %7281 = vmatprep.subr.bf16.mxu1 %v11215_v56  ;;  %v11243_v56 = vld [vmem:[%s12177_s12 + $0x328] ss:$16 sps:$4 sm:$0xff]  }
 0x229   : > { %7241 = vmatpush1.bf16.msra.mxu0 %v11210_v45  ;;  %v11248_v45 = vld [vmem:[%s12177_s12 + $0x14c] ss:$16 sps:$4 sm:$0xff]  }
 0x22a   : > { %7282 = vmatpush1.bf16.msra.mxu1 %v11213_v58  ;;  %7242 = vmatprep.subr.bf16.mxu0 %v11218_v1  ;;  %v11251_v58 = vld [vmem:[%s12177_s12 + $0x34c] ss:$16 sps:$4 sm:$0xff]   ;;  %v11246_v1 = vld [vmem:[%s12177_s12 + $0x148] ss:$16 sps:$4 sm:$0xff]  }
 0x22b   : > { %7283 = vmatprep.subr.bf16.mxu1 %v11221_v2  ;;  %v6938_v35 = vpop.f32.mrb[16].mxu0  ;;  %v11249_v2 = vld [vmem:[%s12177_s12 + $0x348] ss:$16 sps:$4 sm:$0xff]  }
 0x22c   : > { %v6979_v12 = vpop.f32.mrb[16].mxu1  ;;  %v6939_v15 = vadd.f32 %v6938_v35, %v12860_v54  ;;  %v6940_v16 = vpop.f32.mrb[17].mxu0  ;;  %v11230_v54 = vld [vmem:[%s12177_s12 + $0xec] ss:$16 sps:$4 sm:$0xff]  }
 0x22d   : > { %v6981_v19 = vpop.f32.mrb[17].mxu1  ;;  %v6941_v20 = vadd.f32 %v6940_v16, %v12864_v13  ;;  %v6942_v21 = vpop.f32.mrb[18].mxu0  ;;  %7243 = vmatpush1.bf16.msra.mxu0 %v11216_v5  ;;  %v11228_v13 = vld [vmem:[%s12177_s12 + $0xe8] ss:$16 sps:$4 sm:$0xff]   ;;  %v11254_v5 = vld [vmem:[%s12177_s12 + $0x16c] ss:$16 sps:$4 sm:$0xff]  }
 0x22e   : > { %v6983_v22 = vpop.f32.mrb[18].mxu1  ;;  %7284 = vmatpush1.bf16.msra.mxu1 %v11219_v6  ;;  %v12942_v29 = vadd.f32 %v6979_v12, %v6939_v15  ;;  %v6943_v30 = vpop.f32.mrb[19].mxu0  ;;  %7244 = vmatprep.subr.bf16.mxu0 %v11224_v10  ;;  %v11257_v6 = vld [vmem:[%s12177_s12 + $0x36c] ss:$16 sps:$4 sm:$0xff]   ;;  %v11252_v10 = vld [vmem:[%s12177_s12 + $0x168] ss:$16 sps:$4 sm:$0xff]  }
 0x22f   : > { %v6984_v63 = vpop.f32.mrb[19].mxu1  ;;  %7285 = vmatprep.subr.bf16.mxu1 %v11227_v11  ;;  %v12946_v31 = vadd.f32 %v6981_v19, %v6941_v20  ;;  %v11255_v11 = vld [vmem:[%s12177_s12 + $0x368] ss:$16 sps:$4 sm:$0xff]   ;;  %v11260_v35 = vld [vmem:[%s12177_s12 + $0x18c] ss:$16 sps:$4 sm:$0xff]  }
 0x230   : > { %v11263_v12 = vld [vmem:[%s12177_s12 + $0x38c] ss:$16 sps:$4 sm:$0xff]   ;;  %v11264_v19 = vld [vmem:[%s12177_s12 + $0x1a8] ss:$16 sps:$4 sm:$0xff]  }
 0x231   : > { %7245 = vmatpush1.bf16.msra.mxu0 %v11222_v57  ;;  %v11258_v57 = vld [vmem:[%s12177_s12 + $0x188] ss:$16 sps:$4 sm:$0xff]   ;;  %v11266_v15 = vld [vmem:[%s12177_s12 + $0x1ac] ss:$16 sps:$4 sm:$0xff]  }
 0x232   : > { %7286 = vmatpush1.bf16.msra.mxu1 %v11225_v14  ;;  %7246 = vmatprep.subr.bf16.mxu0 %v11230_v54  ;;  %v11261_v14 = vld [vmem:[%s12177_s12 + $0x388] ss:$16 sps:$4 sm:$0xff]   ;;  %v11269_v16 = vld [vmem:[%s12177_s12 + $0x3ac] ss:$16 sps:$4 sm:$0xff]  }
 0x233   : > { %7287 = vmatprep.subr.bf16.mxu1 %v11233_v0  ;;  %v11267_v20 = vld [vmem:[%s12177_s12 + $0x3a8] ss:$16 sps:$4 sm:$0xff]   ;;  %v11272_v21 = vld [vmem:[%s12177_s12 + $0x1cc] ss:$16 sps:$4 sm:$0xff]  }
 0x234   : > { %v11275_v22 = vld [vmem:[%s12177_s12 + $0x3cc] ss:$16 sps:$4 sm:$0xff]   ;;  %v11270_v30 = vld [vmem:[%s12177_s12 + $0x1c8] ss:$16 sps:$4 sm:$0xff]  }
 0x235   : > { %7247 = vmatpush1.bf16.msra.mxu0 %v11228_v13  ;;  %v11273_v63 = vld [vmem:[%s12177_s12 + $0x3c8] ss:$16 sps:$4 sm:$0xff]   ;;  %v11278_v54 = vld [vmem:[%s12177_s12 + $0x1ec] ss:$16 sps:$4 sm:$0xff]  }
 0x236   : > { %7288 = vmatpush1.bf16.msra.mxu1 %v11231_v32  ;;  %7248 = vmatprep.subr.bf16.mxu0 %v11236_v34  ;;  %v11281_v0 = vld [vmem:[%s12177_s12 + $0x3ec] ss:$16 sps:$4 sm:$0xff]   ;;  %v11276_v13 = vld [vmem:[%s12177_s12 + $0x1e8] ss:$16 sps:$4 sm:$0xff]  }
 0x237   : > { %7289 = vmatprep.subr.bf16.mxu1 %v11239_v36  ;;  %v11279_v32 = vld [vmem:[%s12177_s12 + $0x3e8] ss:$16 sps:$4 sm:$0xff]   ;;  %v11284_v34 = vld [vmem:[%s12177_s12 + $0x40c] ss:$16 sps:$4 sm:$0xff]  }
 0x238   : > { %v11287_v36 = vld [vmem:[%s12177_s12 + $0x60c] ss:$16 sps:$4 sm:$0xff]  }
 0x239   : > { %7249 = vmatpush1.bf16.msra.mxu0 %v11234_v43  ;;  %v11282_v43 = vld [vmem:[%s12177_s12 + $0x408] ss:$16 sps:$4 sm:$0xff]  }
 0x23a   : > { %7290 = vmatpush1.bf16.msra.mxu1 %v11237_v55  ;;  %7250 = vmatprep.subr.bf16.mxu0 %v11242_v48  ;;  %v11285_v55 = vld [vmem:[%s12177_s12 + $0x608] ss:$16 sps:$4 sm:$0xff]   ;;  %v11290_v48 = vld [vmem:[%s12177_s12 + $0x42c] ss:$16 sps:$4 sm:$0xff]  }
 0x23b   : > { %7291 = vmatprep.subr.bf16.mxu1 %v11245_v33  ;;  %v11293_v33 = vld [vmem:[%s12177_s12 + $0x62c] ss:$16 sps:$4 sm:$0xff]  }
 0x23d   : > { %7251 = vmatpush1.bf16.msra.mxu0 %v11240_v52  ;;  %v11288_v52 = vld [vmem:[%s12177_s12 + $0x428] ss:$16 sps:$4 sm:$0xff]  }
 0x23e   : > { %7292 = vmatpush1.bf16.msra.mxu1 %v11243_v56  ;;  %7252 = vmatprep.subr.bf16.mxu0 %v11248_v45  ;;  %v11291_v56 = vld [vmem:[%s12177_s12 + $0x628] ss:$16 sps:$4 sm:$0xff]   ;;  %v11296_v45 = vld [vmem:[%s12177_s12 + $0x44c] ss:$16 sps:$4 sm:$0xff]  }
 0x23f   : > { %7293 = vmatprep.subr.bf16.mxu1 %v11251_v58  ;;  %v11299_v58 = vld [vmem:[%s12177_s12 + $0x64c] ss:$16 sps:$4 sm:$0xff]  }
 0x241   : > { %7253 = vmatpush1.bf16.msra.mxu0 %v11246_v1  ;;  %v11302_v1 = vld [vmem:[%s12177_s12 + $0x46c] ss:$16 sps:$4 sm:$0xff]  }
 0x242   : > { %7294 = vmatpush1.bf16.msra.mxu1 %v11249_v2  ;;  %7254 = vmatprep.subr.bf16.mxu0 %v11254_v5  ;;  %v11305_v2 = vld [vmem:[%s12177_s12 + $0x66c] ss:$16 sps:$4 sm:$0xff]   ;;  %v11300_v5 = vld [vmem:[%s12177_s12 + $0x468] ss:$16 sps:$4 sm:$0xff]  }
 0x243   : > { %7295 = vmatprep.subr.bf16.mxu1 %v11257_v6  ;;  %v11311_v6 = vld [vmem:[%s12177_s12 + $0x68c] ss:$16 sps:$4 sm:$0xff]  }
 0x245   : > { %7255 = vmatpush1.bf16.msra.mxu0 %v11252_v10  ;;  %v11306_v10 = vld [vmem:[%s12177_s12 + $0x488] ss:$16 sps:$4 sm:$0xff]  }
 0x246   : > { %7296 = vmatpush1.bf16.msra.mxu1 %v11255_v11  ;;  %7256 = vmatprep.subr.bf16.mxu0 %v11260_v35  ;;  %v11309_v11 = vld [vmem:[%s12177_s12 + $0x688] ss:$16 sps:$4 sm:$0xff]   ;;  %v11314_v35 = vld [vmem:[%s12177_s12 + $0x4ac] ss:$16 sps:$4 sm:$0xff]  }
 0x247   : > { %7297 = vmatprep.subr.bf16.mxu1 %v11263_v12  ;;  %v11317_v12 = vld [vmem:[%s12177_s12 + $0x6ac] ss:$16 sps:$4 sm:$0xff]  }
 0x249   : > { %7257 = vmatpush1.bf16.msra.mxu0 %v11258_v57  ;;  %v11312_v57 = vld [vmem:[%s12177_s12 + $0x4a8] ss:$16 sps:$4 sm:$0xff]  }
 0x24a   : > { %7298 = vmatpush1.bf16.msra.mxu1 %v11261_v14  ;;  %7258 = vmatprep.subr.bf16.mxu0 %v11266_v15  ;;  %v11315_v14 = vld [vmem:[%s12177_s12 + $0x6a8] ss:$16 sps:$4 sm:$0xff]   ;;  %v11320_v15 = vld [vmem:[%s12177_s12 + $0x4cc] ss:$16 sps:$4 sm:$0xff]  }
 0x24b   : > { %7299 = vmatprep.subr.bf16.mxu1 %v11269_v16  ;;  %v11323_v16 = vld [vmem:[%s12177_s12 + $0x6cc] ss:$16 sps:$4 sm:$0xff]  }
 0x24d   : > { %7259 = vmatpush1.bf16.msra.mxu0 %v11264_v19 }
 0x24e   : > { %7300 = vmatpush1.bf16.msra.mxu1 %v11267_v20  ;;  %7260 = vmatprep.subr.bf16.mxu0 %v11272_v21 }
 0x24f   : > { %7301 = vmatprep.subr.bf16.mxu1 %v11275_v22 }
 0x251   : > { %7261 = vmatpush1.bf16.msra.mxu0 %v11270_v30 }
 0x252   : > { %7302 = vmatpush1.bf16.msra.mxu1 %v11273_v63  ;;  %7262 = vmatprep.subr.bf16.mxu0 %v11278_v54 }
 0x253   : > { %7303 = vmatprep.subr.bf16.mxu1 %v11281_v0 }
 0x255   : > { %7263 = vmatpush1.bf16.msra.mxu0 %v11276_v13  ;;  %v11318_v13 = vld [vmem:[%s12177_s12 + $0x4c8] ss:$16 sps:$4 sm:$0xff]  }
 0x256   : > { %7304 = vmatpush1.bf16.msra.mxu1 %v11279_v32  ;;  %7314 = vmatprep.subr.bf16.mxu0 %v11284_v34  ;;  %v11321_v32 = vld [vmem:[%s12177_s12 + $0x6c8] ss:$16 sps:$4 sm:$0xff]  }
 0x257   : > { %7355 = vmatprep.subr.bf16.mxu1 %v11287_v36 }
 0x258   : > { %7265 = vmatmul.mubr.bf16.vlgmr.msra.gmra.mrb[32].mxu0 %v12254_v7  ;;  %v11294_v7 = vld [vmem:[%s12177_s12 + $0x448] ss:$16 sps:$4 sm:$0xff]  }
 0x259   : > { %7306 = vmatmul.mubr.bf16.vlgmr.msra.gmra.mrb[32].mxu1 %v12256_v8  ;;  %7315 = vmatpush1.bf16.msra.mxu0 %v11282_v43  ;;  %v11297_v8 = vld [vmem:[%s12177_s12 + $0x648] ss:$16 sps:$4 sm:$0xff]  }
 0x25a   : > { %7356 = vmatpush1.bf16.msra.mxu1 %v11285_v55  ;;  %7316 = vmatprep.subr.bf16.mxu0 %v11290_v48  ;;  %v11324_v48 = vld [vmem:[%s12177_s12 + $0x4e8] ss:$16 sps:$4 sm:$0xff]  }
 0x25b   : > { %7357 = vmatprep.subr.bf16.mxu1 %v11293_v33  ;;  %7346 = vmatprep.mubr.bf16.mxu0 %v12294_v37  ;;  %v11303_v37 = vld [vmem:[%s12177_s12 + $0x668] ss:$16 sps:$4 sm:$0xff]  }
 0x25c   : > { %7387 = vmatprep.mubr.bf16.mxu1 %v12298_v38  ;;  %v11308_v38 = vld [vmem:[%s12177_s12 + $0x48c] ss:$16 sps:$4 sm:$0xff]   ;;  %v11327_v33 = vld [vmem:[%s12177_s12 + $0x6e8] ss:$16 sps:$4 sm:$0xff]  }
 0x25d   : > { %7317 = vmatpush1.bf16.msra.mxu0 %v11288_v52  ;;  %v11332_v52 = vld [vmem:[%s12177_s12 + $0x50c] ss:$16 sps:$4 sm:$0xff]  }
 0x25e   : > { %7358 = vmatpush1.bf16.msra.mxu1 %v11291_v56  ;;  %7318 = vmatprep.subr.bf16.mxu0 %v11296_v45  ;;  %v11335_v56 = vld [vmem:[%s12177_s12 + $0x70c] ss:$16 sps:$4 sm:$0xff]   ;;  %v11330_v45 = vld [vmem:[%s12177_s12 + $0x508] ss:$16 sps:$4 sm:$0xff]  }
 0x25f   : > { %7359 = vmatprep.subr.bf16.mxu1 %v11299_v58  ;;  %v11333_v58 = vld [vmem:[%s12177_s12 + $0x708] ss:$16 sps:$4 sm:$0xff]  }
 0x261   : > { %7319 = vmatpush1.bf16.msra.mxu0 %v11294_v7  ;;  %v11338_v7 = vld [vmem:[%s12177_s12 + $0x52c] ss:$16 sps:$4 sm:$0xff]  }
 0x262   : > { %7360 = vmatpush1.bf16.msra.mxu1 %v11297_v8  ;;  %7320 = vmatprep.subr.bf16.mxu0 %v11302_v1  ;;  %v11341_v8 = vld [vmem:[%s12177_s12 + $0x72c] ss:$16 sps:$4 sm:$0xff]   ;;  %v11336_v1 = vld [vmem:[%s12177_s12 + $0x528] ss:$16 sps:$4 sm:$0xff]  }
 0x263   : > { %7361 = vmatprep.subr.bf16.mxu1 %v11305_v2  ;;  %v11339_v2 = vld [vmem:[%s12177_s12 + $0x728] ss:$16 sps:$4 sm:$0xff]  }
 0x265   : > { %7321 = vmatpush1.bf16.msra.mxu0 %v11300_v5  ;;  %v11344_v5 = vld [vmem:[%s12177_s12 + $0x54c] ss:$16 sps:$4 sm:$0xff]  }
 0x266   : > { %7362 = vmatpush1.bf16.msra.mxu1 %v11303_v37  ;;  %7322 = vmatprep.subr.bf16.mxu0 %v11308_v38  ;;  %v11347_v37 = vld [vmem:[%s12177_s12 + $0x74c] ss:$16 sps:$4 sm:$0xff]   ;;  %v11342_v38 = vld [vmem:[%s12177_s12 + $0x548] ss:$16 sps:$4 sm:$0xff]  }
 0x267   : > { %7363 = vmatprep.subr.bf16.mxu1 %v11311_v6  ;;  %v11345_v6 = vld [vmem:[%s12177_s12 + $0x748] ss:$16 sps:$4 sm:$0xff]  }
 0x269   : > { %7323 = vmatpush1.bf16.msra.mxu0 %v11306_v10  ;;  %v11350_v10 = vld [vmem:[%s12177_s12 + $0x56c] ss:$16 sps:$4 sm:$0xff]  }
 0x26a   : > { %7364 = vmatpush1.bf16.msra.mxu1 %v11309_v11  ;;  %7324 = vmatprep.subr.bf16.mxu0 %v11314_v35  ;;  %v11353_v11 = vld [vmem:[%s12177_s12 + $0x76c] ss:$16 sps:$4 sm:$0xff]   ;;  %v11348_v35 = vld [vmem:[%s12177_s12 + $0x568] ss:$16 sps:$4 sm:$0xff]  }
 0x26b   : > { %7365 = vmatprep.subr.bf16.mxu1 %v11317_v12  ;;  %v7020_v19 = vpop.f32.mrb[20].mxu0  ;;  %v11351_v12 = vld [vmem:[%s12177_s12 + $0x768] ss:$16 sps:$4 sm:$0xff]  }
 0x26c   : > { %v7061_v20 = vpop.f32.mrb[20].mxu1  ;;  %v7021_v21 = vadd.f32 %v7020_v19, %v12942_v29  ;;  %v7022_v22 = vpop.f32.mrb[21].mxu0  ;;  %v11326_v29 = vld [vmem:[%s12177_s12 + $0x4ec] ss:$16 sps:$4 sm:$0xff]  }
 0x26d   : > { %v7063_v30 = vpop.f32.mrb[21].mxu1  ;;  %v7023_v63 = vadd.f32 %v7022_v22, %v12946_v31  ;;  %v7024_v54 = vpop.f32.mrb[22].mxu0  ;;  %7325 = vmatpush1.bf16.msra.mxu0 %v11312_v57  ;;  %v11329_v31 = vld [vmem:[%s12177_s12 + $0x6ec] ss:$16 sps:$4 sm:$0xff]   ;;  %v11363_v22 = vld [vmem:[%s12177_s12 + $0x7a8] ss:$16 sps:$4 sm:$0xff]  }
 0x26e   : > { %v7065_v0 = vpop.f32.mrb[22].mxu1  ;;  %7366 = vmatpush1.bf16.msra.mxu1 %v11315_v14  ;;  %v13016_v34 = vadd.f32 %v7061_v20, %v7021_v21  ;;  %v7025_v36 = vpop.f32.mrb[23].mxu0  ;;  %7326 = vmatprep.subr.bf16.mxu0 %v11320_v15  ;;  %v11356_v57 = vld [vmem:[%s12177_s12 + $0x58c] ss:$16 sps:$4 sm:$0xff]   ;;  %v11354_v15 = vld [vmem:[%s12177_s12 + $0x588] ss:$16 sps:$4 sm:$0xff]  }
 0x26f   : > { %v7066_v43 = vpop.f32.mrb[23].mxu1  ;;  %7367 = vmatprep.subr.bf16.mxu1 %v11323_v16  ;;  %v13020_v55 = vadd.f32 %v7063_v30, %v7023_v63  ;;  %v11359_v14 = vld [vmem:[%s12177_s12 + $0x78c] ss:$16 sps:$4 sm:$0xff]   ;;  %v11357_v16 = vld [vmem:[%s12177_s12 + $0x788] ss:$16 sps:$4 sm:$0xff]  }
 0x270   : > { %v11362_v19 = vld [vmem:[%s12177_s12 + $0x5ac] ss:$16 sps:$4 sm:$0xff]   ;;  %v11360_v21 = vld [vmem:[%s12177_s12 + $0x5a8] ss:$16 sps:$4 sm:$0xff]  }
 0x271   : > { %7327 = vmatpush1.bf16.msra.mxu0 %v11318_v13  ;;  %v11365_v20 = vld [vmem:[%s12177_s12 + $0x7ac] ss:$16 sps:$4 sm:$0xff]   ;;  %v11366_v54 = vld [vmem:[%s12177_s12 + $0x5c8] ss:$16 sps:$4 sm:$0xff]  }
 0x272   : > { %7368 = vmatpush1.bf16.msra.mxu1 %v11321_v32  ;;  %7328 = vmatprep.subr.bf16.mxu0 %v11326_v29  ;;  %v11368_v30 = vld [vmem:[%s12177_s12 + $0x5cc] ss:$16 sps:$4 sm:$0xff]   ;;  %v11369_v0 = vld [vmem:[%s12177_s12 + $0x7c8] ss:$16 sps:$4 sm:$0xff]  }
 0x273   : > { %7369 = vmatprep.subr.bf16.mxu1 %v11329_v31  ;;  %v11371_v63 = vld [vmem:[%s12177_s12 + $0x7cc] ss:$16 sps:$4 sm:$0xff]   ;;  %v11372_v36 = vld [vmem:[%s12177_s12 + $0x5e8] ss:$16 sps:$4 sm:$0xff]  }
 0x274   : > { %v11374_v13 = vld [vmem:[%s12177_s12 + $0x5ec] ss:$16 sps:$4 sm:$0xff]   ;;  %v11375_v43 = vld [vmem:[%s12177_s12 + $0x7e8] ss:$16 sps:$4 sm:$0xff]  }
 0x275   : > { %7329 = vmatpush1.bf16.msra.mxu0 %v11324_v48  ;;  %v11377_v32 = vld [vmem:[%s12177_s12 + $0x7ec] ss:$16 sps:$4 sm:$0xff]   ;;  %v11378_v48 = vld [vmem:[%s12177_s12 + $0x808] ss:$16 sps:$4 sm:$0xff]  }
 0x276   : > { %7370 = vmatpush1.bf16.msra.mxu1 %v11327_v33  ;;  %7330 = vmatprep.subr.bf16.mxu0 %v11332_v52  ;;  %v11380_v29 = vld [vmem:[%s12177_s12 + $0x80c] ss:$16 sps:$4 sm:$0xff]   ;;  %v11381_v33 = vld [vmem:[%s12177_s12 + $0xa08] ss:$16 sps:$4 sm:$0xff]  }
 0x277   : > { %7371 = vmatprep.subr.bf16.mxu1 %v11335_v56  ;;  %v11383_v31 = vld [vmem:[%s12177_s12 + $0xa0c] ss:$16 sps:$4 sm:$0xff]  }
 0x278   : > { %v11386_v52 = vld [vmem:[%s12177_s12 + $0x82c] ss:$16 sps:$4 sm:$0xff]  }
 0x279   : > { %7331 = vmatpush1.bf16.msra.mxu0 %v11330_v45  ;;  %v11389_v56 = vld [vmem:[%s12177_s12 + $0xa2c] ss:$16 sps:$4 sm:$0xff]   ;;  %v11384_v45 = vld [vmem:[%s12177_s12 + $0x828] ss:$16 sps:$4 sm:$0xff]  }
 0x27a   : > { %7372 = vmatpush1.bf16.msra.mxu1 %v11333_v58  ;;  %7332 = vmatprep.subr.bf16.mxu0 %v11338_v7  ;;  %v11387_v58 = vld [vmem:[%s12177_s12 + $0xa28] ss:$16 sps:$4 sm:$0xff]   ;;  %v11392_v7 = vld [vmem:[%s12177_s12 + $0x84c] ss:$16 sps:$4 sm:$0xff]  }
 0x27b   : > { %7373 = vmatprep.subr.bf16.mxu1 %v11341_v8  ;;  %v11395_v8 = vld [vmem:[%s12177_s12 + $0xa4c] ss:$16 sps:$4 sm:$0xff]  }
 0x27d   : > { %7333 = vmatpush1.bf16.msra.mxu0 %v11336_v1  ;;  %v11398_v1 = vld [vmem:[%s12177_s12 + $0x86c] ss:$16 sps:$4 sm:$0xff]  }
 0x27e   : > { %7374 = vmatpush1.bf16.msra.mxu1 %v11339_v2  ;;  %7334 = vmatprep.subr.bf16.mxu0 %v11344_v5  ;;  %v11401_v2 = vld [vmem:[%s12177_s12 + $0xa6c] ss:$16 sps:$4 sm:$0xff]   ;;  %v11396_v5 = vld [vmem:[%s12177_s12 + $0x868] ss:$16 sps:$4 sm:$0xff]  }
 0x27f   : > { %7375 = vmatprep.subr.bf16.mxu1 %v11347_v37  ;;  %v11407_v37 = vld [vmem:[%s12177_s12 + $0xa8c] ss:$16 sps:$4 sm:$0xff]  }
 0x281   : > { %7335 = vmatpush1.bf16.msra.mxu0 %v11342_v38  ;;  %v11402_v38 = vld [vmem:[%s12177_s12 + $0x888] ss:$16 sps:$4 sm:$0xff]  }
 0x282   : > { %7376 = vmatpush1.bf16.msra.mxu1 %v11345_v6  ;;  %7336 = vmatprep.subr.bf16.mxu0 %v11350_v10  ;;  %v11405_v6 = vld [vmem:[%s12177_s12 + $0xa88] ss:$16 sps:$4 sm:$0xff]   ;;  %v11410_v10 = vld [vmem:[%s12177_s12 + $0x8ac] ss:$16 sps:$4 sm:$0xff]  }
 0x283   : > { %7377 = vmatprep.subr.bf16.mxu1 %v11353_v11  ;;  %v11413_v11 = vld [vmem:[%s12177_s12 + $0xaac] ss:$16 sps:$4 sm:$0xff]  }
 0x285   : > { %7337 = vmatpush1.bf16.msra.mxu0 %v11348_v35  ;;  %v11408_v35 = vld [vmem:[%s12177_s12 + $0x8a8] ss:$16 sps:$4 sm:$0xff]  }
 0x286   : > { %7378 = vmatpush1.bf16.msra.mxu1 %v11351_v12  ;;  %7338 = vmatprep.subr.bf16.mxu0 %v11356_v57  ;;  %v11411_v12 = vld [vmem:[%s12177_s12 + $0xaa8] ss:$16 sps:$4 sm:$0xff]   ;;  %v11416_v57 = vld [vmem:[%s12177_s12 + $0x8cc] ss:$16 sps:$4 sm:$0xff]  }
 0x287   : > { %7379 = vmatprep.subr.bf16.mxu1 %v11359_v14  ;;  %v11419_v14 = vld [vmem:[%s12177_s12 + $0xacc] ss:$16 sps:$4 sm:$0xff]  }
 0x289   : > { %7339 = vmatpush1.bf16.msra.mxu0 %v11354_v15 }
 0x28a   : > { %7380 = vmatpush1.bf16.msra.mxu1 %v11357_v16  ;;  %7340 = vmatprep.subr.bf16.mxu0 %v11362_v19 }
 0x28b   : > { %7381 = vmatprep.subr.bf16.mxu1 %v11365_v20 }
 0x28d   : > { %7341 = vmatpush1.bf16.msra.mxu0 %v11360_v21 }
 0x28e   : > { %7382 = vmatpush1.bf16.msra.mxu1 %v11363_v22  ;;  %7342 = vmatprep.subr.bf16.mxu0 %v11368_v30 }
 0x28f   : > { %7383 = vmatprep.subr.bf16.mxu1 %v11371_v63 }
 0x291   : > { %7343 = vmatpush1.bf16.msra.mxu0 %v11366_v54  ;;  %v11414_v54 = vld [vmem:[%s12177_s12 + $0x8c8] ss:$16 sps:$4 sm:$0xff]  }
 0x292   : > { %7384 = vmatpush1.bf16.msra.mxu1 %v11369_v0  ;;  %7344 = vmatprep.subr.bf16.mxu0 %v11374_v13  ;;  %v11417_v0 = vld [vmem:[%s12177_s12 + $0xac8] ss:$16 sps:$4 sm:$0xff]  }
 0x293   : > { %7385 = vmatprep.subr.bf16.mxu1 %v11377_v32 }
 0x295   : > { %7345 = vmatpush1.bf16.msra.mxu0 %v11372_v36 }
 0x296   : > { %7386 = vmatpush1.bf16.msra.mxu1 %v11375_v43  ;;  %7396 = vmatprep.subr.bf16.mxu0 %v11380_v29  ;;  %v11420_v29 = vld [vmem:[%s12177_s12 + $0x8e8] ss:$16 sps:$4 sm:$0xff]  }
 0x297   : > { %7437 = vmatprep.subr.bf16.mxu1 %v11383_v31  ;;  %v11423_v31 = vld [vmem:[%s12177_s12 + $0xae8] ss:$16 sps:$4 sm:$0xff]  }
 0x298   : > { %7347 = vmatmul.mubr.bf16.vlgmr.msra.gmra.mrb[36].mxu0 %v12342_v17  ;;  %v11390_v17 = vld [vmem:[%s12177_s12 + $0x848] ss:$16 sps:$4 sm:$0xff]  }
 0x299   : > { %7388 = vmatmul.mubr.bf16.vlgmr.msra.gmra.mrb[36].mxu1 %v12346_v18  ;;  %7397 = vmatpush1.bf16.msra.mxu0 %v11378_v48  ;;  %v11393_v18 = vld [vmem:[%s12177_s12 + $0xa48] ss:$16 sps:$4 sm:$0xff]   ;;  %v11428_v48 = vld [vmem:[%s12177_s12 + $0x90c] ss:$16 sps:$4 sm:$0xff]  }
 0x29a   : > { %7438 = vmatpush1.bf16.msra.mxu1 %v11381_v33  ;;  %7398 = vmatprep.subr.bf16.mxu0 %v11386_v52  ;;  %v11431_v33 = vld [vmem:[%s12177_s12 + $0xb0c] ss:$16 sps:$4 sm:$0xff]   ;;  %v11426_v52 = vld [vmem:[%s12177_s12 + $0x908] ss:$16 sps:$4 sm:$0xff]  }
 0x29b   : > { %7439 = vmatprep.subr.bf16.mxu1 %v11389_v56  ;;  %7428 = vmatprep.mubr.bf16.mxu0 %v12360_v25  ;;  %v11399_v25 = vld [vmem:[%s12177_s12 + $0xa68] ss:$16 sps:$4 sm:$0xff]  }
 0x29c   : > { %7469 = vmatprep.mubr.bf16.mxu1 %v12364_v26  ;;  %v11404_v26 = vld [vmem:[%s12177_s12 + $0x88c] ss:$16 sps:$4 sm:$0xff]   ;;  %v11429_v56 = vld [vmem:[%s12177_s12 + $0xb08] ss:$16 sps:$4 sm:$0xff]  }
 0x29d   : > { %7399 = vmatpush1.bf16.msra.mxu0 %v11384_v45  ;;  %v11434_v45 = vld [vmem:[%s12177_s12 + $0x92c] ss:$16 sps:$4 sm:$0xff]  }
 0x29e   : > { %7440 = vmatpush1.bf16.msra.mxu1 %v11387_v58  ;;  %7400 = vmatprep.subr.bf16.mxu0 %v11392_v7  ;;  %v11437_v58 = vld [vmem:[%s12177_s12 + $0xb2c] ss:$16 sps:$4 sm:$0xff]   ;;  %v11432_v7 = vld [vmem:[%s12177_s12 + $0x928] ss:$16 sps:$4 sm:$0xff]  }
 0x29f   : > { %7441 = vmatprep.subr.bf16.mxu1 %v11395_v8  ;;  %v11435_v8 = vld [vmem:[%s12177_s12 + $0xb28] ss:$16 sps:$4 sm:$0xff]  }
 0x2a1   : > { %7401 = vmatpush1.bf16.msra.mxu0 %v11390_v17  ;;  %v11440_v17 = vld [vmem:[%s12177_s12 + $0x94c] ss:$16 sps:$4 sm:$0xff]  }
 0x2a2   : > { %7442 = vmatpush1.bf16.msra.mxu1 %v11393_v18  ;;  %7402 = vmatprep.subr.bf16.mxu0 %v11398_v1  ;;  %v11443_v18 = vld [vmem:[%s12177_s12 + $0xb4c] ss:$16 sps:$4 sm:$0xff]   ;;  %v11438_v1 = vld [vmem:[%s12177_s12 + $0x948] ss:$16 sps:$4 sm:$0xff]  }
 0x2a3   : > { %7443 = vmatprep.subr.bf16.mxu1 %v11401_v2  ;;  %v11441_v2 = vld [vmem:[%s12177_s12 + $0xb48] ss:$16 sps:$4 sm:$0xff]  }
 0x2a5   : > { %7403 = vmatpush1.bf16.msra.mxu0 %v11396_v5  ;;  %v11446_v5 = vld [vmem:[%s12177_s12 + $0x96c] ss:$16 sps:$4 sm:$0xff]  }
 0x2a6   : > { %7444 = vmatpush1.bf16.msra.mxu1 %v11399_v25  ;;  %7404 = vmatprep.subr.bf16.mxu0 %v11404_v26  ;;  %v11449_v25 = vld [vmem:[%s12177_s12 + $0xb6c] ss:$16 sps:$4 sm:$0xff]   ;;  %v11444_v26 = vld [vmem:[%s12177_s12 + $0x968] ss:$16 sps:$4 sm:$0xff]  }
 0x2a7   : > { %7445 = vmatprep.subr.bf16.mxu1 %v11407_v37  ;;  %v11447_v37 = vld [vmem:[%s12177_s12 + $0xb68] ss:$16 sps:$4 sm:$0xff]  }
 0x2a9   : > { %7405 = vmatpush1.bf16.msra.mxu0 %v11402_v38  ;;  %v11452_v38 = vld [vmem:[%s12177_s12 + $0x98c] ss:$16 sps:$4 sm:$0xff]  }
 0x2aa   : > { %7446 = vmatpush1.bf16.msra.mxu1 %v11405_v6  ;;  %7406 = vmatprep.subr.bf16.mxu0 %v11410_v10  ;;  %v11455_v6 = vld [vmem:[%s12177_s12 + $0xb8c] ss:$16 sps:$4 sm:$0xff]   ;;  %v11450_v10 = vld [vmem:[%s12177_s12 + $0x988] ss:$16 sps:$4 sm:$0xff]  }
 0x2ab   : > { %7447 = vmatprep.subr.bf16.mxu1 %v11413_v11  ;;  %v7102_v15 = vpop.f32.mrb[24].mxu0  ;;  %v11453_v11 = vld [vmem:[%s12177_s12 + $0xb88] ss:$16 sps:$4 sm:$0xff]  }
 0x2ac   : > { %v7143_v16 = vpop.f32.mrb[24].mxu1  ;;  %v7103_v19 = vadd.f32 %v7102_v15, %v13016_v34  ;;  %v7104_v20 = vpop.f32.mrb[25].mxu0  ;;  %v11422_v34 = vld [vmem:[%s12177_s12 + $0x8ec] ss:$16 sps:$4 sm:$0xff]  }
 0x2ad   : > { %v7145_v21 = vpop.f32.mrb[25].mxu1  ;;  %v7105_v22 = vadd.f32 %v7104_v20, %v13020_v55  ;;  %v7106_v30 = vpop.f32.mrb[26].mxu0  ;;  %7407 = vmatpush1.bf16.msra.mxu0 %v11408_v35  ;;  %v11425_v55 = vld [vmem:[%s12177_s12 + $0xaec] ss:$16 sps:$4 sm:$0xff]   ;;  %v11465_v20 = vld [vmem:[%s12177_s12 + $0xbc8] ss:$16 sps:$4 sm:$0xff]  }
 0x2ae   : > { %v7147_v63 = vpop.f32.mrb[26].mxu1  ;;  %7448 = vmatpush1.bf16.msra.mxu1 %v11411_v12  ;;  %v13090_v13 = vadd.f32 %v7143_v16, %v7103_v19  ;;  %v7107_v32 = vpop.f32.mrb[27].mxu0  ;;  %7408 = vmatprep.subr.bf16.mxu0 %v11416_v57  ;;  %v11458_v35 = vld [vmem:[%s12177_s12 + $0x9ac] ss:$16 sps:$4 sm:$0xff]   ;;  %v11456_v57 = vld [vmem:[%s12177_s12 + $0x9a8] ss:$16 sps:$4 sm:$0xff]  }
 0x2af   : > { %v7148_v36 = vpop.f32.mrb[27].mxu1  ;;  %7449 = vmatprep.subr.bf16.mxu1 %v11419_v14  ;;  %v13094_v43 = vadd.f32 %v7145_v21, %v7105_v22  ;;  %v11461_v12 = vld [vmem:[%s12177_s12 + $0xbac] ss:$16 sps:$4 sm:$0xff]   ;;  %v11459_v14 = vld [vmem:[%s12177_s12 + $0xba8] ss:$16 sps:$4 sm:$0xff]  }
 0x2b0   : > { %v11464_v15 = vld [vmem:[%s12177_s12 + $0x9cc] ss:$16 sps:$4 sm:$0xff]   ;;  %v11462_v19 = vld [vmem:[%s12177_s12 + $0x9c8] ss:$16 sps:$4 sm:$0xff]  }
 0x2b1   : > { %7409 = vmatpush1.bf16.msra.mxu0 %v11414_v54  ;;  %v11467_v16 = vld [vmem:[%s12177_s12 + $0xbcc] ss:$16 sps:$4 sm:$0xff]   ;;  %v11468_v30 = vld [vmem:[%s12177_s12 + $0x9e8] ss:$16 sps:$4 sm:$0xff]  }
 0x2b2   : > { %7450 = vmatpush1.bf16.msra.mxu1 %v11417_v0  ;;  %7410 = vmatprep.subr.bf16.mxu0 %v11422_v34  ;;  %v11470_v21 = vld [vmem:[%s12177_s12 + $0x9ec] ss:$16 sps:$4 sm:$0xff]   ;;  %v11471_v63 = vld [vmem:[%s12177_s12 + $0xbe8] ss:$16 sps:$4 sm:$0xff]  }
 0x2b3   : > { %7451 = vmatprep.subr.bf16.mxu1 %v11425_v55  ;;  %v11473_v22 = vld [vmem:[%s12177_s12 + $0xbec] ss:$16 sps:$4 sm:$0xff]   ;;  %v11474_v32 = vld [vmem:[%s12177_s12 + $0xc08] ss:$16 sps:$4 sm:$0xff]  }
 0x2b4   : > { %v11476_v54 = vld [vmem:[%s12177_s12 + $0xc0c] ss:$16 sps:$4 sm:$0xff]   ;;  %v11477_v36 = vld [vmem:[%s12177_s12 + $0xe08] ss:$16 sps:$4 sm:$0xff]  }
 0x2b5   : > { %7411 = vmatpush1.bf16.msra.mxu0 %v11420_v29  ;;  %v11479_v0 = vld [vmem:[%s12177_s12 + $0xe0c] ss:$16 sps:$4 sm:$0xff]   ;;  %v11480_v29 = vld [vmem:[%s12177_s12 + $0xc28] ss:$16 sps:$4 sm:$0xff]  }
 0x2b6   : > { %7452 = vmatpush1.bf16.msra.mxu1 %v11423_v31  ;;  %7412 = vmatprep.subr.bf16.mxu0 %v11428_v48  ;;  %v11482_v34 = vld [vmem:[%s12177_s12 + $0xc2c] ss:$16 sps:$4 sm:$0xff]   ;;  %v11483_v31 = vld [vmem:[%s12177_s12 + $0xe28] ss:$16 sps:$4 sm:$0xff]  }
 0x2b7   : > { %7453 = vmatprep.subr.bf16.mxu1 %v11431_v33  ;;  %v11485_v55 = vld [vmem:[%s12177_s12 + $0xe2c] ss:$16 sps:$4 sm:$0xff]  }
 0x2b8   : > { %v11488_v48 = vld [vmem:[%s12177_s12 + $0xc4c] ss:$16 sps:$4 sm:$0xff]  }
 0x2b9   : > { %7413 = vmatpush1.bf16.msra.mxu0 %v11426_v52  ;;  %v11491_v33 = vld [vmem:[%s12177_s12 + $0xe4c] ss:$16 sps:$4 sm:$0xff]  }
 0x2ba   : > { %7454 = vmatpush1.bf16.msra.mxu1 %v11429_v56  ;;  %7414 = vmatprep.subr.bf16.mxu0 %v11434_v45  ;;  %v11494_v52 = vld [vmem:[%s12177_s12 + $0xc6c] ss:$16 sps:$4 sm:$0xff]   ;;  %v11492_v45 = vld [vmem:[%s12177_s12 + $0xc68] ss:$16 sps:$4 sm:$0xff]  }
 0x2bb   : > { %7455 = vmatprep.subr.bf16.mxu1 %v11437_v58  ;;  %v11497_v56 = vld [vmem:[%s12177_s12 + $0xe6c] ss:$16 sps:$4 sm:$0xff]  }
 0x2bc   : > { %v11503_v58 = vld [vmem:[%s12177_s12 + $0xe8c] ss:$16 sps:$4 sm:$0xff]  }
 0x2bd   : > { %7415 = vmatpush1.bf16.msra.mxu0 %v11432_v7  ;;  %v11498_v7 = vld [vmem:[%s12177_s12 + $0xc88] ss:$16 sps:$4 sm:$0xff]  }
 0x2be   : > { %7456 = vmatpush1.bf16.msra.mxu1 %v11435_v8  ;;  %7416 = vmatprep.subr.bf16.mxu0 %v11440_v17  ;;  %v11501_v8 = vld [vmem:[%s12177_s12 + $0xe88] ss:$16 sps:$4 sm:$0xff]   ;;  %v11506_v17 = vld [vmem:[%s12177_s12 + $0xcac] ss:$16 sps:$4 sm:$0xff]  }
 0x2bf   : > { %7457 = vmatprep.subr.bf16.mxu1 %v11443_v18  ;;  %v11509_v18 = vld [vmem:[%s12177_s12 + $0xeac] ss:$16 sps:$4 sm:$0xff]  }
 0x2c1   : > { %7417 = vmatpush1.bf16.msra.mxu0 %v11438_v1  ;;  %v11504_v1 = vld [vmem:[%s12177_s12 + $0xca8] ss:$16 sps:$4 sm:$0xff]  }
 0x2c2   : > { %7458 = vmatpush1.bf16.msra.mxu1 %v11441_v2  ;;  %7418 = vmatprep.subr.bf16.mxu0 %v11446_v5  ;;  %v11507_v2 = vld [vmem:[%s12177_s12 + $0xea8] ss:$16 sps:$4 sm:$0xff]   ;;  %v11512_v5 = vld [vmem:[%s12177_s12 + $0xccc] ss:$16 sps:$4 sm:$0xff]  }
 0x2c3   : > { %7459 = vmatprep.subr.bf16.mxu1 %v11449_v25  ;;  %v11515_v25 = vld [vmem:[%s12177_s12 + $0xecc] ss:$16 sps:$4 sm:$0xff]  }
 0x2c5   : > { %7419 = vmatpush1.bf16.msra.mxu0 %v11444_v26 }
 0x2c6   : > { %7460 = vmatpush1.bf16.msra.mxu1 %v11447_v37  ;;  %7420 = vmatprep.subr.bf16.mxu0 %v11452_v38 }
 0x2c7   : > { %7461 = vmatprep.subr.bf16.mxu1 %v11455_v6 }
 0x2c9   : > { %7421 = vmatpush1.bf16.msra.mxu0 %v11450_v10 }
 0x2ca   : > { %7462 = vmatpush1.bf16.msra.mxu1 %v11453_v11  ;;  %7422 = vmatprep.subr.bf16.mxu0 %v11458_v35  ;;  %v11510_v11 = vld [vmem:[%s12177_s12 + $0xcc8] ss:$16 sps:$4 sm:$0xff]   ;;  %v300_v35 = vld [vmem:[#allocation2] sm:$0xff] }
 0x2cb   : > { %7463 = vmatprep.subr.bf16.mxu1 %v11461_v12 }
 0x2cd   : > { %7423 = vmatpush1.bf16.msra.mxu0 %v11456_v57  ;;  %v301_v57 = vld [vmem:[#allocation2 + $0x8] sm:$0xff] }
 0x2ce   : > { %7464 = vmatpush1.bf16.msra.mxu1 %v11459_v14  ;;  %7424 = vmatprep.subr.bf16.mxu0 %v11464_v15 }
 0x2cf   : > { %7465 = vmatprep.subr.bf16.mxu1 %v11467_v16  ;;  %v11513_v16 = vld [vmem:[%s12177_s12 + $0xec8] ss:$16 sps:$4 sm:$0xff]  }
 0x2d1   : > { %7425 = vmatpush1.bf16.msra.mxu0 %v11462_v19 }
 0x2d2   : > { %7466 = vmatpush1.bf16.msra.mxu1 %v11465_v20  ;;  %7426 = vmatprep.subr.bf16.mxu0 %v11470_v21  ;;  %v11518_v21 = vld [vmem:[%s12177_s12 + $0xcec] ss:$16 sps:$4 sm:$0xff]  }
 0x2d3   : > { %7467 = vmatprep.subr.bf16.mxu1 %v11473_v22  ;;  %v11521_v22 = vld [vmem:[%s12177_s12 + $0xeec] ss:$16 sps:$4 sm:$0xff]  }
 0x2d5   : > { %7427 = vmatpush1.bf16.msra.mxu0 %v11468_v30 }
 0x2d6   : > { %7468 = vmatpush1.bf16.msra.mxu1 %v11471_v63  ;;  %7478 = vmatprep.subr.bf16.mxu0 %v11476_v54  ;;  %v11516_v54 = vld [vmem:[%s12177_s12 + $0xce8] ss:$16 sps:$4 sm:$0xff]  }
 0x2d7   : > { %7519 = vmatprep.subr.bf16.mxu1 %v11479_v0  ;;  %v11519_v0 = vld [vmem:[%s12177_s12 + $0xee8] ss:$16 sps:$4 sm:$0xff]  }
 0x2d8   : > { %7429 = vmatmul.mubr.bf16.vlgmr.msra.gmra.mrb[40].mxu0 %v12434_v39  ;;  %v11486_v39 = vld [vmem:[%s12177_s12 + $0xc48] ss:$16 sps:$4 sm:$0xff]  }
 0x2d9   : > { %7470 = vmatmul.mubr.bf16.vlgmr.msra.gmra.mrb[40].mxu1 %v12438_v40  ;;  %7479 = vmatpush1.bf16.msra.mxu0 %v11474_v32  ;;  %v11489_v40 = vld [vmem:[%s12177_s12 + $0xe48] ss:$16 sps:$4 sm:$0xff]   ;;  %v11524_v32 = vld [vmem:[%s12177_s12 + $0xd0c] ss:$16 sps:$4 sm:$0xff]  }
 0x2da   : > { %7520 = vmatpush1.bf16.msra.mxu1 %v11477_v36  ;;  %7480 = vmatprep.subr.bf16.mxu0 %v11482_v34  ;;  %v11527_v36 = vld [vmem:[%s12177_s12 + $0xf0c] ss:$16 sps:$4 sm:$0xff]   ;;  %v11522_v34 = vld [vmem:[%s12177_s12 + $0xd08] ss:$16 sps:$4 sm:$0xff]  }
 0x2db   : > { %7521 = vmatprep.subr.bf16.mxu1 %v11485_v55  ;;  %7510 = vmatprep.mubr.bf16.mxu0 %v12450_v23  ;;  %v11495_v23 = vld [vmem:[%s12177_s12 + $0xe68] ss:$16 sps:$4 sm:$0xff]  }
 0x2dc   : > { %7551 = vmatprep.mubr.bf16.mxu1 %v12454_v24  ;;  %v11500_v24 = vld [vmem:[%s12177_s12 + $0xc8c] ss:$16 sps:$4 sm:$0xff]   ;;  %v11525_v55 = vld [vmem:[%s12177_s12 + $0xf08] ss:$16 sps:$4 sm:$0xff]  }
 0x2dd   : > { %7481 = vmatpush1.bf16.msra.mxu0 %v11480_v29  ;;  %v11530_v29 = vld [vmem:[%s12177_s12 + $0xd2c] ss:$16 sps:$4 sm:$0xff]  }
 0x2de   : > { %7522 = vmatpush1.bf16.msra.mxu1 %v11483_v31  ;;  %7482 = vmatprep.subr.bf16.mxu0 %v11488_v48  ;;  %v11533_v31 = vld [vmem:[%s12177_s12 + $0xf2c] ss:$16 sps:$4 sm:$0xff]   ;;  %v11528_v48 = vld [vmem:[%s12177_s12 + $0xd28] ss:$16 sps:$4 sm:$0xff]  }
 0x2df   : > { %7523 = vmatprep.subr.bf16.mxu1 %v11491_v33  ;;  %v11531_v33 = vld [vmem:[%s12177_s12 + $0xf28] ss:$16 sps:$4 sm:$0xff]  }
 0x2e1   : > { %7483 = vmatpush1.bf16.msra.mxu0 %v11486_v39  ;;  %v11536_v39 = vld [vmem:[%s12177_s12 + $0xd4c] ss:$16 sps:$4 sm:$0xff]  }
 0x2e2   : > { %7524 = vmatpush1.bf16.msra.mxu1 %v11489_v40  ;;  %7484 = vmatprep.subr.bf16.mxu0 %v11494_v52  ;;  %v11539_v40 = vld [vmem:[%s12177_s12 + $0xf4c] ss:$16 sps:$4 sm:$0xff]   ;;  %v11534_v52 = vld [vmem:[%s12177_s12 + $0xd48] ss:$16 sps:$4 sm:$0xff]  }
 0x2e3   : > { %7525 = vmatprep.subr.bf16.mxu1 %v11497_v56  ;;  %v11537_v56 = vld [vmem:[%s12177_s12 + $0xf48] ss:$16 sps:$4 sm:$0xff]  }
 0x2e5   : > { %7485 = vmatpush1.bf16.msra.mxu0 %v11492_v45  ;;  %v11542_v45 = vld [vmem:[%s12177_s12 + $0xd6c] ss:$16 sps:$4 sm:$0xff]  }
 0x2e6   : > { %7526 = vmatpush1.bf16.msra.mxu1 %v11495_v23  ;;  %7486 = vmatprep.subr.bf16.mxu0 %v11500_v24  ;;  %v11545_v23 = vld [vmem:[%s12177_s12 + $0xf6c] ss:$16 sps:$4 sm:$0xff]   ;;  %v11540_v24 = vld [vmem:[%s12177_s12 + $0xd68] ss:$16 sps:$4 sm:$0xff]  }
 0x2e7   : > { %7527 = vmatprep.subr.bf16.mxu1 %v11503_v58  ;;  %v11543_v58 = vld [vmem:[%s12177_s12 + $0xf68] ss:$16 sps:$4 sm:$0xff]  }
 0x2e9   : > { %7487 = vmatpush1.bf16.msra.mxu0 %v11498_v7  ;;  %v11548_v7 = vld [vmem:[%s12177_s12 + $0xd8c] ss:$16 sps:$4 sm:$0xff]  }
 0x2ea   : > { %7528 = vmatpush1.bf16.msra.mxu1 %v11501_v8  ;;  %7488 = vmatprep.subr.bf16.mxu0 %v11506_v17  ;;  %v11551_v8 = vld [vmem:[%s12177_s12 + $0xf8c] ss:$16 sps:$4 sm:$0xff]   ;;  %v11546_v17 = vld [vmem:[%s12177_s12 + $0xd88] ss:$16 sps:$4 sm:$0xff]  }
 0x2eb   : > { %7529 = vmatprep.subr.bf16.mxu1 %v11509_v18  ;;  %v7184_v26 = vpop.f32.mrb[28].mxu0  ;;  %v11549_v18 = vld [vmem:[%s12177_s12 + $0xf88] ss:$16 sps:$4 sm:$0xff]  }
 0x2ec   : > { %v7225_v37 = vpop.f32.mrb[28].mxu1  ;;  %v7185_v38 = vadd.f32 %v7184_v26, %v13090_v13  ;;  %v7186_v6 = vpop.f32.mrb[29].mxu0  ;;  %v11560_v26 = vld [vmem:[%s12177_s12 + $0xdcc] ss:$16 sps:$4 sm:$0xff]  }
 0x2ed   : > { %v7227_v10 = vpop.f32.mrb[29].mxu1  ;;  %v7187_v12 = vadd.f32 %v7186_v6, %v13094_v43  ;;  %v7188_v14 = vpop.f32.mrb[30].mxu0  ;;  %7489 = vmatpush1.bf16.msra.mxu0 %v11504_v1  ;;  %v11554_v1 = vld [vmem:[%s12177_s12 + $0xdac] ss:$16 sps:$4 sm:$0xff]   ;;  %v11561_v6 = vld [vmem:[%s12177_s12 + $0xfc8] ss:$16 sps:$4 sm:$0xff]  }
 0x2ee   : > { %v7229_v15 = vpop.f32.mrb[30].mxu1  ;;  %7530 = vmatpush1.bf16.msra.mxu1 %v11507_v2  ;;  %v7226_v19 = vadd.f32 %v7225_v37, %v7185_v38  ;;  %v7189_v20 = vpop.f32.mrb[31].mxu0  ;;  %7490 = vmatprep.subr.bf16.mxu0 %v11512_v5  ;;  %v11557_v2 = vld [vmem:[%s12177_s12 + $0xfac] ss:$16 sps:$4 sm:$0xff]   ;;  %v11552_v5 = vld [vmem:[%s12177_s12 + $0xda8] ss:$16 sps:$4 sm:$0xff]  }
 0x2ef   : > { %v7230_v13 = vpop.f32.mrb[31].mxu1  ;;  %7531 = vmatprep.subr.bf16.mxu1 %v11515_v25  ;;  %v7228_v30 = vadd.f32 %v7227_v10, %v7187_v12  ;;  %v11555_v25 = vld [vmem:[%s12177_s12 + $0xfa8] ss:$16 sps:$4 sm:$0xff]   ;;  %v11563_v37 = vld [vmem:[%s12177_s12 + $0xfcc] ss:$16 sps:$4 sm:$0xff]  }
 0x2f0   : > { %v7888_v43 = vadd.f32 %v7226_v19, %v300_v35  ;;  %v11558_v38 = vld [vmem:[%s12177_s12 + $0xdc8] ss:$16 sps:$4 sm:$0xff]   ;;  %v11566_v10 = vld [vmem:[%s12177_s12 + $0xdec] ss:$16 sps:$4 sm:$0xff]  }
 0x2f1   : > { %v7889_v63 = vadd.f32 %v7228_v30, %v301_v57  ;;  %7491 = vmatpush1.bf16.msra.mxu0 %v11510_v11  ;;  %v11569_v11 = vld [vmem:[%s12177_s12 + $0xfec] ss:$16 sps:$4 sm:$0xff]   ;;  %v11564_v35 = vld [vmem:[%s12177_s12 + $0xde8] ss:$16 sps:$4 sm:$0xff]  }
 0x2f2   : > { %7532 = vmatpush1.bf16.msra.mxu1 %v11513_v16  ;;  %7892 = vst [vmem:[#allocation2] sm:$0xff] %v7888_v43  ;;  %7492 = vmatprep.subr.bf16.mxu0 %v11518_v21  ;;  %v11567_v12 = vld [vmem:[%s12177_s12 + $0xfe8] ss:$16 sps:$4 sm:$0xff]   ;;  %v11572_v57 = vld [vmem:[%s12177_s12 + $0x100c] ss:$16 sps:$4 sm:$0xff]  }
 0x2f3   : > { %7533 = vmatprep.subr.bf16.mxu1 %v11521_v22  ;;  %7893 = vst [vmem:[#allocation2 + $0x8] sm:$0xff] %v7889_v63  ;;  %v11575_v14 = vld [vmem:[%s12177_s12 + $0x120c] ss:$16 sps:$4 sm:$0xff]   ;;  %v11570_v15 = vld [vmem:[%s12177_s12 + $0x1008] ss:$16 sps:$4 sm:$0xff]  }
 0x2f4   : > { %v11573_v16 = vld [vmem:[%s12177_s12 + $0x1208] ss:$16 sps:$4 sm:$0xff]   ;;  %v11578_v19 = vld [vmem:[%s12177_s12 + $0x102c] ss:$16 sps:$4 sm:$0xff]  }
 0x2f5   : > { %7493 = vmatpush1.bf16.msra.mxu0 %v11516_v54  ;;  %v11581_v20 = vld [vmem:[%s12177_s12 + $0x122c] ss:$16 sps:$4 sm:$0xff]   ;;  %v11576_v13 = vld [vmem:[%s12177_s12 + $0x1028] ss:$16 sps:$4 sm:$0xff]  }
 0x2f6   : > { %7534 = vmatpush1.bf16.msra.mxu1 %v11519_v0  ;;  %7494 = vmatprep.subr.bf16.mxu0 %v11524_v32  ;;  %v11579_v21 = vld [vmem:[%s12177_s12 + $0x1228] ss:$16 sps:$4 sm:$0xff]   ;;  %v11584_v22 = vld [vmem:[%s12177_s12 + $0x104c] ss:$16 sps:$4 sm:$0xff]  }
 0x2f7   : > { %7535 = vmatprep.subr.bf16.mxu1 %v11527_v36  ;;  %v11587_v30 = vld [vmem:[%s12177_s12 + $0x124c] ss:$16 sps:$4 sm:$0xff]   ;;  %v11588_v54 = vld [vmem:[%s12177_s12 + $0x1068] ss:$16 sps:$4 sm:$0xff]  }
 0x2f8   : > { %v11590_v43 = vld [vmem:[%s12177_s12 + $0x106c] ss:$16 sps:$4 sm:$0xff]   ;;  %v11594_v32 = vld [vmem:[%s12177_s12 + $0x1088] ss:$16 sps:$4 sm:$0xff]  }
 0x2f9   : > { %7495 = vmatpush1.bf16.msra.mxu0 %v11522_v34  ;;  %v11593_v63 = vld [vmem:[%s12177_s12 + $0x126c] ss:$16 sps:$4 sm:$0xff]   ;;  %v11597_v36 = vld [vmem:[%s12177_s12 + $0x1288] ss:$16 sps:$4 sm:$0xff]  }
 0x2fa   : > { %7536 = vmatpush1.bf16.msra.mxu1 %v11525_v55  ;;  %7496 = vmatprep.subr.bf16.mxu0 %v11530_v29  ;;  %v11599_v0 = vld [vmem:[%s12177_s12 + $0x128c] ss:$16 sps:$4 sm:$0xff]   ;;  %v11600_v29 = vld [vmem:[%s12177_s12 + $0x10a8] ss:$16 sps:$4 sm:$0xff]  }
 0x2fb   : > { %7537 = vmatprep.subr.bf16.mxu1 %v11533_v31  ;;  %v11602_v34 = vld [vmem:[%s12177_s12 + $0x10ac] ss:$16 sps:$4 sm:$0xff]   ;;  %v11603_v31 = vld [vmem:[%s12177_s12 + $0x12a8] ss:$16 sps:$4 sm:$0xff]  }
 0x2fc   : > { %v11605_v55 = vld [vmem:[%s12177_s12 + $0x12ac] ss:$16 sps:$4 sm:$0xff]  }
 0x2fd   : > { %7497 = vmatpush1.bf16.msra.mxu0 %v11528_v48  ;;  %v11608_v48 = vld [vmem:[%s12177_s12 + $0x10cc] ss:$16 sps:$4 sm:$0xff]  }
 0x2fe   : > { %7538 = vmatpush1.bf16.msra.mxu1 %v11531_v33  ;;  %7498 = vmatprep.subr.bf16.mxu0 %v11536_v39  ;;  %v11611_v33 = vld [vmem:[%s12177_s12 + $0x12cc] ss:$16 sps:$4 sm:$0xff]  }
 0x2ff   : > { %7539 = vmatprep.subr.bf16.mxu1 %v11539_v40 }
 0x301   : > { %7499 = vmatpush1.bf16.msra.mxu0 %v11534_v52 }
 0x302   : > { %7540 = vmatpush1.bf16.msra.mxu1 %v11537_v56  ;;  %7500 = vmatprep.subr.bf16.mxu0 %v11542_v45 }
 0x303   : > { %7541 = vmatprep.subr.bf16.mxu1 %v11545_v23 }
 0x305   : > { %7501 = vmatpush1.bf16.msra.mxu0 %v11540_v24 }
 0x306   : > { %7542 = vmatpush1.bf16.msra.mxu1 %v11543_v58  ;;  %7502 = vmatprep.subr.bf16.mxu0 %v11548_v7  ;;  %v11606_v7 = vld [vmem:[%s12177_s12 + $0x10c8] ss:$16 sps:$4 sm:$0xff]  }
 0x307   : > { %7543 = vmatprep.subr.bf16.mxu1 %v11551_v8  ;;  %v11609_v8 = vld [vmem:[%s12177_s12 + $0x12c8] ss:$16 sps:$4 sm:$0xff]  }
 0x309   : > { %7503 = vmatpush1.bf16.msra.mxu0 %v11546_v17 }
 0x30a   : > { %7544 = vmatpush1.bf16.msra.mxu1 %v11549_v18  ;;  %7504 = vmatprep.subr.bf16.mxu0 %v11554_v1  ;;  %v11614_v1 = vld [vmem:[%s12177_s12 + $0x10ec] ss:$16 sps:$4 sm:$0xff]  }
 0x30b   : > { %7545 = vmatprep.subr.bf16.mxu1 %v11557_v2  ;;  %v11617_v2 = vld [vmem:[%s12177_s12 + $0x12ec] ss:$16 sps:$4 sm:$0xff]  }
 0x30d   : > { %7505 = vmatpush1.bf16.msra.mxu0 %v11552_v5  ;;  %v11612_v5 = vld [vmem:[%s12177_s12 + $0x10e8] ss:$16 sps:$4 sm:$0xff]  }
 0x30e   : > { %7546 = vmatpush1.bf16.msra.mxu1 %v11555_v25  ;;  %7506 = vmatprep.subr.bf16.mxu0 %v11560_v26  ;;  %v11615_v25 = vld [vmem:[%s12177_s12 + $0x12e8] ss:$16 sps:$4 sm:$0xff]   ;;  %v11620_v26 = vld [vmem:[%s12177_s12 + $0x110c] ss:$16 sps:$4 sm:$0xff]  }
 0x30f   : > { %7547 = vmatprep.subr.bf16.mxu1 %v11563_v37  ;;  %v11623_v37 = vld [vmem:[%s12177_s12 + $0x130c] ss:$16 sps:$4 sm:$0xff]  }
 0x311   : > { %7507 = vmatpush1.bf16.msra.mxu0 %v11558_v38  ;;  %v11618_v38 = vld [vmem:[%s12177_s12 + $0x1108] ss:$16 sps:$4 sm:$0xff]  }
 0x312   : > { %7548 = vmatpush1.bf16.msra.mxu1 %v11561_v6  ;;  %7508 = vmatprep.subr.bf16.mxu0 %v11566_v10  ;;  %v11621_v6 = vld [vmem:[%s12177_s12 + $0x1308] ss:$16 sps:$4 sm:$0xff]   ;;  %v11626_v10 = vld [vmem:[%s12177_s12 + $0x112c] ss:$16 sps:$4 sm:$0xff]  }
 0x313   : > { %7549 = vmatprep.subr.bf16.mxu1 %v11569_v11  ;;  %v11629_v11 = vld [vmem:[%s12177_s12 + $0x132c] ss:$16 sps:$4 sm:$0xff]  }
 0x315   : > { %7509 = vmatpush1.bf16.msra.mxu0 %v11564_v35  ;;  %v11624_v35 = vld [vmem:[%s12177_s12 + $0x1128] ss:$16 sps:$4 sm:$0xff]  }
 0x316   : > { %7550 = vmatpush1.bf16.msra.mxu1 %v11567_v12  ;;  %7560 = vmatprep.subr.bf16.mxu0 %v11572_v57  ;;  %v11627_v12 = vld [vmem:[%s12177_s12 + $0x1328] ss:$16 sps:$4 sm:$0xff]   ;;  %v11632_v57 = vld [vmem:[%s12177_s12 + $0x114c] ss:$16 sps:$4 sm:$0xff]  }
 0x317   : > { %7601 = vmatprep.subr.bf16.mxu1 %v11575_v14  ;;  %v11635_v14 = vld [vmem:[%s12177_s12 + $0x134c] ss:$16 sps:$4 sm:$0xff]  }
 0x318   : > { %7511 = vmatmul.mubr.bf16.vlgmr.msra.gmra.mrb[44].mxu0 %v12525_v60  ;;  %v11582_v60 = vld [vmem:[%s12177_s12 + $0x1048] ss:$16 sps:$4 sm:$0xff]  }
 0x319   : > { %7552 = vmatmul.mubr.bf16.vlgmr.msra.gmra.mrb[44].mxu1 %v12529_v61  ;;  %7561 = vmatpush1.bf16.msra.mxu0 %v11570_v15  ;;  %v11585_v61 = vld [vmem:[%s12177_s12 + $0x1248] ss:$16 sps:$4 sm:$0xff]  }
 0x31a   : > { %7602 = vmatpush1.bf16.msra.mxu1 %v11573_v16  ;;  %7562 = vmatprep.subr.bf16.mxu0 %v11578_v19  ;;  %v11630_v15 = vld [vmem:[%s12177_s12 + $0x1148] ss:$16 sps:$4 sm:$0xff]   ;;  %v11638_v19 = vld [vmem:[%s12177_s12 + $0x116c] ss:$16 sps:$4 sm:$0xff]  }
 0x31b   : > { %7603 = vmatprep.subr.bf16.mxu1 %v11581_v20  ;;  %7592 = vmatprep.mubr.bf16.mxu0 %v12540_v41  ;;  %v11591_v41 = vld [vmem:[%s12177_s12 + $0x1268] ss:$16 sps:$4 sm:$0xff]   ;;  %v11641_v20 = vld [vmem:[%s12177_s12 + $0x136c] ss:$16 sps:$4 sm:$0xff]  }
 0x31c   : > { %7633 = vmatprep.mubr.bf16.mxu1 %v12544_v42  ;;  %v11596_v42 = vld [vmem:[%s12177_s12 + $0x108c] ss:$16 sps:$4 sm:$0xff]   ;;  %v11633_v16 = vld [vmem:[%s12177_s12 + $0x1348] ss:$16 sps:$4 sm:$0xff]  }
 0x31d   : > { %7563 = vmatpush1.bf16.msra.mxu0 %v11576_v13  ;;  %v11636_v13 = vld [vmem:[%s12177_s12 + $0x1168] ss:$16 sps:$4 sm:$0xff]  }
 0x31e   : > { %7604 = vmatpush1.bf16.msra.mxu1 %v11579_v21  ;;  %7564 = vmatprep.subr.bf16.mxu0 %v11584_v22  ;;  %v11639_v21 = vld [vmem:[%s12177_s12 + $0x1368] ss:$16 sps:$4 sm:$0xff]   ;;  %v11644_v22 = vld [vmem:[%s12177_s12 + $0x118c] ss:$16 sps:$4 sm:$0xff]  }
 0x31f   : > { %7605 = vmatprep.subr.bf16.mxu1 %v11587_v30  ;;  %v11647_v30 = vld [vmem:[%s12177_s12 + $0x138c] ss:$16 sps:$4 sm:$0xff]  }
 0x321   : > { %7565 = vmatpush1.bf16.msra.mxu0 %v11582_v60  ;;  %v11642_v60 = vld [vmem:[%s12177_s12 + $0x1188] ss:$16 sps:$4 sm:$0xff]  }
 0x322   : > { %7606 = vmatpush1.bf16.msra.mxu1 %v11585_v61  ;;  %7566 = vmatprep.subr.bf16.mxu0 %v11590_v43  ;;  %v11645_v61 = vld [vmem:[%s12177_s12 + $0x1388] ss:$16 sps:$4 sm:$0xff]   ;;  %v11650_v43 = vld [vmem:[%s12177_s12 + $0x11ac] ss:$16 sps:$4 sm:$0xff]  }
 0x323   : > { %7607 = vmatprep.subr.bf16.mxu1 %v11593_v63  ;;  %v11653_v63 = vld [vmem:[%s12177_s12 + $0x13ac] ss:$16 sps:$4 sm:$0xff]  }
 0x325   : > { %7567 = vmatpush1.bf16.msra.mxu0 %v11588_v54  ;;  %v11648_v54 = vld [vmem:[%s12177_s12 + $0x11a8] ss:$16 sps:$4 sm:$0xff]  }
 0x326   : > { %7608 = vmatpush1.bf16.msra.mxu1 %v11591_v41  ;;  %7568 = vmatprep.subr.bf16.mxu0 %v11596_v42  ;;  %v11651_v41 = vld [vmem:[%s12177_s12 + $0x13a8] ss:$16 sps:$4 sm:$0xff]   ;;  %v11656_v42 = vld [vmem:[%s12177_s12 + $0x11cc] ss:$16 sps:$4 sm:$0xff]  }
 0x327   : > { %7609 = vmatprep.subr.bf16.mxu1 %v11599_v0  ;;  %v11659_v0 = vld [vmem:[%s12177_s12 + $0x13cc] ss:$16 sps:$4 sm:$0xff]  }
 0x329   : > { %7569 = vmatpush1.bf16.msra.mxu0 %v11594_v32  ;;  %v11654_v32 = vld [vmem:[%s12177_s12 + $0x11c8] ss:$16 sps:$4 sm:$0xff]  }
 0x32a   : > { %7610 = vmatpush1.bf16.msra.mxu1 %v11597_v36  ;;  %7570 = vmatprep.subr.bf16.mxu0 %v11602_v34  ;;  %v11657_v36 = vld [vmem:[%s12177_s12 + $0x13c8] ss:$16 sps:$4 sm:$0xff]   ;;  %v11662_v34 = vld [vmem:[%s12177_s12 + $0x11ec] ss:$16 sps:$4 sm:$0xff]  }
 0x32b   : > { %7611 = vmatprep.subr.bf16.mxu1 %v11605_v55  ;;  %v7266_v39 = vpop.f32.mrb[32].mxu0  ;;  %v11665_v55 = vld [vmem:[%s12177_s12 + $0x13ec] ss:$16 sps:$4 sm:$0xff]  }
 0x32c   : > { %v7307_v40 = vpop.f32.mrb[32].mxu1  ;;  %v7268_v56 = vpop.f32.mrb[33].mxu0 }
 0x32d   : > { %v13230_v52 = vadd.f32 %v7307_v40, %v7266_v39  ;;  %v7309_v45 = vpop.f32.mrb[33].mxu1  ;;  %v7270_v24 = vpop.f32.mrb[34].mxu0  ;;  %7571 = vmatpush1.bf16.msra.mxu0 %v11600_v29  ;;  %v11660_v29 = vld [vmem:[%s12177_s12 + $0x11e8] ss:$16 sps:$4 sm:$0xff]  }
 0x32e   : > { %v13232_v23 = vadd.f32 %v7309_v45, %v7268_v56  ;;  %v7311_v58 = vpop.f32.mrb[34].mxu1  ;;  %7612 = vmatpush1.bf16.msra.mxu1 %v11603_v31  ;;  %v7271_v17 = vpop.f32.mrb[35].mxu0  ;;  %7572 = vmatprep.subr.bf16.mxu0 %v11608_v48  ;;  %v11663_v31 = vld [vmem:[%s12177_s12 + $0x13e8] ss:$16 sps:$4 sm:$0xff]   ;;  %v11668_v48 = vld [vmem:[%s12177_s12 + $0x140c] ss:$16 sps:$4 sm:$0xff]  }
 0x32f   : > { %v7312_v18 = vpop.f32.mrb[35].mxu1  ;;  %7613 = vmatprep.subr.bf16.mxu1 %v11611_v33  ;;  %v11671_v33 = vld [vmem:[%s12177_s12 + $0x160c] ss:$16 sps:$4 sm:$0xff]   ;;  %v11666_v39 = vld [vmem:[%s12177_s12 + $0x1408] ss:$16 sps:$4 sm:$0xff]  }
 0x330   : > { %v11669_v40 = vld [vmem:[%s12177_s12 + $0x1608] ss:$16 sps:$4 sm:$0xff]   ;;  %v11674_v56 = vld [vmem:[%s12177_s12 + $0x142c] ss:$16 sps:$4 sm:$0xff]  }
 0x331   : > { %7573 = vmatpush1.bf16.msra.mxu0 %v11606_v7  ;;  %v11677_v45 = vld [vmem:[%s12177_s12 + $0x162c] ss:$16 sps:$4 sm:$0xff]   ;;  %v11672_v24 = vld [vmem:[%s12177_s12 + $0x1428] ss:$16 sps:$4 sm:$0xff]  }
 0x332   : > { %7614 = vmatpush1.bf16.msra.mxu1 %v11609_v8  ;;  %7574 = vmatprep.subr.bf16.mxu0 %v11614_v1  ;;  %v11675_v58 = vld [vmem:[%s12177_s12 + $0x1628] ss:$16 sps:$4 sm:$0xff]   ;;  %v11680_v7 = vld [vmem:[%s12177_s12 + $0x144c] ss:$16 sps:$4 sm:$0xff]  }
 0x333   : > { %7615 = vmatprep.subr.bf16.mxu1 %v11617_v2  ;;  %v11683_v8 = vld [vmem:[%s12177_s12 + $0x164c] ss:$16 sps:$4 sm:$0xff]   ;;  %v11684_v1 = vld [vmem:[%s12177_s12 + $0x1468] ss:$16 sps:$4 sm:$0xff]  }
 0x334   : > { %v11686_v17 = vld [vmem:[%s12177_s12 + $0x146c] ss:$16 sps:$4 sm:$0xff]  }
 0x335   : > { %7575 = vmatpush1.bf16.msra.mxu0 %v11612_v5  ;;  %v11689_v18 = vld [vmem:[%s12177_s12 + $0x166c] ss:$16 sps:$4 sm:$0xff]   ;;  %v11690_v5 = vld [vmem:[%s12177_s12 + $0x1488] ss:$16 sps:$4 sm:$0xff]  }
 0x336   : > { %7616 = vmatpush1.bf16.msra.mxu1 %v11615_v25  ;;  %7576 = vmatprep.subr.bf16.mxu0 %v11620_v26  ;;  %v11695_v2 = vld [vmem:[%s12177_s12 + $0x168c] ss:$16 sps:$4 sm:$0xff]   ;;  %v11693_v25 = vld [vmem:[%s12177_s12 + $0x1688] ss:$16 sps:$4 sm:$0xff]  }
 0x337   : > { %7617 = vmatprep.subr.bf16.mxu1 %v11623_v37  ;;  %v11698_v26 = vld [vmem:[%s12177_s12 + $0x14ac] ss:$16 sps:$4 sm:$0xff]  }
 0x338   : > { %v11701_v37 = vld [vmem:[%s12177_s12 + $0x16ac] ss:$16 sps:$4 sm:$0xff]  }
 0x339   : > { %7577 = vmatpush1.bf16.msra.mxu0 %v11618_v38  ;;  %v11696_v38 = vld [vmem:[%s12177_s12 + $0x14a8] ss:$16 sps:$4 sm:$0xff]  }
 0x33a   : > { %7618 = vmatpush1.bf16.msra.mxu1 %v11621_v6  ;;  %7578 = vmatprep.subr.bf16.mxu0 %v11626_v10  ;;  %v11699_v6 = vld [vmem:[%s12177_s12 + $0x16a8] ss:$16 sps:$4 sm:$0xff]   ;;  %v11704_v10 = vld [vmem:[%s12177_s12 + $0x14cc] ss:$16 sps:$4 sm:$0xff]  }
 0x33b   : > { %7619 = vmatprep.subr.bf16.mxu1 %v11629_v11  ;;  %v11707_v11 = vld [vmem:[%s12177_s12 + $0x16cc] ss:$16 sps:$4 sm:$0xff]  }
 0x33d   : > { %7579 = vmatpush1.bf16.msra.mxu0 %v11624_v35 }
 0x33e   : > { %7620 = vmatpush1.bf16.msra.mxu1 %v11627_v12  ;;  %7580 = vmatprep.subr.bf16.mxu0 %v11632_v57 }
 0x33f   : > { %7621 = vmatprep.subr.bf16.mxu1 %v11635_v14 }
 0x341   : > { %7581 = vmatpush1.bf16.msra.mxu0 %v11630_v15 }
 0x342   : > { %7622 = vmatpush1.bf16.msra.mxu1 %v11633_v16  ;;  %7582 = vmatprep.subr.bf16.mxu0 %v11638_v19 }
 0x343   : > { %7623 = vmatprep.subr.bf16.mxu1 %v11641_v20 }
 0x345   : > { %7583 = vmatpush1.bf16.msra.mxu0 %v11636_v13  ;;  %v11702_v13 = vld [vmem:[%s12177_s12 + $0x14c8] ss:$16 sps:$4 sm:$0xff]  }
 0x346   : > { %7624 = vmatpush1.bf16.msra.mxu1 %v11639_v21  ;;  %7584 = vmatprep.subr.bf16.mxu0 %v11644_v22  ;;  %v11705_v21 = vld [vmem:[%s12177_s12 + $0x16c8] ss:$16 sps:$4 sm:$0xff]  }
 0x347   : > { %7625 = vmatprep.subr.bf16.mxu1 %v11647_v30 }
 0x349   : > { %7585 = vmatpush1.bf16.msra.mxu0 %v11642_v60 }
 0x34a   : > { %7626 = vmatpush1.bf16.msra.mxu1 %v11645_v61  ;;  %7586 = vmatprep.subr.bf16.mxu0 %v11650_v43  ;;  %v11708_v43 = vld [vmem:[%s12177_s12 + $0x14e8] ss:$16 sps:$4 sm:$0xff]  }
 0x34b   : > { %7627 = vmatprep.subr.bf16.mxu1 %v11653_v63  ;;  %v11711_v63 = vld [vmem:[%s12177_s12 + $0x16e8] ss:$16 sps:$4 sm:$0xff]  }
 0x34d   : > { %7587 = vmatpush1.bf16.msra.mxu0 %v11648_v54  ;;  %v11716_v54 = vld [vmem:[%s12177_s12 + $0x150c] ss:$16 sps:$4 sm:$0xff]  }
 0x34e   : > { %7628 = vmatpush1.bf16.msra.mxu1 %v11651_v41  ;;  %7588 = vmatprep.subr.bf16.mxu0 %v11656_v42  ;;  %v11719_v41 = vld [vmem:[%s12177_s12 + $0x170c] ss:$16 sps:$4 sm:$0xff]   ;;  %v11714_v42 = vld [vmem:[%s12177_s12 + $0x1508] ss:$16 sps:$4 sm:$0xff]  }
 0x34f   : > { %7629 = vmatprep.subr.bf16.mxu1 %v11659_v0  ;;  %v11717_v0 = vld [vmem:[%s12177_s12 + $0x1708] ss:$16 sps:$4 sm:$0xff]  }
 0x351   : > { %7589 = vmatpush1.bf16.msra.mxu0 %v11654_v32  ;;  %v11722_v32 = vld [vmem:[%s12177_s12 + $0x152c] ss:$16 sps:$4 sm:$0xff]  }
 0x352   : > { %7630 = vmatpush1.bf16.msra.mxu1 %v11657_v36  ;;  %7590 = vmatprep.subr.bf16.mxu0 %v11662_v34  ;;  %v11725_v36 = vld [vmem:[%s12177_s12 + $0x172c] ss:$16 sps:$4 sm:$0xff]   ;;  %v11720_v34 = vld [vmem:[%s12177_s12 + $0x1528] ss:$16 sps:$4 sm:$0xff]  }
 0x353   : > { %7631 = vmatprep.subr.bf16.mxu1 %v11665_v55  ;;  %v11723_v55 = vld [vmem:[%s12177_s12 + $0x1728] ss:$16 sps:$4 sm:$0xff]  }
 0x355   : > { %7591 = vmatpush1.bf16.msra.mxu0 %v11660_v29  ;;  %v11728_v29 = vld [vmem:[%s12177_s12 + $0x154c] ss:$16 sps:$4 sm:$0xff]  }
 0x356   : > { %7632 = vmatpush1.bf16.msra.mxu1 %v11663_v31  ;;  %7642 = vmatprep.subr.bf16.mxu0 %v11668_v48  ;;  %v11731_v31 = vld [vmem:[%s12177_s12 + $0x174c] ss:$16 sps:$4 sm:$0xff]   ;;  %v11726_v48 = vld [vmem:[%s12177_s12 + $0x1548] ss:$16 sps:$4 sm:$0xff]  }
 0x357   : > { %7683 = vmatprep.subr.bf16.mxu1 %v11671_v33  ;;  %v11729_v33 = vld [vmem:[%s12177_s12 + $0x1748] ss:$16 sps:$4 sm:$0xff]  }
 0x358   : > { %7593 = vmatmul.mubr.bf16.vlgmr.msra.gmra.mrb[48].mxu0 %v12618_v47  ;;  %v11678_v47 = vld [vmem:[%s12177_s12 + $0x1448] ss:$16 sps:$4 sm:$0xff]  }
 0x359   : > { %7634 = vmatmul.mubr.bf16.vlgmr.msra.gmra.mrb[48].mxu1 %v12622_v49  ;;  %7643 = vmatpush1.bf16.msra.mxu0 %v11666_v39  ;;  %v11681_v49 = vld [vmem:[%s12177_s12 + $0x1648] ss:$16 sps:$4 sm:$0xff]   ;;  %v11734_v39 = vld [vmem:[%s12177_s12 + $0x156c] ss:$16 sps:$4 sm:$0xff]  }
 0x35a   : > { %7684 = vmatpush1.bf16.msra.mxu1 %v11669_v40  ;;  %7644 = vmatprep.subr.bf16.mxu0 %v11674_v56  ;;  %v11737_v40 = vld [vmem:[%s12177_s12 + $0x176c] ss:$16 sps:$4 sm:$0xff]   ;;  %v11732_v56 = vld [vmem:[%s12177_s12 + $0x1568] ss:$16 sps:$4 sm:$0xff]  }
 0x35b   : > { %7685 = vmatprep.subr.bf16.mxu1 %v11677_v45  ;;  %7674 = vmatprep.mubr.bf16.mxu0 %v12634_v59  ;;  %v11687_v59 = vld [vmem:[%s12177_s12 + $0x1668] ss:$16 sps:$4 sm:$0xff]  }
 0x35c   : > { %7715 = vmatprep.mubr.bf16.mxu1 %v12638_v62  ;;  %v11692_v62 = vld [vmem:[%s12177_s12 + $0x148c] ss:$16 sps:$4 sm:$0xff]   ;;  %v11735_v45 = vld [vmem:[%s12177_s12 + $0x1768] ss:$16 sps:$4 sm:$0xff]  }
 0x35d   : > { %7645 = vmatpush1.bf16.msra.mxu0 %v11672_v24  ;;  %v11740_v24 = vld [vmem:[%s12177_s12 + $0x158c] ss:$16 sps:$4 sm:$0xff]  }
 0x35e   : > { %7686 = vmatpush1.bf16.msra.mxu1 %v11675_v58  ;;  %7646 = vmatprep.subr.bf16.mxu0 %v11680_v7  ;;  %v11743_v58 = vld [vmem:[%s12177_s12 + $0x178c] ss:$16 sps:$4 sm:$0xff]   ;;  %v11738_v7 = vld [vmem:[%s12177_s12 + $0x1588] ss:$16 sps:$4 sm:$0xff]  }
 0x35f   : > { %7687 = vmatprep.subr.bf16.mxu1 %v11683_v8  ;;  %v11741_v8 = vld [vmem:[%s12177_s12 + $0x1788] ss:$16 sps:$4 sm:$0xff]  }
 0x361   : > { %7647 = vmatpush1.bf16.msra.mxu0 %v11678_v47  ;;  %v11746_v47 = vld [vmem:[%s12177_s12 + $0x15ac] ss:$16 sps:$4 sm:$0xff]  }
 0x362   : > { %7688 = vmatpush1.bf16.msra.mxu1 %v11681_v49  ;;  %7648 = vmatprep.subr.bf16.mxu0 %v11686_v17  ;;  %v11749_v49 = vld [vmem:[%s12177_s12 + $0x17ac] ss:$16 sps:$4 sm:$0xff]   ;;  %v11744_v17 = vld [vmem:[%s12177_s12 + $0x15a8] ss:$16 sps:$4 sm:$0xff]  }
 0x363   : > { %7689 = vmatprep.subr.bf16.mxu1 %v11689_v18  ;;  %v11747_v18 = vld [vmem:[%s12177_s12 + $0x17a8] ss:$16 sps:$4 sm:$0xff]  }
 0x365   : > { %7649 = vmatpush1.bf16.msra.mxu0 %v11684_v1  ;;  %v11752_v1 = vld [vmem:[%s12177_s12 + $0x15cc] ss:$16 sps:$4 sm:$0xff]  }
 0x366   : > { %7690 = vmatpush1.bf16.msra.mxu1 %v11687_v59  ;;  %7650 = vmatprep.subr.bf16.mxu0 %v11692_v62  ;;  %v11755_v59 = vld [vmem:[%s12177_s12 + $0x17cc] ss:$16 sps:$4 sm:$0xff]   ;;  %v11750_v62 = vld [vmem:[%s12177_s12 + $0x15c8] ss:$16 sps:$4 sm:$0xff]  }
 0x367   : > { %7691 = vmatprep.subr.bf16.mxu1 %v11695_v2  ;;  %v11753_v2 = vld [vmem:[%s12177_s12 + $0x17c8] ss:$16 sps:$4 sm:$0xff]  }
 0x369   : > { %7651 = vmatpush1.bf16.msra.mxu0 %v11690_v5  ;;  %v11758_v5 = vld [vmem:[%s12177_s12 + $0x15ec] ss:$16 sps:$4 sm:$0xff]  }
 0x36a   : > { %7692 = vmatpush1.bf16.msra.mxu1 %v11693_v25  ;;  %7652 = vmatprep.subr.bf16.mxu0 %v11698_v26  ;;  %v11761_v25 = vld [vmem:[%s12177_s12 + $0x17ec] ss:$16 sps:$4 sm:$0xff]   ;;  %v11756_v26 = vld [vmem:[%s12177_s12 + $0x15e8] ss:$16 sps:$4 sm:$0xff]  }
 0x36b   : > { %7693 = vmatprep.subr.bf16.mxu1 %v11701_v37  ;;  %v7348_v35 = vpop.f32.mrb[36].mxu0  ;;  %v11759_v37 = vld [vmem:[%s12177_s12 + $0x17e8] ss:$16 sps:$4 sm:$0xff]  }
 0x36c   : > { %v7389_v12 = vpop.f32.mrb[36].mxu1  ;;  %v7349_v57 = vadd.f32 %v7348_v35, %v13230_v52  ;;  %v7350_v14 = vpop.f32.mrb[37].mxu0  ;;  %v11710_v52 = vld [vmem:[%s12177_s12 + $0x14ec] ss:$16 sps:$4 sm:$0xff]  }
 0x36d   : > { %v7391_v15 = vpop.f32.mrb[37].mxu1  ;;  %v7351_v16 = vadd.f32 %v7350_v14, %v13232_v23  ;;  %v7352_v19 = vpop.f32.mrb[38].mxu0  ;;  %7653 = vmatpush1.bf16.msra.mxu0 %v11696_v38  ;;  %v11713_v23 = vld [vmem:[%s12177_s12 + $0x16ec] ss:$16 sps:$4 sm:$0xff]   ;;  %v11771_v14 = vld [vmem:[%s12177_s12 + $0x1a28] ss:$16 sps:$4 sm:$0xff]  }
 0x36e   : > { %v7393_v20 = vpop.f32.mrb[38].mxu1  ;;  %7694 = vmatpush1.bf16.msra.mxu1 %v11699_v6  ;;  %v13306_v22 = vadd.f32 %v7389_v12, %v7349_v57  ;;  %v7353_v30 = vpop.f32.mrb[39].mxu0  ;;  %7654 = vmatprep.subr.bf16.mxu0 %v11704_v10  ;;  %v11764_v38 = vld [vmem:[%s12177_s12 + $0x180c] ss:$16 sps:$4 sm:$0xff]   ;;  %v11762_v10 = vld [vmem:[%s12177_s12 + $0x1808] ss:$16 sps:$4 sm:$0xff]  }
 0x36f   : > { %v7394_v60 = vpop.f32.mrb[39].mxu1  ;;  %7695 = vmatprep.subr.bf16.mxu1 %v11707_v11  ;;  %v13310_v61 = vadd.f32 %v7391_v15, %v7351_v16  ;;  %v11767_v6 = vld [vmem:[%s12177_s12 + $0x1a0c] ss:$16 sps:$4 sm:$0xff]   ;;  %v11765_v11 = vld [vmem:[%s12177_s12 + $0x1a08] ss:$16 sps:$4 sm:$0xff]  }
 0x370   : > { %v11770_v35 = vld [vmem:[%s12177_s12 + $0x182c] ss:$16 sps:$4 sm:$0xff]   ;;  %v11768_v57 = vld [vmem:[%s12177_s12 + $0x1828] ss:$16 sps:$4 sm:$0xff]  }
 0x371   : > { %7655 = vmatpush1.bf16.msra.mxu0 %v11702_v13  ;;  %v11773_v12 = vld [vmem:[%s12177_s12 + $0x1a2c] ss:$16 sps:$4 sm:$0xff]   ;;  %v11780_v13 = vld [vmem:[%s12177_s12 + $0x1868] ss:$16 sps:$4 sm:$0xff]  }
 0x372   : > { %7696 = vmatpush1.bf16.msra.mxu1 %v11705_v21  ;;  %7656 = vmatprep.subr.bf16.mxu0 %v11710_v52  ;;  %v11776_v15 = vld [vmem:[%s12177_s12 + $0x184c] ss:$16 sps:$4 sm:$0xff]   ;;  %v11786_v30 = vld [vmem:[%s12177_s12 + $0x1888] ss:$16 sps:$4 sm:$0xff]  }
 0x373   : > { %7697 = vmatprep.subr.bf16.mxu1 %v11713_v23  ;;  %v11779_v16 = vld [vmem:[%s12177_s12 + $0x1a4c] ss:$16 sps:$4 sm:$0xff]   ;;  %v11789_v60 = vld [vmem:[%s12177_s12 + $0x1a88] ss:$16 sps:$4 sm:$0xff]  }
 0x374   : > { %v11782_v19 = vld [vmem:[%s12177_s12 + $0x186c] ss:$16 sps:$4 sm:$0xff]  }
 0x375   : > { %7657 = vmatpush1.bf16.msra.mxu0 %v11708_v43  ;;  %v11785_v20 = vld [vmem:[%s12177_s12 + $0x1a6c] ss:$16 sps:$4 sm:$0xff]   ;;  %v11792_v43 = vld [vmem:[%s12177_s12 + $0x18a8] ss:$16 sps:$4 sm:$0xff]  }
 0x376   : > { %7698 = vmatpush1.bf16.msra.mxu1 %v11711_v63  ;;  %7658 = vmatprep.subr.bf16.mxu0 %v11716_v54  ;;  %v11791_v21 = vld [vmem:[%s12177_s12 + $0x1a8c] ss:$16 sps:$4 sm:$0xff]   ;;  %v11795_v63 = vld [vmem:[%s12177_s12 + $0x1aa8] ss:$16 sps:$4 sm:$0xff]  }
 0x377   : > { %7699 = vmatprep.subr.bf16.mxu1 %v11719_v41  ;;  %v11794_v52 = vld [vmem:[%s12177_s12 + $0x18ac] ss:$16 sps:$4 sm:$0xff]  }
 0x378   : > { %v11797_v23 = vld [vmem:[%s12177_s12 + $0x1aac] ss:$16 sps:$4 sm:$0xff]  }
 0x379   : > { %7659 = vmatpush1.bf16.msra.mxu0 %v11714_v42  ;;  %v11800_v54 = vld [vmem:[%s12177_s12 + $0x18cc] ss:$16 sps:$4 sm:$0xff]  }
 0x37a   : > { %7700 = vmatpush1.bf16.msra.mxu1 %v11717_v0  ;;  %7660 = vmatprep.subr.bf16.mxu0 %v11722_v32  ;;  %v11803_v41 = vld [vmem:[%s12177_s12 + $0x1acc] ss:$16 sps:$4 sm:$0xff]  }
 0x37b   : > { %7701 = vmatprep.subr.bf16.mxu1 %v11725_v36 }
 0x37d   : > { %7661 = vmatpush1.bf16.msra.mxu0 %v11720_v34 }
 0x37e   : > { %7702 = vmatpush1.bf16.msra.mxu1 %v11723_v55  ;;  %7662 = vmatprep.subr.bf16.mxu0 %v11728_v29 }
 0x37f   : > { %7703 = vmatprep.subr.bf16.mxu1 %v11731_v31 }
 0x381   : > { %7663 = vmatpush1.bf16.msra.mxu0 %v11726_v48  ;;  %v11798_v48 = vld [vmem:[%s12177_s12 + $0x18c8] ss:$16 sps:$4 sm:$0xff]  }
 0x382   : > { %7704 = vmatpush1.bf16.msra.mxu1 %v11729_v33  ;;  %7664 = vmatprep.subr.bf16.mxu0 %v11734_v39  ;;  %v11801_v33 = vld [vmem:[%s12177_s12 + $0x1ac8] ss:$16 sps:$4 sm:$0xff]  }
 0x383   : > { %7705 = vmatprep.subr.bf16.mxu1 %v11737_v40 }
 0x385   : > { %7665 = vmatpush1.bf16.msra.mxu0 %v11732_v56 }
 0x386   : > { %7706 = vmatpush1.bf16.msra.mxu1 %v11735_v45  ;;  %7666 = vmatprep.subr.bf16.mxu0 %v11740_v24  ;;  %v11804_v24 = vld [vmem:[%s12177_s12 + $0x18e8] ss:$16 sps:$4 sm:$0xff]  }
 0x387   : > { %7707 = vmatprep.subr.bf16.mxu1 %v11743_v58  ;;  %v11807_v58 = vld [vmem:[%s12177_s12 + $0x1ae8] ss:$16 sps:$4 sm:$0xff]  }
 0x389   : > { %7667 = vmatpush1.bf16.msra.mxu0 %v11738_v7  ;;  %v11812_v7 = vld [vmem:[%s12177_s12 + $0x190c] ss:$16 sps:$4 sm:$0xff]  }
 0x38a   : > { %7708 = vmatpush1.bf16.msra.mxu1 %v11741_v8  ;;  %7668 = vmatprep.subr.bf16.mxu0 %v11746_v47  ;;  %v11815_v8 = vld [vmem:[%s12177_s12 + $0x1b0c] ss:$16 sps:$4 sm:$0xff]   ;;  %v11810_v47 = vld [vmem:[%s12177_s12 + $0x1908] ss:$16 sps:$4 sm:$0xff]  }
 0x38b   : > { %7709 = vmatprep.subr.bf16.mxu1 %v11749_v49  ;;  %v11813_v49 = vld [vmem:[%s12177_s12 + $0x1b08] ss:$16 sps:$4 sm:$0xff]  }
 0x38d   : > { %7669 = vmatpush1.bf16.msra.mxu0 %v11744_v17  ;;  %v11818_v17 = vld [vmem:[%s12177_s12 + $0x192c] ss:$16 sps:$4 sm:$0xff]  }
 0x38e   : > { %7710 = vmatpush1.bf16.msra.mxu1 %v11747_v18  ;;  %7670 = vmatprep.subr.bf16.mxu0 %v11752_v1  ;;  %v11821_v18 = vld [vmem:[%s12177_s12 + $0x1b2c] ss:$16 sps:$4 sm:$0xff]   ;;  %v11816_v1 = vld [vmem:[%s12177_s12 + $0x1928] ss:$16 sps:$4 sm:$0xff]  }
 0x38f   : > { %7711 = vmatprep.subr.bf16.mxu1 %v11755_v59  ;;  %v11819_v59 = vld [vmem:[%s12177_s12 + $0x1b28] ss:$16 sps:$4 sm:$0xff]  }
 0x391   : > { %7671 = vmatpush1.bf16.msra.mxu0 %v11750_v62  ;;  %v11824_v62 = vld [vmem:[%s12177_s12 + $0x194c] ss:$16 sps:$4 sm:$0xff]  }
 0x392   : > { %7712 = vmatpush1.bf16.msra.mxu1 %v11753_v2  ;;  %7672 = vmatprep.subr.bf16.mxu0 %v11758_v5  ;;  %v11827_v2 = vld [vmem:[%s12177_s12 + $0x1b4c] ss:$16 sps:$4 sm:$0xff]   ;;  %v11822_v5 = vld [vmem:[%s12177_s12 + $0x1948] ss:$16 sps:$4 sm:$0xff]  }
 0x393   : > { %7713 = vmatprep.subr.bf16.mxu1 %v11761_v25  ;;  %v11825_v25 = vld [vmem:[%s12177_s12 + $0x1b48] ss:$16 sps:$4 sm:$0xff]  }
 0x395   : > { %7673 = vmatpush1.bf16.msra.mxu0 %v11756_v26  ;;  %v11830_v26 = vld [vmem:[%s12177_s12 + $0x196c] ss:$16 sps:$4 sm:$0xff]  }
 0x396   : > { %7714 = vmatpush1.bf16.msra.mxu1 %v11759_v37  ;;  %7724 = vmatprep.subr.bf16.mxu0 %v11764_v38  ;;  %v11833_v37 = vld [vmem:[%s12177_s12 + $0x1b6c] ss:$16 sps:$4 sm:$0xff]   ;;  %v11828_v38 = vld [vmem:[%s12177_s12 + $0x1968] ss:$16 sps:$4 sm:$0xff]  }
 0x397   : > { %7765 = vmatprep.subr.bf16.mxu1 %v11767_v6  ;;  %v11831_v6 = vld [vmem:[%s12177_s12 + $0x1b68] ss:$16 sps:$4 sm:$0xff]  }
 0x398   : > { %7675 = vmatmul.mubr.bf16.vlgmr.msra.gmra.mrb[52].mxu0 %v12714_v44  ;;  %v11774_v44 = vld [vmem:[%s12177_s12 + $0x1848] ss:$16 sps:$4 sm:$0xff]  }
 0x399   : > { %7716 = vmatmul.mubr.bf16.vlgmr.msra.gmra.mrb[52].mxu1 %v12718_v46  ;;  %7725 = vmatpush1.bf16.msra.mxu0 %v11762_v10  ;;  %v11777_v46 = vld [vmem:[%s12177_s12 + $0x1a48] ss:$16 sps:$4 sm:$0xff]   ;;  %v11836_v10 = vld [vmem:[%s12177_s12 + $0x198c] ss:$16 sps:$4 sm:$0xff]  }
 0x39a   : > { %7766 = vmatpush1.bf16.msra.mxu1 %v11765_v11  ;;  %7726 = vmatprep.subr.bf16.mxu0 %v11770_v35  ;;  %v11839_v11 = vld [vmem:[%s12177_s12 + $0x1b8c] ss:$16 sps:$4 sm:$0xff]   ;;  %v11834_v35 = vld [vmem:[%s12177_s12 + $0x1988] ss:$16 sps:$4 sm:$0xff]  }
 0x39b   : > { %7767 = vmatprep.subr.bf16.mxu1 %v11773_v12  ;;  %7756 = vmatprep.mubr.bf16.mxu0 %v12730_v50  ;;  %v11783_v50 = vld [vmem:[%s12177_s12 + $0x1a68] ss:$16 sps:$4 sm:$0xff]  }
 0x39c   : > { %7797 = vmatprep.mubr.bf16.mxu1 %v12734_v51  ;;  %v11788_v51 = vld [vmem:[%s12177_s12 + $0x188c] ss:$16 sps:$4 sm:$0xff]   ;;  %v11837_v12 = vld [vmem:[%s12177_s12 + $0x1b88] ss:$16 sps:$4 sm:$0xff]  }
 0x39d   : > { %7727 = vmatpush1.bf16.msra.mxu0 %v11768_v57  ;;  %v11842_v57 = vld [vmem:[%s12177_s12 + $0x19ac] ss:$16 sps:$4 sm:$0xff]  }
 0x39e   : > { %7768 = vmatpush1.bf16.msra.mxu1 %v11771_v14  ;;  %7728 = vmatprep.subr.bf16.mxu0 %v11776_v15  ;;  %v11845_v14 = vld [vmem:[%s12177_s12 + $0x1bac] ss:$16 sps:$4 sm:$0xff]   ;;  %v11840_v15 = vld [vmem:[%s12177_s12 + $0x19a8] ss:$16 sps:$4 sm:$0xff]  }
 0x39f   : > { %7769 = vmatprep.subr.bf16.mxu1 %v11779_v16  ;;  %v11843_v16 = vld [vmem:[%s12177_s12 + $0x1ba8] ss:$16 sps:$4 sm:$0xff]  }
 0x3a1   : > { %7729 = vmatpush1.bf16.msra.mxu0 %v11774_v44  ;;  %v11848_v44 = vld [vmem:[%s12177_s12 + $0x19cc] ss:$16 sps:$4 sm:$0xff]  }
 0x3a2   : > { %7770 = vmatpush1.bf16.msra.mxu1 %v11777_v46  ;;  %7730 = vmatprep.subr.bf16.mxu0 %v11782_v19  ;;  %v11851_v46 = vld [vmem:[%s12177_s12 + $0x1bcc] ss:$16 sps:$4 sm:$0xff]   ;;  %v11846_v19 = vld [vmem:[%s12177_s12 + $0x19c8] ss:$16 sps:$4 sm:$0xff]  }
 0x3a3   : > { %7771 = vmatprep.subr.bf16.mxu1 %v11785_v20  ;;  %v11849_v20 = vld [vmem:[%s12177_s12 + $0x1bc8] ss:$16 sps:$4 sm:$0xff]  }
 0x3a5   : > { %7731 = vmatpush1.bf16.msra.mxu0 %v11780_v13  ;;  %v11854_v13 = vld [vmem:[%s12177_s12 + $0x19ec] ss:$16 sps:$4 sm:$0xff]  }
 0x3a6   : > { %7772 = vmatpush1.bf16.msra.mxu1 %v11783_v50  ;;  %7732 = vmatprep.subr.bf16.mxu0 %v11788_v51  ;;  %v11857_v50 = vld [vmem:[%s12177_s12 + $0x1bec] ss:$16 sps:$4 sm:$0xff]   ;;  %v11852_v51 = vld [vmem:[%s12177_s12 + $0x19e8] ss:$16 sps:$4 sm:$0xff]  }
 0x3a7   : > { %7773 = vmatprep.subr.bf16.mxu1 %v11791_v21  ;;  %v11855_v21 = vld [vmem:[%s12177_s12 + $0x1be8] ss:$16 sps:$4 sm:$0xff]  }
 0x3a9   : > { %7733 = vmatpush1.bf16.msra.mxu0 %v11786_v30  ;;  %v11860_v30 = vld [vmem:[%s12177_s12 + $0x1c0c] ss:$16 sps:$4 sm:$0xff]  }
 0x3aa   : > { %7774 = vmatpush1.bf16.msra.mxu1 %v11789_v60  ;;  %7734 = vmatprep.subr.bf16.mxu0 %v11794_v52  ;;  %v11863_v60 = vld [vmem:[%s12177_s12 + $0x1e0c] ss:$16 sps:$4 sm:$0xff]   ;;  %v11858_v52 = vld [vmem:[%s12177_s12 + $0x1c08] ss:$16 sps:$4 sm:$0xff]  }
 0x3ab   : > { %7775 = vmatprep.subr.bf16.mxu1 %v11797_v23  ;;  %v7430_v42 = vpop.f32.mrb[40].mxu0  ;;  %v11861_v23 = vld [vmem:[%s12177_s12 + $0x1e08] ss:$16 sps:$4 sm:$0xff]  }
 0x3ac   : > { %v7471_v0 = vpop.f32.mrb[40].mxu1  ;;  %v7431_v32 = vadd.f32 %v7430_v42, %v13306_v22  ;;  %v7432_v36 = vpop.f32.mrb[41].mxu0  ;;  %v11806_v22 = vld [vmem:[%s12177_s12 + $0x18ec] ss:$16 sps:$4 sm:$0xff]  }
 0x3ad   : > { %v7473_v34 = vpop.f32.mrb[41].mxu1  ;;  %v7433_v55 = vadd.f32 %v7432_v36, %v13310_v61  ;;  %v7434_v29 = vpop.f32.mrb[42].mxu0  ;;  %7735 = vmatpush1.bf16.msra.mxu0 %v11792_v43  ;;  %v11809_v61 = vld [vmem:[%s12177_s12 + $0x1aec] ss:$16 sps:$4 sm:$0xff]  }
 0x3ae   : > { %v7475_v31 = vpop.f32.mrb[42].mxu1  ;;  %7776 = vmatpush1.bf16.msra.mxu1 %v11795_v63  ;;  %v13380_v39 = vadd.f32 %v7471_v0, %v7431_v32  ;;  %v7435_v40 = vpop.f32.mrb[43].mxu0  ;;  %7736 = vmatprep.subr.bf16.mxu0 %v11800_v54  ;;  %v11866_v43 = vld [vmem:[%s12177_s12 + $0x1c2c] ss:$16 sps:$4 sm:$0xff]   ;;  %v11864_v54 = vld [vmem:[%s12177_s12 + $0x1c28] ss:$16 sps:$4 sm:$0xff]  }
 0x3af   : > { %v7476_v56 = vpop.f32.mrb[43].mxu1  ;;  %7777 = vmatprep.subr.bf16.mxu1 %v11803_v41  ;;  %v13384_v45 = vadd.f32 %v7473_v34, %v7433_v55  ;;  %v11869_v63 = vld [vmem:[%s12177_s12 + $0x1e2c] ss:$16 sps:$4 sm:$0xff]   ;;  %v11867_v41 = vld [vmem:[%s12177_s12 + $0x1e28] ss:$16 sps:$4 sm:$0xff]  }
 0x3b0   : > { %v11872_v42 = vld [vmem:[%s12177_s12 + $0x1c4c] ss:$16 sps:$4 sm:$0xff]   ;;  %v11876_v34 = vld [vmem:[%s12177_s12 + $0x1c68] ss:$16 sps:$4 sm:$0xff]  }
 0x3b1   : > { %7737 = vmatpush1.bf16.msra.mxu0 %v11798_v48  ;;  %v11875_v0 = vld [vmem:[%s12177_s12 + $0x1e4c] ss:$16 sps:$4 sm:$0xff]   ;;  %v11882_v29 = vld [vmem:[%s12177_s12 + $0x1c88] ss:$16 sps:$4 sm:$0xff]  }
 0x3b2   : > { %7778 = vmatpush1.bf16.msra.mxu1 %v11801_v33  ;;  %7738 = vmatprep.subr.bf16.mxu0 %v11806_v22  ;;  %v11878_v32 = vld [vmem:[%s12177_s12 + $0x1c6c] ss:$16 sps:$4 sm:$0xff]   ;;  %v11885_v31 = vld [vmem:[%s12177_s12 + $0x1e88] ss:$16 sps:$4 sm:$0xff]  }
 0x3b3   : > { %7779 = vmatprep.subr.bf16.mxu1 %v11809_v61  ;;  %v11881_v36 = vld [vmem:[%s12177_s12 + $0x1e6c] ss:$16 sps:$4 sm:$0xff]   ;;  %v11888_v40 = vld [vmem:[%s12177_s12 + $0x1ca8] ss:$16 sps:$4 sm:$0xff]  }
 0x3b4   : > { %v11887_v55 = vld [vmem:[%s12177_s12 + $0x1e8c] ss:$16 sps:$4 sm:$0xff]   ;;  %v11891_v56 = vld [vmem:[%s12177_s12 + $0x1ea8] ss:$16 sps:$4 sm:$0xff]  }
 0x3b5   : > { %7739 = vmatpush1.bf16.msra.mxu0 %v11804_v24  ;;  %v11890_v48 = vld [vmem:[%s12177_s12 + $0x1cac] ss:$16 sps:$4 sm:$0xff]  }
 0x3b6   : > { %7780 = vmatpush1.bf16.msra.mxu1 %v11807_v58  ;;  %7740 = vmatprep.subr.bf16.mxu0 %v11812_v7  ;;  %v11893_v33 = vld [vmem:[%s12177_s12 + $0x1eac] ss:$16 sps:$4 sm:$0xff]  }
 0x3b7   : > { %7781 = vmatprep.subr.bf16.mxu1 %v11815_v8  ;;  %v11896_v22 = vld [vmem:[%s12177_s12 + $0x1ccc] ss:$16 sps:$4 sm:$0xff]  }
 0x3b8   : > { %v11899_v61 = vld [vmem:[%s12177_s12 + $0x1ecc] ss:$16 sps:$4 sm:$0xff]  }
 0x3b9   : > { %7741 = vmatpush1.bf16.msra.mxu0 %v11810_v47 }
 0x3ba   : > { %7782 = vmatpush1.bf16.msra.mxu1 %v11813_v49  ;;  %7742 = vmatprep.subr.bf16.mxu0 %v11818_v17 }
 0x3bb   : > { %7783 = vmatprep.subr.bf16.mxu1 %v11821_v18 }
 0x3bd   : > { %7743 = vmatpush1.bf16.msra.mxu0 %v11816_v1  ;;  %v11894_v1 = vld [vmem:[%s12177_s12 + $0x1cc8] ss:$16 sps:$4 sm:$0xff]  }
 0x3be   : > { %7784 = vmatpush1.bf16.msra.mxu1 %v11819_v59  ;;  %7744 = vmatprep.subr.bf16.mxu0 %v11824_v62  ;;  %v11897_v59 = vld [vmem:[%s12177_s12 + $0x1ec8] ss:$16 sps:$4 sm:$0xff]  }
 0x3bf   : > { %7785 = vmatprep.subr.bf16.mxu1 %v11827_v2 }
 0x3c1   : > { %7745 = vmatpush1.bf16.msra.mxu0 %v11822_v5 }
 0x3c2   : > { %7786 = vmatpush1.bf16.msra.mxu1 %v11825_v25  ;;  %7746 = vmatprep.subr.bf16.mxu0 %v11830_v26  ;;  %v11900_v26 = vld [vmem:[%s12177_s12 + $0x1ce8] ss:$16 sps:$4 sm:$0xff]  }
 0x3c3   : > { %7787 = vmatprep.subr.bf16.mxu1 %v11833_v37  ;;  %v11903_v37 = vld [vmem:[%s12177_s12 + $0x1ee8] ss:$16 sps:$4 sm:$0xff]  }
 0x3c5   : > { %7747 = vmatpush1.bf16.msra.mxu0 %v11828_v38  ;;  %v11908_v38 = vld [vmem:[%s12177_s12 + $0x1d0c] ss:$16 sps:$4 sm:$0xff]  }
 0x3c6   : > { %7788 = vmatpush1.bf16.msra.mxu1 %v11831_v6  ;;  %7748 = vmatprep.subr.bf16.mxu0 %v11836_v10  ;;  %v11911_v6 = vld [vmem:[%s12177_s12 + $0x1f0c] ss:$16 sps:$4 sm:$0xff]   ;;  %v11906_v10 = vld [vmem:[%s12177_s12 + $0x1d08] ss:$16 sps:$4 sm:$0xff]  }
 0x3c7   : > { %7789 = vmatprep.subr.bf16.mxu1 %v11839_v11  ;;  %v11909_v11 = vld [vmem:[%s12177_s12 + $0x1f08] ss:$16 sps:$4 sm:$0xff]  }
 0x3c9   : > { %7749 = vmatpush1.bf16.msra.mxu0 %v11834_v35  ;;  %v11914_v35 = vld [vmem:[%s12177_s12 + $0x1d2c] ss:$16 sps:$4 sm:$0xff]  }
 0x3ca   : > { %7790 = vmatpush1.bf16.msra.mxu1 %v11837_v12  ;;  %7750 = vmatprep.subr.bf16.mxu0 %v11842_v57  ;;  %v11917_v12 = vld [vmem:[%s12177_s12 + $0x1f2c] ss:$16 sps:$4 sm:$0xff]   ;;  %v11912_v57 = vld [vmem:[%s12177_s12 + $0x1d28] ss:$16 sps:$4 sm:$0xff]  }
 0x3cb   : > { %7791 = vmatprep.subr.bf16.mxu1 %v11845_v14  ;;  %v11915_v14 = vld [vmem:[%s12177_s12 + $0x1f28] ss:$16 sps:$4 sm:$0xff]  }
 0x3cd   : > { %7751 = vmatpush1.bf16.msra.mxu0 %v11840_v15  ;;  %v11920_v15 = vld [vmem:[%s12177_s12 + $0x1d4c] ss:$16 sps:$4 sm:$0xff]  }
 0x3ce   : > { %7792 = vmatpush1.bf16.msra.mxu1 %v11843_v16  ;;  %7752 = vmatprep.subr.bf16.mxu0 %v11848_v44  ;;  %v11923_v16 = vld [vmem:[%s12177_s12 + $0x1f4c] ss:$16 sps:$4 sm:$0xff]   ;;  %v11918_v44 = vld [vmem:[%s12177_s12 + $0x1d48] ss:$16 sps:$4 sm:$0xff]  }
 0x3cf   : > { %7793 = vmatprep.subr.bf16.mxu1 %v11851_v46  ;;  %v11921_v46 = vld [vmem:[%s12177_s12 + $0x1f48] ss:$16 sps:$4 sm:$0xff]  }
 0x3d1   : > { %7753 = vmatpush1.bf16.msra.mxu0 %v11846_v19  ;;  %v11926_v19 = vld [vmem:[%s12177_s12 + $0x1d6c] ss:$16 sps:$4 sm:$0xff]  }
 0x3d2   : > { %7794 = vmatpush1.bf16.msra.mxu1 %v11849_v20  ;;  %7754 = vmatprep.subr.bf16.mxu0 %v11854_v13  ;;  %v11929_v20 = vld [vmem:[%s12177_s12 + $0x1f6c] ss:$16 sps:$4 sm:$0xff]   ;;  %v11924_v13 = vld [vmem:[%s12177_s12 + $0x1d68] ss:$16 sps:$4 sm:$0xff]  }
 0x3d3   : > { %7795 = vmatprep.subr.bf16.mxu1 %v11857_v50  ;;  %v11927_v50 = vld [vmem:[%s12177_s12 + $0x1f68] ss:$16 sps:$4 sm:$0xff]  }
 0x3d5   : > { %7755 = vmatpush1.bf16.msra.mxu0 %v11852_v51  ;;  %v11932_v51 = vld [vmem:[%s12177_s12 + $0x1d8c] ss:$16 sps:$4 sm:$0xff]  }
 0x3d6   : > { %7796 = vmatpush1.bf16.msra.mxu1 %v11855_v21  ;;  %7806 = vmatprep.subr.bf16.mxu0 %v11860_v30  ;;  %v11935_v21 = vld [vmem:[%s12177_s12 + $0x1f8c] ss:$16 sps:$4 sm:$0xff]   ;;  %v11930_v30 = vld [vmem:[%s12177_s12 + $0x1d88] ss:$16 sps:$4 sm:$0xff]  }
 0x3d7   : > { %7847 = vmatprep.subr.bf16.mxu1 %v11863_v60  ;;  %v11933_v60 = vld [vmem:[%s12177_s12 + $0x1f88] ss:$16 sps:$4 sm:$0xff]  }
 0x3d8   : > { %7757 = vmatmul.mubr.bf16.vlgmr.msra.gmra.mrb[56].mxu0 %v12816_v3  ;;  %v11870_v3 = vld [vmem:[%s12177_s12 + $0x1c48] ss:$16 sps:$4 sm:$0xff]  }
 0x3d9   : > { %7798 = vmatmul.mubr.bf16.vlgmr.msra.gmra.mrb[56].mxu1 %v12820_v4  ;;  %7807 = vmatpush1.bf16.msra.mxu0 %v11858_v52  ;;  %v11873_v4 = vld [vmem:[%s12177_s12 + $0x1e48] ss:$16 sps:$4 sm:$0xff]   ;;  %v11938_v52 = vld [vmem:[%s12177_s12 + $0x1dac] ss:$16 sps:$4 sm:$0xff]  }
 0x3da   : > { %7848 = vmatpush1.bf16.msra.mxu1 %v11861_v23  ;;  %7808 = vmatprep.subr.bf16.mxu0 %v11866_v43  ;;  %v11941_v23 = vld [vmem:[%s12177_s12 + $0x1fac] ss:$16 sps:$4 sm:$0xff]   ;;  %v11936_v43 = vld [vmem:[%s12177_s12 + $0x1da8] ss:$16 sps:$4 sm:$0xff]  }
 0x3db   : > { %7849 = vmatprep.subr.bf16.mxu1 %v11869_v63  ;;  %7838 = vmatprep.mubr.bf16.mxu0 %v12826_v9  ;;  %v11879_v9 = vld [vmem:[%s12177_s12 + $0x1e68] ss:$16 sps:$4 sm:$0xff]  }
 0x3dc   : > { %7879 = vmatprep.mubr.bf16.mxu1 %v12830_v53  ;;  %v11884_v53 = vld [vmem:[%s12177_s12 + $0x1c8c] ss:$16 sps:$4 sm:$0xff]   ;;  %v11939_v63 = vld [vmem:[%s12177_s12 + $0x1fa8] ss:$16 sps:$4 sm:$0xff]  }
 0x3dd   : > { %7809 = vmatpush1.bf16.msra.mxu0 %v11864_v54  ;;  %v11944_v54 = vld [vmem:[%s12177_s12 + $0x1dcc] ss:$16 sps:$4 sm:$0xff]  }
 0x3de   : > { %7850 = vmatpush1.bf16.msra.mxu1 %v11867_v41  ;;  %7810 = vmatprep.subr.bf16.mxu0 %v11872_v42  ;;  %v11947_v41 = vld [vmem:[%s12177_s12 + $0x1fcc] ss:$16 sps:$4 sm:$0xff]   ;;  %v11942_v42 = vld [vmem:[%s12177_s12 + $0x1dc8] ss:$16 sps:$4 sm:$0xff]  }
 0x3df   : > { %7851 = vmatprep.subr.bf16.mxu1 %v11875_v0  ;;  %v11945_v0 = vld [vmem:[%s12177_s12 + $0x1fc8] ss:$16 sps:$4 sm:$0xff]  }
 0x3e1   : > { %7811 = vmatpush1.bf16.msra.mxu0 %v11870_v3  ;;  %v11950_v3 = vld [vmem:[%s12177_s12 + $0x1dec] ss:$16 sps:$4 sm:$0xff]  }
 0x3e2   : > { %7852 = vmatpush1.bf16.msra.mxu1 %v11873_v4  ;;  %7812 = vmatprep.subr.bf16.mxu0 %v11878_v32  ;;  %v11953_v4 = vld [vmem:[%s12177_s12 + $0x1fec] ss:$16 sps:$4 sm:$0xff]   ;;  %v11948_v32 = vld [vmem:[%s12177_s12 + $0x1de8] ss:$16 sps:$4 sm:$0xff]  }
 0x3e3   : > { %7853 = vmatprep.subr.bf16.mxu1 %v11881_v36  ;;  %v11951_v36 = vld [vmem:[%s12177_s12 + $0x1fe8] ss:$16 sps:$4 sm:$0xff]  }
 0x3e5   : > { %7813 = vmatpush1.bf16.msra.mxu0 %v11876_v34 }
 0x3e6   : > { %7854 = vmatpush1.bf16.msra.mxu1 %v11879_v9  ;;  %7814 = vmatprep.subr.bf16.mxu0 %v11884_v53 }
 0x3e7   : > { %7855 = vmatprep.subr.bf16.mxu1 %v11887_v55 }
 0x3e9   : > { %7815 = vmatpush1.bf16.msra.mxu0 %v11882_v29 }
 0x3ea   : > { %7856 = vmatpush1.bf16.msra.mxu1 %v11885_v31  ;;  %7816 = vmatprep.subr.bf16.mxu0 %v11890_v48 }
 0x3eb   : > { %7857 = vmatprep.subr.bf16.mxu1 %v11893_v33  ;;  %v7512_v24 = vpop.f32.mrb[44].mxu0 }
 0x3ec   : > { %v7553_v58 = vpop.f32.mrb[44].mxu1  ;;  %v7513_v7 = vadd.f32 %v7512_v24, %v13380_v39  ;;  %v7514_v8 = vpop.f32.mrb[45].mxu0  ;;  %v11902_v39 = vld [vmem:[%s12177_s12 + $0x1cec] ss:$16 sps:$4 sm:$0xff]  }
 0x3ed   : > { %v7555_v47 = vpop.f32.mrb[45].mxu1  ;;  %v7515_v49 = vadd.f32 %v7514_v8, %v13384_v45  ;;  %v7516_v17 = vpop.f32.mrb[46].mxu0  ;;  %7817 = vmatpush1.bf16.msra.mxu0 %v11888_v40  ;;  %v11905_v45 = vld [vmem:[%s12177_s12 + $0x1eec] ss:$16 sps:$4 sm:$0xff]  }
 0x3ee   : > { %v7557_v18 = vpop.f32.mrb[46].mxu1  ;;  %7858 = vmatpush1.bf16.msra.mxu1 %v11891_v56  ;;  %v13454_v62 = vadd.f32 %v7553_v58, %v7513_v7  ;;  %v7517_v2 = vpop.f32.mrb[47].mxu0  ;;  %7818 = vmatprep.subr.bf16.mxu0 %v11896_v22 }
 0x3ef   : > { %v7558_v5 = vpop.f32.mrb[47].mxu1  ;;  %7859 = vmatprep.subr.bf16.mxu1 %v11899_v61  ;;  %v13458_v25 = vadd.f32 %v7555_v47, %v7515_v49 }
 0x3f1   : > { %7819 = vmatpush1.bf16.msra.mxu0 %v11894_v1 }
 0x3f2   : > { %7860 = vmatpush1.bf16.msra.mxu1 %v11897_v59  ;;  %7820 = vmatprep.subr.bf16.mxu0 %v11902_v39 }
 0x3f3   : > { %7861 = vmatprep.subr.bf16.mxu1 %v11905_v45 }
 0x3f5   : > { %7821 = vmatpush1.bf16.msra.mxu0 %v11900_v26 }
 0x3f6   : > { %7862 = vmatpush1.bf16.msra.mxu1 %v11903_v37  ;;  %7822 = vmatprep.subr.bf16.mxu0 %v11908_v38 }
 0x3f7   : > { %7863 = vmatprep.subr.bf16.mxu1 %v11911_v6 }
 0x3f9   : > { %7823 = vmatpush1.bf16.msra.mxu0 %v11906_v10 }
 0x3fa   : > { %7864 = vmatpush1.bf16.msra.mxu1 %v11909_v11  ;;  %7824 = vmatprep.subr.bf16.mxu0 %v11914_v35 }
 0x3fb   : > { %7865 = vmatprep.subr.bf16.mxu1 %v11917_v12 }
 0x3fd   : > { %7825 = vmatpush1.bf16.msra.mxu0 %v11912_v57 }
 0x3fe   : > { %7866 = vmatpush1.bf16.msra.mxu1 %v11915_v14  ;;  %7826 = vmatprep.subr.bf16.mxu0 %v11920_v15 }
 0x3ff   : > { %7867 = vmatprep.subr.bf16.mxu1 %v11923_v16  ;;  %v302_v16 = vld [vmem:[#allocation2 + $0x10] sm:$0xff] }
 0x401   : > { %7827 = vmatpush1.bf16.msra.mxu0 %v11918_v44 }
 0x402   : > { %7868 = vmatpush1.bf16.msra.mxu1 %v11921_v46  ;;  %7828 = vmatprep.subr.bf16.mxu0 %v11926_v19 }
 0x403   : > { %7869 = vmatprep.subr.bf16.mxu1 %v11929_v20 }
 0x405   : > { %7829 = vmatpush1.bf16.msra.mxu0 %v11924_v13  ;;  %v303_v13 = vld [vmem:[#allocation2 + $0x18] sm:$0xff] }
 0x406   : > { %7870 = vmatpush1.bf16.msra.mxu1 %v11927_v50  ;;  %7830 = vmatprep.subr.bf16.mxu0 %v11932_v51 }
 0x407   : > { %7871 = vmatprep.subr.bf16.mxu1 %v11935_v21 }
 0x409   : > { %7831 = vmatpush1.bf16.msra.mxu0 %v11930_v30 }
 0x40a   : > { %7872 = vmatpush1.bf16.msra.mxu1 %v11933_v60  ;;  %7832 = vmatprep.subr.bf16.mxu0 %v11938_v52  ;;  %v11954_v52 = vld [vmem:[%s13901_s3 + $0x4] ss:$12 sps:$4 sm:$0xff] (!%p10149_p6)  }
 0x40b   : > { %7873 = vmatprep.subr.bf16.mxu1 %v11941_v23  ;;  %v11956_v23 = vld [vmem:[%s13901_s3] ss:$12 sps:$4 sm:$0xff] (!%p10149_p6)  }
 0x40d   : > { %7833 = vmatpush1.bf16.msra.mxu0 %v11936_v43  ;;  %v11957_v43 = vld [vmem:[%s13901_s3 + $0x1c] ss:$12 sps:$4 sm:$0xff] (!%p10149_p6)  }
 0x40e   : > { %7874 = vmatpush1.bf16.msra.mxu1 %v11939_v63  ;;  %7834 = vmatprep.subr.bf16.mxu0 %v11944_v54  ;;  %v11959_v63 = vld [vmem:[%s13901_s3 + $0x18] ss:$12 sps:$4 sm:$0xff] (!%p10149_p6)   ;;  %v11960_v54 = vld [vmem:[%s13901_s3 + $0x34] ss:$12 sps:$4 sm:$0xff] (!%p10149_p6)  }
 0x40f   : > { %7875 = vmatprep.subr.bf16.mxu1 %v11947_v41  ;;  %v11962_v41 = vld [vmem:[%s13901_s3 + $0x30] ss:$12 sps:$4 sm:$0xff] (!%p10149_p6)  }
 0x411   : > { %7835 = vmatpush1.bf16.msra.mxu0 %v11942_v42  ;;  %v11963_v42 = vld [vmem:[%s13901_s3 + $0x4c] ss:$12 sps:$4 sm:$0xff] (!%p10149_p6)  }
 0x412   : > { %7876 = vmatpush1.bf16.msra.mxu1 %v11945_v0  ;;  %7836 = vmatprep.subr.bf16.mxu0 %v11950_v3  ;;  %v7906_v0 = vlaneseq (!%p10149_p6)  ;;  %v11965_v3 = vld [vmem:[%s13901_s3 + $0x48] ss:$12 sps:$4 sm:$0xff] (!%p10149_p6)  }
 0x413   : > { %7877 = vmatprep.subr.bf16.mxu1 %v11953_v4  ;;  %v11966_v4 = vld [vmem:[%s13901_s3 + $0x64] ss:$12 sps:$4 sm:$0xff] (!%p10149_p6)  }
 0x415   : > { %7837 = vmatpush1.bf16.msra.mxu0 %v11948_v32  ;;  %v13526_v32 = vshrl.u32 (!%p10149_p6), %v7906_v0, 7  ;;  %v12056_v0 = vld [vmem:[%s13901_s3 + $0x1b8] ss:$12 sps:$4 sm:$0xff] (!%p10149_p6)  }
 0x416   : > { %7878 = vmatpush1.bf16.msra.mxu1 %v11951_v36  ;;  %8595 = vmatprep.subr.bf16.mxu0 (!%p10149_p6), %v11954_v52  ;;  %v11968_v36 = vld [vmem:[%s13901_s3 + $0x60] ss:$12 sps:$4 sm:$0xff] (!%p10149_p6)  }
 0x417   : > { %v12050_v52 = vld [vmem:[%s13901_s3 + $0x260] ss:$12 sps:$4 sm:$0xff] (!%p10149_p6)  }
 0x418   : > { %7839 = vmatmul.mubr.bf16.vlgmr.msra.gmra.mrb[60].mxu0 %v12906_v27 }
 0x419   : > { %7880 = vmatmul.mubr.bf16.vlgmr.msra.gmra.mrb[60].mxu1 %v12910_v28  ;;  %8596 = vmatpush1.bf16.msra.mxu0 (!%p10149_p6), %v11956_v23  ;;  %v12001_v23 = vld [vmem:[%s13901_s3 + $0x168] ss:$12 sps:$4 sm:$0xff] (!%p10149_p6)  }
 0x41a   : > { %8597 = vmatprep.subr.bf16.mxu0 (!%p10149_p6), %v11957_v43  ;;  %v12004_v43 = vld [vmem:[%s13901_s3 + $0x184] ss:$12 sps:$4 sm:$0xff] (!%p10149_p6)  }
 0x41d   : > { %8598 = vmatpush1.bf16.msra.mxu0 (!%p10149_p6), %v11959_v63  ;;  %v12051_v63 = vld [vmem:[%s13901_s3 + $0x1a0] ss:$12 sps:$4 sm:$0xff] (!%p10149_p6)  }
 0x41e   : > { %8599 = vmatprep.subr.bf16.mxu0 (!%p10149_p6), %v11960_v54  ;;  %v12055_v54 = vld [vmem:[%s13901_s3 + $0x278] ss:$12 sps:$4 sm:$0xff] (!%p10149_p6)  }
 0x421   : > { %8600 = vmatpush1.bf16.msra.mxu0 (!%p10149_p6), %v11962_v41  ;;  %v12002_v41 = vld [vmem:[%s13901_s3 + $0x180] ss:$12 sps:$4 sm:$0xff] (!%p10149_p6)  }
 0x422   : > { %8601 = vmatprep.subr.bf16.mxu0 (!%p10149_p6), %v11963_v42  ;;  %v12009_v42 = vld [vmem:[%s13901_s3 + $0x19c] ss:$12 sps:$4 sm:$0xff] (!%p10149_p6)  }
 0x425   : > { %8602 = vmatpush1.bf16.msra.mxu0 (!%p10149_p6), %v11965_v3  ;;  %v12060_v3 = vld [vmem:[%s13901_s3 + $0x290] ss:$12 sps:$4 sm:$0xff] (!%p10149_p6)  }
 0x426   : > { %8603 = vmatprep.subr.bf16.mxu0 (!%p10149_p6), %v11966_v4  ;;  %v12007_v4 = vld [vmem:[%s13901_s3 + $0x198] ss:$12 sps:$4 sm:$0xff] (!%p10149_p6)  }
 0x429   : > { %8604 = vmatpush1.bf16.msra.mxu0 (!%p10149_p6), %v11968_v36  ;;  %v12014_v36 = vld [vmem:[%s13901_s3 + $0x1b4] ss:$12 sps:$4 sm:$0xff] (!%p10149_p6)  }
 0x42b   : > { %v7594_v34 = vpop.f32.mrb[48].mxu0 }
 0x42c   : > { %v7635_v9 = vpop.f32.mrb[48].mxu1  ;;  %v7595_v53 = vadd.f32 %v7594_v34, %v13454_v62  ;;  %v7596_v55 = vpop.f32.mrb[49].mxu0  ;;  %v11969_v34 = vld [vmem:[%s13901_s3 + $0x7c] ss:$12 sps:$4 sm:$0xff] (!%p10149_p6)  }
 0x42d   : > { %v7637_v29 = vpop.f32.mrb[49].mxu1  ;;  %v7597_v31 = vadd.f32 %v7596_v55, %v13458_v25  ;;  %v7598_v48 = vpop.f32.mrb[50].mxu0  ;;  %8605 = vmatprep.subr.bf16.mxu0 (!%p10149_p6), %v11969_v34  ;;  %v11972_v55 = vld [vmem:[%s13901_s3 + $0x94] ss:$12 sps:$4 sm:$0xff] (!%p10149_p6)   ;;  %v7920_v34 = vsub.s32 (!%p10149_p6), 3, %v13526_v32 }
 0x42e   : > { %v7639_v33 = vpop.f32.mrb[50].mxu1  ;;  %v7636_v40 = vadd.f32 %v7635_v9, %v7595_v53  ;;  %v7599_v56 = vpop.f32.mrb[51].mxu0  ;;  %v7912_v9 = vsub.s32 (!%p10149_p6), 1, %v13526_v32  ;;  %v11971_v53 = vld [vmem:[%s13901_s3 + $0x78] ss:$12 sps:$4 sm:$0xff] (!%p10149_p6)  }
 0x42f   : > { %v7640_v22 = vpop.f32.mrb[51].mxu1  ;;  %v7638_v61 = vadd.f32 %v7637_v29, %v7597_v31  ;;  %v7901_v29 = vld [vmem:[#allocation2 + $0x8] sm:$0xff] (!%p10149_p6)  ;;  %v13544_v31 = vld [vmem:[%s13900_s2] sm:$0xf] (!%p10149_p6)  ;;  %8606 = vmatpush1.bf16.msra.mxu0 (!%p10149_p6), %v11971_v53  ;;  %v11974_v33 = vld [vmem:[%s13901_s3 + $0x90] ss:$12 sps:$4 sm:$0xff] (!%p10149_p6)  }
 0x430   : > { %v7913_v48 = vrot.slane (!%p10149_p6), %v13544_v31, %v7912_v9  ;;  %8607 = vmatprep.subr.bf16.mxu0 (!%p10149_p6), %v11972_v55  ;;  %v12005_v22 = vld [vmem:[%s13901_s3 + $0xc8] ss:$12 sps:$4 sm:$0xff] (!%p10149_p6)   ;;  %v12061_v53 = vld [vmem:[%s13901_s3 + $0x1d0] ss:$12 sps:$4 sm:$0xff] (!%p10149_p6)  }
 0x431   : > { %10274 = vmatprep.subr.bf16.mxu1 (!%p10149_p6), %v12005_v22  ;;  %v12065_v55 = vld [vmem:[%s13901_s3 + $0x2a8] ss:$12 sps:$4 sm:$0xff] (!%p10149_p6)   ;;  %v7921_v22 = vrot.slane (!%p10149_p6), %v13544_v31, %v7920_v34 }
 0x432   : > { %v7927_v56 = vadd.f32 (!%p10149_p6), %v7913_v48, %v7901_v29  ;;  %v12012_v29 = vld [vmem:[%s13901_s3 + $0x1b0] ss:$12 sps:$4 sm:$0xff] (!%p10149_p6)   ;;  %v7916_v48 = vsub.s32 (!%p10149_p6), 2, %v13526_v32 }
 0x433   : > { %8608 = vmatpush1.bf16.msra.mxu0 (!%p10149_p6), %v11974_v33  ;;  %v12019_v33 = vld [vmem:[%s13901_s3 + $0x1cc] ss:$12 sps:$4 sm:$0xff] (!%p10149_p6)   ;;  %v12095_v34 = vld [vmem:[%s13903_s5 + $0x30] sm:$0xff] (!%p10149_p6)  }
 0x46b   : > { %v7676_v24 = vpop.f32.mrb[52].mxu0 }
 0x46c   : > { %v7717_v58 = vpop.f32.mrb[52].mxu1  ;;  %v7677_v7 = vadd.f32 %v7676_v24, %v7636_v40  ;;  %v7678_v27 = vpop.f32.mrb[53].mxu0  ;;  %v11975_v40 = vld [vmem:[%s13901_s3 + $0xac] ss:$12 sps:$4 sm:$0xff] (!%p10149_p6)   ;;  %v11977_v24 = vld [vmem:[%s13901_s3 + $0xa8] ss:$12 sps:$4 sm:$0xff] (!%p10149_p6)  }
 0x46d   : > { %v7719_v8 = vpop.f32.mrb[53].mxu1  ;;  %v7679_v28 = vadd.f32 %v7678_v27, %v7638_v61  ;;  %v7680_v47 = vpop.f32.mrb[54].mxu0  ;;  %v12006_v61 = vld [vmem:[%s13901_s3 + $0x8] ss:$12 sps:$4 sm:$0xff] (!%p10149_p6)   ;;  %8609 = vmatprep.subr.bf16.mxu0 (!%p10149_p6), %v11975_v40 }
 0x46e   : > { %v7721_v49 = vpop.f32.mrb[54].mxu1  ;;  %v7718_v17 = vadd.f32 %v7717_v58, %v7677_v7  ;;  %v7681_v18 = vpop.f32.mrb[55].mxu0  ;;  %v11978_v58 = vld [vmem:[%s13901_s3 + $0xc4] ss:$12 sps:$4 sm:$0xff] (!%p10149_p6)   ;;  %v7931_v7 = vmax.f32 (!%p10149_p6), %v7927_v56, 0.0  ;;  %10275 = vmatpush3.bf16.msra.mxu1 (!%p10149_p6), %v12006_v61  ;;  %8610 = vmatpush1.bf16.msra.mxu0 (!%p10149_p6), %v11977_v24 }
 0x46f   : > { %v7722_v1 = vpop.f32.mrb[55].mxu1  ;;  %v7720_v59 = vadd.f32 %v7719_v8, %v7679_v28  ;;  %v12010_v8 = vld [vmem:[%s13901_s3 + $0xe0] ss:$12 sps:$4 sm:$0xff] (!%p10149_p6)   ;;  %v11981_v49 = vld [vmem:[%s13901_s3 + $0xdc] ss:$12 sps:$4 sm:$0xff] (!%p10149_p6)   ;;  %8611 = vmatprep.subr.bf16.mxu0 (!%p10149_p6), %v11978_v58 }
 0x470   : > { %v7935_v27 = vpack.c.bf16 (!%p10149_p6), %v7931_v7, %v7931_v7  ;;  %v11980_v28 = vld [vmem:[%s13901_s3 + $0xc0] ss:$12 sps:$4 sm:$0xff] (!%p10149_p6)   ;;  %10276 = vmatprep.subr.bf16.mxu1 (!%p10149_p6), %v12010_v8  ;;  %v12016_v18 = vld [vmem:[%s13901_s3 + $0x38] ss:$12 sps:$4 sm:$0xff] (!%p10149_p6)   ;;  %v12066_v40 = vld [vmem:[%s13901_s3 + $0x1e8] ss:$12 sps:$4 sm:$0xff] (!%p10149_p6)   ;;  %v7917_v7 = vrot.slane (!%p10149_p6), %v13544_v31, %v7916_v48 }
 0x471   : > { %v12011_v47 = vld [vmem:[%s13901_s3 + $0x20] ss:$12 sps:$4 sm:$0xff] (!%p10149_p6)   ;;  %v11983_v1 = vld [vmem:[%s13901_s3 + $0xd8] ss:$12 sps:$4 sm:$0xff] (!%p10149_p6)   ;;  %v12017_v61 = vld [vmem:[%s13901_s3 + $0x1c8] ss:$12 sps:$4 sm:$0xff] (!%p10149_p6)  }
 0x472   : > { %8627 = vmatprep.mubr.bf16.mxu0 (!%p10149_p6), %v7935_v27  ;;  %10277 = vmatpush3.bf16.msra.mxu1 (!%p10149_p6), %v12011_v47  ;;  %v12070_v56 = vld [vmem:[%s13901_s3 + $0x2c0] ss:$12 sps:$4 sm:$0xff] (!%p10149_p6)   ;;  %v12024_v24 = vld [vmem:[%s13901_s3 + $0x1e4] ss:$12 sps:$4 sm:$0xff] (!%p10149_p6)  }
 0x473   : > { %8709 = vmatprep.mubr.bf16.mxu1 (!%p10149_p6), %v7935_v27  ;;  %8612 = vmatpush1.bf16.msra.mxu0 (!%p10149_p6), %v11980_v28  ;;  %v12071_v58 = vld [vmem:[%s13901_s3 + $0x200] ss:$12 sps:$4 sm:$0xff] (!%p10149_p6)   ;;  %v12075_v27 = vld [vmem:[%s13901_s3 + $0x2d8] ss:$12 sps:$4 sm:$0xff] (!%p10149_p6)  }
 0x474   : > { %8613 = vmatprep.subr.bf16.mxu0 (!%p10149_p6), %v11981_v49  ;;  %v12022_v49 = vld [vmem:[%s13901_s3 + $0x1e0] ss:$12 sps:$4 sm:$0xff] (!%p10149_p6)  }
 0x477   : > { %8614 = vmatpush1.bf16.msra.mxu0 (!%p10149_p6), %v11983_v1  ;;  %v12076_v1 = vld [vmem:[%s13901_s3 + $0x218] ss:$12 sps:$4 sm:$0xff] (!%p10149_p6)  }
 0x4ab   : > { %v7758_v62 = vpop.f32.mrb[56].mxu0 }
 0x4ac   : > { %v7799_v2 = vpop.f32.mrb[56].mxu1  ;;  %v7759_v5 = vadd.f32 %v7758_v62, %v7718_v17  ;;  %v7760_v39 = vpop.f32.mrb[57].mxu0  ;;  %v12015_v17 = vld [vmem:[%s13901_s3 + $0xf8] ss:$12 sps:$4 sm:$0xff] (!%p10149_p6)   ;;  %v12021_v62 = vld [vmem:[%s13901_s3 + $0x50] ss:$12 sps:$4 sm:$0xff] (!%p10149_p6)  }
 0x4ad   : > { %v7801_v45 = vpop.f32.mrb[57].mxu1  ;;  %v7761_v25 = vadd.f32 %v7760_v39, %v7720_v59  ;;  %v7762_v26 = vpop.f32.mrb[58].mxu0  ;;  %10278 = vmatprep.subr.bf16.mxu1 (!%p10149_p6), %v12015_v17  ;;  %v12020_v59 = vld [vmem:[%s13901_s3 + $0x110] ss:$12 sps:$4 sm:$0xff] (!%p10149_p6)  }
 0x4ae   : > { %v7803_v37 = vpop.f32.mrb[58].mxu1  ;;  %v7800_v38 = vadd.f32 %v7799_v2, %v7759_v5  ;;  %v7763_v6 = vpop.f32.mrb[59].mxu0  ;;  %10279 = vmatpush3.bf16.msra.mxu1 (!%p10149_p6), %v12016_v18  ;;  %v11984_v2 = vld [vmem:[%s13901_s3 + $0xf4] ss:$12 sps:$4 sm:$0xff] (!%p10149_p6)   ;;  %v11986_v39 = vld [vmem:[%s13901_s3 + $0xf0] ss:$12 sps:$4 sm:$0xff] (!%p10149_p6)  }
 0x4af   : > { %v7804_v10 = vpop.f32.mrb[59].mxu1  ;;  %v7802_v11 = vadd.f32 %v7801_v45, %v7761_v25  ;;  %10280 = vmatprep.subr.bf16.mxu1 (!%p10149_p6), %v12020_v59  ;;  %v12025_v5 = vld [vmem:[%s13901_s3 + $0x128] ss:$12 sps:$4 sm:$0xff] (!%p10149_p6)   ;;  %v7908_v45 = vsub.s32 (!%p10149_p6), 0, %v13526_v32  ;;  %8615 = vmatprep.subr.bf16.mxu0 (!%p10149_p6), %v11984_v2  ;;  %v11987_v26 = vld [vmem:[%s13901_s3 + $0x10c] ss:$12 sps:$4 sm:$0xff] (!%p10149_p6)  }
 0x4b0   : > { %v12026_v25 = vld [vmem:[%s13901_s3 + $0x68] ss:$12 sps:$4 sm:$0xff] (!%p10149_p6)   ;;  %v12030_v37 = vld [vmem:[%s13901_s3 + $0x140] ss:$12 sps:$4 sm:$0xff] (!%p10149_p6)   ;;  %8616 = vmatpush1.bf16.msra.mxu0 (!%p10149_p6), %v11986_v39  ;;  %v11990_v6 = vld [vmem:[%s13901_s3 + $0x124] ss:$12 sps:$4 sm:$0xff] (!%p10149_p6)  }
 0x4b1   : > { %v12031_v10 = vld [vmem:[%s13901_s3 + $0x80] ss:$12 sps:$4 sm:$0xff] (!%p10149_p6)   ;;  %8617 = vmatprep.subr.bf16.mxu0 (!%p10149_p6), %v11987_v26  ;;  %v12029_v17 = vld [vmem:[%s13901_s3 + $0x1fc] ss:$12 sps:$4 sm:$0xff] (!%p10149_p6)   ;;  %v12027_v2 = vld [vmem:[%s13901_s3 + $0x1f8] ss:$12 sps:$4 sm:$0xff] (!%p10149_p6)  }
 0x4b2   : > { %10281 = vmatpush3.bf16.msra.mxu1 (!%p10149_p6), %v12021_v62  ;;  %v12080_v59 = vld [vmem:[%s13901_s3 + $0x2f0] ss:$12 sps:$4 sm:$0xff] (!%p10149_p6)   ;;  %v12082_v26 = vld [vmem:[%s13903_s5 + $0x40] sm:$0xff] (!%p10149_p6)   ;;  %v12099_v32 = vld [vmem:[%s13903_s5 + $0x88] sm:$0xff] (!%p10149_p6)  }
 0x4b3   : > { %10282 = vmatprep.subr.bf16.mxu1 (!%p10149_p6), %v12025_v5  ;;  %v12034_v5 = vld [vmem:[%s13901_s3 + $0x214] ss:$12 sps:$4 sm:$0xff] (!%p10149_p6)  }
 0x4b6   : > { %10283 = vmatpush3.bf16.msra.mxu1 (!%p10149_p6), %v12026_v25  ;;  %v12081_v25 = vld [vmem:[%s13901_s3 + $0x230] ss:$12 sps:$4 sm:$0xff] (!%p10149_p6)  }
 0x4b7   : > { %10284 = vmatprep.subr.bf16.mxu1 (!%p10149_p6), %v12030_v37  ;;  %v12032_v37 = vld [vmem:[%s13901_s3 + $0x210] ss:$12 sps:$4 sm:$0xff] (!%p10149_p6)  }
 0x4ba   : > { %10285 = vmatpush3.bf16.msra.mxu1 (!%p10149_p6), %v12031_v10 }
 0x4eb   : > { %v7840_v35 = vpop.f32.mrb[60].mxu0 }
 0x4ec   : > { %v7881_v12 = vpop.f32.mrb[60].mxu1  ;;  %v7841_v57 = vadd.f32 %v7840_v35, %v7800_v38  ;;  %v7842_v14 = vpop.f32.mrb[61].mxu0  ;;  %v11989_v38 = vld [vmem:[%s13901_s3 + $0x108] ss:$12 sps:$4 sm:$0xff] (!%p10149_p6)   ;;  %v12035_v35 = vld [vmem:[%s13901_s3 + $0x158] ss:$12 sps:$4 sm:$0xff] (!%p10149_p6)  }
 0x4ed   : > { %v7883_v15 = vpop.f32.mrb[61].mxu1  ;;  %v7843_v44 = vadd.f32 %v7842_v14, %v7802_v11  ;;  %v7844_v46 = vpop.f32.mrb[62].mxu0  ;;  %7899 = sbr.rel (%p10149_p6) target bundleno = 1811 (0x713), region = 56  ;;  %v7909_v11 = vrot.slane (!%p10149_p6), %v13544_v31, %v7908_v45  ;;  %v11993_v14 = vld [vmem:[%s13901_s3 + $0x13c] ss:$12 sps:$4 sm:$0xff] (!%p10149_p6)   ;;  %8618 = vmatpush1.bf16.msra.mxu0 (!%p10149_p6), %v11989_v38  ;;  %10286 = vmatprep.subr.bf16.mxu1 (!%p10149_p6), %v12035_v35  ;;  %v12083_v38 = vld [vmem:[%s13903_s5] sm:$0xff] (!%p10149_p6)  }
 0x4ee   : > { %v7885_v19 = vpop.f32.mrb[62].mxu1  ;;  %v7882_v20 = vadd.f32 %v7881_v12, %v7841_v57  ;;  %v7845_v50 = vpop.f32.mrb[63].mxu0  ;;  %v7900_v12 = vld [vmem:[#allocation2] sm:$0xff] (!%p10149_p6)  ;;  %8619 = vmatprep.subr.bf16.mxu0 (!%p10149_p6), %v11990_v6  ;;  %v12039_v6 = vld [vmem:[%s13901_s3 + $0x22c] ss:$12 sps:$4 sm:$0xff] (!%p10149_p6)  }
 0x4ef   : > { %v7886_v51 = vpop.f32.mrb[63].mxu1  ;;  %v7884_v21 = vadd.f32 %v7883_v15, %v7843_v44  ;;  %v11992_v57 = vld [vmem:[%s13901_s3 + $0x120] ss:$12 sps:$4 sm:$0xff] (!%p10149_p6)   ;;  %v12036_v15 = vld [vmem:[%s13901_s3 + $0x98] ss:$12 sps:$4 sm:$0xff] (!%p10149_p6)  }
 0x4f0   : > { %v7890_v30 = vadd.f32 %v7882_v20, %v302_v16  ;;  %v7926_v16 = vadd.f32 (!%p10149_p6), %v7909_v11, %v7900_v12  ;;  %v12040_v44 = vld [vmem:[%s13901_s3 + $0x170] ss:$12 sps:$4 sm:$0xff] (!%p10149_p6)   ;;  %v11995_v46 = vld [vmem:[%s13901_s3 + $0x138] ss:$12 sps:$4 sm:$0xff] (!%p10149_p6)   ;;  %v11996_v19 = vld [vmem:[%s13901_s3 + $0x154] ss:$12 sps:$4 sm:$0xff] (!%p10149_p6)   ;;  %10287 = vmatpush3.bf16.msra.mxu1 (!%p10149_p6), %v12036_v15 }
 0x4f1   : > { %v7891_v60 = vadd.f32 %v7884_v21, %v303_v13  ;;  %8620 = vmatpush1.bf16.msra.mxu0 (!%p10149_p6), %v11992_v57  ;;  %v12041_v20 = vld [vmem:[%s13901_s3 + $0xb0] ss:$12 sps:$4 sm:$0xff] (!%p10149_p6)   ;;  %10288 = vmatprep.subr.bf16.mxu1 (!%p10149_p6), %v12040_v44  ;;  %v12045_v50 = vld [vmem:[%s13901_s3 + $0x248] ss:$12 sps:$4 sm:$0xff] (!%p10149_p6)   ;;  %v12042_v15 = vld [vmem:[%s13901_s3 + $0x240] ss:$12 sps:$4 sm:$0xff] (!%p10149_p6)  }
 0x4f2   : > { %7894 = vst [vmem:[#allocation2 + $0x10] sm:$0xff] %v7890_v30  ;;  %8621 = vmatprep.subr.bf16.mxu0 (!%p10149_p6), %v11993_v14  ;;  %v7930_v13 = vmax.f32 (!%p10149_p6), %v7926_v16, 0.0  ;;  %v11998_v51 = vld [vmem:[%s13901_s3 + $0x150] ss:$12 sps:$4 sm:$0xff] (!%p10149_p6)   ;;  %v12046_v21 = vld [vmem:[%s13901_s3 + $0x188] ss:$12 sps:$4 sm:$0xff] (!%p10149_p6)  }
 0x4f3   : > { %7895 = vst [vmem:[#allocation2 + $0x18] sm:$0xff] %v7891_v60  ;;  %v11999_v30 = vld [vmem:[%s13901_s3 + $0x16c] ss:$12 sps:$4 sm:$0xff] (!%p10149_p6)   ;;  %v12037_v35 = vld [vmem:[%s13901_s3 + $0x228] ss:$12 sps:$4 sm:$0xff] (!%p10149_p6)  }
 0x4f4   : > { %10289 = vmatpush3.bf16.msra.mxu1 %v12041_v20  ;;  %v7934_v60 = vpack.c.bf16 %v7930_v13, %v7930_v13  ;;  %v12084_v11 = vld [vmem:[%s13903_s5 + $0x48] sm:$0xff]   ;;  %v12044_v57 = vld [vmem:[%s13901_s3 + $0x244] ss:$12 sps:$4 sm:$0xff]   ;;  %v12089_v20 = vld [vmem:[%s13903_s5 + $0x18] sm:$0xff]  }
 0x4f5   : > { %8622 = vmatpush1.bf16.msra.mxu0 %v11995_v46  ;;  %10296 = vmatprep.subr.bf16.mxu1 %v12045_v50  ;;  %v12085_v12 = vld [vmem:[%s13903_s5 + $0x8] sm:$0xff]   ;;  %v12086_v14 = vld [vmem:[%s13903_s5 + $0x50] sm:$0xff]   ;;  %v12088_v46 = vld [vmem:[%s13903_s5 + $0x58] sm:$0xff]  }
 0x4f6   : > { %8623 = vmatprep.subr.bf16.mxu0 %v11996_v19  ;;  %v12087_v16 = vld [vmem:[%s13903_s5 + $0x10] sm:$0xff]   ;;  %v12049_v44 = vld [vmem:[%s13901_s3 + $0x25c] ss:$12 sps:$4 sm:$0xff]   ;;  %v12047_v19 = vld [vmem:[%s13901_s3 + $0x258] ss:$12 sps:$4 sm:$0xff]  }
 0x4f7   : > { %8710 = vmatmul.mubr.bf16.vlgmr.msra.gmra.mrb[0].mxu1 %v7934_v60  ;;  %v12054_v13 = vld [vmem:[%s13901_s3 + $0x274] ss:$12 sps:$4 sm:$0xff]  }
 0x4f8   : > { %10297 = vmatpush3.bf16.msra.mxu1 %v12046_v21  ;;  %v12090_v50 = vld [vmem:[%s13903_s5 + $0x60] sm:$0xff]  }
 0x4f9   : > { %8624 = vmatpush1.bf16.msra.mxu0 %v11998_v51  ;;  %10298 = vmatprep.subr.bf16.mxu1 %v12050_v52  ;;  %v7902_v47 = vld [vmem:[#allocation2 + $0x10] sm:$0xff]  ;;  %v12091_v21 = vld [vmem:[%s13903_s5 + $0x20] sm:$0xff]  }
 0x4fa   : > { %8625 = vmatprep.subr.bf16.mxu0 %v11999_v30  ;;  %v7903_v8 = vld [vmem:[#allocation2 + $0x18] sm:$0xff]  ;;  %v7928_v18 = vadd.f32 %v7917_v7, %v7902_v47  ;;  %v12064_v52 = vld [vmem:[%s13901_s3 + $0x2a4] ss:$12 sps:$4 sm:$0xff]  }
 0x4fb   : > { %v7929_v28 = vadd.f32 %v7921_v22, %v7903_v8  ;;  %v12052_v51 = vld [vmem:[%s13901_s3 + $0x270] ss:$12 sps:$4 sm:$0xff]   ;;  %v12059_v30 = vld [vmem:[%s13901_s3 + $0x28c] ss:$12 sps:$4 sm:$0xff]  }
 0x4fc   : > { %10299 = vmatpush3.bf16.msra.mxu1 %v12051_v63  ;;  %v7932_v39 = vmax.f32 %v7928_v18, 0.0  ;;  %v12067_v63 = vld [vmem:[%s13901_s3 + $0x2b8] ss:$12 sps:$4 sm:$0xff]  }
 0x4fd   : > { %8626 = vmatpush1.bf16.msra.mxu0 %v12001_v23  ;;  %10300 = vmatprep.subr.bf16.mxu1 %v12055_v54  ;;  %v7933_v31 = vmax.f32 %v7929_v28, 0.0  ;;  %v12062_v23 = vld [vmem:[%s13901_s3 + $0x2a0] ss:$12 sps:$4 sm:$0xff]  }
 0x4fe   : > { %8636 = vmatprep.subr.bf16.mxu0 %v12004_v43  ;;  %v7936_v10 = vpack.c.bf16 %v7932_v39, %v7932_v39  ;;  %v12069_v43 = vld [vmem:[%s13901_s3 + $0x2bc] ss:$12 sps:$4 sm:$0xff]   ;;  %v12074_v54 = vld [vmem:[%s13901_s3 + $0x2d4] ss:$12 sps:$4 sm:$0xff]  }
 0x4ff   : > { %v7937_v62 = vpack.c.bf16 %v7933_v31, %v7933_v31 }
 0x500   : > { %8628 = vmatmul.mubr.bf16.vlgmr.msra.gmra.mrb[0].mxu0 %v7934_v60  ;;  %10301 = vmatpush3.bf16.msra.mxu1 %v12056_v0  ;;  %v12057_v60 = vld [vmem:[%s13901_s3 + $0x288] ss:$12 sps:$4 sm:$0xff]  }
 0x501   : > { %8637 = vmatpush1.bf16.msra.mxu0 %v12002_v41  ;;  %10302 = vmatprep.subr.bf16.mxu1 %v12060_v3  ;;  %v12072_v41 = vld [vmem:[%s13901_s3 + $0x2d0] ss:$12 sps:$4 sm:$0xff]   ;;  %v12077_v0 = vld [vmem:[%s13901_s3 + $0x2e8] ss:$12 sps:$4 sm:$0xff]  }
 0x502   : > { %8638 = vmatprep.subr.bf16.mxu0 %v12009_v42  ;;  %8668 = vmatprep.mubr.bf16.mxu0 %v7937_v62  ;;  %v12079_v42 = vld [vmem:[%s13901_s3 + $0x2ec] ss:$12 sps:$4 sm:$0xff]  }
 0x503   : > { %8749 = vmatprep.mubr.bf16.mxu1 %v7937_v62  ;;  %v12092_v3 = vld [vmem:[%s13903_s5 + $0x68] sm:$0xff]  }
 0x504   : > { %10303 = vmatpush3.bf16.msra.mxu1 %v12061_v53  ;;  %v12096_v53 = vld [vmem:[%s13903_s5 + $0x78] sm:$0xff]  }
 0x505   : > { %8639 = vmatpush1.bf16.msra.mxu0 %v12007_v4  ;;  %10304 = vmatprep.subr.bf16.mxu1 %v12065_v55  ;;  %v12093_v4 = vld [vmem:[%s13903_s5 + $0x28] sm:$0xff]   ;;  %v12097_v55 = vld [vmem:[%s13903_s5 + $0x38] sm:$0xff]  }
 0x506   : > { %8640 = vmatprep.subr.bf16.mxu0 %v12014_v36  ;;  %v12094_v36 = vld [vmem:[%s13903_s5 + $0x70] sm:$0xff]  }
 0x508   : > { %10305 = vmatpush3.bf16.msra.mxu1 %v12066_v40 }
 0x509   : > { %8641 = vmatpush1.bf16.msra.mxu0 %v12012_v29  ;;  %10306 = vmatprep.subr.bf16.mxu1 %v12070_v56  ;;  %v12115_v29 = vmov 0.0  }
 0x50a   : > { %8642 = vmatprep.subr.bf16.mxu0 %v12019_v33 }
 0x50c   : > { %10307 = vmatpush3.bf16.msra.mxu1 %v12071_v58 }
 0x50d   : > { %8643 = vmatpush1.bf16.msra.mxu0 %v12017_v61  ;;  %10308 = vmatprep.subr.bf16.mxu1 %v12075_v27 }
 0x50e   : > { %8644 = vmatprep.subr.bf16.mxu0 %v12024_v24  ;;  %v8066_v24 = vld [vmem:[%s13902_s4] sm:$0x7] }
 0x50f   : > { %v8079_v58 = vrot.slane %v8066_v24, %v7916_v48  ;;  %v8071_v31 = vrot.slane %v8066_v24, %v7908_v45  ;;  %v8075_v18 = vrot.slane %v8066_v24, %v7912_v9  ;;  %v12100_v9 = vld [vmem:[%s13903_s5 + $0x90] sm:$0xff]   ;;  %v12101_v45 = vld [vmem:[%s13903_s5 + $0x98] sm:$0xff]  }
 0x510   : > { %10309 = vmatpush3.bf16.msra.mxu1 %v12076_v1 }
 0x511   : > { %8645 = vmatpush1.bf16.msra.mxu0 %v12022_v49  ;;  %10310 = vmatprep.subr.bf16.mxu1 %v12080_v59 }
 0x512   : > { %8646 = vmatprep.subr.bf16.mxu0 %v12029_v17 }
 0x514   : > { %10311 = vmatpush3.bf16.msra.mxu1 %v12081_v25 }
 0x515   : > { %8647 = vmatpush1.bf16.msra.mxu0 %v12027_v2  ;;  %10318 = vmatprep.subr.bf16.mxu1 %v12082_v26 }
 0x516   : > { %8648 = vmatprep.subr.bf16.mxu0 %v12034_v5 }
 0x517   : > { %8750 = vmatmul.mubr.bf16.vlgmr.msra.gmra.mrb[4].mxu1 %v7936_v10 }
 0x518   : > { %10319 = vmatpush3.bf16.msra.mxu1 %v12083_v38 }
 0x519   : > { %8649 = vmatpush1.bf16.msra.mxu0 %v12032_v37  ;;  %10320 = vmatprep.subr.bf16.mxu1 %v12084_v11  ;;  %v12098_v37 = vld [vmem:[%s13903_s5 + $0x80] sm:$0xff]   ;;  %v12104_v11 = vld [vmem:[%s13903_s5 + $0xb0] sm:$0xff]  }
 0x51a   : > { %8650 = vmatprep.subr.bf16.mxu0 %v12039_v6  ;;  %v12102_v6 = vld [vmem:[%s13903_s5 + $0xa0] sm:$0xff]  }
 0x51c   : > { %10321 = vmatpush3.bf16.msra.mxu1 %v12085_v12 }
 0x51d   : > { %8651 = vmatpush1.bf16.msra.mxu0 %v12037_v35  ;;  %10322 = vmatprep.subr.bf16.mxu1 %v12086_v14  ;;  %v12105_v35 = vld [vmem:[%s13903_s5 + $0xb8] sm:$0xff]  }
 0x51e   : > { %8652 = vmatprep.subr.bf16.mxu0 %v12044_v57 }
 0x520   : > { %10323 = vmatpush3.bf16.msra.mxu1 %v12087_v16 }
 0x521   : > { %8653 = vmatpush1.bf16.msra.mxu0 %v12042_v15  ;;  %10324 = vmatprep.subr.bf16.mxu1 %v12088_v46 }
 0x522   : > { %8654 = vmatprep.subr.bf16.mxu0 %v12049_v44 }
 0x524   : > { %10325 = vmatpush3.bf16.msra.mxu1 %v12089_v20 }
 0x525   : > { %8655 = vmatpush1.bf16.msra.mxu0 %v12047_v19  ;;  %10326 = vmatprep.subr.bf16.mxu1 %v12090_v50  ;;  %v10246_v19 = vld [vmem:[%s13904_s6] ss:$0 sm:$0xff] }
 0x526   : > { %8656 = vmatprep.subr.bf16.mxu0 %v12054_v13 }
 0x528   : > { %10327 = vmatpush3.bf16.msra.mxu1 %v12091_v21 }
 0x529   : > { %8657 = vmatpush1.bf16.msra.mxu0 %v12052_v51  ;;  %10328 = vmatprep.subr.bf16.mxu1 %v12092_v3 }
 0x52a   : > { %8658 = vmatprep.subr.bf16.mxu0 %v12059_v30 }
 0x52c   : > { %10329 = vmatpush3.bf16.msra.mxu1 %v12093_v4 }
 0x52d   : > { %8659 = vmatpush1.bf16.msra.mxu0 %v12057_v60  ;;  %10330 = vmatprep.subr.bf16.mxu1 %v12094_v36 }
 0x52e   : > { %8660 = vmatprep.subr.bf16.mxu0 %v12064_v52 }
 0x530   : > { %10331 = vmatpush3.bf16.msra.mxu1 %v12095_v34 }
 0x531   : > { %8661 = vmatpush1.bf16.msra.mxu0 %v12062_v23  ;;  %10332 = vmatprep.subr.bf16.mxu1 %v12096_v53 }
 0x532   : > { %8662 = vmatprep.subr.bf16.mxu0 %v12069_v43 }
 0x534   : > { %10333 = vmatpush3.bf16.msra.mxu1 %v12097_v55 }
 0x535   : > { %8663 = vmatpush1.bf16.msra.mxu0 %v12067_v63  ;;  %10349 = vmatprep.subr.bf16.mxu1 %v12115_v29 }
 0x536   : > { %8664 = vmatprep.subr.bf16.mxu0 %v12074_v54 }
 0x539   : > { %8665 = vmatpush1.bf16.msra.mxu0 %v12072_v41 }
 0x53a   : > { %8666 = vmatprep.subr.bf16.mxu0 %v12079_v42 }
 0x53d   : > { %8667 = vmatpush1.bf16.msra.mxu0 %v12077_v0 }
 0x540   : > { %8669 = vmatmul.mubr.bf16.vlgmr.msra.gmra.mrb[0].mxu0 %v7936_v10  ;;  %v12103_v10 = vld [vmem:[%s13903_s5 + $0xa8] sm:$0xff]  }
 0x5ca   : > { %v10290_v33 = vpop.f32.mrb[0].mxu1 }
 0x5cb   : > { %v10291_v40 = vpop.f32.mrb[1].mxu1 }
 0x5cc   : > { %v10292_v56 = vadd.f32 %v10291_v40, %v10290_v33  ;;  %v10293_v22 = vpop.f32.mrb[2].mxu1 }
 0x5cd   : > { %v10294_v61 = vpop.f32.mrb[3].mxu1 }
 0x5ce   : > { %v8712_v7 = vadd.f32 %v10292_v56, %v8079_v58 }
 0x5ea   : > { %v10312_v27 = vpop.f32.mrb[4].mxu1 }
 0x5eb   : > { %v10313_v8 = vpop.f32.mrb[5].mxu1 }
 0x5ec   : > { %v10314_v28 = vadd.f32 %v10313_v8, %v10312_v27  ;;  %v10315_v47 = vpop.f32.mrb[6].mxu1 }
 0x5ed   : > { %v10316_v49 = vpop.f32.mrb[7].mxu1 }
 0x5ee   : > { %v8752_v17 = vadd.f32 %v10314_v28, %v8712_v7 }
 0x5f0   : > { %v8759_v12 = vmax.f32 %v8752_v17, 0.0 }
 0x5f2   : > { %v8762_v57 = vpack.c.bf16 %v8759_v12, %v8759_v12 }
 0x613   : > { %v8670_v1 = vpop.f32.mrb[0].mxu0 }
 0x614   : > { %v10369_v59 = vadd.f32 %v8670_v1, %v8071_v31  ;;  %v8672_v62 = vpop.f32.mrb[1].mxu0 }
 0x615   : > { %v10370_v2 = vadd.f32 %v8672_v62, %v8075_v18  ;;  %v8674_v5 = vpop.f32.mrb[2].mxu0 }
 0x616   : > { %v8757_v39 = vmax.f32 %v10369_v59, 0.0  ;;  %v8675_v48 = vpop.f32.mrb[3].mxu0 }
 0x617   : > { %v8758_v25 = vmax.f32 %v10370_v2, 0.0 }
 0x618   : > { %v8760_v38 = vpack.c.bf16 %v8757_v39, %v8757_v39 }
 0x619   : > { %v8761_v26 = vpack.c.bf16 %v8758_v25, %v8758_v25 }
 0x61b   : > { %8994 = vmatprep.mubr.bf16.mxu1 %v8761_v26 }
 0x61c   : > { %8995 = vmatmul.mubr.bf16.vlgmr.msra.gmra.mrb[8].mxu1 %v8760_v38 }
 0x61d   : > { %10350 = vmatpush3.bf16.msra.mxu1 %v12098_v37  ;;  %10365 = vmatprep.mubr.msk.bf16.mxu1 %vm12116_vm0, %v12115_v29 }
 0x61e   : > { %10351 = vmatprep.subr.bf16.mxu1 %v12115_v29 }
 0x621   : > { %10352 = vmatpush3.bf16.msra.mxu1 %v12099_v32 }
 0x622   : > { %10353 = vmatprep.subr.bf16.mxu1 %v12115_v29 }
 0x625   : > { %10354 = vmatpush3.bf16.msra.mxu1 %v12100_v9 }
 0x626   : > { %10355 = vmatprep.subr.bf16.mxu1 %v12115_v29 }
 0x629   : > { %10356 = vmatpush3.bf16.msra.mxu1 %v12101_v45 }
 0x62a   : > { %10357 = vmatprep.subr.bf16.mxu1 %v12115_v29 }
 0x62d   : > { %10358 = vmatpush3.bf16.msra.mxu1 %v12102_v6 }
 0x62e   : > { %10359 = vmatprep.subr.bf16.mxu1 %v12115_v29 }
 0x631   : > { %10360 = vmatpush3.bf16.msra.mxu1 %v12103_v10 }
 0x632   : > { %10361 = vmatprep.subr.bf16.mxu1 %v12115_v29 }
 0x635   : > { %10362 = vmatpush3.bf16.msra.mxu1 %v12104_v11 }
 0x636   : > { %10363 = vmatprep.subr.bf16.mxu1 %v12115_v29 }
 0x639   : > { %10364 = vmatpush3.bf16.msra.mxu1 %v12105_v35 }
 0x63c   : > { %10366 = vmatmul.mubr.bf16.vlgmr.msra.gmra.mrb[12].mxu1 %v8762_v57 }
 0x6ef   : > { %v10334_v14 = vpop.f32.mrb[8].mxu1 }
 0x6f0   : > { %v10335_v15 = vpop.f32.mrb[9].mxu1 }
 0x6f1   : > { %v10336_v16 = vadd.f32 %v10335_v15, %v10334_v14  ;;  %v10337_v44 = vpop.f32.mrb[10].mxu1 }
 0x6f2   : > { %v10338_v46 = vpop.f32.mrb[11].mxu1 }
 0x6f3   : > { %v8997_v20 = vadd.f32 %v10336_v16, %v10246_v19 }
 0x70f   : > { %v9036_v13 = vpop.f32.mrb[12].mxu1 }
 0x710   : > { %v9037_v50 = vadd.f32 %v9036_v13, %v8997_v20  ;;  %v10367_v51 = vpop.f32.mrb[13].mxu1 }
 0x711   : > { %v9039_v21 = vpop.f32.mrb[14].mxu1 }
 0x712   : > { %9042 = vst [vmem:[%s13905_s7] sm:$0xff] %v9037_v50  ;;  %v10368_v30 = vpop.f32.mrb[15].mxu1 }
 0x713 PF: > { %s17_s24 = sadd.s32 1, %s12112_s24  }
 0x714   : > { %p14_p7 = scmp.ge.s32.totalorder %s17_s24, 4  }
 0x716   :  { %16 = sbr.rel (!%p14_p7) target bundleno = 1 (0x1), region = 85 }

</bundles_post_ra>
